<compile_context>
chip_gen: v7x
topology: tpu7x:2x2x1
jax: 0.10.0
libtpu: 0.0.40
codegen_flags: <defaults>
</compile_context>

<pallas_src>
import jax
import jax.numpy as jnp
from jax.experimental import pallas as pl
from jax.experimental.pallas import tpu as pltpu


def _bf16_valu_ok():
    """bf16 elementwise epilogue only on chips with bf16 vector ALUs (v6e/v7x+)."""
    try:
        kind = jax.devices()[0].device_kind.lower()
    except Exception:
        return False
    if "tpu" not in kind:
        return False
    return not any(tag in kind for tag in ("v2", "v3", "v4", "v5"))


def make_nerf_kernel(D, W, input_ch, input_ch_views, skips, use_viewdirs,
                     have_skip, output_ch, bf16_epilogue):
    """Returns a kernel closed over the static network configuration."""
    post_skip = tuple(sorted(s + 1 for s in skips))   # layers consuming a skip concat
    bf16, f32 = jnp.bfloat16, jnp.float32

    def act(pre, b_row):
        # bias-add + ReLU.  bf16 path halves VALU vreg-ops (v6e/v7x); f32 on v5e.
        if bf16_epilogue:
            return jnp.maximum(pre.astype(bf16) + b_row, 0)
        return jnp.maximum(pre + b_row, 0.0)

    def kernel(*refs):
        x_ref = refs[0]
        out_ref = refs[-1]
        p = list(refs[1:-1])

        pi = 0
        w_first = p[pi]; pi += 1            # (input_ch, W)          f32 (tiny K)
        w_hid = p[pi]; pi += 1              # (D-1, W, W)            bf16
        if have_skip:
            w_skip = p[pi]; pi += 1         # (n_skip, input_ch, W)  f32 (tiny K)
        b_hid = p[pi]; pi += 1              # (D, 1, W)              epilogue dtype

        x = x_ref[...]                                       # (tile, C) f32
        pts = x[:, :input_ch]                                # f32

        # Layer 0.
        h = act(jnp.dot(pts, w_first[...], preferred_element_type=f32), b_hid[0])

        # Layers 1 .. D-1; the skip concat is replaced by a split-weight dual dot.
        skip_k = 0
        for j in range(1, D):
            pre = jnp.dot(h.astype(bf16), w_hid[j - 1],
                          preferred_element_type=f32)
            if j in post_skip:
                pre = pre + jnp.dot(pts, w_skip[skip_k], preferred_element_type=f32)
                skip_k += 1
            h = act(pre, b_hid[j])

        if use_viewdirs:
            w_af = p[pi]; pi += 1           # (W, W+128) bf16: feature cols 0..W-1, alpha col W+3
            b_feat = p[pi]; pi += 1         # (1, W)     f32
            w_vf = p[pi]; pi += 1           # (W, W//2)  bf16  (feature rows of views linear)
            w_vv = p[pi]; pi += 1           # (input_ch_views, W//2) f32 (view rows, tiny K)
            b_views = p[pi]; pi += 1        # (1, W//2)  f32
            w_rgb = p[pi]; pi += 1          # (W//2, 128) bf16: rgb in cols 0..2
            b_head = p[pi]; pi += 1         # (1, 128)   f32: b_rgb cols 0..2, b_alpha col 3

            pre_af = jnp.dot(h.astype(bf16), w_af[...], preferred_element_type=f32)
            feature = pre_af[:, :W] + b_feat[...]
            alpha_part = pre_af[:, W:]                       # (tile, 128), alpha in col 3
            views = x[:, input_ch:input_ch + input_ch_views]  # f32
            hv = (jnp.dot(feature.astype(bf16), w_vf[...], preferred_element_type=f32)
                  + jnp.dot(views, w_vv[...], preferred_element_type=f32)
                  + b_views[...])
            hv = jnp.maximum(hv, 0.0)
            rgb_part = jnp.dot(hv.astype(bf16), w_rgb[...], preferred_element_type=f32)
            out_full = alpha_part + rgb_part + b_head[...]
        else:
            w_out = p[pi]; pi += 1          # (W, 128) bf16, cols 0..output_ch-1 used
            b_out = p[pi]; pi += 1          # (1, 128) f32
            out_full = jnp.dot(h.astype(bf16), w_out[...],
                               preferred_element_type=f32) + b_out[...]

        # Direct (tile, output_ch) store: 16 B/ray of HBM writeback (vs 512 B/ray
        # for a 128-lane padded output) and no second XLA column-slice pass.
        out_ref[...] = out_full[:, :output_ch].astype(out_ref.dtype)

    return kernel


def _full_spec(arr):
    """Full-array block, resident across the whole grid (constant index_map)."""
    zeros = (0,) * arr.ndim
    return pl.BlockSpec(arr.shape, lambda i, _z=zeros: _z)


def _round_up(a, m):
    return ((a + m - 1) // m) * m


def nerf_forward_pallas(x, params, *, D=8, W=256, input_ch=3, input_ch_views=3,
                        output_ch=4, skips=(4,), use_viewdirs=False,
                        tile_n=1024, bf16_epilogue=None, vmem_limit_mb=48):
    """x: (N, input_ch + input_ch_views) f32; params: list of (weight(in,out), bias(out,))."""
    skips = tuple(sorted(skips))
    assert D >= 2
    assert all(0 <= s < D - 1 for s in skips), \
        "a skip after the last hidden layer has no matching layer (same as PyTorch)"
    if use_viewdirs:
        assert output_ch == 4, "use_viewdirs=True always produces 4 channels (rgb ++ alpha)"

    N, C = x.shape
    assert C == input_ch + input_ch_views

    if bf16_epilogue is None:
        bf16_epilogue = _bf16_valu_ok()

    bf16, f32 = jnp.bfloat16, jnp.float32
    epi_dtype = bf16 if bf16_epilogue else f32

    # ---- pack hidden-stack params ----
    idx = 0
    w0, b0 = params[idx]; idx += 1
    w_first = w0.astype(f32)                                  # (input_ch, W), keep f32 (tiny K)
    b_list = [b0]
    w_hid_list, w_skip_list = [], []
    post_skip = set(s + 1 for s in skips)
    for j in range(1, D):
        w, b = params[idx]; idx += 1
        if j in post_skip:                                    # fan_in = input_ch + W
            w_skip_list.append(w[:input_ch, :].astype(f32))   # pts part (concat order [pts, h])
            w_hid_list.append(w[input_ch:, :].astype(bf16))   # h part
        else:
            w_hid_list.append(w.astype(bf16))
        b_list.append(b)
    w_hid = jnp.stack(w_hid_list, axis=0)                     # (D-1, W, W) bf16
    b_hid = jnp.stack(b_list, axis=0)[:, None, :].astype(epi_dtype)   # (D, 1, W)
    have_skip = len(w_skip_list) > 0

    flat_args = [w_first, w_hid]
    if have_skip:
        flat_args.append(jnp.stack(w_skip_list, axis=0))      # (n_skip, input_ch, W) f32
    flat_args.append(b_hid)

    # ---- pack head params (matmul RHS padded to a lane-dense 128-multiple) ----
    out_pad = pl.cdiv(output_ch, 128) * 128
    if use_viewdirs:
        (w_a, b_a) = params[idx]; idx += 1                    # alpha_linear   (W, 1)
        (w_f, b_f) = params[idx]; idx += 1                    # feature_linear (W, W)
        (w_v, b_v) = params[idx]; idx += 1                    # views_linears[0] (W + views, W//2)
        (w_r, b_r) = params[idx]; idx += 1                    # rgb_linear (W//2, 3)
        # Fused feature+alpha RHS: one MXU dot instead of two.
        w_af = jnp.zeros((W, W + out_pad), bf16)
        w_af = w_af.at[:, :W].set(w_f.astype(bf16))
        w_af = w_af.at[:, W + 3:W + 4].set(w_a.astype(bf16))  # alpha lands in output col 3
        b_feat = b_f.reshape(1, -1).astype(f32)
        w_vf = w_v[:W, :].astype(bf16)                        # feature rows ([feature, views] order)
        w_vv = w_v[W:, :].astype(f32)                         # view rows (tiny K, keep f32)
        b_views = b_v.reshape(1, -1).astype(f32)
        w_rgb = jnp.zeros((W // 2, out_pad), bf16).at[:, 0:3].set(w_r.astype(bf16))
        b_head = (jnp.zeros((1, out_pad), f32)
                  .at[:, 0:3].set(b_r.astype(f32))
                  .at[:, 3:4].set(b_a.astype(f32)))
        flat_args += [w_af, b_feat, w_vf, w_vv, b_views, w_rgb, b_head]
    else:
        (w_o, b_o) = params[idx]; idx += 1                    # output_linear (W, output_ch)
        w_out = jnp.zeros((W, out_pad), bf16).at[:, :output_ch].set(w_o.astype(bf16))
        b_out = jnp.zeros((1, out_pad), f32).at[:, :output_ch].set(b_o.astype(f32))
        flat_args += [w_out, b_out]

    # ---- ray tiling: big tiles to amortize grid-step overhead, but grid_n >= 2
    #      whenever possible so both v7x TensorCores get work; pad rows <= 255 ----
    tile_eff = max(256, _round_up(tile_n, 256))
    tile_eff = min(tile_eff, max(256, _round_up(pl.cdiv(N, 2), 256)))
    grid_n = pl.cdiv(N, tile_eff)
    n_pad = grid_n * tile_eff
    if n_pad != N:
        x = jnp.pad(x, ((0, n_pad - N), (0, 0)))

    in_specs = [pl.BlockSpec((tile_eff, C), lambda i: (i, 0))]
    in_specs += [_full_spec(a) for a in flat_args]
    out_spec = pl.BlockSpec((tile_eff, output_ch), lambda i: (i, 0))

    # ---- advisory cost estimate for XLA scheduling around the custom call ----
    n_skip = len(w_skip_list)
    flops_row = 2 * input_ch * W + (D - 1) * 2 * W * W + n_skip * 2 * input_ch * W
    if use_viewdirs:
        flops_row += (2 * W * (W + out_pad)
                      + 2 * (W + input_ch_views) * (W // 2)
                      + 2 * (W // 2) * out_pad)
    else:
        flops_row += 2 * W * out_pad
    param_bytes = sum(int(a.size) * a.dtype.itemsize for a in flat_args)
    cost = pl.CostEstimate(
        flops=int(flops_row) * int(n_pad),
        transcendentals=0,
        bytes_accessed=int(x.size) * 4 + param_bytes + int(n_pad) * output_ch * 4,
    )

    kernel = make_nerf_kernel(D, W, input_ch, input_ch_views, skips,
                              use_viewdirs, have_skip, output_ch, bf16_epilogue)

    out = pl.pallas_call(
        kernel,
        out_shape=jax.ShapeDtypeStruct((n_pad, output_ch), jnp.float32),
        grid_spec=pltpu.PrefetchScalarGridSpec(
            num_scalar_prefetch=0,
            grid=(grid_n,),
            in_specs=in_specs,
            out_specs=out_spec,
        ),
        compiler_params=pltpu.CompilerParams(
            dimension_semantics=("parallel",),
            vmem_limit_bytes=vmem_limit_mb * 1024 * 1024,
        ),
        cost_estimate=cost,
    )(x, *flat_args)

    return out[:N] if n_pad != N else out


def init_nerf_params(key, *, D=8, W=256, input_ch=3, input_ch_views=3,
                     output_ch=4, skips=(4,), use_viewdirs=False):
    """Deterministic PyTorch-Linear-style init; weights stored as (in, out)."""
    def linear(key, fan_in, fan_out):
        k1, k2 = jax.random.split(key)
        bound = 1.0 / (fan_in ** 0.5)
        w = jax.random.uniform(k1, (fan_in, fan_out), jnp.float32, -bound, bound)
        b = jax.random.uniform(k2, (fan_out,), jnp.float32, -bound, bound)
        return w, b

    params = []
    keys = jax.random.split(key, D + 5)
    ki = 0
    for j in range(D):                     # pts_linears
        if j == 0:
            fan_in = input_ch
        elif (j - 1) in skips:
            fan_in = W + input_ch
        else:
            fan_in = W
        params.append(linear(keys[ki], fan_in, W)); ki += 1
    if use_viewdirs:
        params.append(linear(keys[ki], W, 1)); ki += 1                        # alpha_linear
        params.append(linear(keys[ki], W, W)); ki += 1                        # feature_linear
        params.append(linear(keys[ki], W + input_ch_views, W // 2)); ki += 1  # views_linears[0]
        params.append(linear(keys[ki], W // 2, 3)); ki += 1                   # rgb_linear
    else:
        params.append(linear(keys[ki], W, output_ch)); ki += 1                # output_linear
    return params


def nerf_forward_ref(x, params, *, D=8, input_ch=3, input_ch_views=3,
                     skips=(4,), use_viewdirs=False):
    """Pure-JAX f32 reference mirroring the PyTorch forward exactly."""
    input_pts = x[:, :input_ch]
    input_views = x[:, input_ch:input_ch + input_ch_views]
    idx = 0
    h = input_pts
    for i in range(D):
        w, b = params[idx]; idx += 1
        h = jnp.maximum(h @ w + b, 0.0)
        if i in skips:
            h = jnp.concatenate([input_pts, h], axis=-1)
    if use_viewdirs:
        w_a, b_a = params[idx]; idx += 1
        alpha = h @ w_a + b_a
        w_f, b_f = params[idx]; idx += 1
        feature = h @ w_f + b_f
        hv = jnp.concatenate([feature, input_views], axis=-1)
        w_v, b_v = params[idx]; idx += 1
        hv = jnp.maximum(hv @ w_v + b_v, 0.0)
        w_r, b_r = params[idx]; idx += 1
        rgb = hv @ w_r + b_r
        return jnp.concatenate([rgb, alpha], axis=-1)
    else:
        w_o, b_o = params[idx]
        return h @ w_o + b_o


if __name__ == "__main__":
    key = jax.random.PRNGKey(0)
    k1, k2, k3, k4 = jax.random.split(key, 4)

    # ---- Config 1: PyTorch defaults (use_viewdirs=False) ----
    D, W = 8, 256
    input_ch, input_ch_views, output_ch = 3, 3, 4
    skips = (4,)
    N = 1000          # not a tile multiple: exercises pad + row-slice; grid_n == 2
    x = jax.random.normal(k1, (N, input_ch + input_ch_views), jnp.float32)
    params = init_nerf_params(k2, D=D, W=W, input_ch=input_ch,
                              input_ch_views=input_ch_views,
                              output_ch=output_ch, skips=skips, use_viewdirs=False)
    out = nerf_forward_pallas(x, params, D=D, W=W, input_ch=input_ch,
                              input_ch_views=input_ch_views, output_ch=output_ch,
                              skips=skips, use_viewdirs=False)
    out = jax.block_until_ready(out)
    ref = nerf_forward_ref(x, params, D=D, input_ch=input_ch,
                           input_ch_views=input_ch_views, skips=skips,
                           use_viewdirs=False)
    assert out.shape == (N, output_ch), out.shape
    # bf16 matmul operands (f32 accumulation) vs a pure-f32 reference.
    assert jnp.allclose(out, ref, rtol=5e-2, atol=5e-2), \
        float(jnp.max(jnp.abs(out - ref)))

    # ---- Config 2: use_viewdirs=True (fused alpha/feature head) ----
    N2 = 300
    x2 = jax.random.normal(k3, (N2, input_ch + input_ch_views), jnp.float32)
    params2 = init_nerf_params(k4, D=D, W=W, input_ch=input_ch,
                               input_ch_views=input_ch_views,
                               output_ch=4, skips=skips, use_viewdirs=True)
    out2 = nerf_forward_pallas(x2, params2, D=D, W=W, input_ch=input_ch,
                               input_ch_views=input_ch_views, output_ch=4,
                               skips=skips, use_viewdirs=True)
    out2 = jax.block_until_ready(out2)
    ref2 = nerf_forward_ref(x2, params2, D=D, input_ch=input_ch,
                            input_ch_views=input_ch_views, skips=skips,
                            use_viewdirs=True)
    assert out2.shape == (N2, 4), out2.shape
    assert jnp.allclose(out2, ref2, rtol=5e-2, atol=5e-2), \
        float(jnp.max(jnp.abs(out2 - ref2)))

    print("KERNEL_OK")
</pallas_src>

<mosaic_0001>
module attributes {stable_mosaic.version = 11 : i64} {
  func.func @kernel(%arg0: i32, %arg1: memref<512x6xf32, #tpu.memory_space<vmem>>, %arg2: memref<3x256xf32, #tpu.memory_space<vmem>>, %arg3: memref<7x256x256xbf16, #tpu.memory_space<vmem>>, %arg4: memref<1x3x256xf32, #tpu.memory_space<vmem>>, %arg5: memref<8x1x256xf32, #tpu.memory_space<vmem>>, %arg6: memref<256x128xbf16, #tpu.memory_space<vmem>>, %arg7: memref<1x128xf32, #tpu.memory_space<vmem>>, %arg8: memref<512x4xf32, #tpu.memory_space<vmem>>) attributes {dimension_semantics = [#tpu.dimension_semantics<parallel>], iteration_bounds = array<i64: 2>, scalar_prefetch = 0 : i64, scratch_operands = 0 : i64, tpu.core_type = #tpu.core_type<tc>, window_params = [{transform_indices = @transform_0, window_bounds = array<i64: 512, 6>}, {pipeline_mode = #tpu.pipeline_mode<synchronous>, transform_indices = @transform_1, window_bounds = array<i64: 3, 256>}, {pipeline_mode = #tpu.pipeline_mode<synchronous>, transform_indices = @transform_2, window_bounds = array<i64: 7, 256, 256>}, {pipeline_mode = #tpu.pipeline_mode<synchronous>, transform_indices = @transform_3, window_bounds = array<i64: 1, 3, 256>}, {pipeline_mode = #tpu.pipeline_mode<synchronous>, transform_indices = @transform_4, window_bounds = array<i64: 8, 1, 256>}, {pipeline_mode = #tpu.pipeline_mode<synchronous>, transform_indices = @transform_5, window_bounds = array<i64: 256, 128>}, {pipeline_mode = #tpu.pipeline_mode<synchronous>, transform_indices = @transform_6, window_bounds = array<i64: 1, 128>}, {transform_indices = @transform_7, window_bounds = array<i64: 512, 4>}]} {
    %c0 = arith.constant 0 : index
    %c0_0 = arith.constant 0 : index
    %0 = vector.load %arg1[%c0, %c0_0] : memref<512x6xf32, #tpu.memory_space<vmem>>, vector<512x6xf32>
    %1 = vector.extract_strided_slice %0 {offsets = [0, 0], sizes = [512, 3], strides = [1, 1]} : vector<512x6xf32> to vector<512x3xf32>
    %c0_1 = arith.constant 0 : index
    %c0_2 = arith.constant 0 : index
    %2 = vector.load %arg2[%c0_1, %c0_2] : memref<3x256xf32, #tpu.memory_space<vmem>>, vector<3x256xf32>
    %cst = arith.constant dense<0.000000e+00> : vector<512x256xf32>
    %3 = tpu.matmul %1, %2, %cst {dimension_numbers = #tpu.dot_dimension_numbers<[1], [0], [0], [1], [0, 0, 1, 1], [], []>} : vector<512x3xf32>, vector<3x256xf32>, vector<512x256xf32> -> vector<512x256xf32>
    %c0_3 = arith.constant 0 : index
    %c0_4 = arith.constant 0 : index
    %c0_5 = arith.constant 0 : index
    %4 = vector.load %arg5[%c0_3, %c0_4, %c0_5] : memref<8x1x256xf32, #tpu.memory_space<vmem>>, vector<1x1x256xf32>
    %5 = vector.shape_cast %4 : vector<1x1x256xf32> to vector<1x256xf32>
    %6 = vector.broadcast %5 : vector<1x256xf32> to vector<512x256xf32>
    %7 = arith.addf %3, %6 : vector<512x256xf32>
    %cst_6 = arith.constant 0.000000e+00 : f32
    %8 = vector.broadcast %cst_6 : f32 to vector<512x256xf32>
    %9 = arith.maximumf %7, %8 : vector<512x256xf32>
    %10 = arith.truncf %9 : vector<512x256xf32> to vector<512x256xbf16>
    %c0_7 = arith.constant 0 : index
    %c0_8 = arith.constant 0 : index
    %c0_9 = arith.constant 0 : index
    %11 = vector.load %arg3[%c0_7, %c0_8, %c0_9] : memref<7x256x256xbf16, #tpu.memory_space<vmem>>, vector<1x256x256xbf16>
    %12 = vector.shape_cast %11 : vector<1x256x256xbf16> to vector<256x256xbf16>
    %cst_10 = arith.constant dense<0.000000e+00> : vector<512x256xf32>
    %13 = tpu.matmul %10, %12, %cst_10 {dimension_numbers = #tpu.dot_dimension_numbers<[1], [0], [0], [1], [0, 0, 1, 1], [], []>} : vector<512x256xbf16>, vector<256x256xbf16>, vector<512x256xf32> -> vector<512x256xf32>
    %c1 = arith.constant 1 : index
    %c0_11 = arith.constant 0 : index
    %c0_12 = arith.constant 0 : index
    %14 = vector.load %arg5[%c1, %c0_11, %c0_12] : memref<8x1x256xf32, #tpu.memory_space<vmem>>, vector<1x1x256xf32>
    %15 = vector.shape_cast %14 : vector<1x1x256xf32> to vector<1x256xf32>
    %16 = vector.broadcast %15 : vector<1x256xf32> to vector<512x256xf32>
    %17 = arith.addf %13, %16 : vector<512x256xf32>
    %cst_13 = arith.constant 0.000000e+00 : f32
    %18 = vector.broadcast %cst_13 : f32 to vector<512x256xf32>
    %19 = arith.maximumf %17, %18 : vector<512x256xf32>
    %20 = arith.truncf %19 : vector<512x256xf32> to vector<512x256xbf16>
    %c1_14 = arith.constant 1 : index
    %c0_15 = arith.constant 0 : index
    %c0_16 = arith.constant 0 : index
    %21 = vector.load %arg3[%c1_14, %c0_15, %c0_16] : memref<7x256x256xbf16, #tpu.memory_space<vmem>>, vector<1x256x256xbf16>
    %22 = vector.shape_cast %21 : vector<1x256x256xbf16> to vector<256x256xbf16>
    %cst_17 = arith.constant dense<0.000000e+00> : vector<512x256xf32>
    %23 = tpu.matmul %20, %22, %cst_17 {dimension_numbers = #tpu.dot_dimension_numbers<[1], [0], [0], [1], [0, 0, 1, 1], [], []>} : vector<512x256xbf16>, vector<256x256xbf16>, vector<512x256xf32> -> vector<512x256xf32>
    %c2 = arith.constant 2 : index
    %c0_18 = arith.constant 0 : index
    %c0_19 = arith.constant 0 : index
    %24 = vector.load %arg5[%c2, %c0_18, %c0_19] : memref<8x1x256xf32, #tpu.memory_space<vmem>>, vector<1x1x256xf32>
    %25 = vector.shape_cast %24 : vector<1x1x256xf32> to vector<1x256xf32>
    %26 = vector.broadcast %25 : vector<1x256xf32> to vector<512x256xf32>
    %27 = arith.addf %23, %26 : vector<512x256xf32>
    %cst_20 = arith.constant 0.000000e+00 : f32
    %28 = vector.broadcast %cst_20 : f32 to vector<512x256xf32>
    %29 = arith.maximumf %27, %28 : vector<512x256xf32>
    %30 = arith.truncf %29 : vector<512x256xf32> to vector<512x256xbf16>
    %c2_21 = arith.constant 2 : index
    %c0_22 = arith.constant 0 : index
    %c0_23 = arith.constant 0 : index
    %31 = vector.load %arg3[%c2_21, %c0_22, %c0_23] : memref<7x256x256xbf16, #tpu.memory_space<vmem>>, vector<1x256x256xbf16>
    %32 = vector.shape_cast %31 : vector<1x256x256xbf16> to vector<256x256xbf16>
    %cst_24 = arith.constant dense<0.000000e+00> : vector<512x256xf32>
    %33 = tpu.matmul %30, %32, %cst_24 {dimension_numbers = #tpu.dot_dimension_numbers<[1], [0], [0], [1], [0, 0, 1, 1], [], []>} : vector<512x256xbf16>, vector<256x256xbf16>, vector<512x256xf32> -> vector<512x256xf32>
    %c3 = arith.constant 3 : index
    %c0_25 = arith.constant 0 : index
    %c0_26 = arith.constant 0 : index
    %34 = vector.load %arg5[%c3, %c0_25, %c0_26] : memref<8x1x256xf32, #tpu.memory_space<vmem>>, vector<1x1x256xf32>
    %35 = vector.shape_cast %34 : vector<1x1x256xf32> to vector<1x256xf32>
    %36 = vector.broadcast %35 : vector<1x256xf32> to vector<512x256xf32>
    %37 = arith.addf %33, %36 : vector<512x256xf32>
    %cst_27 = arith.constant 0.000000e+00 : f32
    %38 = vector.broadcast %cst_27 : f32 to vector<512x256xf32>
    %39 = arith.maximumf %37, %38 : vector<512x256xf32>
    %40 = arith.truncf %39 : vector<512x256xf32> to vector<512x256xbf16>
    %c3_28 = arith.constant 3 : index
    %c0_29 = arith.constant 0 : index
    %c0_30 = arith.constant 0 : index
    %41 = vector.load %arg3[%c3_28, %c0_29, %c0_30] : memref<7x256x256xbf16, #tpu.memory_space<vmem>>, vector<1x256x256xbf16>
    %42 = vector.shape_cast %41 : vector<1x256x256xbf16> to vector<256x256xbf16>
    %cst_31 = arith.constant dense<0.000000e+00> : vector<512x256xf32>
    %43 = tpu.matmul %40, %42, %cst_31 {dimension_numbers = #tpu.dot_dimension_numbers<[1], [0], [0], [1], [0, 0, 1, 1], [], []>} : vector<512x256xbf16>, vector<256x256xbf16>, vector<512x256xf32> -> vector<512x256xf32>
    %c4 = arith.constant 4 : index
    %c0_32 = arith.constant 0 : index
    %c0_33 = arith.constant 0 : index
    %44 = vector.load %arg5[%c4, %c0_32, %c0_33] : memref<8x1x256xf32, #tpu.memory_space<vmem>>, vector<1x1x256xf32>
    %45 = vector.shape_cast %44 : vector<1x1x256xf32> to vector<1x256xf32>
    %46 = vector.broadcast %45 : vector<1x256xf32> to vector<512x256xf32>
    %47 = arith.addf %43, %46 : vector<512x256xf32>
    %cst_34 = arith.constant 0.000000e+00 : f32
    %48 = vector.broadcast %cst_34 : f32 to vector<512x256xf32>
    %49 = arith.maximumf %47, %48 : vector<512x256xf32>
    %50 = arith.truncf %49 : vector<512x256xf32> to vector<512x256xbf16>
    %c4_35 = arith.constant 4 : index
    %c0_36 = arith.constant 0 : index
    %c0_37 = arith.constant 0 : index
    %51 = vector.load %arg3[%c4_35, %c0_36, %c0_37] : memref<7x256x256xbf16, #tpu.memory_space<vmem>>, vector<1x256x256xbf16>
    %52 = vector.shape_cast %51 : vector<1x256x256xbf16> to vector<256x256xbf16>
    %cst_38 = arith.constant dense<0.000000e+00> : vector<512x256xf32>
    %53 = tpu.matmul %50, %52, %cst_38 {dimension_numbers = #tpu.dot_dimension_numbers<[1], [0], [0], [1], [0, 0, 1, 1], [], []>} : vector<512x256xbf16>, vector<256x256xbf16>, vector<512x256xf32> -> vector<512x256xf32>
    %c0_39 = arith.constant 0 : index
    %c0_40 = arith.constant 0 : index
    %c0_41 = arith.constant 0 : index
    %54 = vector.load %arg4[%c0_39, %c0_40, %c0_41] : memref<1x3x256xf32, #tpu.memory_space<vmem>>, vector<1x3x256xf32>
    %55 = vector.shape_cast %54 : vector<1x3x256xf32> to vector<3x256xf32>
    %cst_42 = arith.constant dense<0.000000e+00> : vector<512x256xf32>
    %56 = tpu.matmul %1, %55, %cst_42 {dimension_numbers = #tpu.dot_dimension_numbers<[1], [0], [0], [1], [0, 0, 1, 1], [], []>} : vector<512x3xf32>, vector<3x256xf32>, vector<512x256xf32> -> vector<512x256xf32>
    %57 = arith.addf %53, %56 : vector<512x256xf32>
    %c5 = arith.constant 5 : index
    %c0_43 = arith.constant 0 : index
    %c0_44 = arith.constant 0 : index
    %58 = vector.load %arg5[%c5, %c0_43, %c0_44] : memref<8x1x256xf32, #tpu.memory_space<vmem>>, vector<1x1x256xf32>
    %59 = vector.shape_cast %58 : vector<1x1x256xf32> to vector<1x256xf32>
    %60 = vector.broadcast %59 : vector<1x256xf32> to vector<512x256xf32>
    %61 = arith.addf %57, %60 : vector<512x256xf32>
    %cst_45 = arith.constant 0.000000e+00 : f32
    %62 = vector.broadcast %cst_45 : f32 to vector<512x256xf32>
    %63 = arith.maximumf %61, %62 : vector<512x256xf32>
    %64 = arith.truncf %63 : vector<512x256xf32> to vector<512x256xbf16>
    %c5_46 = arith.constant 5 : index
    %c0_47 = arith.constant 0 : index
    %c0_48 = arith.constant 0 : index
    %65 = vector.load %arg3[%c5_46, %c0_47, %c0_48] : memref<7x256x256xbf16, #tpu.memory_space<vmem>>, vector<1x256x256xbf16>
    %66 = vector.shape_cast %65 : vector<1x256x256xbf16> to vector<256x256xbf16>
    %cst_49 = arith.constant dense<0.000000e+00> : vector<512x256xf32>
    %67 = tpu.matmul %64, %66, %cst_49 {dimension_numbers = #tpu.dot_dimension_numbers<[1], [0], [0], [1], [0, 0, 1, 1], [], []>} : vector<512x256xbf16>, vector<256x256xbf16>, vector<512x256xf32> -> vector<512x256xf32>
    %c6 = arith.constant 6 : index
    %c0_50 = arith.constant 0 : index
    %c0_51 = arith.constant 0 : index
    %68 = vector.load %arg5[%c6, %c0_50, %c0_51] : memref<8x1x256xf32, #tpu.memory_space<vmem>>, vector<1x1x256xf32>
    %69 = vector.shape_cast %68 : vector<1x1x256xf32> to vector<1x256xf32>
    %70 = vector.broadcast %69 : vector<1x256xf32> to vector<512x256xf32>
    %71 = arith.addf %67, %70 : vector<512x256xf32>
    %cst_52 = arith.constant 0.000000e+00 : f32
    %72 = vector.broadcast %cst_52 : f32 to vector<512x256xf32>
    %73 = arith.maximumf %71, %72 : vector<512x256xf32>
    %74 = arith.truncf %73 : vector<512x256xf32> to vector<512x256xbf16>
    %c6_53 = arith.constant 6 : index
    %c0_54 = arith.constant 0 : index
    %c0_55 = arith.constant 0 : index
    %75 = vector.load %arg3[%c6_53, %c0_54, %c0_55] : memref<7x256x256xbf16, #tpu.memory_space<vmem>>, vector<1x256x256xbf16>
    %76 = vector.shape_cast %75 : vector<1x256x256xbf16> to vector<256x256xbf16>
    %cst_56 = arith.constant dense<0.000000e+00> : vector<512x256xf32>
    %77 = tpu.matmul %74, %76, %cst_56 {dimension_numbers = #tpu.dot_dimension_numbers<[1], [0], [0], [1], [0, 0, 1, 1], [], []>} : vector<512x256xbf16>, vector<256x256xbf16>, vector<512x256xf32> -> vector<512x256xf32>
    %c7 = arith.constant 7 : index
    %c0_57 = arith.constant 0 : index
    %c0_58 = arith.constant 0 : index
    %78 = vector.load %arg5[%c7, %c0_57, %c0_58] : memref<8x1x256xf32, #tpu.memory_space<vmem>>, vector<1x1x256xf32>
    %79 = vector.shape_cast %78 : vector<1x1x256xf32> to vector<1x256xf32>
    %80 = vector.broadcast %79 : vector<1x256xf32> to vector<512x256xf32>
    %81 = arith.addf %77, %80 : vector<512x256xf32>
    %cst_59 = arith.constant 0.000000e+00 : f32
    %82 = vector.broadcast %cst_59 : f32 to vector<512x256xf32>
    %83 = arith.maximumf %81, %82 : vector<512x256xf32>
    %84 = arith.truncf %83 : vector<512x256xf32> to vector<512x256xbf16>
    %c0_60 = arith.constant 0 : index
    %c0_61 = arith.constant 0 : index
    %85 = vector.load %arg6[%c0_60, %c0_61] : memref<256x128xbf16, #tpu.memory_space<vmem>>, vector<256x128xbf16>
    %cst_62 = arith.constant dense<0.000000e+00> : vector<512x128xf32>
    %86 = tpu.matmul %84, %85, %cst_62 {dimension_numbers = #tpu.dot_dimension_numbers<[1], [0], [0], [1], [0, 0, 1, 1], [], []>} : vector<512x256xbf16>, vector<256x128xbf16>, vector<512x128xf32> -> vector<512x128xf32>
    %c0_63 = arith.constant 0 : index
    %c0_64 = arith.constant 0 : index
    %87 = vector.load %arg7[%c0_63, %c0_64] : memref<1x128xf32, #tpu.memory_space<vmem>>, vector<1x128xf32>
    %88 = vector.broadcast %87 : vector<1x128xf32> to vector<512x128xf32>
    %89 = arith.addf %86, %88 : vector<512x128xf32>
    %90 = vector.extract_strided_slice %89 {offsets = [0, 0], sizes = [512, 4], strides = [1, 1]} : vector<512x128xf32> to vector<512x4xf32>
    %c0_65 = arith.constant 0 : index
    %c0_66 = arith.constant 0 : index
    %91 = vector.load %arg8[%c0_65, %c0_66] : memref<512x4xf32, #tpu.memory_space<vmem>>, vector<512x4xf32>
    tpu.vector_store %arg8[%c0_65, %c0_66], %90 {strides = array<i32>} : memref<512x4xf32, #tpu.memory_space<vmem>>, vector<512x4xf32>,
    return
  }
  func.func @transform_0(%arg0: i32) -> (i32, i32) {
    %c0_i32 = arith.constant 0 : i32
    %c0_i32_0 = arith.constant 0 : i32
    return %arg0, %c0_i32 : i32, i32
  }
  func.func @transform_1(%arg0: i32) -> (i32, i32) {
    %c0_i32 = arith.constant 0 : i32
    %c0_i32_0 = arith.constant 0 : i32
    %c0_i32_1 = arith.constant 0 : i32
    return %c0_i32, %c0_i32_0 : i32, i32
  }
  func.func @transform_2(%arg0: i32) -> (i32, i32, i32) {
    %c0_i32 = arith.constant 0 : i32
    %c0_i32_0 = arith.constant 0 : i32
    %c0_i32_1 = arith.constant 0 : i32
    %c0_i32_2 = arith.constant 0 : i32
    return %c0_i32, %c0_i32_0, %c0_i32_1 : i32, i32, i32
  }
  func.func @transform_3(%arg0: i32) -> (i32, i32, i32) {
    %c0_i32 = arith.constant 0 : i32
    %c0_i32_0 = arith.constant 0 : i32
    %c0_i32_1 = arith.constant 0 : i32
    %c0_i32_2 = arith.constant 0 : i32
    return %c0_i32, %c0_i32_0, %c0_i32_1 : i32, i32, i32
  }
  func.func @transform_4(%arg0: i32) -> (i32, i32, i32) {
    %c0_i32 = arith.constant 0 : i32
    %c0_i32_0 = arith.constant 0 : i32
    %c0_i32_1 = arith.constant 0 : i32
    %c0_i32_2 = arith.constant 0 : i32
    return %c0_i32, %c0_i32_0, %c0_i32_1 : i32, i32, i32
  }
  func.func @transform_5(%arg0: i32) -> (i32, i32) {
    %c0_i32 = arith.constant 0 : i32
    %c0_i32_0 = arith.constant 0 : i32
    %c0_i32_1 = arith.constant 0 : i32
    return %c0_i32, %c0_i32_0 : i32, i32
  }
  func.func @transform_6(%arg0: i32) -> (i32, i32) {
    %c0_i32 = arith.constant 0 : i32
    %c0_i32_0 = arith.constant 0 : i32
    %c0_i32_1 = arith.constant 0 : i32
    return %c0_i32, %c0_i32_0 : i32, i32
  }
  func.func @transform_7(%arg0: i32) -> (i32, i32) {
    %c0_i32 = arith.constant 0 : i32
    %c0_i32_0 = arith.constant 0 : i32
    return %arg0, %c0_i32 : i32, i32
  }
}

</mosaic_0001>

<bundles_post_ra>
// kernel: tpu_custom_call.1
= control target key start
LH: loop header
LB: loop body
LE: loop exit
PB: predicated region body
PF: predicated region fallthrough
CT: control target
= control target key end

     0   :  { %12 = vsyncpa [#allocation3], 0  ;;  %s8564_s24 = smov 0   ;;  %s11039_s0 = inlined_call_operand.vmem [shape: f32[1024,6], index: 0, kind: input, shape index: {}]   ;;  %s11040_s1 = inlined_call_operand.vmem [shape: f32[3,256], index: 1, kind: input, shape index: {}]   ;;  %s11041_s2 = inlined_call_operand.hbm [shape: bf16[7,256,256], index: 2, kind: input, shape index: {}]   ;;  %s11042_s3 = inlined_call_operand.vmem [shape: f32[1,3,256], index: 3, kind: input, shape index: {}]   ;;  %s11043_s4 = inlined_call_operand.vmem [shape: f32[8,1,256], index: 4, kind: input, shape index: {}]   ;;  %s11044_s5 = inlined_call_operand.vmem [shape: bf16[256,128], index: 5, kind: input, shape index: {}]   ;;  %s11045_s6 = inlined_call_operand.vmem [shape: f32[1,128], index: 6, kind: input, shape index: {}]   ;;  %s11046_s7 = inlined_call_operand.vmem [shape: f32[1024,4], index: 7, kind: output, shape index: {}]  }
   0x1 LB: > { %s7613_s25 = sadd.s32 4294967295, %s8517_s24   ;;  %p7615_p0 = scmp.ge.s32.totalorder %s8517_s24, 1  ;;  %s8517_s24 = sphi %s8564_s24, %s18_s24  }
   0x2   : > { %p201_p1 = scmp.lt.s32.totalorder %s8517_s24, 3  ;;  %s8519_s26 = smov [#allocation2]  }
   0x3   : > { %s216_s27 = sshll.u32 %s8519_s26, 4  ;;  %p8578_p3 = scmp.eq.s32.totalorder %s7613_s25, 0  ;;  %s217_s27 = int_to_ptr.vmem [resolvable:$true] %s216_s27 }
   0x4   : > { %p8572_p2 = pnand %p7615_p0, %p201_p1  ;;  %s8479_s10 = scalar_lea.hbm %s11041_s2, 28672 }
   0x5   : > { %s11060_s29 = scalar_select %p8578_p3, 1, 0 }
   0x6   : > { %s11059_s28 = scalar_select %p8572_p2, 1, 0 }
   0x7   : > { %p8042_p4 = pneg %p8572_p2  ;;  %p8480_p6 = scmp.ne.s32.totalorder %s11041_s2, %s8479_s10 }
   0x8   : > { %p8486_p10 = scmp.lt.u32.totalorder %s8479_s10, %s11041_s2 }
   0x9   : > { %p8586_p5 = pnand %p8578_p3, %p8042_p4 }
   0xb   : > { %p8481_p7 = pneg %p8586_p5 }
   0xd   : > { %p8482_p8 = pnand %p8481_p7, %p8480_p6 }
   0xf   : > { %p8483_p9 = pneg %p8482_p8 }
  0x11   : > { %p8488_p11 = pnand %p8486_p10, %p8483_p9 }
  0x13   : > { %8491 = shalt.err (!%p8488_p11)
}
  0x14   : > { %s8492_s15 = scalar_lea.vmem %s217_s27, 28672  ;;  %p8500_p1 = scmp.lt.s32.totalorder %s217_s27, %s217_s27 }
  0x15   : > { %p8493_p12 = scmp.ne.s32.totalorder %s217_s27, %s8492_s15  ;;  %p8501_p4 = scmp.lt.s32.totalorder %s8492_s15, %s8492_s15 }
  0x17   : > { %p8495_p13 = pnand %p8493_p12, %p8481_p7  ;;  %p8502_p3 = por %p8501_p4, %p8500_p1 }
  0x19   : > { %p8496_p0 = pneg %p8495_p13 }
  0x1b   : > { %p8503_p2 = pnand %p8502_p3, %p8496_p0 }
  0x1d   : > { %8506 = shalt.err (!%p8503_p2)
}
  0x1e   : > { %s8520_s16 = smov 128   ;;  %s8521_s17 = smov 8  }
  0x1f   : > { %8045 = dma.hbm_to_vmem [thread:$0]  (!%p8586_p5), %s11041_s2, 28672, %s217_s27, [#allocation3], %s8520_s16, %s8520_s16, %s8521_s17  }
  0x20   : > { %p11062_p6 = scmp.ne.s32.totalorder %s11059_s28, 0 }
  0x22   : > { %253 = sbr.rel (%p11062_p6) target bundleno = 2330 (0x91a), region = 48 }
  0x29   : > { %p11063_p8 = scmp.ne.s32.totalorder %s11060_s29, 0 }
  0x2b   : > { %8512 = dma.done.wait (%p11063_p8), [#allocation3], 28672  }
  0x2c   : > { %8514 = vsyncadd (%p11063_p8), [#allocation3], 4294938624  ;;  %s7620_s20 = sshll.u32 %s7613_s25, 6  ;;  %v8522_v0 = vmov 0.0   ;;  %v362_v1 = vld [vmem:[%s11040_s1] sm:$0x77] }
  0x2d   : > { %639 = vmatprep.mubr.f32.mxu0 %v8522_v0  ;;  %p286_p2 = scmp.lt.s32.totalorder %s7620_s20, 127  ;;  %vm570_vm0 = vcmask 1042432   ;;  %v376_v2 = vcombine.high %v362_v1, %v362_v1  ;;  %vm377_vm1 = vcmask 23552   ;;  %v8062_v12 = vld [vmem:[#allocation2 + $0x4] ss:$8 sps:$4 sm:$0xff]   ;;  %vm7480_vm2 = vcmask 31744  }
  0x2e   : > { %v8064_v13 = vld [vmem:[#allocation2] ss:$8 sps:$4 sm:$0xff]   ;;  %1421 = vmatprep.subr.bf16.mxu1 %v8062_v12  ;;  %v8065_v15 = vld [vmem:[#allocation2 + $0x14] ss:$8 sps:$4 sm:$0xff]   ;;  %v8067_v16 = vld [vmem:[#allocation2 + $0x10] ss:$8 sps:$4 sm:$0xff]  }
  0x2f   : > { %s11186_s20 = smov (!%p286_p2, %s7620_s20), 127  ;;  %7624 = vmatprep.subr.msk.mxu0 %vm570_vm0, %v376_v2  ;;  %1422 = vmatpush1.bf16.msra.mxu1 %v8064_v13  ;;  %v8068_v18 = vld [vmem:[#allocation2 + $0x24] ss:$8 sps:$4 sm:$0xff]   ;;  %v8070_v19 = vld [vmem:[#allocation2 + $0x20] ss:$8 sps:$4 sm:$0xff]  }
  0x30   : > { %s7621_s21 = sshll.u32 %s11186_s20, 3  ;;  %7625 = vmatpush1.msk.msra.mxu0 %vm570_vm0, %v362_v1  ;;  %1423 = vmatprep.subr.bf16.mxu1 %v8065_v15  ;;  %v8071_v21 = vld [vmem:[#allocation2 + $0x34] ss:$8 sps:$4 sm:$0xff]   ;;  %v8073_v22 = vld [vmem:[#allocation2 + $0x30] ss:$8 sps:$4 sm:$0xff]  }
  0x31   : > { %s8623_s26 = scalar_lea.vmem %s11039_s0, %s7621_s21  ;;  %v8074_v24 = vld [vmem:[#allocation2 + $0x44] ss:$8 sps:$4 sm:$0xff]   ;;  %v8076_v25 = vld [vmem:[#allocation2 + $0x40] ss:$8 sps:$4 sm:$0xff]   ;;  %v8077_v27 = vld [vmem:[#allocation2 + $0x54] ss:$8 sps:$4 sm:$0xff]   ;;  %s10838_s19 = scalar_lea.vmem %s11046_s7, %s7621_s21 }
  0x32   : > { %v298_v3 = vld [vmem:[%s8623_s26] sm:$0xff]  ;;  %v299_v4 = vld [vmem:[%s8623_s26 + $0x8] sm:$0xff]  ;;  %v300_v5 = vld [vmem:[%s8623_s26 + $0x10] sm:$0xff] }
  0x33   : > { %7626 = vmatmul.mubr.msk.f32.vlgmr.msra.gmra.mrb[0].mxu0 %vm377_vm1, %v298_v3  ;;  %v301_v6 = vld [vmem:[%s8623_s26 + $0x18] sm:$0xff]  ;;  %v302_v7 = vld [vmem:[%s8623_s26 + $0x20] sm:$0xff]  ;;  %v303_v8 = vld [vmem:[%s8623_s26 + $0x28] sm:$0xff]  ;;  %1424 = vmatpush1.bf16.msra.mxu1 %v8067_v16 }
  0x34   : > { %645 = vmatprep.mubr.f32.mxu0 %v8522_v0  ;;  %v304_v9 = vld [vmem:[%s8623_s26 + $0x30] sm:$0xff]  ;;  %v305_v10 = vld [vmem:[%s8623_s26 + $0x38] sm:$0xff]  ;;  %v306_v11 = vld [vmem:[%s8623_s26 + $0x40] sm:$0xff]  ;;  %1425 = vmatprep.subr.bf16.mxu1 %v8068_v18 }
  0x35   : > { %v307_v14 = vld [vmem:[%s8623_s26 + $0x48] sm:$0xff]  ;;  %v308_v17 = vld [vmem:[%s8623_s26 + $0x50] sm:$0xff]  ;;  %v309_v20 = vld [vmem:[%s8623_s26 + $0x58] sm:$0xff] }
  0x36   : > { %v310_v23 = vld [vmem:[%s8623_s26 + $0x60] sm:$0xff]  ;;  %v311_v26 = vld [vmem:[%s8623_s26 + $0x68] sm:$0xff]  ;;  %v8079_v28 = vld [vmem:[#allocation2 + $0x50] ss:$8 sps:$4 sm:$0xff]  }
  0x37   : > { %7627 = vmatmul.mubr.msk.f32.gmra.mrb[2].mxu0 %vm377_vm1, %v299_v4  ;;  %1426 = vmatpush1.bf16.msra.mxu1 %v8070_v19  ;;  %v312_v29 = vld [vmem:[%s8623_s26 + $0x70] sm:$0xff]  ;;  %v8080_v30 = vld [vmem:[#allocation2 + $0x64] ss:$8 sps:$4 sm:$0xff]   ;;  %v8082_v31 = vld [vmem:[#allocation2 + $0x60] ss:$8 sps:$4 sm:$0xff]  }
  0x38   : > { %651 = vmatprep.mubr.f32.mxu0 %v8522_v0  ;;  %1427 = vmatprep.subr.bf16.mxu1 %v8071_v21  ;;  %v313_v32 = vld [vmem:[%s8623_s26 + $0x78] sm:$0xff]  ;;  %v8086_v35 = vld [vmem:[#allocation2 + $0x100] ss:$8 sps:$4 sm:$0xff]   ;;  %v8088_v36 = vld [vmem:[#allocation2 + $0x104] ss:$8 sps:$4 sm:$0xff]  }
  0x39   : > { %v8083_v33 = vld [vmem:[#allocation2 + $0x74] ss:$8 sps:$4 sm:$0xff]   ;;  %v8085_v34 = vld [vmem:[#allocation2 + $0x70] ss:$8 sps:$4 sm:$0xff]   ;;  %v314_v37 = vld [vmem:[%s8623_s26 + $0x80] sm:$0xff]  ;;  %2172 = vmatprep.subr.bf16.mxu0 %v8088_v36 }
  0x3a   : > { %v8089_v38 = vld [vmem:[#allocation2 + $0x84] ss:$8 sps:$4 sm:$0xff]   ;;  %2173 = vmatpush1.bf16.msra.mxu0 %v8086_v35  ;;  %v8091_v39 = vld [vmem:[#allocation2 + $0x80] ss:$8 sps:$4 sm:$0xff]   ;;  %v8092_v41 = vld [vmem:[#allocation2 + $0x94] ss:$8 sps:$4 sm:$0xff]  }
  0x3b   : > { %7628 = vmatmul.mubr.msk.f32.gmra.mrb[4].mxu0 %vm377_vm1, %v300_v5  ;;  %1428 = vmatpush1.bf16.msra.mxu1 %v8073_v22  ;;  %v315_v40 = vld [vmem:[%s8623_s26 + $0x88] sm:$0xff]  ;;  %v8094_v42 = vld [vmem:[#allocation2 + $0x90] ss:$8 sps:$4 sm:$0xff]   ;;  %v8098_v47 = vld [vmem:[#allocation2 + $0xb4] ss:$8 sps:$4 sm:$0xff]  }
  0x3c   : > { %657 = vmatprep.mubr.f32.mxu0 %v8522_v0  ;;  %1429 = vmatprep.subr.bf16.mxu1 %v8074_v24  ;;  %v316_v43 = vld [vmem:[%s8623_s26 + $0x90] sm:$0xff]  ;;  %v8095_v44 = vld [vmem:[#allocation2 + $0xa4] ss:$8 sps:$4 sm:$0xff]   ;;  %v8097_v45 = vld [vmem:[#allocation2 + $0xa0] ss:$8 sps:$4 sm:$0xff]  }
  0x3d   : > { %v317_v46 = vld [vmem:[%s8623_s26 + $0x98] sm:$0xff]  ;;  %v318_v51 = vld [vmem:[%s8623_s26 + $0xa0] sm:$0xff]  ;;  %v319_v54 = vld [vmem:[%s8623_s26 + $0xa8] sm:$0xff] }
  0x3e   : > { %v8100_v48 = vld [vmem:[#allocation2 + $0xb0] ss:$8 sps:$4 sm:$0xff]   ;;  %v8103_v50 = vld [vmem:[#allocation2 + $0x114] ss:$8 sps:$4 sm:$0xff]   ;;  %v8104_v52 = vld [vmem:[#allocation2 + $0xc4] ss:$8 sps:$4 sm:$0xff]  }
  0x3f   : > { %7629 = vmatmul.mubr.msk.f32.gmra.mrb[6].mxu0 %vm377_vm1, %v301_v6  ;;  %1430 = vmatpush1.bf16.msra.mxu1 %v8076_v25  ;;  %v8101_v49 = vld [vmem:[#allocation2 + $0x110] ss:$8 sps:$4 sm:$0xff]   ;;  %v8106_v53 = vld [vmem:[#allocation2 + $0xc0] ss:$8 sps:$4 sm:$0xff]   ;;  %v8107_v55 = vld [vmem:[#allocation2 + $0xd4] ss:$8 sps:$4 sm:$0xff]  }
  0x40   : > { %663 = vmatprep.mubr.f32.mxu0 %v8522_v0  ;;  %1431 = vmatprep.subr.bf16.mxu1 %v8077_v27  ;;  %v320_v56 = vld [vmem:[%s8623_s26 + $0xb0] sm:$0xff]  ;;  %v8110_v58 = vld [vmem:[#allocation2 + $0xe4] ss:$8 sps:$4 sm:$0xff]   ;;  %v321_v59 = vld [vmem:[%s8623_s26 + $0xb8] sm:$0xff] }
  0x41   : > { %2174 = vmatprep.subr.bf16.mxu0 %v8103_v50  ;;  %v8109_v57 = vld [vmem:[#allocation2 + $0xd0] ss:$8 sps:$4 sm:$0xff]   ;;  %v8112_v60 = vld [vmem:[#allocation2 + $0xe0] ss:$8 sps:$4 sm:$0xff]   ;;  %v8113_v61 = vld [vmem:[#allocation2 + $0xf4] ss:$8 sps:$4 sm:$0xff]  }
  0x42   : > { %2175 = vmatpush1.bf16.msra.mxu0 %v8101_v49  ;;  %v322_v62 = vld [vmem:[%s8623_s26 + $0xc0] sm:$0xff]  ;;  %v8115_v63 = vld [vmem:[#allocation2 + $0xf0] ss:$8 sps:$4 sm:$0xff]   ;;  %v323_v1 = vld [vmem:[%s8623_s26 + $0xc8] sm:$0xff] }
  0x43   : > { %7630 = vmatmul.mubr.msk.f32.gmra.mrb[8].mxu0 %vm377_vm1, %v302_v7  ;;  %1432 = vmatpush1.bf16.msra.mxu1 %v8079_v28  ;;  %v8116_v2 = vld [vmem:[#allocation2 + $0x120] ss:$8 sps:$4 sm:$0xff]   ;;  %v8118_v3 = vld [vmem:[#allocation2 + $0x124] ss:$8 sps:$4 sm:$0xff]   ;;  %v324_v4 = vld [vmem:[%s8623_s26 + $0xd0] sm:$0xff] }
  0x44   : > { %669 = vmatprep.mubr.f32.mxu0 %v8522_v0  ;;  %1433 = vmatprep.subr.bf16.mxu1 %v8080_v30  ;;  %v325_v5 = vld [vmem:[%s8623_s26 + $0xd8] sm:$0xff]  ;;  %v326_v6 = vld [vmem:[%s8623_s26 + $0xe0] sm:$0xff]  ;;  %v327_v7 = vld [vmem:[%s8623_s26 + $0xe8] sm:$0xff] }
  0x45   : > { %2176 = vmatprep.subr.bf16.mxu0 %v8118_v3  ;;  %v330_v12 = vld [vmem:[%s8623_s26 + $0x100] sm:$0xff]  ;;  %v331_v15 = vld [vmem:[%s8623_s26 + $0x108] sm:$0xff]  ;;  %v332_v16 = vld [vmem:[%s8623_s26 + $0x110] sm:$0xff] }
  0x46   : > { %2177 = vmatpush1.bf16.msra.mxu0 %v8116_v2  ;;  %v8122_v13 = vld [vmem:[#allocation2 + $0x140] ss:$8 sps:$4 sm:$0xff]   ;;  %v8125_v19 = vld [vmem:[#allocation2 + $0x150] ss:$8 sps:$4 sm:$0xff]   ;;  %v8139_v49 = vld [vmem:[#allocation2 + $0x194] ss:$8 sps:$4 sm:$0xff]  }
  0x47   : > { %7631 = vmatmul.mubr.msk.f32.gmra.mrb[10].mxu0 %vm377_vm1, %v303_v8  ;;  %1434 = vmatpush1.bf16.msra.mxu1 %v8082_v31  ;;  %v8119_v8 = vld [vmem:[#allocation2 + $0x130] ss:$8 sps:$4 sm:$0xff]   ;;  %v334_v18 = vld [vmem:[%s8623_s26 + $0x120] sm:$0xff]  ;;  %v335_v21 = vld [vmem:[%s8623_s26 + $0x128] sm:$0xff] }
  0x48   : > { %675 = vmatprep.mubr.f32.mxu0 %v8522_v0  ;;  %1435 = vmatprep.subr.bf16.mxu1 %v8083_v33  ;;  %v336_v22 = vld [vmem:[%s8623_s26 + $0x130] sm:$0xff]  ;;  %v338_v24 = vld [vmem:[%s8623_s26 + $0x140] sm:$0xff]  ;;  %v339_v27 = vld [vmem:[%s8623_s26 + $0x148] sm:$0xff] }
  0x49   : > { %v8128_v25 = vld [vmem:[#allocation2 + $0x160] ss:$8 sps:$4 sm:$0xff]   ;;  %v340_v28 = vld [vmem:[%s8623_s26 + $0x150] sm:$0xff]  ;;  %v345_v35 = vld [vmem:[%s8623_s26 + $0x178] sm:$0xff] }
  0x4a   : > { %v342_v30 = vld [vmem:[%s8623_s26 + $0x160] sm:$0xff]  ;;  %v8131_v31 = vld [vmem:[#allocation2 + $0x170] ss:$8 sps:$4 sm:$0xff]   ;;  %v343_v33 = vld [vmem:[%s8623_s26 + $0x168] sm:$0xff] }
  0x4b   : > { %7632 = vmatmul.mubr.msk.f32.gmra.mrb[12].mxu0 %vm377_vm1, %v304_v9  ;;  %1436 = vmatpush1.bf16.msra.mxu1 %v8085_v34  ;;  %v8121_v9 = vld [vmem:[#allocation2 + $0x134] ss:$8 sps:$4 sm:$0xff]   ;;  %v346_v36 = vld [vmem:[%s8623_s26 + $0x180] sm:$0xff]  ;;  %v351_v50 = vld [vmem:[%s8623_s26 + $0x1a8] sm:$0xff] }
  0x4c   : > { %681 = vmatprep.mubr.f32.mxu0 %v8522_v0  ;;  %1437 = vmatprep.subr.bf16.mxu1 %v8089_v38  ;;  %v344_v34 = vld [vmem:[%s8623_s26 + $0x170] sm:$0xff]  ;;  %v8136_v38 = vld [vmem:[#allocation2 + $0x184] ss:$8 sps:$4 sm:$0xff]  }
  0x4d   : > { %2178 = vmatprep.subr.bf16.mxu0 %v8121_v9 }
  0x4e   : > { %2179 = vmatpush1.bf16.msra.mxu0 %v8119_v8  ;;  %v354_v8 = vld [vmem:[%s8623_s26 + $0x1c0] sm:$0xff] }
  0x4f   : > { %7633 = vmatmul.mubr.msk.f32.gmra.mrb[14].mxu0 %vm377_vm1, %v305_v10  ;;  %1438 = vmatpush1.bf16.msra.mxu1 %v8091_v39  ;;  %v328_v10 = vld [vmem:[%s8623_s26 + $0xf0] sm:$0xff]  ;;  %v347_v39 = vld [vmem:[%s8623_s26 + $0x188] sm:$0xff] }
  0x50   : > { %687 = vmatprep.mubr.f32.mxu0 %v8522_v0  ;;  %1439 = vmatprep.subr.bf16.mxu1 %v8092_v41  ;;  %v365_v41 = vlaneseq }
  0x53   : > { %7634 = vmatmul.mubr.msk.f32.gmra.mrb[16].mxu0 %vm377_vm1, %v306_v11  ;;  %1440 = vmatpush1.bf16.msra.mxu1 %v8094_v42  ;;  %v329_v11 = vld [vmem:[%s8623_s26 + $0xf8] sm:$0xff] }
  0x54   : > { %693 = vmatprep.mubr.f32.mxu0 %v8522_v0  ;;  %1441 = vmatprep.subr.bf16.mxu1 %v8095_v44  ;;  %v349_v42 = vld [vmem:[%s8623_s26 + $0x198] sm:$0xff]  ;;  %v350_v44 = vld [vmem:[%s8623_s26 + $0x1a0] sm:$0xff] }
  0x57   : > { %7635 = vmatmul.mubr.msk.f32.gmra.mrb[18].mxu0 %vm377_vm1, %v307_v14  ;;  %1442 = vmatpush1.bf16.msra.mxu1 %v8097_v45  ;;  %v8124_v14 = vld [vmem:[#allocation2 + $0x144] ss:$8 sps:$4 sm:$0xff]   ;;  %v363_v45 = vld [vmem:[%s11043_s4] sm:$0x3] }
  0x58   : > { %699 = vmatprep.mubr.f32.mxu0 %v8522_v0  ;;  %1443 = vmatprep.subr.bf16.mxu1 %v8098_v47 }
  0x59   : > { %2180 = vmatprep.subr.bf16.mxu0 %v8124_v14 }
  0x5a   : > { %2181 = vmatpush1.bf16.msra.mxu0 %v8122_v13  ;;  %v8142_v13 = vld [vmem:[#allocation2 + $0x1a4] ss:$8 sps:$4 sm:$0xff]  }
  0x5b   : > { %7636 = vmatmul.mubr.msk.f32.gmra.mrb[20].mxu0 %vm377_vm1, %v308_v17  ;;  %1444 = vmatpush1.bf16.msra.mxu1 %v8100_v48  ;;  %v333_v17 = vld [vmem:[%s8623_s26 + $0x118] sm:$0xff] }
  0x5c   : > { %705 = vmatprep.mubr.f32.mxu0 %v8522_v0  ;;  %1445 = vmatprep.subr.bf16.mxu1 %v8104_v52  ;;  %v8137_v48 = vld [vmem:[#allocation2 + $0x190] ss:$8 sps:$4 sm:$0xff]  }
  0x5f   : > { %7637 = vmatmul.mubr.msk.f32.gmra.mrb[22].mxu0 %vm377_vm1, %v309_v20  ;;  %1446 = vmatpush1.bf16.msra.mxu1 %v8106_v53  ;;  %v8127_v20 = vld [vmem:[#allocation2 + $0x154] ss:$8 sps:$4 sm:$0xff]  }
  0x60   : > { %711 = vmatprep.mubr.f32.mxu0 %v8522_v0  ;;  %1447 = vmatprep.subr.bf16.mxu1 %v8107_v55  ;;  %v352_v55 = vld [vmem:[%s8623_s26 + $0x1b0] sm:$0xff] }
  0x61   : > { %2182 = vmatprep.subr.bf16.mxu0 %v8127_v20 }
  0x62   : > { %2183 = vmatpush1.bf16.msra.mxu0 %v8125_v19 }
  0x63   : > { %7638 = vmatmul.mubr.msk.f32.gmra.mrb[24].mxu0 %vm377_vm1, %v310_v23  ;;  %1448 = vmatpush1.bf16.msra.mxu1 %v8109_v57  ;;  %v337_v23 = vld [vmem:[%s8623_s26 + $0x138] sm:$0xff] }
  0x64   : > { %717 = vmatprep.mubr.f32.mxu0 %v8522_v0  ;;  %1449 = vmatprep.subr.bf16.mxu1 %v8110_v58 }
  0x67   : > { %7639 = vmatmul.mubr.msk.f32.gmra.mrb[26].mxu0 %vm377_vm1, %v311_v26  ;;  %1450 = vmatpush1.bf16.msra.mxu1 %v8112_v60  ;;  %v8130_v26 = vld [vmem:[#allocation2 + $0x164] ss:$8 sps:$4 sm:$0xff]  }
  0x68   : > { %723 = vmatprep.mubr.f32.mxu0 %v8522_v0  ;;  %1451 = vmatprep.subr.bf16.mxu1 %v8113_v61  ;;  %v353_v61 = vld [vmem:[%s8623_s26 + $0x1b8] sm:$0xff] }
  0x69   : > { %2184 = vmatprep.subr.bf16.mxu0 %v8130_v26  ;;  %v356_v26 = vld [vmem:[%s8623_s26 + $0x1d0] sm:$0xff] }
  0x6a   : > { %2185 = vmatpush1.bf16.msra.mxu0 %v8128_v25 }
  0x6b   : > { %7640 = vmatmul.mubr.msk.f32.gmra.mrb[28].mxu0 %vm377_vm1, %v312_v29  ;;  %1452 = vmatpush1.bf16.msra.mxu1 %v8115_v63  ;;  %v341_v29 = vld [vmem:[%s8623_s26 + $0x158] sm:$0xff] }
  0x6c   : > { %729 = vmatprep.mubr.f32.mxu0 %v8522_v0 }
  0x6f   : > { %7641 = vmatmul.mubr.msk.f32.gmra.mrb[30].mxu0 %vm377_vm1, %v313_v32  ;;  %v8133_v32 = vld [vmem:[#allocation2 + $0x174] ss:$8 sps:$4 sm:$0xff]  }
  0x70   : > { %735 = vmatprep.mubr.f32.mxu0 %v8522_v0  ;;  %2186 = vmatprep.subr.bf16.mxu0 %v8133_v32 }
  0x71   : > { %2187 = vmatpush1.bf16.msra.mxu0 %v8131_v31 }
  0x72   : > { %2188 = vmatprep.subr.bf16.mxu0 %v8136_v38 }
  0x73   : > { %7642 = vmatmul.mubr.msk.f32.gmra.mrb[32].mxu0 %vm377_vm1, %v314_v37  ;;  %v8134_v37 = vld [vmem:[#allocation2 + $0x180] ss:$8 sps:$4 sm:$0xff]  }
  0x74   : > { %741 = vmatprep.mubr.f32.mxu0 %v8522_v0 }
  0x75   : > { %2189 = vmatpush1.bf16.msra.mxu0 %v8134_v37 }
  0x76   : > { %2190 = vmatprep.subr.bf16.mxu0 %v8139_v49  ;;  %v8145_v49 = vld [vmem:[#allocation2 + $0x1b4] ss:$8 sps:$4 sm:$0xff]  }
  0x77   : > { %7643 = vmatmul.mubr.msk.f32.gmra.mrb[34].mxu0 %vm377_vm1, %v315_v40  ;;  %v348_v40 = vld [vmem:[%s8623_s26 + $0x190] sm:$0xff] }
  0x78   : > { %747 = vmatprep.mubr.f32.mxu0 %v8522_v0 }
  0x79   : > { %2191 = vmatpush1.bf16.msra.mxu0 %v8137_v48  ;;  %v8143_v48 = vld [vmem:[#allocation2 + $0x1b0] ss:$8 sps:$4 sm:$0xff]  }
  0x7a   : > { %2192 = vmatprep.subr.bf16.mxu0 %v8142_v13 }
  0x7b   : > { %7644 = vmatmul.mubr.msk.f32.gmra.mrb[36].mxu0 %vm377_vm1, %v316_v43  ;;  %v366_v43 = vshrl.u32 %v365_v41, 7 }
  0x7c   : > { %753 = vmatprep.mubr.f32.mxu0 %v8522_v0 }
  0x7d   : > { %v8792_v47 = vsub.s32 1, %v366_v43 }
  0x7f   : > { %7645 = vmatmul.mubr.msk.f32.gmra.mrb[38].mxu0 %vm377_vm1, %v317_v46  ;;  %v8790_v46 = vsub.s32 0, %v366_v43  ;;  %11065 = vst [vmem:[#allocation6_spill] sm:$0xff] %v8792_v47  ;;  %v8801_v53 = vrot.slane %v363_v45, %v8792_v47 }
  0x80   : > { %759 = vmatprep.mubr.f32.mxu0 %v8522_v0 }
  0x81   : > { %11064 = vst [vmem:[#allocation5_spill] sm:$0xff] %v8790_v46 }
  0x83   : > { %7646 = vmatmul.mubr.msk.f32.gmra.mrb[40].mxu0 %vm377_vm1, %v318_v51  ;;  %v8798_v51 = vrot.slane %v363_v45, %v8790_v46 }
  0x84   : > { %765 = vmatprep.mubr.f32.mxu0 %v8522_v0 }
  0x87   : > { %7647 = vmatmul.mubr.msk.f32.gmra.mrb[42].mxu0 %vm377_vm1, %v319_v54 }
  0x88   : > { %771 = vmatprep.mubr.f32.mxu0 %v8522_v0 }
  0x8b   : > { %7648 = vmatmul.mubr.msk.f32.gmra.mrb[44].mxu0 %vm377_vm1, %v320_v56 }
  0x8c   : > { %777 = vmatprep.mubr.f32.mxu0 %v8522_v0 }
  0x8f   : > { %7649 = vmatmul.mubr.msk.f32.gmra.mrb[46].mxu0 %vm377_vm1, %v321_v59 }
  0x90   : > { %783 = vmatprep.mubr.f32.mxu0 %v8522_v0 }
  0x93   : > { %7650 = vmatmul.mubr.msk.f32.gmra.mrb[48].mxu0 %vm377_vm1, %v322_v62 }
  0x94   : > { %789 = vmatprep.mubr.f32.mxu0 %v8522_v0 }
  0x97   : > { %7651 = vmatmul.mubr.msk.f32.gmra.mrb[50].mxu0 %vm377_vm1, %v323_v1 }
  0x98   : > { %795 = vmatprep.mubr.f32.mxu0 %v8522_v0 }
  0x9b   : > { %7652 = vmatmul.mubr.msk.f32.gmra.mrb[52].mxu0 %vm377_vm1, %v324_v4 }
  0x9c   : > { %801 = vmatprep.mubr.f32.mxu0 %v8522_v0 }
  0x9f   : > { %7653 = vmatmul.mubr.msk.f32.gmra.mrb[54].mxu0 %vm377_vm1, %v325_v5 }
  0xa0   : > { %807 = vmatprep.mubr.f32.mxu0 %v8522_v0 }
  0xa3   : > { %7654 = vmatmul.mubr.msk.f32.gmra.mrb[56].mxu0 %vm377_vm1, %v326_v6 }
  0xa4   : > { %813 = vmatprep.mubr.f32.mxu0 %v8522_v0 }
  0xa7   : > { %7655 = vmatmul.mubr.msk.f32.gmra.mrb[58].mxu0 %vm377_vm1, %v327_v7 }
  0xa8   : > { %819 = vmatprep.mubr.f32.mxu0 %v8522_v0 }
  0xab   : > { %7656 = vmatmul.mubr.msk.f32.gmra.mrb[60].mxu0 %vm377_vm1, %v328_v10 }
  0xac   : > { %825 = vmatprep.mubr.f32.mxu0 %v8522_v0 }
  0xaf   : > { %7657 = vmatmul.mubr.msk.f32.gmra.mrb[62].mxu0 %vm377_vm1, %v329_v11 }
  0xb0   : > { %831 = vmatprep.mubr.f32.mxu0 %v8522_v0 }
  0xb3   : > { %7658 = vmatmul.mubr.msk.f32.gmra.mrb[64].mxu0 %vm377_vm1, %v330_v12  ;;  %v8140_v12 = vld [vmem:[#allocation2 + $0x1a0] ss:$8 sps:$4 sm:$0xff]  }
  0xb4   : > { %837 = vmatprep.mubr.f32.mxu0 %v8522_v0  ;;  %2193 = vmatpush1.bf16.msra.mxu0 %v8140_v12 }
  0xb5   : > { %2194 = vmatprep.subr.bf16.mxu0 %v8145_v49 }
  0xb7   : > { %7659 = vmatmul.mubr.msk.f32.gmra.mrb[66].mxu0 %vm377_vm1, %v331_v15 }
  0xb8   : > { %843 = vmatprep.mubr.f32.mxu0 %v8522_v0  ;;  %2195 = vmatpush1.bf16.msra.mxu0 %v8143_v48 }
  0xbb   : > { %7660 = vmatmul.mubr.msk.f32.gmra.mrb[68].mxu0 %vm377_vm1, %v332_v16 }
  0xbc   : > { %849 = vmatprep.mubr.f32.mxu0 %v8522_v0 }
  0xbf   : > { %7661 = vmatmul.mubr.msk.f32.gmra.mrb[70].mxu0 %vm377_vm1, %v333_v17  ;;  %v355_v17 = vld [vmem:[%s8623_s26 + $0x1c8] sm:$0xff] }
  0xc0   : > { %855 = vmatprep.mubr.f32.mxu0 %v8522_v0 }
  0xc3   : > { %7662 = vmatmul.mubr.msk.f32.gmra.mrb[72].mxu0 %vm377_vm1, %v334_v18 }
  0xc4   : > { %861 = vmatprep.mubr.f32.mxu0 %v8522_v0 }
  0xc7   : > { %7663 = vmatmul.mubr.msk.f32.gmra.mrb[74].mxu0 %vm377_vm1, %v335_v21 }
  0xc8   : > { %867 = vmatprep.mubr.f32.mxu0 %v8522_v0 }
  0xcb   : > { %7664 = vmatmul.mubr.msk.f32.gmra.mrb[76].mxu0 %vm377_vm1, %v336_v22 }
  0xcc   : > { %873 = vmatprep.mubr.f32.mxu0 %v8522_v0 }
  0xcf   : > { %7665 = vmatmul.mubr.msk.f32.gmra.mrb[78].mxu0 %vm377_vm1, %v337_v23 }
  0xd0   : > { %879 = vmatprep.mubr.f32.mxu0 %v8522_v0 }
  0xd3   : > { %7666 = vmatmul.mubr.msk.f32.gmra.mrb[80].mxu0 %vm377_vm1, %v338_v24 }
  0xd4   : > { %885 = vmatprep.mubr.f32.mxu0 %v8522_v0 }
  0xd7   : > { %7667 = vmatmul.mubr.msk.f32.gmra.mrb[82].mxu0 %vm377_vm1, %v339_v27 }
  0xd8   : > { %891 = vmatprep.mubr.f32.mxu0 %v8522_v0 }
  0xdb   : > { %7668 = vmatmul.mubr.msk.f32.gmra.mrb[84].mxu0 %vm377_vm1, %v340_v28 }
  0xdc   : > { %897 = vmatprep.mubr.f32.mxu0 %v8522_v0 }
  0xdf   : > { %7669 = vmatmul.mubr.msk.f32.gmra.mrb[86].mxu0 %vm377_vm1, %v341_v29 }
  0xe0   : > { %903 = vmatprep.mubr.f32.mxu0 %v8522_v0 }
  0xe3   : > { %7670 = vmatmul.mubr.msk.f32.gmra.mrb[88].mxu0 %vm377_vm1, %v342_v30 }
  0xe4   : > { %909 = vmatprep.mubr.f32.mxu0 %v8522_v0 }
  0xe7   : > { %7671 = vmatmul.mubr.msk.f32.gmra.mrb[90].mxu0 %vm377_vm1, %v343_v33  ;;  %v357_v33 = vld [vmem:[%s8623_s26 + $0x1d8] sm:$0xff] }
  0xe8   : > { %915 = vmatprep.mubr.f32.mxu0 %v8522_v0 }
  0xeb   : > { %7672 = vmatmul.mubr.msk.f32.gmra.mrb[92].mxu0 %vm377_vm1, %v344_v34 }
  0xec   : > { %921 = vmatprep.mubr.f32.mxu0 %v8522_v0 }
  0xef   : > { %7673 = vmatmul.mubr.msk.f32.gmra.mrb[94].mxu0 %vm377_vm1, %v345_v35 }
  0xf0   : > { %927 = vmatprep.mubr.f32.mxu0 %v8522_v0 }
  0xf3   : > { %7674 = vmatmul.mubr.msk.f32.gmra.mrb[96].mxu0 %vm377_vm1, %v346_v36 }
  0xf4   : > { %933 = vmatprep.mubr.f32.mxu0 %v8522_v0 }
  0xf7   : > { %7675 = vmatmul.mubr.msk.f32.gmra.mrb[98].mxu0 %vm377_vm1, %v347_v39 }
  0xf8   : > { %939 = vmatprep.mubr.f32.mxu0 %v8522_v0 }
  0xfb   : > { %7676 = vmatmul.mubr.msk.f32.gmra.mrb[100].mxu0 %vm377_vm1, %v348_v40 }
  0xfc   : > { %945 = vmatprep.mubr.f32.mxu0 %v8522_v0 }
  0xff   : > { %7677 = vmatmul.mubr.msk.f32.gmra.mrb[102].mxu0 %vm377_vm1, %v349_v42  ;;  %v358_v42 = vld [vmem:[%s8623_s26 + $0x1e0] sm:$0xff] }
 0x100   : > { %951 = vmatprep.mubr.f32.mxu0 %v8522_v0 }
 0x103   : > { %7678 = vmatmul.mubr.msk.f32.gmra.mrb[104].mxu0 %vm377_vm1, %v350_v44 }
 0x104   : > { %957 = vmatprep.mubr.f32.mxu0 %v8522_v0 }
 0x106   : > { %v641_v52 = vpop.f32.mrb[0].mxu0 }
 0x107   : > { %v643_v54 = vpop.f32.mrb[1].mxu0  ;;  %7679 = vmatmul.mubr.msk.f32.gmra.mrb[106].mxu0 %vm377_vm1, %v351_v50  ;;  %v642_v56 = vadd.f32 %v641_v52, %v8798_v51 }
 0x108   : > { %963 = vmatprep.mubr.f32.mxu0 %v8522_v0  ;;  %v644_v58 = vadd.f32 %v643_v54, %v8801_v53 }
 0x109   : > { %v1024_v63 = vmax.f32 %v642_v56, 0.0 }
 0x10a   : > { %v647_v57 = vpop.f32.mrb[2].mxu0  ;;  %v1025_v3 = vmax.f32 %v644_v58, 0.0 }
 0x10b   : > { %v648_v59 = vadd.f32 %v647_v57, %v8798_v51  ;;  %v649_v60 = vpop.f32.mrb[3].mxu0  ;;  %7680 = vmatmul.mubr.msk.f32.gmra.mrb[108].mxu0 %vm377_vm1, %v352_v55  ;;  %v359_v55 = vld [vmem:[%s8623_s26 + $0x1e8] sm:$0xff] }
 0x10c   : > { %969 = vmatprep.mubr.f32.mxu0 %v8522_v0  ;;  %v650_v62 = vadd.f32 %v649_v60, %v8801_v53 }
 0x10d   : > { %v1026_v1 = vmax.f32 %v648_v59, 0.0 }
 0x10e   : > { %v653_v2 = vpop.f32.mrb[4].mxu0  ;;  %v1027_v4 = vmax.f32 %v650_v62, 0.0 }
 0x10f   : > { %v655_v5 = vpop.f32.mrb[5].mxu0  ;;  %7681 = vmatmul.mubr.msk.f32.gmra.mrb[110].mxu0 %vm377_vm1, %v353_v61  ;;  %v1152_v6 = vpack.c.bf16 %v1026_v1, %v1024_v63  ;;  %v654_v9 = vadd.f32 %v653_v2, %v8798_v51  ;;  %v360_v1 = vld [vmem:[%s8623_s26 + $0x1f0] sm:$0xff] }
 0x110   : > { %975 = vmatprep.mubr.f32.mxu0 %v8522_v0  ;;  %v1153_v7 = vpack.c.bf16 %v1027_v4, %v1025_v3  ;;  %v656_v10 = vadd.f32 %v655_v5, %v8801_v53 }
 0x111   : > { %v1028_v18 = vmax.f32 %v654_v9, 0.0 }
 0x112   : > { %v659_v11 = vpop.f32.mrb[6].mxu0  ;;  %1453 = vmatprep.mubr.bf16.mxu1 %v1153_v7  ;;  %v1029_v20 = vmax.f32 %v656_v10, 0.0 }
 0x113   : > { %v660_v14 = vadd.f32 %v659_v11, %v8798_v51  ;;  %v661_v15 = vpop.f32.mrb[7].mxu0  ;;  %7682 = vmatmul.mubr.msk.f32.gmra.mrb[112].mxu0 %vm377_vm1, %v354_v8  ;;  %1454 = vmatmul.mubr.bf16.vlgmr.msra.gmra.mrb[0].mxu1 %v1152_v6  ;;  %v361_v8 = vld [vmem:[%s8623_s26 + $0x1f8] sm:$0xff] }
 0x114   : > { %v662_v16 = vadd.f32 %v661_v15, %v8801_v53  ;;  %981 = vmatprep.mubr.f32.mxu0 %v8522_v0 }
 0x115   : > { %v1030_v19 = vmax.f32 %v660_v14, 0.0 }
 0x116   : > { %v1031_v21 = vmax.f32 %v662_v16, 0.0  ;;  %v665_v22 = vpop.f32.mrb[8].mxu0 }
 0x117   : > { %v667_v23 = vpop.f32.mrb[9].mxu0  ;;  %7683 = vmatmul.mubr.msk.f32.gmra.mrb[114].mxu0 %vm377_vm1, %v355_v17  ;;  %v1154_v24 = vpack.c.bf16 %v1030_v19, %v1028_v18  ;;  %v666_v27 = vadd.f32 %v665_v22, %v8798_v51 }
 0x118   : > { %987 = vmatprep.mubr.f32.mxu0 %v8522_v0  ;;  %v1155_v25 = vpack.c.bf16 %v1031_v21, %v1029_v20  ;;  %v668_v28 = vadd.f32 %v667_v23, %v8801_v53  ;;  %v8146_v20 = vld [vmem:[#allocation2 + $0x1c0] ss:$8 sps:$4 sm:$0xff]   ;;  %v8148_v21 = vld [vmem:[#allocation2 + $0x1c4] ss:$8 sps:$4 sm:$0xff]  }
 0x119   : > { %v1032_v34 = vmax.f32 %v666_v27, 0.0  ;;  %2196 = vmatprep.subr.bf16.mxu0 %v8148_v21 }
 0x11a   : > { %v671_v29 = vpop.f32.mrb[10].mxu0  ;;  %1463 = vmatprep.mubr.bf16.mxu1 %v1155_v25  ;;  %v1033_v36 = vmax.f32 %v668_v28, 0.0  ;;  %2197 = vmatpush1.bf16.msra.mxu0 %v8146_v20  ;;  %v8154_v20 = vld [vmem:[#allocation2 + $0x204] ss:$8 sps:$4 sm:$0xff]  }
 0x11b   : > { %v672_v30 = vadd.f32 %v671_v29, %v8798_v51  ;;  %v673_v31 = vpop.f32.mrb[11].mxu0  ;;  %7684 = vmatmul.mubr.msk.f32.gmra.mrb[116].mxu0 %vm377_vm1, %v356_v26  ;;  %1464 = vmatmul.mubr.bf16.gmra.mrb[4].mxu1 %v1154_v24 }
 0x11c   : > { %v674_v32 = vadd.f32 %v673_v31, %v8801_v53  ;;  %993 = vmatprep.mubr.f32.mxu0 %v8522_v0  ;;  %2923 = vmatprep.subr.bf16.mxu1 %v8154_v20 }
 0x11d   : > { %v1034_v35 = vmax.f32 %v672_v30, 0.0 }
 0x11e   : > { %v1035_v37 = vmax.f32 %v674_v32, 0.0  ;;  %v677_v38 = vpop.f32.mrb[12].mxu0 }
 0x11f   : > { %v679_v39 = vpop.f32.mrb[13].mxu0  ;;  %7685 = vmatmul.mubr.msk.f32.gmra.mrb[118].mxu0 %vm377_vm1, %v357_v33  ;;  %v1156_v40 = vpack.c.bf16 %v1034_v35, %v1032_v34  ;;  %v678_v43 = vadd.f32 %v677_v38, %v8798_v51 }
 0x120   : > { %999 = vmatprep.mubr.f32.mxu0 %v8522_v0  ;;  %v1157_v41 = vpack.c.bf16 %v1035_v37, %v1033_v36  ;;  %v680_v44 = vadd.f32 %v679_v39, %v8801_v53 }
 0x121   : > { %v1036_v56 = vmax.f32 %v678_v43, 0.0 }
 0x122   : > { %v683_v45 = vpop.f32.mrb[14].mxu0  ;;  %1473 = vmatprep.mubr.bf16.mxu1 %v1157_v41  ;;  %v1037_v58 = vmax.f32 %v680_v44, 0.0 }
 0x123   : > { %v684_v50 = vadd.f32 %v683_v45, %v8798_v51  ;;  %v685_v52 = vpop.f32.mrb[15].mxu0  ;;  %7686 = vmatmul.mubr.msk.f32.gmra.mrb[120].mxu0 %vm377_vm1, %v358_v42  ;;  %1474 = vmatmul.mubr.bf16.gmra.mrb[8].mxu1 %v1156_v40 }
 0x124   : > { %v686_v54 = vadd.f32 %v685_v52, %v8801_v53  ;;  %1005 = vmatprep.mubr.f32.mxu0 %v8522_v0 }
 0x125   : > { %v1038_v57 = vmax.f32 %v684_v50, 0.0 }
 0x126   : > { %v1039_v59 = vmax.f32 %v686_v54, 0.0  ;;  %v689_v60 = vpop.f32.mrb[16].mxu0  ;;  %v8149_v54 = vld [vmem:[#allocation2 + $0x1d0] ss:$8 sps:$4 sm:$0xff]  }
 0x127   : > { %v691_v61 = vpop.f32.mrb[17].mxu0  ;;  %7687 = vmatmul.mubr.msk.f32.gmra.mrb[122].mxu0 %vm377_vm1, %v359_v55  ;;  %v1158_v62 = vpack.c.bf16 %v1038_v57, %v1036_v56  ;;  %v690_v2 = vadd.f32 %v689_v60, %v8798_v51  ;;  %v8151_v55 = vld [vmem:[#allocation2 + $0x1d4] ss:$8 sps:$4 sm:$0xff]  }
 0x128   : > { %1011 = vmatprep.mubr.f32.mxu0 %v8522_v0  ;;  %v1159_v63 = vpack.c.bf16 %v1039_v59, %v1037_v58  ;;  %v692_v3 = vadd.f32 %v691_v61, %v8801_v53  ;;  %2198 = vmatprep.subr.bf16.mxu0 %v8151_v55  ;;  %v8158_v55 = vld [vmem:[#allocation2 + $0x210] ss:$8 sps:$4 sm:$0xff]  }
 0x129   : > { %v1040_v9 = vmax.f32 %v690_v2, 0.0  ;;  %2199 = vmatpush1.bf16.msra.mxu0 %v8149_v54 }
 0x12a   : > { %v695_v4 = vpop.f32.mrb[18].mxu0  ;;  %1483 = vmatprep.mubr.bf16.mxu1 %v1159_v63  ;;  %v1041_v11 = vmax.f32 %v692_v3, 0.0 }
 0x12b   : > { %v696_v5 = vadd.f32 %v695_v4, %v8798_v51  ;;  %v697_v6 = vpop.f32.mrb[19].mxu0  ;;  %7688 = vmatmul.mubr.msk.f32.gmra.mrb[124].mxu0 %vm377_vm1, %v360_v1  ;;  %1484 = vmatmul.mubr.bf16.gmra.mrb[12].mxu1 %v1158_v62 }
 0x12c   : > { %v698_v7 = vadd.f32 %v697_v6, %v8801_v53  ;;  %1017 = vmatprep.mubr.f32.mxu0 %v8522_v0 }
 0x12d   : > { %v1042_v10 = vmax.f32 %v696_v5, 0.0 }
 0x12e   : > { %v1043_v12 = vmax.f32 %v698_v7, 0.0  ;;  %v701_v13 = vpop.f32.mrb[20].mxu0 }
 0x12f   : > { %v703_v14 = vpop.f32.mrb[21].mxu0  ;;  %7689 = vmatmul.mubr.msk.f32.gmra.mrb[126].mxu0 %vm377_vm1, %v361_v8  ;;  %v1160_v15 = vpack.c.bf16 %v1042_v10, %v1040_v9  ;;  %v702_v17 = vadd.f32 %v701_v13, %v8798_v51 }
 0x130   : > { %v1161_v16 = vpack.c.bf16 %v1043_v12, %v1041_v11  ;;  %v704_v18 = vadd.f32 %v703_v14, %v8801_v53 }
 0x131   : > { %v1044_v25 = vmax.f32 %v702_v17, 0.0 }
 0x132   : > { %v707_v19 = vpop.f32.mrb[22].mxu0  ;;  %1493 = vmatprep.mubr.bf16.mxu1 %v1161_v16  ;;  %v1045_v27 = vmax.f32 %v704_v18, 0.0 }
 0x133   : > { %v708_v22 = vadd.f32 %v707_v19, %v8798_v51  ;;  %v709_v23 = vpop.f32.mrb[23].mxu0  ;;  %1494 = vmatmul.mubr.bf16.gmra.mrb[16].mxu1 %v1160_v15  ;;  %v8152_v19 = vld [vmem:[#allocation2 + $0x200] ss:$8 sps:$4 sm:$0xff]  }
 0x134   : > { %v710_v24 = vadd.f32 %v709_v23, %v8801_v53  ;;  %v8155_v23 = vld [vmem:[#allocation2 + $0x1e0] ss:$8 sps:$4 sm:$0xff]   ;;  %2924 = vmatpush1.bf16.msra.mxu1 %v8152_v19 }
 0x135   : > { %v1046_v26 = vmax.f32 %v708_v22, 0.0 }
 0x136   : > { %v1047_v28 = vmax.f32 %v710_v24, 0.0  ;;  %v713_v29 = vpop.f32.mrb[24].mxu0  ;;  %v8157_v24 = vld [vmem:[#allocation2 + $0x1e4] ss:$8 sps:$4 sm:$0xff]  }
 0x137   : > { %v715_v30 = vpop.f32.mrb[25].mxu0  ;;  %v1162_v31 = vpack.c.bf16 %v1046_v26, %v1044_v25  ;;  %v714_v33 = vadd.f32 %v713_v29, %v8798_v51  ;;  %2200 = vmatprep.subr.bf16.mxu0 %v8157_v24  ;;  %v8164_v24 = vld [vmem:[#allocation2 + $0x220] ss:$8 sps:$4 sm:$0xff]  }
 0x138   : > { %v1163_v32 = vpack.c.bf16 %v1047_v28, %v1045_v27  ;;  %v716_v34 = vadd.f32 %v715_v30, %v8801_v53  ;;  %2201 = vmatpush1.bf16.msra.mxu0 %v8155_v23 }
 0x139   : > { %v1048_v39 = vmax.f32 %v714_v33, 0.0 }
 0x13a   : > { %v719_v35 = vpop.f32.mrb[26].mxu0  ;;  %1503 = vmatprep.mubr.bf16.mxu1 %v1163_v32  ;;  %v1049_v41 = vmax.f32 %v716_v34, 0.0 }
 0x13b   : > { %v720_v36 = vadd.f32 %v719_v35, %v8798_v51  ;;  %v721_v37 = vpop.f32.mrb[27].mxu0  ;;  %1504 = vmatmul.mubr.bf16.gmra.mrb[20].mxu1 %v1162_v31 }
 0x13c   : > { %v722_v38 = vadd.f32 %v721_v37, %v8801_v53 }
 0x13d   : > { %v1050_v40 = vmax.f32 %v720_v36, 0.0 }
 0x13e   : > { %v1051_v42 = vmax.f32 %v722_v38, 0.0  ;;  %v725_v43 = vpop.f32.mrb[28].mxu0 }
 0x13f   : > { %v727_v44 = vpop.f32.mrb[29].mxu0  ;;  %v1164_v45 = vpack.c.bf16 %v1050_v40, %v1048_v39  ;;  %v726_v49 = vadd.f32 %v725_v43, %v8798_v51 }
 0x140   : > { %v1165_v48 = vpack.c.bf16 %v1051_v42, %v1049_v41  ;;  %v728_v50 = vadd.f32 %v727_v44, %v8801_v53 }
 0x141   : > { %v1052_v59 = vmax.f32 %v726_v49, 0.0 }
 0x142   : > { %v731_v52 = vpop.f32.mrb[30].mxu0  ;;  %1513 = vmatprep.mubr.bf16.mxu1 %v1165_v48  ;;  %v1053_v61 = vmax.f32 %v728_v50, 0.0 }
 0x143   : > { %v732_v56 = vadd.f32 %v731_v52, %v8798_v51  ;;  %v733_v57 = vpop.f32.mrb[31].mxu0  ;;  %1514 = vmatmul.mubr.bf16.gmra.mrb[24].mxu1 %v1164_v45 }
 0x144   : > { %v734_v58 = vadd.f32 %v733_v57, %v8801_v53 }
 0x145   : > { %v1054_v60 = vmax.f32 %v732_v56, 0.0  ;;  %v8160_v56 = vld [vmem:[#allocation2 + $0x214] ss:$8 sps:$4 sm:$0xff]  }
 0x146   : > { %v1055_v62 = vmax.f32 %v734_v58, 0.0  ;;  %v737_v63 = vpop.f32.mrb[32].mxu0  ;;  %2925 = vmatprep.subr.bf16.mxu1 %v8160_v56 }
 0x147   : > { %v739_v1 = vpop.f32.mrb[33].mxu0  ;;  %v1166_v2 = vpack.c.bf16 %v1054_v60, %v1052_v59  ;;  %v738_v4 = vadd.f32 %v737_v63, %v8798_v51  ;;  %v8161_v59 = vld [vmem:[#allocation2 + $0x1f0] ss:$8 sps:$4 sm:$0xff]   ;;  %v8163_v60 = vld [vmem:[#allocation2 + $0x1f4] ss:$8 sps:$4 sm:$0xff]   ;;  %2926 = vmatpush1.bf16.msra.mxu1 %v8158_v55 }
 0x148   : > { %v1167_v3 = vpack.c.bf16 %v1055_v62, %v1053_v61  ;;  %v740_v5 = vadd.f32 %v739_v1, %v8801_v53  ;;  %2202 = vmatprep.subr.bf16.mxu0 %v8163_v60 }
 0x149   : > { %v1056_v10 = vmax.f32 %v738_v4, 0.0  ;;  %2203 = vmatpush1.bf16.msra.mxu0 %v8161_v59  ;;  %v8169_v59 = vld [vmem:[#allocation2 + $0x234] ss:$8 sps:$4 sm:$0xff]  }
 0x14a   : > { %v743_v6 = vpop.f32.mrb[34].mxu0  ;;  %1523 = vmatprep.mubr.bf16.mxu1 %v1167_v3  ;;  %v1057_v12 = vmax.f32 %v740_v5, 0.0 }
 0x14b   : > { %v744_v7 = vadd.f32 %v743_v6, %v8798_v51  ;;  %v745_v8 = vpop.f32.mrb[35].mxu0  ;;  %1524 = vmatmul.mubr.bf16.gmra.mrb[28].mxu1 %v1166_v2 }
 0x14c   : > { %v746_v9 = vadd.f32 %v745_v8, %v8801_v53 }
 0x14d   : > { %v1058_v11 = vmax.f32 %v744_v7, 0.0 }
 0x14e   : > { %v1059_v13 = vmax.f32 %v746_v9, 0.0  ;;  %v749_v14 = vpop.f32.mrb[36].mxu0 }
 0x14f   : > { %v751_v15 = vpop.f32.mrb[37].mxu0  ;;  %v1168_v16 = vpack.c.bf16 %v1058_v11, %v1056_v10  ;;  %v750_v18 = vadd.f32 %v749_v14, %v8798_v51 }
 0x150   : > { %v1169_v17 = vpack.c.bf16 %v1059_v13, %v1057_v12  ;;  %v752_v21 = vadd.f32 %v751_v15, %v8801_v53 }
 0x151   : > { %v1060_v28 = vmax.f32 %v750_v18, 0.0 }
 0x152   : > { %v755_v22 = vpop.f32.mrb[38].mxu0  ;;  %1533 = vmatprep.mubr.bf16.mxu1 %v1169_v17  ;;  %v1061_v30 = vmax.f32 %v752_v21, 0.0 }
 0x153   : > { %v756_v25 = vadd.f32 %v755_v22, %v8798_v51  ;;  %v757_v26 = vpop.f32.mrb[39].mxu0  ;;  %1534 = vmatmul.mubr.bf16.gmra.mrb[32].mxu1 %v1168_v16 }
 0x154   : > { %v758_v27 = vadd.f32 %v757_v26, %v8801_v53 }
 0x155   : > { %v1062_v29 = vmax.f32 %v756_v25, 0.0  ;;  %v8166_v25 = vld [vmem:[#allocation2 + $0x224] ss:$8 sps:$4 sm:$0xff]  }
 0x156   : > { %v1063_v31 = vmax.f32 %v758_v27, 0.0  ;;  %v761_v32 = vpop.f32.mrb[40].mxu0  ;;  %2927 = vmatprep.subr.bf16.mxu1 %v8166_v25  ;;  %v8170_v25 = vld [vmem:[#allocation2 + $0x240] ss:$8 sps:$4 sm:$0xff]  }
 0x157   : > { %v763_v33 = vpop.f32.mrb[41].mxu0  ;;  %v1170_v34 = vpack.c.bf16 %v1062_v29, %v1060_v28  ;;  %v762_v36 = vadd.f32 %v761_v32, %v8798_v51  ;;  %2928 = vmatpush1.bf16.msra.mxu1 %v8164_v24 }
 0x158   : > { %v1171_v35 = vpack.c.bf16 %v1063_v31, %v1061_v30  ;;  %v764_v37 = vadd.f32 %v763_v33, %v8801_v53  ;;  %2929 = vmatprep.subr.bf16.mxu1 %v8169_v59  ;;  %v8173_v59 = vld [vmem:[#allocation2 + $0x250] ss:$8 sps:$4 sm:$0xff]  }
 0x159   : > { %v1064_v42 = vmax.f32 %v762_v36, 0.0 }
 0x15a   : > { %v767_v38 = vpop.f32.mrb[42].mxu0  ;;  %1543 = vmatprep.mubr.bf16.mxu1 %v1171_v35  ;;  %v1065_v44 = vmax.f32 %v764_v37, 0.0 }
 0x15b   : > { %v768_v39 = vadd.f32 %v767_v38, %v8798_v51  ;;  %v769_v40 = vpop.f32.mrb[43].mxu0  ;;  %1544 = vmatmul.mubr.bf16.gmra.mrb[36].mxu1 %v1170_v34 }
 0x15c   : > { %v770_v41 = vadd.f32 %v769_v40, %v8801_v53 }
 0x15d   : > { %v1066_v43 = vmax.f32 %v768_v39, 0.0 }
 0x15e   : > { %v1067_v45 = vmax.f32 %v770_v41, 0.0  ;;  %v773_v48 = vpop.f32.mrb[44].mxu0 }
 0x15f   : > { %v775_v49 = vpop.f32.mrb[45].mxu0  ;;  %v1172_v50 = vpack.c.bf16 %v1066_v43, %v1064_v42  ;;  %v774_v54 = vadd.f32 %v773_v48, %v8798_v51 }
 0x160   : > { %v1173_v52 = vpack.c.bf16 %v1067_v45, %v1065_v44  ;;  %v776_v57 = vadd.f32 %v775_v49, %v8801_v53 }
 0x161   : > { %v1068_v1 = vmax.f32 %v774_v54, 0.0 }
 0x162   : > { %v779_v58 = vpop.f32.mrb[46].mxu0  ;;  %1553 = vmatprep.mubr.bf16.mxu1 %v1173_v52  ;;  %v1069_v3 = vmax.f32 %v776_v57, 0.0 }
 0x163   : > { %v780_v61 = vadd.f32 %v779_v58, %v8798_v51  ;;  %v781_v62 = vpop.f32.mrb[47].mxu0  ;;  %1554 = vmatmul.mubr.bf16.gmra.mrb[40].mxu1 %v1172_v50  ;;  %v8167_v58 = vld [vmem:[#allocation2 + $0x230] ss:$8 sps:$4 sm:$0xff]  }
 0x164   : > { %v782_v63 = vadd.f32 %v781_v62, %v8801_v53  ;;  %2930 = vmatpush1.bf16.msra.mxu1 %v8167_v58 }
 0x165   : > { %v1070_v2 = vmax.f32 %v780_v61, 0.0 }
 0x166   : > { %v1071_v4 = vmax.f32 %v782_v63, 0.0  ;;  %v785_v5 = vpop.f32.mrb[48].mxu0 }
 0x167   : > { %v787_v6 = vpop.f32.mrb[49].mxu0  ;;  %v1174_v7 = vpack.c.bf16 %v1070_v2, %v1068_v1  ;;  %v786_v9 = vadd.f32 %v785_v5, %v8798_v51 }
 0x168   : > { %v1175_v8 = vpack.c.bf16 %v1071_v4, %v1069_v3  ;;  %v788_v10 = vadd.f32 %v787_v6, %v8801_v53 }
 0x169   : > { %v1072_v15 = vmax.f32 %v786_v9, 0.0 }
 0x16a   : > { %v791_v11 = vpop.f32.mrb[50].mxu0  ;;  %1563 = vmatprep.mubr.bf16.mxu1 %v1175_v8  ;;  %v1073_v17 = vmax.f32 %v788_v10, 0.0 }
 0x16b   : > { %v792_v12 = vadd.f32 %v791_v11, %v8798_v51  ;;  %v793_v13 = vpop.f32.mrb[51].mxu0  ;;  %1564 = vmatmul.mubr.bf16.gmra.mrb[44].mxu1 %v1174_v7 }
 0x16c   : > { %v794_v14 = vadd.f32 %v793_v13, %v8801_v53 }
 0x16d   : > { %v1074_v16 = vmax.f32 %v792_v12, 0.0 }
 0x16e   : > { %v1075_v18 = vmax.f32 %v794_v14, 0.0  ;;  %v797_v19 = vpop.f32.mrb[52].mxu0 }
 0x16f   : > { %v799_v20 = vpop.f32.mrb[53].mxu0  ;;  %v1176_v21 = vpack.c.bf16 %v1074_v16, %v1072_v15  ;;  %v798_v23 = vadd.f32 %v797_v19, %v8798_v51 }
 0x170   : > { %v1177_v22 = vpack.c.bf16 %v1075_v18, %v1073_v17  ;;  %v800_v26 = vadd.f32 %v799_v20, %v8801_v53 }
 0x171   : > { %v1076_v31 = vmax.f32 %v798_v23, 0.0 }
 0x172   : > { %v803_v27 = vpop.f32.mrb[54].mxu0  ;;  %1573 = vmatprep.mubr.bf16.mxu1 %v1177_v22  ;;  %v1077_v33 = vmax.f32 %v800_v26, 0.0  ;;  %v8172_v26 = vld [vmem:[#allocation2 + $0x244] ss:$8 sps:$4 sm:$0xff]  }
 0x173   : > { %v804_v28 = vadd.f32 %v803_v27, %v8798_v51  ;;  %v805_v29 = vpop.f32.mrb[55].mxu0  ;;  %1574 = vmatmul.mubr.bf16.gmra.mrb[48].mxu1 %v1176_v21  ;;  %2931 = vmatprep.subr.bf16.mxu1 %v8172_v26  ;;  %v8176_v26 = vld [vmem:[#allocation2 + $0x260] ss:$8 sps:$4 sm:$0xff]  }
 0x174   : > { %v806_v30 = vadd.f32 %v805_v29, %v8801_v53  ;;  %2932 = vmatpush1.bf16.msra.mxu1 %v8170_v25 }
 0x175   : > { %v1078_v32 = vmax.f32 %v804_v28, 0.0 }
 0x176   : > { %v1079_v34 = vmax.f32 %v806_v30, 0.0  ;;  %v809_v35 = vpop.f32.mrb[56].mxu0 }
 0x177   : > { %v811_v36 = vpop.f32.mrb[57].mxu0  ;;  %v1178_v37 = vpack.c.bf16 %v1078_v32, %v1076_v31  ;;  %v810_v39 = vadd.f32 %v809_v35, %v8798_v51 }
 0x178   : > { %v1179_v38 = vpack.c.bf16 %v1079_v34, %v1077_v33  ;;  %v812_v40 = vadd.f32 %v811_v36, %v8801_v53 }
 0x179   : > { %v1080_v45 = vmax.f32 %v810_v39, 0.0 }
 0x17a   : > { %v815_v41 = vpop.f32.mrb[58].mxu0  ;;  %1583 = vmatprep.mubr.bf16.mxu1 %v1179_v38  ;;  %v1081_v49 = vmax.f32 %v812_v40, 0.0 }
 0x17b   : > { %v816_v42 = vadd.f32 %v815_v41, %v8798_v51  ;;  %v817_v43 = vpop.f32.mrb[59].mxu0  ;;  %1584 = vmatmul.mubr.bf16.gmra.mrb[52].mxu1 %v1178_v37 }
 0x17c   : > { %v818_v44 = vadd.f32 %v817_v43, %v8801_v53 }
 0x17d   : > { %v1082_v48 = vmax.f32 %v816_v42, 0.0 }
 0x17e   : > { %v1083_v50 = vmax.f32 %v818_v44, 0.0  ;;  %v821_v52 = vpop.f32.mrb[60].mxu0 }
 0x17f   : > { %v823_v54 = vpop.f32.mrb[61].mxu0  ;;  %v1180_v55 = vpack.c.bf16 %v1082_v48, %v1080_v45  ;;  %v822_v57 = vadd.f32 %v821_v52, %v8798_v51 }
 0x180   : > { %v1181_v56 = vpack.c.bf16 %v1083_v50, %v1081_v49  ;;  %v824_v60 = vadd.f32 %v823_v54, %v8801_v53 }
 0x181   : > { %v1084_v2 = vmax.f32 %v822_v57, 0.0 }
 0x182   : > { %v827_v61 = vpop.f32.mrb[62].mxu0  ;;  %1593 = vmatprep.mubr.bf16.mxu1 %v1181_v56  ;;  %v1085_v4 = vmax.f32 %v824_v60, 0.0  ;;  %v8175_v60 = vld [vmem:[#allocation2 + $0x254] ss:$8 sps:$4 sm:$0xff]  }
 0x183   : > { %v828_v62 = vadd.f32 %v827_v61, %v8798_v51  ;;  %v829_v63 = vpop.f32.mrb[63].mxu0  ;;  %1594 = vmatmul.mubr.bf16.gmra.mrb[56].mxu1 %v1180_v55  ;;  %2933 = vmatprep.subr.bf16.mxu1 %v8175_v60  ;;  %v8179_v60 = vld [vmem:[#allocation2 + $0x270] ss:$8 sps:$4 sm:$0xff]  }
 0x184   : > { %v830_v1 = vadd.f32 %v829_v63, %v8801_v53  ;;  %2934 = vmatpush1.bf16.msra.mxu1 %v8173_v59 }
 0x185   : > { %v1086_v3 = vmax.f32 %v828_v62, 0.0 }
 0x186   : > { %v1087_v5 = vmax.f32 %v830_v1, 0.0  ;;  %v833_v6 = vpop.f32.mrb[64].mxu0 }
 0x187   : > { %v835_v7 = vpop.f32.mrb[65].mxu0  ;;  %v1182_v8 = vpack.c.bf16 %v1086_v3, %v1084_v2  ;;  %v834_v10 = vadd.f32 %v833_v6, %v8798_v51 }
 0x188   : > { %v1183_v9 = vpack.c.bf16 %v1087_v5, %v1085_v4  ;;  %v836_v11 = vadd.f32 %v835_v7, %v8801_v53 }
 0x189   : > { %v1088_v16 = vmax.f32 %v834_v10, 0.0 }
 0x18a   : > { %v839_v12 = vpop.f32.mrb[66].mxu0  ;;  %1603 = vmatprep.mubr.bf16.mxu1 %v1183_v9  ;;  %v1089_v18 = vmax.f32 %v836_v11, 0.0 }
 0x18b   : > { %v840_v13 = vadd.f32 %v839_v12, %v8798_v51  ;;  %v841_v14 = vpop.f32.mrb[67].mxu0  ;;  %1604 = vmatmul.mubr.bf16.gmra.mrb[60].mxu1 %v1182_v8 }
 0x18c   : > { %v842_v15 = vadd.f32 %v841_v14, %v8801_v53 }
 0x18d   : > { %v1090_v17 = vmax.f32 %v840_v13, 0.0 }
 0x18e   : > { %v1091_v19 = vmax.f32 %v842_v15, 0.0  ;;  %v845_v20 = vpop.f32.mrb[68].mxu0 }
 0x18f   : > { %v847_v21 = vpop.f32.mrb[69].mxu0  ;;  %v1184_v22 = vpack.c.bf16 %v1090_v17, %v1088_v16  ;;  %v846_v24 = vadd.f32 %v845_v20, %v8798_v51 }
 0x190   : > { %v1185_v23 = vpack.c.bf16 %v1091_v19, %v1089_v18  ;;  %v848_v27 = vadd.f32 %v847_v21, %v8801_v53 }
 0x191   : > { %v1092_v32 = vmax.f32 %v846_v24, 0.0 }
 0x192   : > { %v851_v28 = vpop.f32.mrb[70].mxu0  ;;  %1613 = vmatprep.mubr.bf16.mxu1 %v1185_v23  ;;  %v1093_v34 = vmax.f32 %v848_v27, 0.0  ;;  %v8178_v27 = vld [vmem:[#allocation2 + $0x264] ss:$8 sps:$4 sm:$0xff]  }
 0x193   : > { %v852_v29 = vadd.f32 %v851_v28, %v8798_v51  ;;  %v853_v30 = vpop.f32.mrb[71].mxu0  ;;  %1614 = vmatmul.mubr.bf16.gmra.mrb[64].mxu1 %v1184_v22  ;;  %2935 = vmatprep.subr.bf16.mxu1 %v8178_v27  ;;  %v8182_v27 = vld [vmem:[#allocation2 + $0x280] ss:$8 sps:$4 sm:$0xff]  }
 0x194   : > { %v854_v31 = vadd.f32 %v853_v30, %v8801_v53  ;;  %2936 = vmatpush1.bf16.msra.mxu1 %v8176_v26 }
 0x195   : > { %v1094_v33 = vmax.f32 %v852_v29, 0.0 }
 0x196   : > { %v1095_v35 = vmax.f32 %v854_v31, 0.0  ;;  %v857_v36 = vpop.f32.mrb[72].mxu0 }
 0x197   : > { %v859_v37 = vpop.f32.mrb[73].mxu0  ;;  %v1186_v38 = vpack.c.bf16 %v1094_v33, %v1092_v32  ;;  %v858_v40 = vadd.f32 %v857_v36, %v8798_v51 }
 0x198   : > { %v1187_v39 = vpack.c.bf16 %v1095_v35, %v1093_v34  ;;  %v860_v41 = vadd.f32 %v859_v37, %v8801_v53 }
 0x199   : > { %v1096_v48 = vmax.f32 %v858_v40, 0.0 }
 0x19a   : > { %v863_v42 = vpop.f32.mrb[74].mxu0  ;;  %1623 = vmatprep.mubr.bf16.mxu1 %v1187_v39  ;;  %v1097_v50 = vmax.f32 %v860_v41, 0.0 }
 0x19b   : > { %v864_v43 = vadd.f32 %v863_v42, %v8798_v51  ;;  %v865_v44 = vpop.f32.mrb[75].mxu0  ;;  %1624 = vmatmul.mubr.bf16.gmra.mrb[68].mxu1 %v1186_v38 }
 0x19c   : > { %v866_v45 = vadd.f32 %v865_v44, %v8801_v53 }
 0x19d   : > { %v1098_v49 = vmax.f32 %v864_v43, 0.0 }
 0x19e   : > { %v1099_v52 = vmax.f32 %v866_v45, 0.0  ;;  %v869_v54 = vpop.f32.mrb[76].mxu0 }
 0x19f   : > { %v871_v55 = vpop.f32.mrb[77].mxu0  ;;  %v1188_v56 = vpack.c.bf16 %v1098_v49, %v1096_v48  ;;  %v870_v58 = vadd.f32 %v869_v54, %v8798_v51 }
 0x1a0   : > { %v1189_v57 = vpack.c.bf16 %v1099_v52, %v1097_v50  ;;  %v872_v61 = vadd.f32 %v871_v55, %v8801_v53 }
 0x1a1   : > { %v1100_v3 = vmax.f32 %v870_v58, 0.0 }
 0x1a2   : > { %v875_v62 = vpop.f32.mrb[78].mxu0  ;;  %1633 = vmatprep.mubr.bf16.mxu1 %v1189_v57  ;;  %v1101_v5 = vmax.f32 %v872_v61, 0.0  ;;  %v8181_v61 = vld [vmem:[#allocation2 + $0x274] ss:$8 sps:$4 sm:$0xff]  }
 0x1a3   : > { %v876_v63 = vadd.f32 %v875_v62, %v8798_v51  ;;  %v877_v1 = vpop.f32.mrb[79].mxu0  ;;  %1634 = vmatmul.mubr.bf16.gmra.mrb[72].mxu1 %v1188_v56  ;;  %2937 = vmatprep.subr.bf16.mxu1 %v8181_v61 }
 0x1a4   : > { %v878_v2 = vadd.f32 %v877_v1, %v8801_v53  ;;  %2938 = vmatpush1.bf16.msra.mxu1 %v8179_v60  ;;  %v7690_v60 = vld [vmem:[%s11043_s4 + $0x2] sm:$0x3] }
 0x1a5   : > { %v1102_v4 = vmax.f32 %v876_v63, 0.0 }
 0x1a6   : > { %v1103_v6 = vmax.f32 %v878_v2, 0.0  ;;  %v881_v7 = vpop.f32.mrb[80].mxu0 }
 0x1a7   : > { %v883_v8 = vpop.f32.mrb[81].mxu0  ;;  %v1190_v9 = vpack.c.bf16 %v1102_v4, %v1100_v3  ;;  %v882_v11 = vadd.f32 %v881_v7, %v8798_v51 }
 0x1a8   : > { %v1191_v10 = vpack.c.bf16 %v1103_v6, %v1101_v5  ;;  %v884_v12 = vadd.f32 %v883_v8, %v8801_v53 }
 0x1a9   : > { %v1104_v17 = vmax.f32 %v882_v11, 0.0 }
 0x1aa   : > { %v887_v13 = vpop.f32.mrb[82].mxu0  ;;  %1643 = vmatprep.mubr.bf16.mxu1 %v1191_v10  ;;  %v1105_v19 = vmax.f32 %v884_v12, 0.0 }
 0x1ab   : > { %v888_v14 = vadd.f32 %v887_v13, %v8798_v51  ;;  %v889_v15 = vpop.f32.mrb[83].mxu0  ;;  %1644 = vmatmul.mubr.bf16.gmra.mrb[76].mxu1 %v1190_v9 }
 0x1ac   : > { %v890_v16 = vadd.f32 %v889_v15, %v8801_v53 }
 0x1ad   : > { %v1106_v18 = vmax.f32 %v888_v14, 0.0 }
 0x1ae   : > { %v1107_v20 = vmax.f32 %v890_v16, 0.0  ;;  %v893_v21 = vpop.f32.mrb[84].mxu0 }
 0x1af   : > { %v895_v22 = vpop.f32.mrb[85].mxu0  ;;  %v1192_v23 = vpack.c.bf16 %v1106_v18, %v1104_v17  ;;  %v894_v25 = vadd.f32 %v893_v21, %v8798_v51 }
 0x1b0   : > { %v1193_v24 = vpack.c.bf16 %v1107_v20, %v1105_v19  ;;  %v896_v28 = vadd.f32 %v895_v22, %v8801_v53 }
 0x1b1   : > { %v1108_v33 = vmax.f32 %v894_v25, 0.0 }
 0x1b2   : > { %v899_v29 = vpop.f32.mrb[86].mxu0  ;;  %1653 = vmatprep.mubr.bf16.mxu1 %v1193_v24  ;;  %v1109_v35 = vmax.f32 %v896_v28, 0.0  ;;  %v8184_v28 = vld [vmem:[#allocation2 + $0x284] ss:$8 sps:$4 sm:$0xff]  }
 0x1b3   : > { %v900_v30 = vadd.f32 %v899_v29, %v8798_v51  ;;  %v901_v31 = vpop.f32.mrb[87].mxu0  ;;  %1654 = vmatmul.mubr.bf16.gmra.mrb[80].mxu1 %v1192_v23  ;;  %2939 = vmatprep.subr.bf16.mxu1 %v8184_v28 }
 0x1b4   : > { %v902_v32 = vadd.f32 %v901_v31, %v8801_v53  ;;  %2940 = vmatpush1.bf16.msra.mxu1 %v8182_v27 }
 0x1b5   : > { %v1110_v34 = vmax.f32 %v900_v30, 0.0 }
 0x1b6   : > { %v1111_v36 = vmax.f32 %v902_v32, 0.0  ;;  %v905_v37 = vpop.f32.mrb[88].mxu0 }
 0x1b7   : > { %v907_v38 = vpop.f32.mrb[89].mxu0  ;;  %v1194_v39 = vpack.c.bf16 %v1110_v34, %v1108_v33  ;;  %v906_v41 = vadd.f32 %v905_v37, %v8798_v51 }
 0x1b8   : > { %v1195_v40 = vpack.c.bf16 %v1111_v36, %v1109_v35  ;;  %v908_v42 = vadd.f32 %v907_v38, %v8801_v53 }
 0x1b9   : > { %v1112_v49 = vmax.f32 %v906_v41, 0.0 }
 0x1ba   : > { %v911_v43 = vpop.f32.mrb[90].mxu0  ;;  %1663 = vmatprep.mubr.bf16.mxu1 %v1195_v40  ;;  %v1113_v52 = vmax.f32 %v908_v42, 0.0 }
 0x1bb   : > { %v912_v44 = vadd.f32 %v911_v43, %v8798_v51  ;;  %v913_v45 = vpop.f32.mrb[91].mxu0  ;;  %1664 = vmatmul.mubr.bf16.gmra.mrb[84].mxu1 %v1194_v39 }
 0x1bc   : > { %v914_v48 = vadd.f32 %v913_v45, %v8801_v53 }
 0x1bd   : > { %v1114_v50 = vmax.f32 %v912_v44, 0.0 }
 0x1be   : > { %v1115_v54 = vmax.f32 %v914_v48, 0.0  ;;  %v917_v55 = vpop.f32.mrb[92].mxu0 }
 0x1bf   : > { %v919_v56 = vpop.f32.mrb[93].mxu0  ;;  %v1196_v57 = vpack.c.bf16 %v1114_v50, %v1112_v49  ;;  %v918_v59 = vadd.f32 %v917_v55, %v8798_v51 }
 0x1c0   : > { %v1197_v58 = vpack.c.bf16 %v1115_v54, %v1113_v52  ;;  %v920_v62 = vadd.f32 %v919_v56, %v8801_v53 }
 0x1c1   : > { %v1116_v4 = vmax.f32 %v918_v59, 0.0 }
 0x1c2   : > { %v923_v63 = vpop.f32.mrb[94].mxu0  ;;  %1673 = vmatprep.mubr.bf16.mxu1 %v1197_v58  ;;  %v1117_v6 = vmax.f32 %v920_v62, 0.0  ;;  %v8185_v62 = vld [vmem:[#allocation2 + $0x290] ss:$8 sps:$4 sm:$0xff]  }
 0x1c3   : > { %v924_v1 = vadd.f32 %v923_v63, %v8798_v51  ;;  %v925_v2 = vpop.f32.mrb[95].mxu0  ;;  %1674 = vmatmul.mubr.bf16.gmra.mrb[88].mxu1 %v1196_v57  ;;  %v8187_v63 = vld [vmem:[#allocation2 + $0x294] ss:$8 sps:$4 sm:$0xff]  }
 0x1c4   : > { %v926_v3 = vadd.f32 %v925_v2, %v8801_v53  ;;  %2941 = vmatprep.subr.bf16.mxu1 %v8187_v63 }
 0x1c5   : > { %v1118_v5 = vmax.f32 %v924_v1, 0.0  ;;  %2942 = vmatpush1.bf16.msra.mxu1 %v8185_v62 }
 0x1c6   : > { %v1119_v7 = vmax.f32 %v926_v3, 0.0  ;;  %v929_v8 = vpop.f32.mrb[96].mxu0 }
 0x1c7   : > { %v931_v9 = vpop.f32.mrb[97].mxu0  ;;  %v1198_v10 = vpack.c.bf16 %v1118_v5, %v1116_v4  ;;  %v930_v12 = vadd.f32 %v929_v8, %v8798_v51  ;;  %v8949_v5 = vrot.slane %v7690_v60, %v8790_v46 }
 0x1c8   : > { %v1199_v11 = vpack.c.bf16 %v1119_v7, %v1117_v6  ;;  %v932_v13 = vadd.f32 %v931_v9, %v8801_v53  ;;  %v8953_v7 = vrot.slane %v7690_v60, %v8792_v47  ;;  %v8190_v60 = vld [vmem:[#allocation2 + $0x2a4] ss:$8 sps:$4 sm:$0xff]  }
 0x1c9   : > { %v1120_v18 = vmax.f32 %v930_v12, 0.0  ;;  %2943 = vmatprep.subr.bf16.mxu1 %v8190_v60 }
 0x1ca   : > { %v935_v14 = vpop.f32.mrb[98].mxu0  ;;  %1683 = vmatprep.mubr.bf16.mxu1 %v1199_v11  ;;  %v1121_v20 = vmax.f32 %v932_v13, 0.0 }
 0x1cb   : > { %v936_v15 = vadd.f32 %v935_v14, %v8798_v51  ;;  %v937_v16 = vpop.f32.mrb[99].mxu0  ;;  %1684 = vmatmul.mubr.bf16.gmra.mrb[92].mxu1 %v1198_v10 }
 0x1cc   : > { %v938_v17 = vadd.f32 %v937_v16, %v8801_v53 }
 0x1cd   : > { %v1122_v19 = vmax.f32 %v936_v15, 0.0 }
 0x1ce   : > { %v1123_v21 = vmax.f32 %v938_v17, 0.0  ;;  %v941_v22 = vpop.f32.mrb[100].mxu0 }
 0x1cf   : > { %v943_v23 = vpop.f32.mrb[101].mxu0  ;;  %v1200_v24 = vpack.c.bf16 %v1122_v19, %v1120_v18  ;;  %v942_v26 = vadd.f32 %v941_v22, %v8798_v51 }
 0x1d0   : > { %v1201_v25 = vpack.c.bf16 %v1123_v21, %v1121_v20  ;;  %v944_v29 = vadd.f32 %v943_v23, %v8801_v53 }
 0x1d1   : > { %v1124_v34 = vmax.f32 %v942_v26, 0.0 }
 0x1d2   : > { %v947_v30 = vpop.f32.mrb[102].mxu0  ;;  %1693 = vmatprep.mubr.bf16.mxu1 %v1201_v25  ;;  %v1125_v36 = vmax.f32 %v944_v29, 0.0 }
 0x1d3   : > { %v948_v31 = vadd.f32 %v947_v30, %v8798_v51  ;;  %v949_v32 = vpop.f32.mrb[103].mxu0  ;;  %1694 = vmatmul.mubr.bf16.gmra.mrb[96].mxu1 %v1200_v24 }
 0x1d4   : > { %v950_v33 = vadd.f32 %v949_v32, %v8801_v53 }
 0x1d5   : > { %v1126_v35 = vmax.f32 %v948_v31, 0.0 }
 0x1d6   : > { %v1127_v37 = vmax.f32 %v950_v33, 0.0  ;;  %v953_v38 = vpop.f32.mrb[104].mxu0 }
 0x1d7   : > { %v955_v39 = vpop.f32.mrb[105].mxu0  ;;  %v1202_v40 = vpack.c.bf16 %v1126_v35, %v1124_v34  ;;  %v954_v42 = vadd.f32 %v953_v38, %v8798_v51 }
 0x1d8   : > { %v1203_v41 = vpack.c.bf16 %v1127_v37, %v1125_v36  ;;  %v956_v43 = vadd.f32 %v955_v39, %v8801_v53 }
 0x1d9   : > { %v1128_v50 = vmax.f32 %v954_v42, 0.0 }
 0x1da   : > { %v959_v44 = vpop.f32.mrb[106].mxu0  ;;  %1703 = vmatprep.mubr.bf16.mxu1 %v1203_v41  ;;  %v1129_v54 = vmax.f32 %v956_v43, 0.0 }
 0x1db   : > { %v960_v45 = vadd.f32 %v959_v44, %v8798_v51  ;;  %v961_v48 = vpop.f32.mrb[107].mxu0  ;;  %1704 = vmatmul.mubr.bf16.gmra.mrb[100].mxu1 %v1202_v40 }
 0x1dc   : > { %v962_v49 = vadd.f32 %v961_v48, %v8801_v53 }
 0x1dd   : > { %v1130_v52 = vmax.f32 %v960_v45, 0.0 }
 0x1de   : > { %v1131_v55 = vmax.f32 %v962_v49, 0.0  ;;  %v965_v56 = vpop.f32.mrb[108].mxu0 }
 0x1df   : > { %v967_v57 = vpop.f32.mrb[109].mxu0  ;;  %v1204_v58 = vpack.c.bf16 %v1130_v52, %v1128_v50  ;;  %v966_v61 = vadd.f32 %v965_v56, %v8798_v51  ;;  %v8188_v56 = vld [vmem:[#allocation2 + $0x2a0] ss:$8 sps:$4 sm:$0xff]  }
 0x1e0   : > { %v1205_v59 = vpack.c.bf16 %v1131_v55, %v1129_v54  ;;  %v968_v1 = vadd.f32 %v967_v57, %v8801_v53  ;;  %2944 = vmatpush1.bf16.msra.mxu1 %v8188_v56 }
 0x1e1   : > { %v1132_v8 = vmax.f32 %v966_v61, 0.0 }
 0x1e2   : > { %v971_v2 = vpop.f32.mrb[110].mxu0  ;;  %1713 = vmatprep.mubr.bf16.mxu1 %v1205_v59  ;;  %v1133_v10 = vmax.f32 %v968_v1, 0.0 }
 0x1e3   : > { %v972_v3 = vadd.f32 %v971_v2, %v8798_v51  ;;  %v973_v4 = vpop.f32.mrb[111].mxu0  ;;  %1714 = vmatmul.mubr.bf16.gmra.mrb[104].mxu1 %v1204_v58 }
 0x1e4   : > { %v974_v6 = vadd.f32 %v973_v4, %v8801_v53 }
 0x1e5   : > { %v1134_v9 = vmax.f32 %v972_v3, 0.0 }
 0x1e6   : > { %v1135_v11 = vmax.f32 %v974_v6, 0.0  ;;  %v977_v12 = vpop.f32.mrb[112].mxu0  ;;  %v1455_v13 = vpop.f32.mrb[0].mxu1 }
 0x1e7   : > { %v1456_v14 = vadd.f32 %v1455_v13, %v8949_v5  ;;  %v979_v15 = vpop.f32.mrb[113].mxu0  ;;  %v1457_v16 = vpop.f32.mrb[1].mxu1  ;;  %v1206_v17 = vpack.c.bf16 %v1134_v9, %v1132_v8  ;;  %v978_v21 = vadd.f32 %v977_v12, %v8798_v51 }
 0x1e8   : > { %v1458_v18 = vadd.f32 %v1457_v16, %v8953_v7  ;;  %v1459_v19 = vpop.f32.mrb[2].mxu1  ;;  %v1207_v20 = vpack.c.bf16 %v1135_v11, %v1133_v10  ;;  %v980_v24 = vadd.f32 %v979_v15, %v8801_v53 }
 0x1e9   : > { %v1460_v22 = vadd.f32 %v1459_v19, %v8949_v5  ;;  %v1461_v23 = vpop.f32.mrb[3].mxu1  ;;  %v1774_v27 = vmax.f32 %v1456_v14, 0.0  ;;  %v1136_v34 = vmax.f32 %v978_v21, 0.0 }
 0x1ea   : > { %v1462_v25 = vadd.f32 %v1461_v23, %v8953_v7  ;;  %v983_v26 = vpop.f32.mrb[114].mxu0  ;;  %1723 = vmatprep.mubr.bf16.mxu1 %v1207_v20  ;;  %v1775_v31 = vmax.f32 %v1458_v18, 0.0  ;;  %v1137_v37 = vmax.f32 %v980_v24, 0.0 }
 0x1eb   : > { %v1776_v28 = vmax.f32 %v1460_v22, 0.0  ;;  %v984_v29 = vadd.f32 %v983_v26, %v8798_v51  ;;  %v985_v30 = vpop.f32.mrb[115].mxu0  ;;  %1724 = vmatmul.mubr.bf16.gmra.mrb[108].mxu1 %v1206_v17 }
 0x1ec   : > { %v1777_v32 = vmax.f32 %v1462_v25, 0.0  ;;  %v986_v33 = vadd.f32 %v985_v30, %v8801_v53 }
 0x1ed   : > { %v1902_v35 = vpack.c.bf16 %v1776_v28, %v1774_v27  ;;  %v1138_v36 = vmax.f32 %v984_v29, 0.0 }
 0x1ee   : > { %v1139_v38 = vmax.f32 %v986_v33, 0.0  ;;  %v989_v39 = vpop.f32.mrb[116].mxu0  ;;  %v1465_v40 = vpop.f32.mrb[4].mxu1  ;;  %v1903_v41 = vpack.c.bf16 %v1777_v32, %v1775_v31 }
 0x1ef   : > { %v1466_v42 = vadd.f32 %v1465_v40, %v8949_v5  ;;  %v991_v43 = vpop.f32.mrb[117].mxu0  ;;  %v1467_v44 = vpop.f32.mrb[5].mxu1  ;;  %v1208_v45 = vpack.c.bf16 %v1138_v36, %v1136_v34  ;;  %v990_v52 = vadd.f32 %v989_v39, %v8798_v51 }
 0x1f0   : > { %v1468_v48 = vadd.f32 %v1467_v44, %v8953_v7  ;;  %v1469_v49 = vpop.f32.mrb[6].mxu1  ;;  %2204 = vmatprep.mubr.bf16.mxu0 %v1903_v41  ;;  %v1209_v50 = vpack.c.bf16 %v1139_v38, %v1137_v37  ;;  %v992_v57 = vadd.f32 %v991_v43, %v8801_v53 }
 0x1f1   : > { %v1470_v54 = vadd.f32 %v1469_v49, %v8949_v5  ;;  %v1471_v55 = vpop.f32.mrb[7].mxu1  ;;  %2205 = vmatmul.mubr.bf16.vlgmr.msra.gmra.mrb[128].mxu0 %v1902_v35  ;;  %v1778_v61 = vmax.f32 %v1466_v42, 0.0  ;;  %v1140_v6 = vmax.f32 %v990_v52, 0.0 }
 0x1f2   : > { %v1472_v58 = vadd.f32 %v1471_v55, %v8953_v7  ;;  %v995_v59 = vpop.f32.mrb[118].mxu0  ;;  %1733 = vmatprep.mubr.bf16.mxu1 %v1209_v50  ;;  %v1779_v2 = vmax.f32 %v1468_v48, 0.0  ;;  %v1141_v10 = vmax.f32 %v992_v57, 0.0  ;;  %v8191_v57 = vld [vmem:[#allocation2 + $0x2b0] ss:$8 sps:$4 sm:$0xff]  }
 0x1f3   : > { %v1780_v62 = vmax.f32 %v1470_v54, 0.0  ;;  %v996_v63 = vadd.f32 %v995_v59, %v8798_v51  ;;  %v997_v1 = vpop.f32.mrb[119].mxu0  ;;  %1734 = vmatmul.mubr.bf16.gmra.mrb[112].mxu1 %v1208_v45 }
 0x1f4   : > { %v1781_v3 = vmax.f32 %v1472_v58, 0.0  ;;  %v998_v4 = vadd.f32 %v997_v1, %v8801_v53 }
 0x1f5   : > { %v1142_v8 = vmax.f32 %v996_v63, 0.0  ;;  %v1904_v9 = vpack.c.bf16 %v1780_v62, %v1778_v61  ;;  %v8193_v61 = vld [vmem:[#allocation2 + $0x2b4] ss:$8 sps:$4 sm:$0xff]  }
 0x1f6   : > { %v1143_v11 = vmax.f32 %v998_v4, 0.0  ;;  %v1001_v12 = vpop.f32.mrb[120].mxu0  ;;  %v1475_v13 = vpop.f32.mrb[8].mxu1  ;;  %v1905_v14 = vpack.c.bf16 %v1781_v3, %v1779_v2  ;;  %2945 = vmatprep.subr.bf16.mxu1 %v8193_v61 }
 0x1f7   : > { %v1476_v15 = vadd.f32 %v1475_v13, %v8949_v5  ;;  %v1003_v16 = vpop.f32.mrb[121].mxu0  ;;  %v1477_v17 = vpop.f32.mrb[9].mxu1  ;;  %v1210_v18 = vpack.c.bf16 %v1142_v8, %v1140_v6  ;;  %v1002_v22 = vadd.f32 %v1001_v12, %v8798_v51  ;;  %2946 = vmatpush1.bf16.msra.mxu1 %v8191_v57 }
 0x1f8   : > { %v1478_v19 = vadd.f32 %v1477_v17, %v8953_v7  ;;  %v1479_v20 = vpop.f32.mrb[10].mxu1  ;;  %2214 = vmatprep.mubr.bf16.mxu0 %v1905_v14  ;;  %v1211_v21 = vpack.c.bf16 %v1143_v11, %v1141_v10  ;;  %v1004_v25 = vadd.f32 %v1003_v16, %v8801_v53 }
 0x1f9   : > { %v1480_v23 = vadd.f32 %v1479_v20, %v8949_v5  ;;  %v1481_v24 = vpop.f32.mrb[11].mxu1  ;;  %2215 = vmatmul.mubr.bf16.gmra.mrb[132].mxu0 %v1904_v9  ;;  %v1782_v28 = vmax.f32 %v1476_v15, 0.0  ;;  %v1144_v35 = vmax.f32 %v1002_v22, 0.0 }
 0x1fa   : > { %v1482_v26 = vadd.f32 %v1481_v24, %v8953_v7  ;;  %v1007_v27 = vpop.f32.mrb[122].mxu0  ;;  %1743 = vmatprep.mubr.bf16.mxu1 %v1211_v21  ;;  %v1783_v32 = vmax.f32 %v1478_v19, 0.0  ;;  %v1145_v38 = vmax.f32 %v1004_v25, 0.0 }
 0x1fb   : > { %v1784_v29 = vmax.f32 %v1480_v23, 0.0  ;;  %v1008_v30 = vadd.f32 %v1007_v27, %v8798_v51  ;;  %v1009_v31 = vpop.f32.mrb[123].mxu0  ;;  %1744 = vmatmul.mubr.bf16.gmra.mrb[116].mxu1 %v1210_v18 }
 0x1fc   : > { %v1785_v33 = vmax.f32 %v1482_v26, 0.0  ;;  %v1010_v34 = vadd.f32 %v1009_v31, %v8801_v53 }
 0x1fd   : > { %v1146_v36 = vmax.f32 %v1008_v30, 0.0  ;;  %v1906_v37 = vpack.c.bf16 %v1784_v29, %v1782_v28 }
 0x1fe   : > { %v1147_v39 = vmax.f32 %v1010_v34, 0.0  ;;  %v1013_v40 = vpop.f32.mrb[124].mxu0  ;;  %v1485_v41 = vpop.f32.mrb[12].mxu1  ;;  %v1907_v42 = vpack.c.bf16 %v1785_v33, %v1783_v32 }
 0x1ff   : > { %v1486_v43 = vadd.f32 %v1485_v41, %v8949_v5  ;;  %v1015_v44 = vpop.f32.mrb[125].mxu0  ;;  %v1487_v45 = vpop.f32.mrb[13].mxu1  ;;  %v1212_v48 = vpack.c.bf16 %v1146_v36, %v1144_v35  ;;  %v1014_v54 = vadd.f32 %v1013_v40, %v8798_v51  ;;  %v8194_v35 = vld [vmem:[#allocation2 + $0x2c0] ss:$8 sps:$4 sm:$0xff]   ;;  %v8196_v36 = vld [vmem:[#allocation2 + $0x2c4] ss:$8 sps:$4 sm:$0xff]  }
 0x200   : > { %v1488_v49 = vadd.f32 %v1487_v45, %v8953_v7  ;;  %v1489_v50 = vpop.f32.mrb[14].mxu1  ;;  %2224 = vmatprep.mubr.bf16.mxu0 %v1907_v42  ;;  %v1213_v52 = vpack.c.bf16 %v1147_v39, %v1145_v38  ;;  %v1016_v58 = vadd.f32 %v1015_v44, %v8801_v53  ;;  %2947 = vmatprep.subr.bf16.mxu1 %v8196_v36 }
 0x201   : > { %v1490_v55 = vadd.f32 %v1489_v50, %v8949_v5  ;;  %v1491_v56 = vpop.f32.mrb[15].mxu1  ;;  %2225 = vmatmul.mubr.bf16.gmra.mrb[136].mxu0 %v1906_v37  ;;  %v1786_v62 = vmax.f32 %v1486_v43, 0.0  ;;  %v1148_v8 = vmax.f32 %v1014_v54, 0.0  ;;  %2948 = vmatpush1.bf16.msra.mxu1 %v8194_v35 }
 0x202   : > { %v1492_v59 = vadd.f32 %v1491_v56, %v8953_v7  ;;  %v1019_v60 = vpop.f32.mrb[126].mxu0  ;;  %1753 = vmatprep.mubr.bf16.mxu1 %v1213_v52  ;;  %v1787_v3 = vmax.f32 %v1488_v49, 0.0  ;;  %v1149_v11 = vmax.f32 %v1016_v58, 0.0 }
 0x203   : > { %v1788_v63 = vmax.f32 %v1490_v55, 0.0  ;;  %v1020_v1 = vadd.f32 %v1019_v60, %v8798_v51  ;;  %v1021_v2 = vpop.f32.mrb[127].mxu0  ;;  %1754 = vmatmul.mubr.bf16.gmra.mrb[120].mxu1 %v1212_v48 }
 0x204   : > { %v1789_v4 = vmax.f32 %v1492_v59, 0.0  ;;  %v1022_v6 = vadd.f32 %v1021_v2, %v8801_v53 }
 0x205   : > { %v1150_v9 = vmax.f32 %v1020_v1, 0.0  ;;  %v1908_v10 = vpack.c.bf16 %v1788_v63, %v1786_v62 }
 0x206   : > { %v1151_v12 = vmax.f32 %v1022_v6, 0.0  ;;  %v1495_v13 = vpop.f32.mrb[16].mxu1  ;;  %v1909_v14 = vpack.c.bf16 %v1789_v4, %v1787_v3 }
 0x207   : > { %v1496_v15 = vadd.f32 %v1495_v13, %v8949_v5  ;;  %v1497_v16 = vpop.f32.mrb[17].mxu1  ;;  %v1214_v17 = vpack.c.bf16 %v1150_v9, %v1148_v8  ;;  %v8197_v8 = vld [vmem:[#allocation2 + $0x2d0] ss:$8 sps:$4 sm:$0xff]   ;;  %v8199_v9 = vld [vmem:[#allocation2 + $0x2d4] ss:$8 sps:$4 sm:$0xff]  }
 0x208   : > { %v1498_v51 = vadd.f32 %v1497_v16, %v8953_v7  ;;  %v1499_v18 = vpop.f32.mrb[18].mxu1  ;;  %2234 = vmatprep.mubr.bf16.mxu0 %v1909_v14  ;;  %v1215_v19 = vpack.c.bf16 %v1151_v12, %v1149_v11  ;;  %2949 = vmatprep.subr.bf16.mxu1 %v8199_v9 }
 0x209   : > { %v1500_v53 = vadd.f32 %v1499_v18, %v8949_v5  ;;  %v1501_v20 = vpop.f32.mrb[19].mxu1  ;;  %2235 = vmatmul.mubr.bf16.gmra.mrb[140].mxu0 %v1908_v10  ;;  %v1790_v22 = vmax.f32 %v1496_v15, 0.0  ;;  %2950 = vmatpush1.bf16.msra.mxu1 %v8197_v8 }
 0x20a   : > { %v1502_v21 = vadd.f32 %v1501_v20, %v8953_v7  ;;  %1763 = vmatprep.mubr.bf16.mxu1 %v1215_v19  ;;  %v1791_v24 = vmax.f32 %v1498_v51, 0.0 }
 0x20b   : > { %v1792_v23 = vmax.f32 %v1500_v53, 0.0  ;;  %1764 = vmatmul.mubr.bf16.gmra.mrb[124].mxu1 %v1214_v17 }
 0x20c   : > { %v1793_v25 = vmax.f32 %v1502_v21, 0.0 }
 0x20d   : > { %v1910_v26 = vpack.c.bf16 %v1792_v23, %v1790_v22 }
 0x20e   : > { %v1505_v27 = vpop.f32.mrb[20].mxu1  ;;  %v1911_v28 = vpack.c.bf16 %v1793_v25, %v1791_v24 }
 0x20f   : > { %v1506_v29 = vadd.f32 %v1505_v27, %v8949_v5  ;;  %v1507_v30 = vpop.f32.mrb[21].mxu1  ;;  %v8200_v27 = vld [vmem:[#allocation2 + $0x300] ss:$8 sps:$4 sm:$0xff]  }
 0x210   : > { %v1508_v31 = vadd.f32 %v1507_v30, %v8953_v7  ;;  %v1509_v32 = vpop.f32.mrb[22].mxu1  ;;  %2244 = vmatprep.mubr.bf16.mxu0 %v1911_v28  ;;  %v8202_v28 = vld [vmem:[#allocation2 + $0x304] ss:$8 sps:$4 sm:$0xff]  }
 0x211   : > { %v1510_v33 = vadd.f32 %v1509_v32, %v8949_v5  ;;  %v1511_v34 = vpop.f32.mrb[23].mxu1  ;;  %2245 = vmatmul.mubr.bf16.gmra.mrb[144].mxu0 %v1910_v26  ;;  %v1794_v38 = vmax.f32 %v1506_v29, 0.0  ;;  %3674 = vmatprep.subr.bf16.mxu0 %v8202_v28 }
 0x212   : > { %v1512_v37 = vadd.f32 %v1511_v34, %v8953_v7  ;;  %v1795_v40 = vmax.f32 %v1508_v31, 0.0  ;;  %3675 = vmatpush1.bf16.msra.mxu0 %v8200_v27 }
 0x213   : > { %v1796_v39 = vmax.f32 %v1510_v33, 0.0 }
 0x214   : > { %v1797_v41 = vmax.f32 %v1512_v37, 0.0 }
 0x215   : > { %v1912_v42 = vpack.c.bf16 %v1796_v39, %v1794_v38  ;;  %v8203_v38 = vld [vmem:[#allocation2 + $0x2e0] ss:$8 sps:$4 sm:$0xff]   ;;  %v8205_v39 = vld [vmem:[#allocation2 + $0x2e4] ss:$8 sps:$4 sm:$0xff]  }
 0x216   : > { %v1515_v43 = vpop.f32.mrb[24].mxu1  ;;  %v1913_v44 = vpack.c.bf16 %v1797_v41, %v1795_v40  ;;  %2951 = vmatprep.subr.bf16.mxu1 %v8205_v39 }
 0x217   : > { %v1516_v45 = vadd.f32 %v1515_v43, %v8949_v5  ;;  %v1517_v48 = vpop.f32.mrb[25].mxu1  ;;  %2952 = vmatpush1.bf16.msra.mxu1 %v8203_v38  ;;  %v8214_v38 = vld [vmem:[#allocation2 + $0x324] ss:$8 sps:$4 sm:$0xff]  }
 0x218   : > { %v1518_v49 = vadd.f32 %v1517_v48, %v8953_v7  ;;  %v1519_v50 = vpop.f32.mrb[26].mxu1  ;;  %2254 = vmatprep.mubr.bf16.mxu0 %v1913_v44 }
 0x219   : > { %v1520_v52 = vadd.f32 %v1519_v50, %v8949_v5  ;;  %v1521_v54 = vpop.f32.mrb[27].mxu1  ;;  %2255 = vmatmul.mubr.bf16.gmra.mrb[148].mxu0 %v1912_v42  ;;  %v1798_v56 = vmax.f32 %v1516_v45, 0.0 }
 0x21a   : > { %v1522_v55 = vadd.f32 %v1521_v54, %v8953_v7  ;;  %v1799_v58 = vmax.f32 %v1518_v49, 0.0 }
 0x21b   : > { %v1800_v57 = vmax.f32 %v1520_v52, 0.0 }
 0x21c   : > { %v1801_v59 = vmax.f32 %v1522_v55, 0.0 }
 0x21d   : > { %v1914_v60 = vpack.c.bf16 %v1800_v57, %v1798_v56 }
 0x21e   : > { %v1525_v61 = vpop.f32.mrb[28].mxu1  ;;  %v1915_v62 = vpack.c.bf16 %v1801_v59, %v1799_v58 }
 0x21f   : > { %v1526_v63 = vadd.f32 %v1525_v61, %v8949_v5  ;;  %v1527_v1 = vpop.f32.mrb[29].mxu1 }
 0x220   : > { %v1528_v2 = vadd.f32 %v1527_v1, %v8953_v7  ;;  %v1529_v3 = vpop.f32.mrb[30].mxu1  ;;  %2264 = vmatprep.mubr.bf16.mxu0 %v1915_v62  ;;  %v8208_v1 = vld [vmem:[#allocation2 + $0x314] ss:$8 sps:$4 sm:$0xff]  }
 0x221   : > { %v1530_v4 = vadd.f32 %v1529_v3, %v8949_v5  ;;  %v1531_v6 = vpop.f32.mrb[31].mxu1  ;;  %2265 = vmatmul.mubr.bf16.gmra.mrb[152].mxu0 %v1914_v60  ;;  %v1802_v11 = vmax.f32 %v1526_v63, 0.0  ;;  %v8206_v63 = vld [vmem:[#allocation2 + $0x310] ss:$8 sps:$4 sm:$0xff]   ;;  %3676 = vmatprep.subr.bf16.mxu0 %v8208_v1 }
 0x222   : > { %v1532_v10 = vadd.f32 %v1531_v6, %v8953_v7  ;;  %v1803_v13 = vmax.f32 %v1528_v2, 0.0  ;;  %3677 = vmatpush1.bf16.msra.mxu0 %v8206_v63 }
 0x223   : > { %v1804_v12 = vmax.f32 %v1530_v4, 0.0  ;;  %3678 = vmatprep.subr.bf16.mxu0 %v8214_v38  ;;  %v8218_v38 = vld [vmem:[#allocation2 + $0x340] ss:$8 sps:$4 sm:$0xff]  }
 0x224   : > { %v1805_v14 = vmax.f32 %v1532_v10, 0.0 }
 0x225   : > { %v1916_v15 = vpack.c.bf16 %v1804_v12, %v1802_v11 }
 0x226   : > { %v1535_v16 = vpop.f32.mrb[32].mxu1  ;;  %v1917_v17 = vpack.c.bf16 %v1805_v14, %v1803_v13  ;;  %v8209_v13 = vld [vmem:[#allocation2 + $0x2f0] ss:$8 sps:$4 sm:$0xff]   ;;  %v8211_v14 = vld [vmem:[#allocation2 + $0x2f4] ss:$8 sps:$4 sm:$0xff]  }
 0x227   : > { %v1536_v51 = vadd.f32 %v1535_v16, %v8949_v5  ;;  %v1537_v18 = vpop.f32.mrb[33].mxu1  ;;  %2953 = vmatprep.subr.bf16.mxu1 %v8211_v14 }
 0x228   : > { %v1538_v19 = vadd.f32 %v1537_v18, %v8953_v7  ;;  %v1539_v53 = vpop.f32.mrb[34].mxu1  ;;  %2274 = vmatprep.mubr.bf16.mxu0 %v1917_v17  ;;  %2954 = vmatpush1.bf16.msra.mxu1 %v8209_v13 }
 0x229   : > { %v1540_v20 = vadd.f32 %v1539_v53, %v8949_v5  ;;  %v1541_v21 = vpop.f32.mrb[35].mxu1  ;;  %2275 = vmatmul.mubr.bf16.gmra.mrb[156].mxu0 %v1916_v15  ;;  %v1806_v23 = vmax.f32 %v1536_v51, 0.0 }
 0x22a   : > { %v1542_v22 = vadd.f32 %v1541_v21, %v8953_v7  ;;  %v1807_v25 = vmax.f32 %v1538_v19, 0.0 }
 0x22b   : > { %v1808_v24 = vmax.f32 %v1540_v20, 0.0 }
 0x22c   : > { %v1809_v26 = vmax.f32 %v1542_v22, 0.0 }
 0x22d   : > { %v1918_v29 = vpack.c.bf16 %v1808_v24, %v1806_v23 }
 0x22e   : > { %v1545_v30 = vpop.f32.mrb[36].mxu1  ;;  %v1919_v31 = vpack.c.bf16 %v1809_v26, %v1807_v25 }
 0x22f   : > { %v1546_v32 = vadd.f32 %v1545_v30, %v8949_v5  ;;  %v1547_v33 = vpop.f32.mrb[37].mxu1 }
 0x230   : > { %v1548_v34 = vadd.f32 %v1547_v33, %v8953_v7  ;;  %v1549_v35 = vpop.f32.mrb[38].mxu1  ;;  %2284 = vmatprep.mubr.bf16.mxu0 %v1919_v31 }
 0x231   : > { %v1550_v36 = vadd.f32 %v1549_v35, %v8949_v5  ;;  %v1551_v37 = vpop.f32.mrb[39].mxu1  ;;  %2285 = vmatmul.mubr.bf16.gmra.mrb[160].mxu0 %v1918_v29  ;;  %v1810_v41 = vmax.f32 %v1546_v32, 0.0 }
 0x232   : > { %v1552_v40 = vadd.f32 %v1551_v37, %v8953_v7  ;;  %v1811_v43 = vmax.f32 %v1548_v34, 0.0  ;;  %v8212_v37 = vld [vmem:[#allocation2 + $0x320] ss:$8 sps:$4 sm:$0xff]  }
 0x233   : > { %v1812_v42 = vmax.f32 %v1550_v36, 0.0  ;;  %3679 = vmatpush1.bf16.msra.mxu0 %v8212_v37 }
 0x234   : > { %v1813_v44 = vmax.f32 %v1552_v40, 0.0 }
 0x235   : > { %v1920_v45 = vpack.c.bf16 %v1812_v42, %v1810_v41 }
 0x236   : > { %v1555_v48 = vpop.f32.mrb[40].mxu1  ;;  %v1921_v49 = vpack.c.bf16 %v1813_v44, %v1811_v43 }
 0x237   : > { %v1556_v50 = vadd.f32 %v1555_v48, %v8949_v5  ;;  %v1557_v52 = vpop.f32.mrb[41].mxu1 }
 0x238   : > { %v1558_v54 = vadd.f32 %v1557_v52, %v8953_v7  ;;  %v1559_v55 = vpop.f32.mrb[42].mxu1  ;;  %2294 = vmatprep.mubr.bf16.mxu0 %v1921_v49 }
 0x239   : > { %v1560_v56 = vadd.f32 %v1559_v55, %v8949_v5  ;;  %v1561_v57 = vpop.f32.mrb[43].mxu1  ;;  %2295 = vmatmul.mubr.bf16.gmra.mrb[164].mxu0 %v1920_v45  ;;  %v1814_v59 = vmax.f32 %v1556_v50, 0.0 }
 0x23a   : > { %v1562_v58 = vadd.f32 %v1561_v57, %v8953_v7  ;;  %v1815_v61 = vmax.f32 %v1558_v54, 0.0 }
 0x23b   : > { %v1816_v60 = vmax.f32 %v1560_v56, 0.0 }
 0x23c   : > { %v1817_v62 = vmax.f32 %v1562_v58, 0.0 }
 0x23d   : > { %v1922_v2 = vpack.c.bf16 %v1816_v60, %v1814_v59 }
 0x23e   : > { %v1565_v3 = vpop.f32.mrb[44].mxu1  ;;  %v1923_v4 = vpack.c.bf16 %v1817_v62, %v1815_v61 }
 0x23f   : > { %v1566_v6 = vadd.f32 %v1565_v3, %v8949_v5  ;;  %v1567_v8 = vpop.f32.mrb[45].mxu1 }
 0x240   : > { %v1568_v9 = vadd.f32 %v1567_v8, %v8953_v7  ;;  %v1569_v10 = vpop.f32.mrb[46].mxu1  ;;  %2304 = vmatprep.mubr.bf16.mxu0 %v1923_v4 }
 0x241   : > { %v1570_v11 = vadd.f32 %v1569_v10, %v8949_v5  ;;  %v1571_v12 = vpop.f32.mrb[47].mxu1  ;;  %2305 = vmatmul.mubr.bf16.gmra.mrb[168].mxu0 %v1922_v2  ;;  %v1818_v16 = vmax.f32 %v1566_v6, 0.0  ;;  %v8215_v10 = vld [vmem:[#allocation2 + $0x330] ss:$8 sps:$4 sm:$0xff]  }
 0x242   : > { %v1572_v15 = vadd.f32 %v1571_v12, %v8953_v7  ;;  %v1819_v51 = vmax.f32 %v1568_v9, 0.0 }
 0x243   : > { %v1820_v17 = vmax.f32 %v1570_v11, 0.0  ;;  %v8217_v11 = vld [vmem:[#allocation2 + $0x334] ss:$8 sps:$4 sm:$0xff]  }
 0x244   : > { %v1821_v18 = vmax.f32 %v1572_v15, 0.0  ;;  %3680 = vmatprep.subr.bf16.mxu0 %v8217_v11  ;;  %v8221_v11 = vld [vmem:[#allocation2 + $0x350] ss:$8 sps:$4 sm:$0xff]  }
 0x245   : > { %v1924_v19 = vpack.c.bf16 %v1820_v17, %v1818_v16  ;;  %3681 = vmatpush1.bf16.msra.mxu0 %v8215_v10 }
 0x246   : > { %v1575_v53 = vpop.f32.mrb[48].mxu1  ;;  %v1925_v20 = vpack.c.bf16 %v1821_v18, %v1819_v51 }
 0x247   : > { %v1576_v21 = vadd.f32 %v1575_v53, %v8949_v5  ;;  %v1577_v22 = vpop.f32.mrb[49].mxu1 }
 0x248   : > { %v1578_v23 = vadd.f32 %v1577_v22, %v8953_v7  ;;  %v1579_v24 = vpop.f32.mrb[50].mxu1  ;;  %2314 = vmatprep.mubr.bf16.mxu0 %v1925_v20 }
 0x249   : > { %v1580_v25 = vadd.f32 %v1579_v24, %v8949_v5  ;;  %v1581_v26 = vpop.f32.mrb[51].mxu1  ;;  %2315 = vmatmul.mubr.bf16.gmra.mrb[172].mxu0 %v1924_v19  ;;  %v1822_v28 = vmax.f32 %v1576_v21, 0.0 }
 0x24a   : > { %v1582_v27 = vadd.f32 %v1581_v26, %v8953_v7  ;;  %v1823_v30 = vmax.f32 %v1578_v23, 0.0 }
 0x24b   : > { %v1824_v29 = vmax.f32 %v1580_v25, 0.0 }
 0x24c   : > { %v1825_v31 = vmax.f32 %v1582_v27, 0.0 }
 0x24d   : > { %v1926_v32 = vpack.c.bf16 %v1824_v29, %v1822_v28 }
 0x24e   : > { %v1585_v33 = vpop.f32.mrb[52].mxu1  ;;  %v1927_v34 = vpack.c.bf16 %v1825_v31, %v1823_v30 }
 0x24f   : > { %v1586_v35 = vadd.f32 %v1585_v33, %v8949_v5  ;;  %v1587_v36 = vpop.f32.mrb[53].mxu1 }
 0x250   : > { %v1588_v39 = vadd.f32 %v1587_v36, %v8953_v7  ;;  %v1589_v40 = vpop.f32.mrb[54].mxu1  ;;  %2324 = vmatprep.mubr.bf16.mxu0 %v1927_v34 }
 0x251   : > { %v1590_v41 = vadd.f32 %v1589_v40, %v8949_v5  ;;  %v1591_v42 = vpop.f32.mrb[55].mxu1  ;;  %2325 = vmatmul.mubr.bf16.gmra.mrb[176].mxu0 %v1926_v32  ;;  %v1826_v44 = vmax.f32 %v1586_v35, 0.0 }
 0x252   : > { %v1592_v43 = vadd.f32 %v1591_v42, %v8953_v7  ;;  %v1827_v48 = vmax.f32 %v1588_v39, 0.0  ;;  %v8220_v39 = vld [vmem:[#allocation2 + $0x344] ss:$8 sps:$4 sm:$0xff]  }
 0x253   : > { %v1828_v45 = vmax.f32 %v1590_v41, 0.0  ;;  %3682 = vmatprep.subr.bf16.mxu0 %v8220_v39  ;;  %v8224_v39 = vld [vmem:[#allocation2 + $0x360] ss:$8 sps:$4 sm:$0xff]  }
 0x254   : > { %v1829_v49 = vmax.f32 %v1592_v43, 0.0  ;;  %3683 = vmatpush1.bf16.msra.mxu0 %v8218_v38 }
 0x255   : > { %v1928_v50 = vpack.c.bf16 %v1828_v45, %v1826_v44 }
 0x256   : > { %v1595_v52 = vpop.f32.mrb[56].mxu1  ;;  %v1929_v54 = vpack.c.bf16 %v1829_v49, %v1827_v48 }
 0x257   : > { %v1596_v55 = vadd.f32 %v1595_v52, %v8949_v5  ;;  %v1597_v56 = vpop.f32.mrb[57].mxu1 }
 0x258   : > { %v1598_v57 = vadd.f32 %v1597_v56, %v8953_v7  ;;  %v1599_v58 = vpop.f32.mrb[58].mxu1  ;;  %2334 = vmatprep.mubr.bf16.mxu0 %v1929_v54 }
 0x259   : > { %v1600_v59 = vadd.f32 %v1599_v58, %v8949_v5  ;;  %v1601_v60 = vpop.f32.mrb[59].mxu1  ;;  %2335 = vmatmul.mubr.bf16.gmra.mrb[180].mxu0 %v1928_v50  ;;  %v1830_v62 = vmax.f32 %v1596_v55, 0.0 }
 0x25a   : > { %v1602_v61 = vadd.f32 %v1601_v60, %v8953_v7  ;;  %v1831_v1 = vmax.f32 %v1598_v57, 0.0 }
 0x25b   : > { %v1832_v63 = vmax.f32 %v1600_v59, 0.0 }
 0x25c   : > { %v1833_v2 = vmax.f32 %v1602_v61, 0.0 }
 0x25d   : > { %v1930_v3 = vpack.c.bf16 %v1832_v63, %v1830_v62 }
 0x25e   : > { %v1605_v4 = vpop.f32.mrb[60].mxu1  ;;  %v1931_v6 = vpack.c.bf16 %v1833_v2, %v1831_v1 }
 0x25f   : > { %v1606_v8 = vadd.f32 %v1605_v4, %v8949_v5  ;;  %v1607_v9 = vpop.f32.mrb[61].mxu1 }
 0x260   : > { %v1608_v12 = vadd.f32 %v1607_v9, %v8953_v7  ;;  %v1609_v13 = vpop.f32.mrb[62].mxu1  ;;  %2344 = vmatprep.mubr.bf16.mxu0 %v1931_v6 }
 0x261   : > { %v1610_v14 = vadd.f32 %v1609_v13, %v8949_v5  ;;  %v1611_v15 = vpop.f32.mrb[63].mxu1  ;;  %2345 = vmatmul.mubr.bf16.gmra.mrb[184].mxu0 %v1930_v3  ;;  %v1834_v17 = vmax.f32 %v1606_v8, 0.0 }
 0x262   : > { %v1612_v16 = vadd.f32 %v1611_v15, %v8953_v7  ;;  %v1835_v18 = vmax.f32 %v1608_v12, 0.0  ;;  %v8223_v12 = vld [vmem:[#allocation2 + $0x354] ss:$8 sps:$4 sm:$0xff]  }
 0x263   : > { %v1836_v51 = vmax.f32 %v1610_v14, 0.0  ;;  %3684 = vmatprep.subr.bf16.mxu0 %v8223_v12  ;;  %v8227_v12 = vld [vmem:[#allocation2 + $0x370] ss:$8 sps:$4 sm:$0xff]  }
 0x264   : > { %v1837_v19 = vmax.f32 %v1612_v16, 0.0  ;;  %3685 = vmatpush1.bf16.msra.mxu0 %v8221_v11 }
 0x265   : > { %v1932_v53 = vpack.c.bf16 %v1836_v51, %v1834_v17 }
 0x266   : > { %v1615_v20 = vpop.f32.mrb[64].mxu1  ;;  %v1933_v21 = vpack.c.bf16 %v1837_v19, %v1835_v18 }
 0x267   : > { %v1616_v22 = vadd.f32 %v1615_v20, %v8949_v5  ;;  %v1617_v23 = vpop.f32.mrb[65].mxu1 }
 0x268   : > { %v1618_v24 = vadd.f32 %v1617_v23, %v8953_v7  ;;  %v1619_v25 = vpop.f32.mrb[66].mxu1  ;;  %2354 = vmatprep.mubr.bf16.mxu0 %v1933_v21 }
 0x269   : > { %v1620_v26 = vadd.f32 %v1619_v25, %v8949_v5  ;;  %v1621_v27 = vpop.f32.mrb[67].mxu1  ;;  %2355 = vmatmul.mubr.bf16.gmra.mrb[188].mxu0 %v1932_v53  ;;  %v1838_v29 = vmax.f32 %v1616_v22, 0.0 }
 0x26a   : > { %v1622_v28 = vadd.f32 %v1621_v27, %v8953_v7  ;;  %v1839_v31 = vmax.f32 %v1618_v24, 0.0 }
 0x26b   : > { %v1840_v30 = vmax.f32 %v1620_v26, 0.0 }
 0x26c   : > { %v1841_v32 = vmax.f32 %v1622_v28, 0.0 }
 0x26d   : > { %v1934_v33 = vpack.c.bf16 %v1840_v30, %v1838_v29 }
 0x26e   : > { %v1625_v34 = vpop.f32.mrb[68].mxu1  ;;  %v1935_v35 = vpack.c.bf16 %v1841_v32, %v1839_v31 }
 0x26f   : > { %v1626_v36 = vadd.f32 %v1625_v34, %v8949_v5  ;;  %v1627_v37 = vpop.f32.mrb[69].mxu1 }
 0x270   : > { %v1628_v40 = vadd.f32 %v1627_v37, %v8953_v7  ;;  %v1629_v41 = vpop.f32.mrb[70].mxu1  ;;  %2364 = vmatprep.mubr.bf16.mxu0 %v1935_v35 }
 0x271   : > { %v1630_v42 = vadd.f32 %v1629_v41, %v8949_v5  ;;  %v1631_v43 = vpop.f32.mrb[71].mxu1  ;;  %2365 = vmatmul.mubr.bf16.gmra.mrb[192].mxu0 %v1934_v33  ;;  %v1842_v45 = vmax.f32 %v1626_v36, 0.0 }
 0x272   : > { %v1632_v44 = vadd.f32 %v1631_v43, %v8953_v7  ;;  %v1843_v49 = vmax.f32 %v1628_v40, 0.0  ;;  %v8226_v40 = vld [vmem:[#allocation2 + $0x364] ss:$8 sps:$4 sm:$0xff]  }
 0x273   : > { %v1844_v48 = vmax.f32 %v1630_v42, 0.0  ;;  %3686 = vmatprep.subr.bf16.mxu0 %v8226_v40  ;;  %v8230_v40 = vld [vmem:[#allocation2 + $0x380] ss:$8 sps:$4 sm:$0xff]  }
 0x274   : > { %v1845_v50 = vmax.f32 %v1632_v44, 0.0  ;;  %3687 = vmatpush1.bf16.msra.mxu0 %v8224_v39 }
 0x275   : > { %v1936_v52 = vpack.c.bf16 %v1844_v48, %v1842_v45 }
 0x276   : > { %v1635_v54 = vpop.f32.mrb[72].mxu1  ;;  %v1937_v55 = vpack.c.bf16 %v1845_v50, %v1843_v49 }
 0x277   : > { %v1636_v56 = vadd.f32 %v1635_v54, %v8949_v5  ;;  %v1637_v57 = vpop.f32.mrb[73].mxu1 }
 0x278   : > { %v1638_v58 = vadd.f32 %v1637_v57, %v8953_v7  ;;  %v1639_v59 = vpop.f32.mrb[74].mxu1  ;;  %2374 = vmatprep.mubr.bf16.mxu0 %v1937_v55 }
 0x279   : > { %v1640_v60 = vadd.f32 %v1639_v59, %v8949_v5  ;;  %v1641_v61 = vpop.f32.mrb[75].mxu1  ;;  %2375 = vmatmul.mubr.bf16.gmra.mrb[196].mxu0 %v1936_v52  ;;  %v1846_v63 = vmax.f32 %v1636_v56, 0.0 }
 0x27a   : > { %v1642_v62 = vadd.f32 %v1641_v61, %v8953_v7  ;;  %v1847_v2 = vmax.f32 %v1638_v58, 0.0 }
 0x27b   : > { %v1848_v1 = vmax.f32 %v1640_v60, 0.0 }
 0x27c   : > { %v1849_v3 = vmax.f32 %v1642_v62, 0.0 }
 0x27d   : > { %v1938_v4 = vpack.c.bf16 %v1848_v1, %v1846_v63 }
 0x27e   : > { %v1645_v6 = vpop.f32.mrb[76].mxu1  ;;  %v1939_v8 = vpack.c.bf16 %v1849_v3, %v1847_v2 }
 0x27f   : > { %v1646_v9 = vadd.f32 %v1645_v6, %v8949_v5  ;;  %v1647_v10 = vpop.f32.mrb[77].mxu1 }
 0x280   : > { %v1648_v13 = vadd.f32 %v1647_v10, %v8953_v7  ;;  %v1649_v14 = vpop.f32.mrb[78].mxu1  ;;  %2384 = vmatprep.mubr.bf16.mxu0 %v1939_v8 }
 0x281   : > { %v1650_v15 = vadd.f32 %v1649_v14, %v8949_v5  ;;  %v1651_v16 = vpop.f32.mrb[79].mxu1  ;;  %2385 = vmatmul.mubr.bf16.gmra.mrb[200].mxu0 %v1938_v4  ;;  %v1850_v51 = vmax.f32 %v1646_v9, 0.0 }
 0x282   : > { %v1652_v17 = vadd.f32 %v1651_v16, %v8953_v7  ;;  %v1851_v19 = vmax.f32 %v1648_v13, 0.0  ;;  %v8229_v13 = vld [vmem:[#allocation2 + $0x374] ss:$8 sps:$4 sm:$0xff]  }
 0x283   : > { %v1852_v18 = vmax.f32 %v1650_v15, 0.0  ;;  %3688 = vmatprep.subr.bf16.mxu0 %v8229_v13 }
 0x284   : > { %v1853_v53 = vmax.f32 %v1652_v17, 0.0  ;;  %3689 = vmatpush1.bf16.msra.mxu0 %v8227_v12 }
 0x285   : > { %v1940_v20 = vpack.c.bf16 %v1852_v18, %v1850_v51 }
 0x286   : > { %v1655_v21 = vpop.f32.mrb[80].mxu1  ;;  %v1941_v22 = vpack.c.bf16 %v1853_v53, %v1851_v19 }
 0x287   : > { %v1656_v23 = vadd.f32 %v1655_v21, %v8949_v5  ;;  %v1657_v24 = vpop.f32.mrb[81].mxu1 }
 0x288   : > { %v1658_v25 = vadd.f32 %v1657_v24, %v8953_v7  ;;  %v1659_v26 = vpop.f32.mrb[82].mxu1  ;;  %2394 = vmatprep.mubr.bf16.mxu0 %v1941_v22 }
 0x289   : > { %v1660_v27 = vadd.f32 %v1659_v26, %v8949_v5  ;;  %v1661_v28 = vpop.f32.mrb[83].mxu1  ;;  %2395 = vmatmul.mubr.bf16.gmra.mrb[204].mxu0 %v1940_v20  ;;  %v1854_v30 = vmax.f32 %v1656_v23, 0.0 }
 0x28a   : > { %v1662_v29 = vadd.f32 %v1661_v28, %v8953_v7  ;;  %v1855_v32 = vmax.f32 %v1658_v25, 0.0 }
 0x28b   : > { %v1856_v31 = vmax.f32 %v1660_v27, 0.0 }
 0x28c   : > { %v1857_v33 = vmax.f32 %v1662_v29, 0.0 }
 0x28d   : > { %v1942_v34 = vpack.c.bf16 %v1856_v31, %v1854_v30 }
 0x28e   : > { %v1665_v35 = vpop.f32.mrb[84].mxu1  ;;  %v1943_v36 = vpack.c.bf16 %v1857_v33, %v1855_v32 }
 0x28f   : > { %v1666_v37 = vadd.f32 %v1665_v35, %v8949_v5  ;;  %v1667_v38 = vpop.f32.mrb[85].mxu1 }
 0x290   : > { %v1668_v41 = vadd.f32 %v1667_v38, %v8953_v7  ;;  %v1669_v42 = vpop.f32.mrb[86].mxu1  ;;  %2404 = vmatprep.mubr.bf16.mxu0 %v1943_v36 }
 0x291   : > { %v1670_v43 = vadd.f32 %v1669_v42, %v8949_v5  ;;  %v1671_v44 = vpop.f32.mrb[87].mxu1  ;;  %2405 = vmatmul.mubr.bf16.gmra.mrb[208].mxu0 %v1942_v34  ;;  %v1858_v48 = vmax.f32 %v1666_v37, 0.0 }
 0x292   : > { %v1672_v45 = vadd.f32 %v1671_v44, %v8953_v7  ;;  %v1859_v50 = vmax.f32 %v1668_v41, 0.0  ;;  %v8232_v41 = vld [vmem:[#allocation2 + $0x384] ss:$8 sps:$4 sm:$0xff]  }
 0x293   : > { %v1860_v49 = vmax.f32 %v1670_v43, 0.0  ;;  %3690 = vmatprep.subr.bf16.mxu0 %v8232_v41 }
 0x294   : > { %v1861_v52 = vmax.f32 %v1672_v45, 0.0  ;;  %3691 = vmatpush1.bf16.msra.mxu0 %v8230_v40 }
 0x295   : > { %v1944_v54 = vpack.c.bf16 %v1860_v49, %v1858_v48 }
 0x296   : > { %v1675_v55 = vpop.f32.mrb[88].mxu1  ;;  %v1945_v56 = vpack.c.bf16 %v1861_v52, %v1859_v50 }
 0x297   : > { %v1676_v57 = vadd.f32 %v1675_v55, %v8949_v5  ;;  %v1677_v58 = vpop.f32.mrb[89].mxu1 }
 0x298   : > { %v1678_v59 = vadd.f32 %v1677_v58, %v8953_v7  ;;  %v1679_v60 = vpop.f32.mrb[90].mxu1  ;;  %2414 = vmatprep.mubr.bf16.mxu0 %v1945_v56 }
 0x299   : > { %v1680_v61 = vadd.f32 %v1679_v60, %v8949_v5  ;;  %v1681_v62 = vpop.f32.mrb[91].mxu1  ;;  %2415 = vmatmul.mubr.bf16.gmra.mrb[212].mxu0 %v1944_v54  ;;  %v1862_v1 = vmax.f32 %v1676_v57, 0.0 }
 0x29a   : > { %v1682_v63 = vadd.f32 %v1681_v62, %v8953_v7  ;;  %v1863_v3 = vmax.f32 %v1678_v59, 0.0 }
 0x29b   : > { %v1864_v2 = vmax.f32 %v1680_v61, 0.0 }
 0x29c   : > { %v1865_v4 = vmax.f32 %v1682_v63, 0.0 }
 0x29d   : > { %v1946_v6 = vpack.c.bf16 %v1864_v2, %v1862_v1 }
 0x29e   : > { %v1685_v8 = vpop.f32.mrb[92].mxu1  ;;  %v1947_v9 = vpack.c.bf16 %v1865_v4, %v1863_v3 }
 0x29f   : > { %v1686_v10 = vadd.f32 %v1685_v8, %v8949_v5  ;;  %v1687_v11 = vpop.f32.mrb[93].mxu1 }
 0x2a0   : > { %v1688_v14 = vadd.f32 %v1687_v11, %v8953_v7  ;;  %v1689_v15 = vpop.f32.mrb[94].mxu1  ;;  %2424 = vmatprep.mubr.bf16.mxu0 %v1947_v9  ;;  %v7723_v11 = vld [vmem:[%s11043_s4 + $0x4] sm:$0x3] }
 0x2a1   : > { %v1690_v16 = vadd.f32 %v1689_v15, %v8949_v5  ;;  %v1691_v17 = vpop.f32.mrb[95].mxu1  ;;  %2425 = vmatmul.mubr.bf16.gmra.mrb[216].mxu0 %v1946_v6  ;;  %v1866_v18 = vmax.f32 %v1686_v10, 0.0  ;;  %v8235_v15 = vld [vmem:[#allocation2 + $0x394] ss:$8 sps:$4 sm:$0xff]  }
 0x2a2   : > { %v1692_v51 = vadd.f32 %v1691_v17, %v8953_v7  ;;  %v1867_v53 = vmax.f32 %v1688_v14, 0.0  ;;  %v8233_v14 = vld [vmem:[#allocation2 + $0x390] ss:$8 sps:$4 sm:$0xff]   ;;  %3692 = vmatprep.subr.bf16.mxu0 %v8235_v15 }
 0x2a3   : > { %v1868_v19 = vmax.f32 %v1690_v16, 0.0  ;;  %3693 = vmatpush1.bf16.msra.mxu0 %v8233_v14 }
 0x2a4   : > { %v1869_v20 = vmax.f32 %v1692_v51, 0.0 }
 0x2a5   : > { %v1948_v21 = vpack.c.bf16 %v1868_v19, %v1866_v18  ;;  %v9086_v19 = vrot.slane %v7723_v11, %v8790_v46 }
 0x2a6   : > { %v1695_v22 = vpop.f32.mrb[96].mxu1  ;;  %v1949_v23 = vpack.c.bf16 %v1869_v20, %v1867_v53  ;;  %v9090_v20 = vrot.slane %v7723_v11, %v8792_v47 }
 0x2a7   : > { %v1696_v24 = vadd.f32 %v1695_v22, %v8949_v5  ;;  %v1697_v25 = vpop.f32.mrb[97].mxu1 }
 0x2a8   : > { %v1698_v26 = vadd.f32 %v1697_v25, %v8953_v7  ;;  %v1699_v27 = vpop.f32.mrb[98].mxu1  ;;  %2434 = vmatprep.mubr.bf16.mxu0 %v1949_v23 }
 0x2a9   : > { %v1700_v28 = vadd.f32 %v1699_v27, %v8949_v5  ;;  %v1701_v29 = vpop.f32.mrb[99].mxu1  ;;  %2435 = vmatmul.mubr.bf16.gmra.mrb[220].mxu0 %v1948_v21  ;;  %v1870_v31 = vmax.f32 %v1696_v24, 0.0 }
 0x2aa   : > { %v1702_v30 = vadd.f32 %v1701_v29, %v8953_v7  ;;  %v1871_v33 = vmax.f32 %v1698_v26, 0.0 }
 0x2ab   : > { %v1872_v32 = vmax.f32 %v1700_v28, 0.0 }
 0x2ac   : > { %v1873_v34 = vmax.f32 %v1702_v30, 0.0 }
 0x2ad   : > { %v1950_v35 = vpack.c.bf16 %v1872_v32, %v1870_v31 }
 0x2ae   : > { %v1705_v36 = vpop.f32.mrb[100].mxu1  ;;  %v1951_v37 = vpack.c.bf16 %v1873_v34, %v1871_v33 }
 0x2af   : > { %v1706_v38 = vadd.f32 %v1705_v36, %v8949_v5  ;;  %v1707_v39 = vpop.f32.mrb[101].mxu1 }
 0x2b0   : > { %v1708_v42 = vadd.f32 %v1707_v39, %v8953_v7  ;;  %v1709_v43 = vpop.f32.mrb[102].mxu1  ;;  %2444 = vmatprep.mubr.bf16.mxu0 %v1951_v37 }
 0x2b1   : > { %v1710_v44 = vadd.f32 %v1709_v43, %v8949_v5  ;;  %v1711_v45 = vpop.f32.mrb[103].mxu1  ;;  %2445 = vmatmul.mubr.bf16.gmra.mrb[224].mxu0 %v1950_v35  ;;  %v1874_v49 = vmax.f32 %v1706_v38, 0.0 }
 0x2b2   : > { %v1712_v48 = vadd.f32 %v1711_v45, %v8953_v7  ;;  %v1875_v52 = vmax.f32 %v1708_v42, 0.0 }
 0x2b3   : > { %v1876_v50 = vmax.f32 %v1710_v44, 0.0 }
 0x2b4   : > { %v1877_v54 = vmax.f32 %v1712_v48, 0.0 }
 0x2b5   : > { %v1952_v55 = vpack.c.bf16 %v1876_v50, %v1874_v49 }
 0x2b6   : > { %v1715_v56 = vpop.f32.mrb[104].mxu1  ;;  %v1953_v57 = vpack.c.bf16 %v1877_v54, %v1875_v52 }
 0x2b7   : > { %v1716_v58 = vadd.f32 %v1715_v56, %v8949_v5  ;;  %v1717_v59 = vpop.f32.mrb[105].mxu1 }
 0x2b8   : > { %v1718_v60 = vadd.f32 %v1717_v59, %v8953_v7  ;;  %v1719_v61 = vpop.f32.mrb[106].mxu1  ;;  %2454 = vmatprep.mubr.bf16.mxu0 %v1953_v57 }
 0x2b9   : > { %v1720_v62 = vadd.f32 %v1719_v61, %v8949_v5  ;;  %v1721_v63 = vpop.f32.mrb[107].mxu1  ;;  %2455 = vmatmul.mubr.bf16.gmra.mrb[228].mxu0 %v1952_v55  ;;  %v1878_v2 = vmax.f32 %v1716_v58, 0.0 }
 0x2ba   : > { %v1722_v1 = vadd.f32 %v1721_v63, %v8953_v7  ;;  %v1879_v4 = vmax.f32 %v1718_v60, 0.0 }
 0x2bb   : > { %v1880_v3 = vmax.f32 %v1720_v62, 0.0 }
 0x2bc   : > { %v1881_v6 = vmax.f32 %v1722_v1, 0.0 }
 0x2bd   : > { %v1954_v8 = vpack.c.bf16 %v1880_v3, %v1878_v2 }
 0x2be   : > { %v1725_v9 = vpop.f32.mrb[108].mxu1  ;;  %v1955_v10 = vpack.c.bf16 %v1881_v6, %v1879_v4 }
 0x2bf   : > { %v1726_v12 = vadd.f32 %v1725_v9, %v8949_v5  ;;  %v1727_v13 = vpop.f32.mrb[109].mxu1 }
 0x2c0   : > { %v1728_v16 = vadd.f32 %v1727_v13, %v8953_v7  ;;  %v1729_v17 = vpop.f32.mrb[110].mxu1  ;;  %2464 = vmatprep.mubr.bf16.mxu0 %v1955_v10 }
 0x2c1   : > { %v1730_v51 = vadd.f32 %v1729_v17, %v8949_v5  ;;  %v1731_v18 = vpop.f32.mrb[111].mxu1  ;;  %2465 = vmatmul.mubr.bf16.gmra.mrb[232].mxu0 %v1954_v8  ;;  %v1882_v21 = vmax.f32 %v1726_v12, 0.0  ;;  %v8236_v8 = vld [vmem:[#allocation2 + $0x3a0] ss:$8 sps:$4 sm:$0xff]   ;;  %v8238_v12 = vld [vmem:[#allocation2 + $0x3a4] ss:$8 sps:$4 sm:$0xff]  }
 0x2c2   : > { %v1732_v53 = vadd.f32 %v1731_v18, %v8953_v7  ;;  %v1883_v23 = vmax.f32 %v1728_v16, 0.0  ;;  %3694 = vmatprep.subr.bf16.mxu0 %v8238_v12 }
 0x2c3   : > { %v1884_v22 = vmax.f32 %v1730_v51, 0.0  ;;  %3695 = vmatpush1.bf16.msra.mxu0 %v8236_v8 }
 0x2c4   : > { %v1885_v24 = vmax.f32 %v1732_v53, 0.0  ;;  %v2206_v25 = vpop.f32.mrb[128].mxu0 }
 0x2c5   : > { %v2207_v26 = vadd.f32 %v2206_v25, %v9086_v19  ;;  %v2208_v27 = vpop.f32.mrb[129].mxu0  ;;  %v1956_v28 = vpack.c.bf16 %v1884_v22, %v1882_v21 }
 0x2c6   : > { %v2209_v29 = vadd.f32 %v2208_v27, %v9090_v20  ;;  %v1735_v30 = vpop.f32.mrb[112].mxu1  ;;  %v2210_v31 = vpop.f32.mrb[130].mxu0  ;;  %v1957_v32 = vpack.c.bf16 %v1885_v24, %v1883_v23 }
 0x2c7   : > { %v1736_v33 = vadd.f32 %v1735_v30, %v8949_v5  ;;  %v2211_v34 = vadd.f32 %v2210_v31, %v9086_v19  ;;  %v1737_v35 = vpop.f32.mrb[113].mxu1  ;;  %v2212_v36 = vpop.f32.mrb[131].mxu0  ;;  %v2525_v40 = vmax.f32 %v2207_v26, 0.0 }
 0x2c8   : > { %v1738_v37 = vadd.f32 %v1737_v35, %v8953_v7  ;;  %v2213_v38 = vadd.f32 %v2212_v36, %v9090_v20  ;;  %v1739_v39 = vpop.f32.mrb[114].mxu1  ;;  %2474 = vmatprep.mubr.bf16.mxu0 %v1957_v32  ;;  %v2526_v44 = vmax.f32 %v2209_v29, 0.0 }
 0x2c9   : > { %v2527_v41 = vmax.f32 %v2211_v34, 0.0  ;;  %v1740_v42 = vadd.f32 %v1739_v39, %v8949_v5  ;;  %v1741_v43 = vpop.f32.mrb[115].mxu1  ;;  %2475 = vmatmul.mubr.bf16.gmra.mrb[236].mxu0 %v1956_v28  ;;  %v1886_v49 = vmax.f32 %v1736_v33, 0.0 }
 0x2ca   : > { %v2528_v45 = vmax.f32 %v2213_v38, 0.0  ;;  %v1742_v48 = vadd.f32 %v1741_v43, %v8953_v7  ;;  %v1887_v54 = vmax.f32 %v1738_v37, 0.0 }
 0x2cb   : > { %v2653_v50 = vpack.c.bf16 %v2527_v41, %v2525_v40  ;;  %v1888_v52 = vmax.f32 %v1740_v42, 0.0 }
 0x2cc   : > { %v1889_v55 = vmax.f32 %v1742_v48, 0.0  ;;  %v2216_v56 = vpop.f32.mrb[132].mxu0  ;;  %v2654_v57 = vpack.c.bf16 %v2528_v45, %v2526_v44 }
 0x2cd   : > { %v2217_v58 = vadd.f32 %v2216_v56, %v9086_v19  ;;  %v2218_v59 = vpop.f32.mrb[133].mxu0  ;;  %v1958_v60 = vpack.c.bf16 %v1888_v52, %v1886_v49 }
 0x2ce   : > { %v2219_v61 = vadd.f32 %v2218_v59, %v9090_v20  ;;  %v1745_v62 = vpop.f32.mrb[116].mxu1  ;;  %v2220_v63 = vpop.f32.mrb[134].mxu0  ;;  %2955 = vmatprep.mubr.bf16.mxu1 %v2654_v57  ;;  %v1959_v1 = vpack.c.bf16 %v1889_v55, %v1887_v54 }
 0x2cf   : > { %v1746_v2 = vadd.f32 %v1745_v62, %v8949_v5  ;;  %v2221_v3 = vadd.f32 %v2220_v63, %v9086_v19  ;;  %v1747_v4 = vpop.f32.mrb[117].mxu1  ;;  %v2222_v6 = vpop.f32.mrb[135].mxu0  ;;  %2956 = vmatmul.mubr.bf16.vlgmr.msra.gmra.mrb[128].mxu1 %v2653_v50  ;;  %v2529_v13 = vmax.f32 %v2217_v58, 0.0 }
 0x2d0   : > { %v1748_v9 = vadd.f32 %v1747_v4, %v8953_v7  ;;  %v2223_v10 = vadd.f32 %v2222_v6, %v9090_v20  ;;  %v1749_v11 = vpop.f32.mrb[118].mxu1  ;;  %2484 = vmatprep.mubr.bf16.mxu0 %v1959_v1  ;;  %v2530_v17 = vmax.f32 %v2219_v61, 0.0 }
 0x2d1   : > { %v2531_v14 = vmax.f32 %v2221_v3, 0.0  ;;  %v1750_v15 = vadd.f32 %v1749_v11, %v8949_v5  ;;  %v1751_v16 = vpop.f32.mrb[119].mxu1  ;;  %2485 = vmatmul.mubr.bf16.gmra.mrb[240].mxu0 %v1958_v60  ;;  %v1890_v53 = vmax.f32 %v1746_v2, 0.0 }
 0x2d2   : > { %v2532_v51 = vmax.f32 %v2223_v10, 0.0  ;;  %v1752_v18 = vadd.f32 %v1751_v16, %v8953_v7  ;;  %v1891_v23 = vmax.f32 %v1748_v9, 0.0  ;;  %v8239_v9 = vld [vmem:[#allocation2 + $0x3b0] ss:$8 sps:$4 sm:$0xff]  }
 0x2d3   : > { %v1892_v21 = vmax.f32 %v1750_v15, 0.0  ;;  %v2655_v22 = vpack.c.bf16 %v2531_v14, %v2529_v13  ;;  %v8241_v13 = vld [vmem:[#allocation2 + $0x3b4] ss:$8 sps:$4 sm:$0xff]  }
 0x2d4   : > { %v1893_v24 = vmax.f32 %v1752_v18, 0.0  ;;  %v2226_v25 = vpop.f32.mrb[136].mxu0  ;;  %v2656_v26 = vpack.c.bf16 %v2532_v51, %v2530_v17  ;;  %3696 = vmatprep.subr.bf16.mxu0 %v8241_v13 }
 0x2d5   : > { %v2227_v27 = vadd.f32 %v2226_v25, %v9086_v19  ;;  %v2228_v28 = vpop.f32.mrb[137].mxu0  ;;  %v1960_v29 = vpack.c.bf16 %v1892_v21, %v1890_v53  ;;  %3697 = vmatpush1.bf16.msra.mxu0 %v8239_v9 }
 0x2d6   : > { %v2229_v30 = vadd.f32 %v2228_v28, %v9090_v20  ;;  %v1755_v31 = vpop.f32.mrb[120].mxu1  ;;  %v2230_v32 = vpop.f32.mrb[138].mxu0  ;;  %2965 = vmatprep.mubr.bf16.mxu1 %v2656_v26  ;;  %v1961_v33 = vpack.c.bf16 %v1893_v24, %v1891_v23 }
 0x2d7   : > { %v1756_v34 = vadd.f32 %v1755_v31, %v8949_v5  ;;  %v2231_v35 = vadd.f32 %v2230_v32, %v9086_v19  ;;  %v1757_v36 = vpop.f32.mrb[121].mxu1  ;;  %v2232_v37 = vpop.f32.mrb[139].mxu0  ;;  %2966 = vmatmul.mubr.bf16.gmra.mrb[132].mxu1 %v2655_v22  ;;  %v2533_v41 = vmax.f32 %v2227_v27, 0.0 }
 0x2d8   : > { %v1758_v38 = vadd.f32 %v1757_v36, %v8953_v7  ;;  %v2233_v39 = vadd.f32 %v2232_v37, %v9090_v20  ;;  %v1759_v40 = vpop.f32.mrb[122].mxu1  ;;  %2494 = vmatprep.mubr.bf16.mxu0 %v1961_v33  ;;  %v2534_v45 = vmax.f32 %v2229_v30, 0.0 }
 0x2d9   : > { %v2535_v42 = vmax.f32 %v2231_v35, 0.0  ;;  %v1760_v43 = vadd.f32 %v1759_v40, %v8949_v5  ;;  %v1761_v44 = vpop.f32.mrb[123].mxu1  ;;  %2495 = vmatmul.mubr.bf16.gmra.mrb[244].mxu0 %v1960_v29  ;;  %v1894_v50 = vmax.f32 %v1756_v34, 0.0 }
 0x2da   : > { %v2536_v48 = vmax.f32 %v2233_v39, 0.0  ;;  %v1762_v49 = vadd.f32 %v1761_v44, %v8953_v7  ;;  %v1895_v55 = vmax.f32 %v1758_v38, 0.0 }
 0x2db   : > { %v1896_v52 = vmax.f32 %v1760_v43, 0.0  ;;  %v2657_v54 = vpack.c.bf16 %v2535_v42, %v2533_v41 }
 0x2dc   : > { %v1897_v56 = vmax.f32 %v1762_v49, 0.0  ;;  %v2236_v57 = vpop.f32.mrb[140].mxu0  ;;  %v2658_v58 = vpack.c.bf16 %v2536_v48, %v2534_v45 }
 0x2dd   : > { %v2237_v59 = vadd.f32 %v2236_v57, %v9086_v19  ;;  %v2238_v60 = vpop.f32.mrb[141].mxu0  ;;  %v1962_v61 = vpack.c.bf16 %v1896_v52, %v1894_v50  ;;  %v8242_v50 = vld [vmem:[#allocation2 + $0x3c0] ss:$8 sps:$4 sm:$0xff]   ;;  %v8244_v52 = vld [vmem:[#allocation2 + $0x3c4] ss:$8 sps:$4 sm:$0xff]  }
 0x2de   : > { %v2239_v62 = vadd.f32 %v2238_v60, %v9090_v20  ;;  %v1765_v63 = vpop.f32.mrb[124].mxu1  ;;  %v2240_v1 = vpop.f32.mrb[142].mxu0  ;;  %2975 = vmatprep.mubr.bf16.mxu1 %v2658_v58  ;;  %v1963_v2 = vpack.c.bf16 %v1897_v56, %v1895_v55  ;;  %3698 = vmatprep.subr.bf16.mxu0 %v8244_v52  ;;  %v8248_v52 = vld [vmem:[#allocation2 + $0x3e0] ss:$8 sps:$4 sm:$0xff]  }
 0x2df   : > { %v1766_v3 = vadd.f32 %v1765_v63, %v8949_v5  ;;  %v2241_v4 = vadd.f32 %v2240_v1, %v9086_v19  ;;  %v1767_v6 = vpop.f32.mrb[125].mxu1  ;;  %v2242_v8 = vpop.f32.mrb[143].mxu0  ;;  %2976 = vmatmul.mubr.bf16.gmra.mrb[136].mxu1 %v2657_v54  ;;  %v2537_v14 = vmax.f32 %v2237_v59, 0.0  ;;  %3699 = vmatpush1.bf16.msra.mxu0 %v8242_v50 }
 0x2e0   : > { %v1768_v10 = vadd.f32 %v1767_v6, %v8953_v7  ;;  %v2243_v11 = vadd.f32 %v2242_v8, %v9090_v20  ;;  %v1769_v12 = vpop.f32.mrb[126].mxu1  ;;  %2504 = vmatprep.mubr.bf16.mxu0 %v1963_v2  ;;  %v2538_v51 = vmax.f32 %v2239_v62, 0.0 }
 0x2e1   : > { %v2539_v15 = vmax.f32 %v2241_v4, 0.0  ;;  %v1770_v16 = vadd.f32 %v1769_v12, %v8949_v5  ;;  %v1771_v17 = vpop.f32.mrb[127].mxu1  ;;  %2505 = vmatmul.mubr.bf16.gmra.mrb[248].mxu0 %v1962_v61  ;;  %v1898_v21 = vmax.f32 %v1766_v3, 0.0 }
 0x2e2   : > { %v2540_v18 = vmax.f32 %v2243_v11, 0.0  ;;  %v1772_v53 = vadd.f32 %v1771_v17, %v8953_v7  ;;  %v1899_v24 = vmax.f32 %v1768_v10, 0.0 }
 0x2e3   : > { %v1900_v22 = vmax.f32 %v1770_v16, 0.0  ;;  %v2659_v23 = vpack.c.bf16 %v2539_v15, %v2537_v14 }
 0x2e4   : > { %v1901_v25 = vmax.f32 %v1772_v53, 0.0  ;;  %v2246_v26 = vpop.f32.mrb[144].mxu0  ;;  %v2660_v27 = vpack.c.bf16 %v2540_v18, %v2538_v51 }
 0x2e5   : > { %v2247_v28 = vadd.f32 %v2246_v26, %v9086_v19  ;;  %v2248_v29 = vpop.f32.mrb[145].mxu0  ;;  %v1964_v30 = vpack.c.bf16 %v1900_v22, %v1898_v21  ;;  %v8245_v21 = vld [vmem:[#allocation2 + $0x3d0] ss:$8 sps:$4 sm:$0xff]   ;;  %v8247_v22 = vld [vmem:[#allocation2 + $0x3d4] ss:$8 sps:$4 sm:$0xff]  }
 0x2e6   : > { %v2249_v5 = vadd.f32 %v2248_v29, %v9090_v20  ;;  %v2250_v31 = vpop.f32.mrb[146].mxu0  ;;  %2985 = vmatprep.mubr.bf16.mxu1 %v2660_v27  ;;  %v1965_v32 = vpack.c.bf16 %v1901_v25, %v1899_v24  ;;  %3700 = vmatprep.subr.bf16.mxu0 %v8247_v22 }
 0x2e7   : > { %v2251_v7 = vadd.f32 %v2250_v31, %v9086_v19  ;;  %v2252_v33 = vpop.f32.mrb[147].mxu0  ;;  %2986 = vmatmul.mubr.bf16.gmra.mrb[140].mxu1 %v2659_v23  ;;  %v2541_v35 = vmax.f32 %v2247_v28, 0.0  ;;  %3701 = vmatpush1.bf16.msra.mxu0 %v8245_v21 }
 0x2e8   : > { %v2253_v34 = vadd.f32 %v2252_v33, %v9090_v20  ;;  %2514 = vmatprep.mubr.bf16.mxu0 %v1965_v32  ;;  %v2542_v37 = vmax.f32 %v2249_v5, 0.0 }
 0x2e9   : > { %v2543_v36 = vmax.f32 %v2251_v7, 0.0  ;;  %2515 = vmatmul.mubr.bf16.gmra.mrb[252].mxu0 %v1964_v30 }
 0x2ea   : > { %v2544_v38 = vmax.f32 %v2253_v34, 0.0 }
 0x2eb   : > { %v2661_v39 = vpack.c.bf16 %v2543_v36, %v2541_v35 }
 0x2ec   : > { %v2256_v40 = vpop.f32.mrb[148].mxu0  ;;  %v2662_v41 = vpack.c.bf16 %v2544_v38, %v2542_v37 }
 0x2ed   : > { %v2257_v42 = vadd.f32 %v2256_v40, %v9086_v19  ;;  %v2258_v43 = vpop.f32.mrb[149].mxu0 }
 0x2ee   : > { %v2259_v44 = vadd.f32 %v2258_v43, %v9090_v20  ;;  %v2260_v45 = vpop.f32.mrb[150].mxu0  ;;  %2995 = vmatprep.mubr.bf16.mxu1 %v2662_v41 }
 0x2ef   : > { %v2261_v48 = vadd.f32 %v2260_v45, %v9086_v19  ;;  %v2262_v49 = vpop.f32.mrb[151].mxu0  ;;  %2996 = vmatmul.mubr.bf16.gmra.mrb[144].mxu1 %v2661_v39  ;;  %v2545_v55 = vmax.f32 %v2257_v42, 0.0 }
 0x2f0   : > { %v2263_v54 = vadd.f32 %v2262_v49, %v9090_v20  ;;  %v2546_v57 = vmax.f32 %v2259_v44, 0.0 }
 0x2f1   : > { %v2547_v56 = vmax.f32 %v2261_v48, 0.0 }
 0x2f2   : > { %v2548_v58 = vmax.f32 %v2263_v54, 0.0  ;;  %v8250_v54 = vld [vmem:[#allocation2 + $0x3e4] ss:$8 sps:$4 sm:$0xff]  }
 0x2f3   : > { %v2663_v59 = vpack.c.bf16 %v2547_v56, %v2545_v55  ;;  %v4252_v56 = vld [vmem:[%s11042_s3] sm:$0x77]  ;;  %3702 = vmatprep.subr.bf16.mxu0 %v8250_v54 }
 0x2f4   : > { %v2266_v60 = vpop.f32.mrb[152].mxu0  ;;  %v2664_v61 = vpack.c.bf16 %v2548_v58, %v2546_v57  ;;  %3703 = vmatpush1.bf16.msra.mxu0 %v8248_v52 }
 0x2f5   : > { %v2267_v62 = vadd.f32 %v2266_v60, %v9086_v19  ;;  %v2268_v63 = vpop.f32.mrb[153].mxu0 }
 0x2f6   : > { %v2269_v1 = vadd.f32 %v2268_v63, %v9090_v20  ;;  %v2270_v2 = vpop.f32.mrb[154].mxu0  ;;  %3005 = vmatprep.mubr.bf16.mxu1 %v2664_v61 }
 0x2f7   : > { %v2271_v3 = vadd.f32 %v2270_v2, %v9086_v19  ;;  %v2272_v4 = vpop.f32.mrb[155].mxu0  ;;  %3006 = vmatmul.mubr.bf16.gmra.mrb[148].mxu1 %v2663_v59  ;;  %v2549_v8 = vmax.f32 %v2267_v62, 0.0  ;;  %v4254_v59 = vcombine.high %v4252_v56, %v4252_v56 }
 0x2f8   : > { %v2273_v6 = vadd.f32 %v2272_v4, %v9090_v20  ;;  %v2550_v10 = vmax.f32 %v2269_v1, 0.0 }
 0x2f9   : > { %v2551_v9 = vmax.f32 %v2271_v3, 0.0  ;;  %7822 = vmatprep.subr.msk.mxu1 %vm570_vm0, %v4254_v59  ;;  %v8257_v59 = vld [vmem:[#allocation2 + $0x404] ss:$8 sps:$4 sm:$0xff]  }
 0x2fa   : > { %v2552_v11 = vmax.f32 %v2273_v6, 0.0  ;;  %7823 = vmatpush1.msk.msra.mxu1 %vm570_vm0, %v4252_v56 }
 0x2fb   : > { %v2665_v12 = vpack.c.bf16 %v2551_v9, %v2549_v8 }
 0x2fc   : > { %v2276_v13 = vpop.f32.mrb[156].mxu0  ;;  %v2666_v14 = vpack.c.bf16 %v2552_v11, %v2550_v10 }
 0x2fd   : > { %v2277_v15 = vadd.f32 %v2276_v13, %v9086_v19  ;;  %v2278_v16 = vpop.f32.mrb[157].mxu0 }
 0x2fe   : > { %v2279_v17 = vadd.f32 %v2278_v16, %v9090_v20  ;;  %v2280_v51 = vpop.f32.mrb[158].mxu0  ;;  %3015 = vmatprep.mubr.bf16.mxu1 %v2666_v14 }
 0x2ff   : > { %v2281_v18 = vadd.f32 %v2280_v51, %v9086_v19  ;;  %v2282_v53 = vpop.f32.mrb[159].mxu0  ;;  %3016 = vmatmul.mubr.bf16.gmra.mrb[152].mxu1 %v2665_v12  ;;  %v2553_v24 = vmax.f32 %v2277_v15, 0.0 }
 0x300   : > { %v2283_v23 = vadd.f32 %v2282_v53, %v9090_v20  ;;  %v2554_v26 = vmax.f32 %v2279_v17, 0.0 }
 0x301   : > { %v2555_v25 = vmax.f32 %v2281_v18, 0.0 }
 0x302   : > { %v2556_v27 = vmax.f32 %v2283_v23, 0.0 }
 0x303   : > { %v2667_v28 = vpack.c.bf16 %v2555_v25, %v2553_v24  ;;  %v8252_v24 = vld [vmem:[#allocation2 + $0x3f0] ss:$8 sps:$4 sm:$0xff]   ;;  %v8254_v25 = vld [vmem:[#allocation2 + $0x3f4] ss:$8 sps:$4 sm:$0xff]  }
 0x304   : > { %v2286_v29 = vpop.f32.mrb[160].mxu0  ;;  %v2668_v30 = vpack.c.bf16 %v2556_v27, %v2554_v26  ;;  %3704 = vmatprep.subr.bf16.mxu0 %v8254_v25 }
 0x305   : > { %v2287_v5 = vadd.f32 %v2286_v29, %v9086_v19  ;;  %v2288_v31 = vpop.f32.mrb[161].mxu0  ;;  %3705 = vmatpush1.bf16.msra.mxu0 %v8252_v24 }
 0x306   : > { %v2289_v32 = vadd.f32 %v2288_v31, %v9090_v20  ;;  %v2290_v7 = vpop.f32.mrb[162].mxu0  ;;  %3025 = vmatprep.mubr.bf16.mxu1 %v2668_v30  ;;  %4868 = vmatprep.subr.bf16.mxu0 %v8257_v59 }
 0x307   : > { %v2291_v33 = vadd.f32 %v2290_v7, %v9086_v19  ;;  %v2292_v34 = vpop.f32.mrb[163].mxu0  ;;  %3026 = vmatmul.mubr.bf16.gmra.mrb[156].mxu1 %v2667_v28  ;;  %v2557_v36 = vmax.f32 %v2287_v5, 0.0 }
 0x308   : > { %v2293_v35 = vadd.f32 %v2292_v34, %v9090_v20  ;;  %v2558_v38 = vmax.f32 %v2289_v32, 0.0 }
 0x309   : > { %v2559_v37 = vmax.f32 %v2291_v33, 0.0 }
 0x30a   : > { %v2560_v39 = vmax.f32 %v2293_v35, 0.0 }
 0x30b   : > { %v2669_v40 = vpack.c.bf16 %v2559_v37, %v2557_v36 }
 0x30c   : > { %v2296_v41 = vpop.f32.mrb[164].mxu0  ;;  %v2670_v42 = vpack.c.bf16 %v2560_v39, %v2558_v38 }
 0x30d   : > { %v2297_v43 = vadd.f32 %v2296_v41, %v9086_v19  ;;  %v2298_v44 = vpop.f32.mrb[165].mxu0 }
 0x30e   : > { %v2299_v45 = vadd.f32 %v2298_v44, %v9090_v20  ;;  %v2300_v48 = vpop.f32.mrb[166].mxu0  ;;  %3035 = vmatprep.mubr.bf16.mxu1 %v2670_v42 }
 0x30f   : > { %v2301_v49 = vadd.f32 %v2300_v48, %v9086_v19  ;;  %v2302_v50 = vpop.f32.mrb[167].mxu0  ;;  %3036 = vmatmul.mubr.bf16.gmra.mrb[160].mxu1 %v2669_v40  ;;  %v2561_v57 = vmax.f32 %v2297_v43, 0.0 }
 0x310   : > { %v2303_v55 = vadd.f32 %v2302_v50, %v9090_v20  ;;  %v2562_v60 = vmax.f32 %v2299_v45, 0.0 }
 0x311   : > { %v2563_v58 = vmax.f32 %v2301_v49, 0.0 }
 0x312   : > { %v2564_v61 = vmax.f32 %v2303_v55, 0.0 }
 0x313   : > { %v2671_v62 = vpack.c.bf16 %v2563_v58, %v2561_v57 }
 0x314   : > { %v2306_v63 = vpop.f32.mrb[168].mxu0  ;;  %v2672_v1 = vpack.c.bf16 %v2564_v61, %v2562_v60 }
 0x315   : > { %v2307_v2 = vadd.f32 %v2306_v63, %v9086_v19  ;;  %v2308_v3 = vpop.f32.mrb[169].mxu0 }
 0x316   : > { %v2309_v4 = vadd.f32 %v2308_v3, %v9090_v20  ;;  %v2310_v6 = vpop.f32.mrb[170].mxu0  ;;  %3045 = vmatprep.mubr.bf16.mxu1 %v2672_v1 }
 0x317   : > { %v2311_v8 = vadd.f32 %v2310_v6, %v9086_v19  ;;  %v2312_v9 = vpop.f32.mrb[171].mxu0  ;;  %3046 = vmatmul.mubr.bf16.gmra.mrb[164].mxu1 %v2671_v62  ;;  %v2565_v11 = vmax.f32 %v2307_v2, 0.0 }
 0x318   : > { %v2313_v10 = vadd.f32 %v2312_v9, %v9090_v20  ;;  %v2566_v13 = vmax.f32 %v2309_v4, 0.0 }
 0x319   : > { %v2567_v12 = vmax.f32 %v2311_v8, 0.0 }
 0x31a   : > { %v2568_v14 = vmax.f32 %v2313_v10, 0.0 }
 0x31b   : > { %v2673_v15 = vpack.c.bf16 %v2567_v12, %v2565_v11 }
 0x31c   : > { %v2316_v16 = vpop.f32.mrb[172].mxu0  ;;  %v2674_v17 = vpack.c.bf16 %v2568_v14, %v2566_v13 }
 0x31d   : > { %v2317_v51 = vadd.f32 %v2316_v16, %v9086_v19  ;;  %v2318_v18 = vpop.f32.mrb[173].mxu0 }
 0x31e   : > { %v2319_v53 = vadd.f32 %v2318_v18, %v9090_v20  ;;  %v2320_v21 = vpop.f32.mrb[174].mxu0  ;;  %3055 = vmatprep.mubr.bf16.mxu1 %v2674_v17 }
 0x31f   : > { %v2321_v22 = vadd.f32 %v2320_v21, %v9086_v19  ;;  %v2322_v23 = vpop.f32.mrb[175].mxu0  ;;  %3056 = vmatmul.mubr.bf16.gmra.mrb[168].mxu1 %v2673_v15  ;;  %v2569_v27 = vmax.f32 %v2317_v51, 0.0 }
 0x320   : > { %v2323_v26 = vadd.f32 %v2322_v23, %v9090_v20  ;;  %v2570_v29 = vmax.f32 %v2319_v53, 0.0 }
 0x321   : > { %v2571_v28 = vmax.f32 %v2321_v22, 0.0 }
 0x322   : > { %v2572_v30 = vmax.f32 %v2323_v26, 0.0 }
 0x323   : > { %v2675_v5 = vpack.c.bf16 %v2571_v28, %v2569_v27 }
 0x324   : > { %v2326_v31 = vpop.f32.mrb[176].mxu0  ;;  %v2676_v32 = vpack.c.bf16 %v2572_v30, %v2570_v29 }
 0x325   : > { %v2327_v7 = vadd.f32 %v2326_v31, %v9086_v19  ;;  %v2328_v33 = vpop.f32.mrb[177].mxu0 }
 0x326   : > { %v2329_v34 = vadd.f32 %v2328_v33, %v9090_v20  ;;  %v2330_v35 = vpop.f32.mrb[178].mxu0  ;;  %3065 = vmatprep.mubr.bf16.mxu1 %v2676_v32 }
 0x327   : > { %v2331_v36 = vadd.f32 %v2330_v35, %v9086_v19  ;;  %v2332_v37 = vpop.f32.mrb[179].mxu0  ;;  %3066 = vmatmul.mubr.bf16.gmra.mrb[172].mxu1 %v2675_v5  ;;  %v2573_v39 = vmax.f32 %v2327_v7, 0.0 }
 0x328   : > { %v2333_v38 = vadd.f32 %v2332_v37, %v9090_v20  ;;  %v2574_v41 = vmax.f32 %v2329_v34, 0.0 }
 0x329   : > { %v2575_v40 = vmax.f32 %v2331_v36, 0.0 }
 0x32a   : > { %v2576_v42 = vmax.f32 %v2333_v38, 0.0 }
 0x32b   : > { %v2677_v43 = vpack.c.bf16 %v2575_v40, %v2573_v39 }
 0x32c   : > { %v2336_v44 = vpop.f32.mrb[180].mxu0  ;;  %v2678_v45 = vpack.c.bf16 %v2576_v42, %v2574_v41 }
 0x32d   : > { %v2337_v48 = vadd.f32 %v2336_v44, %v9086_v19  ;;  %v2338_v49 = vpop.f32.mrb[181].mxu0 }
 0x32e   : > { %v2339_v50 = vadd.f32 %v2338_v49, %v9090_v20  ;;  %v2340_v52 = vpop.f32.mrb[182].mxu0  ;;  %3075 = vmatprep.mubr.bf16.mxu1 %v2678_v45 }
 0x32f   : > { %v2341_v54 = vadd.f32 %v2340_v52, %v9086_v19  ;;  %v2342_v55 = vpop.f32.mrb[183].mxu0  ;;  %3076 = vmatmul.mubr.bf16.gmra.mrb[176].mxu1 %v2677_v43  ;;  %v2577_v57 = vmax.f32 %v2337_v48, 0.0 }
 0x330   : > { %v2343_v56 = vadd.f32 %v2342_v55, %v9090_v20  ;;  %v2578_v60 = vmax.f32 %v2339_v50, 0.0 }
 0x331   : > { %v2579_v58 = vmax.f32 %v2341_v54, 0.0 }
 0x332   : > { %v2580_v61 = vmax.f32 %v2343_v56, 0.0 }
 0x333   : > { %v2679_v62 = vpack.c.bf16 %v2579_v58, %v2577_v57 }
 0x334   : > { %v2346_v63 = vpop.f32.mrb[184].mxu0  ;;  %v2680_v1 = vpack.c.bf16 %v2580_v61, %v2578_v60 }
 0x335   : > { %v2347_v2 = vadd.f32 %v2346_v63, %v9086_v19  ;;  %v2348_v3 = vpop.f32.mrb[185].mxu0 }
 0x336   : > { %v2349_v4 = vadd.f32 %v2348_v3, %v9090_v20  ;;  %v2350_v6 = vpop.f32.mrb[186].mxu0  ;;  %3085 = vmatprep.mubr.bf16.mxu1 %v2680_v1 }
 0x337   : > { %v2351_v8 = vadd.f32 %v2350_v6, %v9086_v19  ;;  %v2352_v9 = vpop.f32.mrb[187].mxu0  ;;  %3086 = vmatmul.mubr.bf16.gmra.mrb[180].mxu1 %v2679_v62  ;;  %v2581_v11 = vmax.f32 %v2347_v2, 0.0 }
 0x338   : > { %v2353_v10 = vadd.f32 %v2352_v9, %v9090_v20  ;;  %v2582_v13 = vmax.f32 %v2349_v4, 0.0 }
 0x339   : > { %v2583_v12 = vmax.f32 %v2351_v8, 0.0 }
 0x33a   : > { %v2584_v14 = vmax.f32 %v2353_v10, 0.0 }
 0x33b   : > { %v2681_v15 = vpack.c.bf16 %v2583_v12, %v2581_v11 }
 0x33c   : > { %v2356_v16 = vpop.f32.mrb[188].mxu0  ;;  %v2682_v17 = vpack.c.bf16 %v2584_v14, %v2582_v13 }
 0x33d   : > { %v2357_v51 = vadd.f32 %v2356_v16, %v9086_v19  ;;  %v2358_v18 = vpop.f32.mrb[189].mxu0 }
 0x33e   : > { %v2359_v53 = vadd.f32 %v2358_v18, %v9090_v20  ;;  %v2360_v21 = vpop.f32.mrb[190].mxu0  ;;  %3095 = vmatprep.mubr.bf16.mxu1 %v2682_v17 }
 0x33f   : > { %v2361_v22 = vadd.f32 %v2360_v21, %v9086_v19  ;;  %v2362_v23 = vpop.f32.mrb[191].mxu0  ;;  %3096 = vmatmul.mubr.bf16.gmra.mrb[184].mxu1 %v2681_v15  ;;  %v2585_v25 = vmax.f32 %v2357_v51, 0.0 }
 0x340   : > { %v2363_v24 = vadd.f32 %v2362_v23, %v9090_v20  ;;  %v2586_v27 = vmax.f32 %v2359_v53, 0.0 }
 0x341   : > { %v2587_v26 = vmax.f32 %v2361_v22, 0.0 }
 0x342   : > { %v2588_v28 = vmax.f32 %v2363_v24, 0.0 }
 0x343   : > { %v2683_v29 = vpack.c.bf16 %v2587_v26, %v2585_v25 }
 0x344   : > { %v2366_v30 = vpop.f32.mrb[192].mxu0  ;;  %v2684_v5 = vpack.c.bf16 %v2588_v28, %v2586_v27 }
 0x345   : > { %v2367_v31 = vadd.f32 %v2366_v30, %v9086_v19  ;;  %v2368_v32 = vpop.f32.mrb[193].mxu0 }
 0x346   : > { %v2369_v7 = vadd.f32 %v2368_v32, %v9090_v20  ;;  %v2370_v33 = vpop.f32.mrb[194].mxu0  ;;  %3105 = vmatprep.mubr.bf16.mxu1 %v2684_v5 }
 0x347   : > { %v2371_v34 = vadd.f32 %v2370_v33, %v9086_v19  ;;  %v2372_v35 = vpop.f32.mrb[195].mxu0  ;;  %3106 = vmatmul.mubr.bf16.gmra.mrb[188].mxu1 %v2683_v29  ;;  %v2589_v37 = vmax.f32 %v2367_v31, 0.0 }
 0x348   : > { %v2373_v36 = vadd.f32 %v2372_v35, %v9090_v20  ;;  %v2590_v39 = vmax.f32 %v2369_v7, 0.0 }
 0x349   : > { %v2591_v38 = vmax.f32 %v2371_v34, 0.0 }
 0x34a   : > { %v2592_v40 = vmax.f32 %v2373_v36, 0.0 }
 0x34b   : > { %v2685_v41 = vpack.c.bf16 %v2591_v38, %v2589_v37 }
 0x34c   : > { %v2376_v42 = vpop.f32.mrb[196].mxu0  ;;  %v2686_v43 = vpack.c.bf16 %v2592_v40, %v2590_v39 }
 0x34d   : > { %v2377_v44 = vadd.f32 %v2376_v42, %v9086_v19  ;;  %v2378_v45 = vpop.f32.mrb[197].mxu0 }
 0x34e   : > { %v2379_v48 = vadd.f32 %v2378_v45, %v9090_v20  ;;  %v2380_v49 = vpop.f32.mrb[198].mxu0  ;;  %3115 = vmatprep.mubr.bf16.mxu1 %v2686_v43 }
 0x34f   : > { %v2381_v50 = vadd.f32 %v2380_v49, %v9086_v19  ;;  %v2382_v52 = vpop.f32.mrb[199].mxu0  ;;  %3116 = vmatmul.mubr.bf16.gmra.mrb[192].mxu1 %v2685_v41  ;;  %v2593_v55 = vmax.f32 %v2377_v44, 0.0 }
 0x350   : > { %v2383_v54 = vadd.f32 %v2382_v52, %v9090_v20  ;;  %v2594_v57 = vmax.f32 %v2379_v48, 0.0 }
 0x351   : > { %v2595_v56 = vmax.f32 %v2381_v50, 0.0 }
 0x352   : > { %v2596_v58 = vmax.f32 %v2383_v54, 0.0 }
 0x353   : > { %v2687_v59 = vpack.c.bf16 %v2595_v56, %v2593_v55 }
 0x354   : > { %v2386_v60 = vpop.f32.mrb[200].mxu0  ;;  %v2688_v61 = vpack.c.bf16 %v2596_v58, %v2594_v57 }
 0x355   : > { %v2387_v62 = vadd.f32 %v2386_v60, %v9086_v19  ;;  %v2388_v63 = vpop.f32.mrb[201].mxu0 }
 0x356   : > { %v2389_v1 = vadd.f32 %v2388_v63, %v9090_v20  ;;  %v2390_v2 = vpop.f32.mrb[202].mxu0  ;;  %3125 = vmatprep.mubr.bf16.mxu1 %v2688_v61 }
 0x357   : > { %v2391_v3 = vadd.f32 %v2390_v2, %v9086_v19  ;;  %v2392_v4 = vpop.f32.mrb[203].mxu0  ;;  %3126 = vmatmul.mubr.bf16.gmra.mrb[196].mxu1 %v2687_v59  ;;  %v2597_v8 = vmax.f32 %v2387_v62, 0.0 }
 0x358   : > { %v2393_v6 = vadd.f32 %v2392_v4, %v9090_v20  ;;  %v2598_v10 = vmax.f32 %v2389_v1, 0.0 }
 0x359   : > { %v2599_v9 = vmax.f32 %v2391_v3, 0.0 }
 0x35a   : > { %v2600_v11 = vmax.f32 %v2393_v6, 0.0 }
 0x35b   : > { %v2689_v12 = vpack.c.bf16 %v2599_v9, %v2597_v8 }
 0x35c   : > { %v2396_v13 = vpop.f32.mrb[204].mxu0  ;;  %v2690_v14 = vpack.c.bf16 %v2600_v11, %v2598_v10 }
 0x35d   : > { %v2397_v15 = vadd.f32 %v2396_v13, %v9086_v19  ;;  %v2398_v16 = vpop.f32.mrb[205].mxu0 }
 0x35e   : > { %v2399_v17 = vadd.f32 %v2398_v16, %v9090_v20  ;;  %v2400_v51 = vpop.f32.mrb[206].mxu0  ;;  %3135 = vmatprep.mubr.bf16.mxu1 %v2690_v14 }
 0x35f   : > { %v2401_v18 = vadd.f32 %v2400_v51, %v9086_v19  ;;  %v2402_v53 = vpop.f32.mrb[207].mxu0  ;;  %3136 = vmatmul.mubr.bf16.gmra.mrb[200].mxu1 %v2689_v12  ;;  %v2601_v22 = vmax.f32 %v2397_v15, 0.0 }
 0x360   : > { %v2403_v21 = vadd.f32 %v2402_v53, %v9090_v20  ;;  %v2602_v24 = vmax.f32 %v2399_v17, 0.0 }
 0x361   : > { %v2603_v23 = vmax.f32 %v2401_v18, 0.0 }
 0x362   : > { %v2604_v25 = vmax.f32 %v2403_v21, 0.0 }
 0x363   : > { %v2691_v26 = vpack.c.bf16 %v2603_v23, %v2601_v22 }
 0x364   : > { %v2406_v27 = vpop.f32.mrb[208].mxu0  ;;  %v2692_v28 = vpack.c.bf16 %v2604_v25, %v2602_v24 }
 0x365   : > { %v2407_v29 = vadd.f32 %v2406_v27, %v9086_v19  ;;  %v2408_v30 = vpop.f32.mrb[209].mxu0 }
 0x366   : > { %v2409_v5 = vadd.f32 %v2408_v30, %v9090_v20  ;;  %v2410_v31 = vpop.f32.mrb[210].mxu0  ;;  %3145 = vmatprep.mubr.bf16.mxu1 %v2692_v28 }
 0x367   : > { %v2411_v32 = vadd.f32 %v2410_v31, %v9086_v19  ;;  %v2412_v7 = vpop.f32.mrb[211].mxu0  ;;  %3146 = vmatmul.mubr.bf16.gmra.mrb[204].mxu1 %v2691_v26  ;;  %v2605_v34 = vmax.f32 %v2407_v29, 0.0 }
 0x368   : > { %v2413_v33 = vadd.f32 %v2412_v7, %v9090_v20  ;;  %v2606_v36 = vmax.f32 %v2409_v5, 0.0 }
 0x369   : > { %v2607_v35 = vmax.f32 %v2411_v32, 0.0 }
 0x36a   : > { %v2608_v37 = vmax.f32 %v2413_v33, 0.0 }
 0x36b   : > { %v2693_v38 = vpack.c.bf16 %v2607_v35, %v2605_v34 }
 0x36c   : > { %v2416_v39 = vpop.f32.mrb[212].mxu0  ;;  %v2694_v40 = vpack.c.bf16 %v2608_v37, %v2606_v36 }
 0x36d   : > { %v2417_v41 = vadd.f32 %v2416_v39, %v9086_v19  ;;  %v2418_v42 = vpop.f32.mrb[213].mxu0 }
 0x36e   : > { %v2419_v43 = vadd.f32 %v2418_v42, %v9090_v20  ;;  %v2420_v44 = vpop.f32.mrb[214].mxu0  ;;  %3155 = vmatprep.mubr.bf16.mxu1 %v2694_v40 }
 0x36f   : > { %v2421_v45 = vadd.f32 %v2420_v44, %v9086_v19  ;;  %v2422_v48 = vpop.f32.mrb[215].mxu0  ;;  %3156 = vmatmul.mubr.bf16.gmra.mrb[208].mxu1 %v2693_v38  ;;  %v2609_v50 = vmax.f32 %v2417_v41, 0.0 }
 0x370   : > { %v2423_v49 = vadd.f32 %v2422_v48, %v9090_v20  ;;  %v2610_v54 = vmax.f32 %v2419_v43, 0.0 }
 0x371   : > { %v2611_v52 = vmax.f32 %v2421_v45, 0.0 }
 0x372   : > { %v2612_v55 = vmax.f32 %v2423_v49, 0.0 }
 0x373   : > { %v2695_v56 = vpack.c.bf16 %v2611_v52, %v2609_v50 }
 0x374   : > { %v2426_v57 = vpop.f32.mrb[216].mxu0  ;;  %v2696_v58 = vpack.c.bf16 %v2612_v55, %v2610_v54 }
 0x375   : > { %v2427_v59 = vadd.f32 %v2426_v57, %v9086_v19  ;;  %v2428_v60 = vpop.f32.mrb[217].mxu0 }
 0x376   : > { %v2429_v61 = vadd.f32 %v2428_v60, %v9090_v20  ;;  %v2430_v62 = vpop.f32.mrb[218].mxu0  ;;  %3165 = vmatprep.mubr.bf16.mxu1 %v2696_v58 }
 0x377   : > { %v2431_v63 = vadd.f32 %v2430_v62, %v9086_v19  ;;  %v2432_v1 = vpop.f32.mrb[219].mxu0  ;;  %3166 = vmatmul.mubr.bf16.gmra.mrb[212].mxu1 %v2695_v56  ;;  %v2613_v3 = vmax.f32 %v2427_v59, 0.0 }
 0x378   : > { %v2433_v2 = vadd.f32 %v2432_v1, %v9090_v20  ;;  %v2614_v6 = vmax.f32 %v2429_v61, 0.0 }
 0x379   : > { %v2615_v4 = vmax.f32 %v2431_v63, 0.0 }
 0x37a   : > { %v2616_v8 = vmax.f32 %v2433_v2, 0.0 }
 0x37b   : > { %v2697_v9 = vpack.c.bf16 %v2615_v4, %v2613_v3 }
 0x37c   : > { %v2436_v10 = vpop.f32.mrb[220].mxu0  ;;  %v2698_v11 = vpack.c.bf16 %v2616_v8, %v2614_v6 }
 0x37d   : > { %v2437_v12 = vadd.f32 %v2436_v10, %v9086_v19  ;;  %v2438_v13 = vpop.f32.mrb[221].mxu0 }
 0x37e   : > { %v2439_v14 = vadd.f32 %v2438_v13, %v9090_v20  ;;  %v2440_v15 = vpop.f32.mrb[222].mxu0  ;;  %3175 = vmatprep.mubr.bf16.mxu1 %v2698_v11 }
 0x37f   : > { %v2441_v16 = vadd.f32 %v2440_v15, %v9086_v19  ;;  %v2442_v17 = vpop.f32.mrb[223].mxu0  ;;  %3176 = vmatmul.mubr.bf16.gmra.mrb[216].mxu1 %v2697_v9  ;;  %v2617_v18 = vmax.f32 %v2437_v12, 0.0  ;;  %v7756_v9 = vld [vmem:[%s11043_s4 + $0x6] sm:$0x3] }
 0x380   : > { %v2443_v51 = vadd.f32 %v2442_v17, %v9090_v20  ;;  %v2618_v21 = vmax.f32 %v2439_v14, 0.0 }
 0x381   : > { %v2619_v53 = vmax.f32 %v2441_v16, 0.0  ;;  %v9228_v16 = vrot.slane %v7756_v9, %v8790_v46 }
 0x382   : > { %v2620_v22 = vmax.f32 %v2443_v51, 0.0  ;;  %v9232_v51 = vrot.slane %v7756_v9, %v8792_v47  ;;  %v8258_v9 = vld [vmem:[#allocation2 + $0x410] ss:$8 sps:$4 sm:$0xff]  }
 0x383   : > { %v2699_v23 = vpack.c.bf16 %v2619_v53, %v2617_v18 }
 0x384   : > { %v2446_v24 = vpop.f32.mrb[224].mxu0  ;;  %v2700_v25 = vpack.c.bf16 %v2620_v22, %v2618_v21 }
 0x385   : > { %v2447_v26 = vadd.f32 %v2446_v24, %v9086_v19  ;;  %v2448_v27 = vpop.f32.mrb[225].mxu0 }
 0x386   : > { %v2449_v28 = vadd.f32 %v2448_v27, %v9090_v20  ;;  %v2450_v29 = vpop.f32.mrb[226].mxu0  ;;  %3185 = vmatprep.mubr.bf16.mxu1 %v2700_v25 }
 0x387   : > { %v2451_v30 = vadd.f32 %v2450_v29, %v9086_v19  ;;  %v2452_v5 = vpop.f32.mrb[227].mxu0  ;;  %3186 = vmatmul.mubr.bf16.gmra.mrb[220].mxu1 %v2699_v23  ;;  %v2621_v32 = vmax.f32 %v2447_v26, 0.0 }
 0x388   : > { %v2453_v31 = vadd.f32 %v2452_v5, %v9090_v20  ;;  %v2622_v33 = vmax.f32 %v2449_v28, 0.0 }
 0x389   : > { %v2623_v7 = vmax.f32 %v2451_v30, 0.0 }
 0x38a   : > { %v2624_v34 = vmax.f32 %v2453_v31, 0.0 }
 0x38b   : > { %v2701_v35 = vpack.c.bf16 %v2623_v7, %v2621_v32 }
 0x38c   : > { %v2456_v36 = vpop.f32.mrb[228].mxu0  ;;  %v2702_v37 = vpack.c.bf16 %v2624_v34, %v2622_v33 }
 0x38d   : > { %v2457_v38 = vadd.f32 %v2456_v36, %v9086_v19  ;;  %v2458_v39 = vpop.f32.mrb[229].mxu0 }
 0x38e   : > { %v2459_v40 = vadd.f32 %v2458_v39, %v9090_v20  ;;  %v2460_v41 = vpop.f32.mrb[230].mxu0  ;;  %3195 = vmatprep.mubr.bf16.mxu1 %v2702_v37 }
 0x38f   : > { %v2461_v42 = vadd.f32 %v2460_v41, %v9086_v19  ;;  %v2462_v43 = vpop.f32.mrb[231].mxu0  ;;  %3196 = vmatmul.mubr.bf16.gmra.mrb[224].mxu1 %v2701_v35  ;;  %v2625_v45 = vmax.f32 %v2457_v38, 0.0 }
 0x390   : > { %v2463_v44 = vadd.f32 %v2462_v43, %v9090_v20  ;;  %v2626_v49 = vmax.f32 %v2459_v40, 0.0 }
 0x391   : > { %v2627_v48 = vmax.f32 %v2461_v42, 0.0 }
 0x392   : > { %v2628_v50 = vmax.f32 %v2463_v44, 0.0 }
 0x393   : > { %v2703_v52 = vpack.c.bf16 %v2627_v48, %v2625_v45 }
 0x394   : > { %v2466_v54 = vpop.f32.mrb[232].mxu0  ;;  %v2704_v55 = vpack.c.bf16 %v2628_v50, %v2626_v49 }
 0x395   : > { %v2467_v56 = vadd.f32 %v2466_v54, %v9086_v19  ;;  %v2468_v57 = vpop.f32.mrb[233].mxu0  ;;  %v8255_v54 = vld [vmem:[#allocation2 + $0x400] ss:$8 sps:$4 sm:$0xff]  }
 0x396   : > { %v2469_v58 = vadd.f32 %v2468_v57, %v9090_v20  ;;  %v2470_v59 = vpop.f32.mrb[234].mxu0  ;;  %3205 = vmatprep.mubr.bf16.mxu1 %v2704_v55 }
 0x397   : > { %v2471_v60 = vadd.f32 %v2470_v59, %v9086_v19  ;;  %v2472_v61 = vpop.f32.mrb[235].mxu0  ;;  %3206 = vmatmul.mubr.bf16.gmra.mrb[228].mxu1 %v2703_v52  ;;  %v2629_v63 = vmax.f32 %v2467_v56, 0.0 }
 0x398   : > { %v2473_v62 = vadd.f32 %v2472_v61, %v9090_v20  ;;  %v2630_v2 = vmax.f32 %v2469_v58, 0.0  ;;  %v8260_v58 = vld [vmem:[#allocation2 + $0x414] ss:$8 sps:$4 sm:$0xff]  }
 0x399   : > { %v2631_v1 = vmax.f32 %v2471_v60, 0.0 }
 0x39a   : > { %v2632_v3 = vmax.f32 %v2473_v62, 0.0 }
 0x39b   : > { %v2705_v4 = vpack.c.bf16 %v2631_v1, %v2629_v63 }
 0x39c   : > { %v2476_v6 = vpop.f32.mrb[236].mxu0  ;;  %v2706_v8 = vpack.c.bf16 %v2632_v3, %v2630_v2 }
 0x39d   : > { %v2477_v10 = vadd.f32 %v2476_v6, %v9086_v19  ;;  %v2478_v11 = vpop.f32.mrb[237].mxu0 }
 0x39e   : > { %v2479_v12 = vadd.f32 %v2478_v11, %v9090_v20  ;;  %v2480_v13 = vpop.f32.mrb[238].mxu0  ;;  %3215 = vmatprep.mubr.bf16.mxu1 %v2706_v8 }
 0x39f   : > { %v2481_v14 = vadd.f32 %v2480_v13, %v9086_v19  ;;  %v2482_v15 = vpop.f32.mrb[239].mxu0  ;;  %3216 = vmatmul.mubr.bf16.gmra.mrb[232].mxu1 %v2705_v4  ;;  %v2633_v18 = vmax.f32 %v2477_v10, 0.0 }
 0x3a0   : > { %v2483_v17 = vadd.f32 %v2482_v15, %v9090_v20  ;;  %v2634_v21 = vmax.f32 %v2479_v12, 0.0 }
 0x3a1   : > { %v2635_v53 = vmax.f32 %v2481_v14, 0.0  ;;  %v8263_v14 = vld [vmem:[#allocation2 + $0x424] ss:$8 sps:$4 sm:$0xff]  }
 0x3a2   : > { %v2636_v22 = vmax.f32 %v2483_v17, 0.0  ;;  %v2957_v23 = vpop.f32.mrb[128].mxu1 }
 0x3a3   : > { %v2958_v24 = vadd.f32 %v2957_v23, %v9228_v16  ;;  %v2959_v25 = vpop.f32.mrb[129].mxu1  ;;  %v2707_v26 = vpack.c.bf16 %v2635_v53, %v2633_v18 }
 0x3a4   : > { %v2960_v27 = vadd.f32 %v2959_v25, %v9232_v51  ;;  %v2486_v28 = vpop.f32.mrb[240].mxu0  ;;  %v2961_v29 = vpop.f32.mrb[130].mxu1  ;;  %v2708_v30 = vpack.c.bf16 %v2636_v22, %v2634_v21 }
 0x3a5   : > { %v2487_v5 = vadd.f32 %v2486_v28, %v9086_v19  ;;  %v2962_v31 = vadd.f32 %v2961_v29, %v9228_v16  ;;  %v2488_v32 = vpop.f32.mrb[241].mxu0  ;;  %v2963_v7 = vpop.f32.mrb[131].mxu1  ;;  %v3276_v36 = vmax.f32 %v2958_v24, 0.0 }
 0x3a6   : > { %v2489_v33 = vadd.f32 %v2488_v32, %v9090_v20  ;;  %v2964_v34 = vadd.f32 %v2963_v7, %v9232_v51  ;;  %v2490_v35 = vpop.f32.mrb[242].mxu0  ;;  %3225 = vmatprep.mubr.bf16.mxu1 %v2708_v30  ;;  %v3277_v40 = vmax.f32 %v2960_v27, 0.0  ;;  %v8261_v27 = vld [vmem:[#allocation2 + $0x420] ss:$8 sps:$4 sm:$0xff]  }
 0x3a7   : > { %v3278_v37 = vmax.f32 %v2962_v31, 0.0  ;;  %v2491_v38 = vadd.f32 %v2490_v35, %v9086_v19  ;;  %v2492_v39 = vpop.f32.mrb[243].mxu0  ;;  %3226 = vmatmul.mubr.bf16.gmra.mrb[236].mxu1 %v2707_v26  ;;  %v2637_v43 = vmax.f32 %v2487_v5, 0.0  ;;  %v8266_v5 = vld [vmem:[#allocation2 + $0x434] ss:$8 sps:$4 sm:$0xff]  }
 0x3a8   : > { %v3279_v41 = vmax.f32 %v2964_v34, 0.0  ;;  %v2493_v42 = vadd.f32 %v2492_v39, %v9090_v20  ;;  %v2638_v48 = vmax.f32 %v2489_v33, 0.0 }
 0x3a9   : > { %v3404_v44 = vpack.c.bf16 %v3278_v37, %v3276_v36  ;;  %v2639_v45 = vmax.f32 %v2491_v38, 0.0 }
 0x3aa   : > { %v2640_v49 = vmax.f32 %v2493_v42, 0.0  ;;  %v2967_v50 = vpop.f32.mrb[132].mxu1  ;;  %v3405_v52 = vpack.c.bf16 %v3279_v41, %v3277_v40  ;;  %v8264_v41 = vld [vmem:[#allocation2 + $0x430] ss:$8 sps:$4 sm:$0xff]  }
 0x3ab   : > { %v2968_v55 = vadd.f32 %v2967_v50, %v9228_v16  ;;  %v2969_v56 = vpop.f32.mrb[133].mxu1  ;;  %v2709_v57 = vpack.c.bf16 %v2639_v45, %v2637_v43 }
 0x3ac   : > { %v2970_v59 = vadd.f32 %v2969_v56, %v9232_v51  ;;  %v2496_v60 = vpop.f32.mrb[244].mxu0  ;;  %v2971_v61 = vpop.f32.mrb[134].mxu1  ;;  %3706 = vmatprep.mubr.bf16.mxu0 %v3405_v52  ;;  %v2710_v62 = vpack.c.bf16 %v2640_v49, %v2638_v48  ;;  %v8269_v48 = vld [vmem:[#allocation2 + $0x444] ss:$8 sps:$4 sm:$0xff]  }
 0x3ad   : > { %v2497_v63 = vadd.f32 %v2496_v60, %v9086_v19  ;;  %v2972_v1 = vadd.f32 %v2971_v61, %v9228_v16  ;;  %v2498_v2 = vpop.f32.mrb[245].mxu0  ;;  %v2973_v3 = vpop.f32.mrb[135].mxu1  ;;  %3707 = vmatmul.mubr.bf16.vlgmr.msra.gmra.mrb[0].mxu0 %v3404_v44  ;;  %v3280_v10 = vmax.f32 %v2968_v55, 0.0  ;;  %v8267_v61 = vld [vmem:[#allocation2 + $0x440] ss:$8 sps:$4 sm:$0xff]  }
 0x3ae   : > { %v2499_v4 = vadd.f32 %v2498_v2, %v9090_v20  ;;  %v2974_v6 = vadd.f32 %v2973_v3, %v9232_v51  ;;  %4869 = vmatpush1.bf16.msra.mxu0 %v8255_v54  ;;  %v2500_v8 = vpop.f32.mrb[246].mxu0  ;;  %3235 = vmatprep.mubr.bf16.mxu1 %v2710_v62  ;;  %v3281_v15 = vmax.f32 %v2970_v59, 0.0  ;;  %v8272_v2 = vld [vmem:[#allocation2 + $0x454] ss:$8 sps:$4 sm:$0xff]  }
 0x3af   : > { %v3282_v11 = vmax.f32 %v2972_v1, 0.0  ;;  %v2501_v12 = vadd.f32 %v2500_v8, %v9086_v19  ;;  %v2502_v13 = vpop.f32.mrb[247].mxu0  ;;  %3236 = vmatmul.mubr.bf16.gmra.mrb[240].mxu1 %v2709_v57  ;;  %4870 = vmatprep.subr.bf16.mxu0 %v8260_v58  ;;  %v2641_v53 = vmax.f32 %v2497_v63, 0.0 }
 0x3b0   : > { %v3283_v17 = vmax.f32 %v2974_v6, 0.0  ;;  %v2503_v18 = vadd.f32 %v2502_v13, %v9090_v20  ;;  %v2642_v23 = vmax.f32 %v2499_v4, 0.0 }
 0x3b1   : > { %v3406_v21 = vpack.c.bf16 %v3282_v11, %v3280_v10  ;;  %v2643_v22 = vmax.f32 %v2501_v12, 0.0 }
 0x3b2   : > { %v2644_v24 = vmax.f32 %v2503_v18, 0.0  ;;  %v2977_v25 = vpop.f32.mrb[136].mxu1  ;;  %v3407_v26 = vpack.c.bf16 %v3283_v17, %v3281_v15  ;;  %4871 = vmatpush1.bf16.msra.mxu0 %v8258_v9  ;;  %v8270_v17 = vld [vmem:[#allocation2 + $0x450] ss:$8 sps:$4 sm:$0xff]  }
 0x3b3   : > { %v2978_v28 = vadd.f32 %v2977_v25, %v9228_v16  ;;  %v2979_v29 = vpop.f32.mrb[137].mxu1  ;;  %v2711_v30 = vpack.c.bf16 %v2643_v22, %v2641_v53  ;;  %4872 = vmatprep.subr.bf16.mxu0 %v8263_v14 }
 0x3b4   : > { %v2980_v31 = vadd.f32 %v2979_v29, %v9232_v51  ;;  %v2506_v32 = vpop.f32.mrb[248].mxu0  ;;  %v2981_v7 = vpop.f32.mrb[138].mxu1  ;;  %3716 = vmatprep.mubr.bf16.mxu0 %v3407_v26  ;;  %v2712_v33 = vpack.c.bf16 %v2644_v24, %v2642_v23  ;;  %v8275_v23 = vld [vmem:[#allocation2 + $0x464] ss:$8 sps:$4 sm:$0xff]  }
 0x3b5   : > { %v2507_v34 = vadd.f32 %v2506_v32, %v9086_v19  ;;  %v2982_v35 = vadd.f32 %v2981_v7, %v9228_v16  ;;  %v2508_v36 = vpop.f32.mrb[249].mxu0  ;;  %v2983_v37 = vpop.f32.mrb[139].mxu1  ;;  %3717 = vmatmul.mubr.bf16.gmra.mrb[4].mxu0 %v3406_v21  ;;  %v3284_v42 = vmax.f32 %v2978_v28, 0.0  ;;  %v8273_v7 = vld [vmem:[#allocation2 + $0x460] ss:$8 sps:$4 sm:$0xff]  }
 0x3b6   : > { %v2509_v38 = vadd.f32 %v2508_v36, %v9090_v20  ;;  %v2984_v39 = vadd.f32 %v2983_v37, %v9232_v51  ;;  %v2510_v40 = vpop.f32.mrb[250].mxu0  ;;  %3245 = vmatprep.mubr.bf16.mxu1 %v2712_v33  ;;  %4873 = vmatpush1.bf16.msra.mxu0 %v8261_v27  ;;  %v3285_v49 = vmax.f32 %v2980_v31, 0.0 }
 0x3b7   : > { %v3286_v43 = vmax.f32 %v2982_v35, 0.0  ;;  %v2511_v44 = vadd.f32 %v2510_v40, %v9086_v19  ;;  %v2512_v45 = vpop.f32.mrb[251].mxu0  ;;  %3246 = vmatmul.mubr.bf16.gmra.mrb[244].mxu1 %v2711_v30  ;;  %4874 = vmatprep.subr.bf16.mxu0 %v8266_v5  ;;  %v2645_v54 = vmax.f32 %v2507_v34, 0.0  ;;  %v8278_v35 = vld [vmem:[#allocation2 + $0x474] ss:$8 sps:$4 sm:$0xff]  }
 0x3b8   : > { %v3287_v50 = vmax.f32 %v2984_v39, 0.0  ;;  %v2513_v52 = vadd.f32 %v2512_v45, %v9090_v20  ;;  %v2646_v57 = vmax.f32 %v2509_v38, 0.0 }
 0x3b9   : > { %v3408_v55 = vpack.c.bf16 %v3286_v43, %v3284_v42  ;;  %v2647_v56 = vmax.f32 %v2511_v44, 0.0  ;;  %v8281_v44 = vld [vmem:[#allocation2 + $0x484] ss:$8 sps:$4 sm:$0xff]  }
 0x3ba   : > { %v2648_v58 = vmax.f32 %v2513_v52, 0.0  ;;  %v2987_v59 = vpop.f32.mrb[140].mxu1  ;;  %v3409_v60 = vpack.c.bf16 %v3287_v50, %v3285_v49  ;;  %4875 = vmatpush1.bf16.msra.mxu0 %v8264_v41  ;;  %v8276_v41 = vld [vmem:[#allocation2 + $0x470] ss:$8 sps:$4 sm:$0xff]  }
 0x3bb   : > { %v2988_v62 = vadd.f32 %v2987_v59, %v9228_v16  ;;  %v2989_v63 = vpop.f32.mrb[141].mxu1  ;;  %v2713_v1 = vpack.c.bf16 %v2647_v56, %v2645_v54  ;;  %4876 = vmatprep.subr.bf16.mxu0 %v8269_v48  ;;  %v8279_v54 = vld [vmem:[#allocation2 + $0x480] ss:$8 sps:$4 sm:$0xff]  }
 0x3bc   : > { %v2990_v3 = vadd.f32 %v2989_v63, %v9232_v51  ;;  %v2516_v4 = vpop.f32.mrb[252].mxu0  ;;  %v2991_v6 = vpop.f32.mrb[142].mxu1  ;;  %3726 = vmatprep.mubr.bf16.mxu0 %v3409_v60  ;;  %v2714_v8 = vpack.c.bf16 %v2648_v58, %v2646_v57  ;;  %v8284_v57 = vld [vmem:[#allocation2 + $0x494] ss:$8 sps:$4 sm:$0xff]   ;;  %v8282_v63 = vld [vmem:[#allocation2 + $0x490] ss:$8 sps:$4 sm:$0xff]  }
 0x3bd   : > { %v2517_v9 = vadd.f32 %v2516_v4, %v9086_v19  ;;  %v2992_v10 = vadd.f32 %v2991_v6, %v9228_v16  ;;  %v2518_v11 = vpop.f32.mrb[253].mxu0  ;;  %v2993_v12 = vpop.f32.mrb[143].mxu1  ;;  %3727 = vmatmul.mubr.bf16.gmra.mrb[8].mxu0 %v3408_v55  ;;  %v3288_v18 = vmax.f32 %v2988_v62, 0.0 }
 0x3be   : > { %v2519_v13 = vadd.f32 %v2518_v11, %v9090_v20  ;;  %v2994_v14 = vadd.f32 %v2993_v12, %v9232_v51  ;;  %v2520_v15 = vpop.f32.mrb[254].mxu0  ;;  %3255 = vmatprep.mubr.bf16.mxu1 %v2714_v8  ;;  %4877 = vmatpush1.bf16.msra.mxu0 %v8267_v61  ;;  %v3289_v24 = vmax.f32 %v2990_v3, 0.0  ;;  %v8415_v3 = vld [vmem:[%s8623_s26] sm:$0xff] }
 0x3bf   : > { %v3290_v53 = vmax.f32 %v2992_v10, 0.0  ;;  %v2521_v21 = vadd.f32 %v2520_v15, %v9086_v19  ;;  %v2522_v22 = vpop.f32.mrb[255].mxu0  ;;  %3256 = vmatmul.mubr.bf16.gmra.mrb[248].mxu1 %v2713_v1  ;;  %4878 = vmatprep.subr.bf16.mxu0 %v8272_v2  ;;  %v2649_v27 = vmax.f32 %v2517_v9, 0.0  ;;  %v8287_v9 = vld [vmem:[#allocation2 + $0x4a4] ss:$8 sps:$4 sm:$0xff]  }
 0x3c0   : > { %v3291_v25 = vmax.f32 %v2994_v14, 0.0  ;;  %v2523_v26 = vadd.f32 %v2522_v22, %v9090_v20  ;;  %v2650_v30 = vmax.f32 %v2519_v13, 0.0  ;;  %v8285_v12 = vld [vmem:[#allocation2 + $0x4a0] ss:$8 sps:$4 sm:$0xff]  }
 0x3c1   : > { %v3410_v28 = vpack.c.bf16 %v3290_v53, %v3288_v18  ;;  %v2651_v29 = vmax.f32 %v2521_v21, 0.0  ;;  %v8416_v15 = vld [vmem:[%s8623_s26 + $0x8] sm:$0xff] }
 0x3c2   : > { %v2652_v5 = vmax.f32 %v2523_v26, 0.0  ;;  %v2997_v31 = vpop.f32.mrb[144].mxu1  ;;  %v3411_v32 = vpack.c.bf16 %v3291_v25, %v3289_v24  ;;  %4879 = vmatpush1.bf16.msra.mxu0 %v8270_v17  ;;  %v8417_v25 = vld [vmem:[%s8623_s26 + $0x10] sm:$0xff] }
 0x3c3   : > { %v2998_v33 = vadd.f32 %v2997_v31, %v9228_v16  ;;  %v2999_v19 = vpop.f32.mrb[145].mxu1  ;;  %v2715_v34 = vpack.c.bf16 %v2651_v29, %v2649_v27  ;;  %4880 = vmatprep.subr.bf16.mxu0 %v8275_v23 }
 0x3c4   : > { %v3000_v36 = vadd.f32 %v2999_v19, %v9232_v51  ;;  %v3001_v37 = vpop.f32.mrb[146].mxu1  ;;  %3736 = vmatprep.mubr.bf16.mxu0 %v3411_v32  ;;  %v2716_v20 = vpack.c.bf16 %v2652_v5, %v2650_v30  ;;  %v8418_v32 = vld [vmem:[%s8623_s26 + $0x18] sm:$0xff] }
 0x3c5   : > { %v3002_v38 = vadd.f32 %v3001_v37, %v9228_v16  ;;  %v3003_v39 = vpop.f32.mrb[147].mxu1  ;;  %3737 = vmatmul.mubr.bf16.gmra.mrb[12].mxu0 %v3410_v28  ;;  %v3292_v42 = vmax.f32 %v2998_v33, 0.0 }
 0x3c6   : > { %v3004_v40 = vadd.f32 %v3003_v39, %v9232_v51  ;;  %3265 = vmatprep.mubr.bf16.mxu1 %v2716_v20  ;;  %4881 = vmatpush1.bf16.msra.mxu0 %v8273_v7  ;;  %v3293_v45 = vmax.f32 %v3000_v36, 0.0  ;;  %v8419_v20 = vld [vmem:[%s8623_s26 + $0x20] sm:$0xff] }
 0x3c7   : > { %v3294_v43 = vmax.f32 %v3002_v38, 0.0  ;;  %3266 = vmatmul.mubr.bf16.gmra.mrb[252].mxu1 %v2715_v34  ;;  %4882 = vmatprep.subr.bf16.mxu0 %v8278_v35 }
 0x3c8   : > { %v3295_v48 = vmax.f32 %v3004_v40, 0.0  ;;  %4323 = vmatprep.mubr.f32.mxu1 %v8522_v0 }
 0x3c9   : > { %v3412_v49 = vpack.c.bf16 %v3294_v43, %v3292_v42  ;;  %v8290_v42 = vld [vmem:[#allocation2 + $0x4b4] ss:$8 sps:$4 sm:$0xff]  }
 0x3ca   : > { %v3007_v50 = vpop.f32.mrb[148].mxu1  ;;  %v3413_v52 = vpack.c.bf16 %v3295_v48, %v3293_v45  ;;  %4883 = vmatpush1.bf16.msra.mxu0 %v8276_v41  ;;  %v8288_v41 = vld [vmem:[#allocation2 + $0x4b0] ss:$8 sps:$4 sm:$0xff]  }
 0x3cb   : > { %v3008_v55 = vadd.f32 %v3007_v50, %v9228_v16  ;;  %v3009_v56 = vpop.f32.mrb[149].mxu1  ;;  %4884 = vmatprep.subr.bf16.mxu0 %v8281_v44 }
 0x3cc   : > { %v3010_v58 = vadd.f32 %v3009_v56, %v9232_v51  ;;  %v3011_v59 = vpop.f32.mrb[150].mxu1  ;;  %3746 = vmatprep.mubr.bf16.mxu0 %v3413_v52 }
 0x3cd   : > { %v3012_v60 = vadd.f32 %v3011_v59, %v9228_v16  ;;  %v3013_v61 = vpop.f32.mrb[151].mxu1  ;;  %3747 = vmatmul.mubr.bf16.gmra.mrb[16].mxu0 %v3412_v49  ;;  %v3296_v1 = vmax.f32 %v3008_v55, 0.0  ;;  %v8420_v49 = vld [vmem:[%s8623_s26 + $0x28] sm:$0xff]  ;;  %v8421_v59 = vld [vmem:[%s8623_s26 + $0x30] sm:$0xff] }
 0x3ce   : > { %v3014_v62 = vadd.f32 %v3013_v61, %v9232_v51  ;;  %4885 = vmatpush1.bf16.msra.mxu0 %v8279_v54  ;;  %v3297_v4 = vmax.f32 %v3010_v58, 0.0 }
 0x3cf   : > { %v3298_v2 = vmax.f32 %v3012_v60, 0.0  ;;  %4886 = vmatprep.subr.bf16.mxu0 %v8284_v57  ;;  %7824 = vmatmul.mubr.msk.f32.vlgmr.msra.gmra.mrb[0].mxu1 %vm377_vm1, %v8415_v3 }
 0x3d0   : > { %v3299_v6 = vmax.f32 %v3014_v62, 0.0  ;;  %4329 = vmatprep.mubr.f32.mxu1 %v8522_v0 }
 0x3d1   : > { %v3414_v8 = vpack.c.bf16 %v3298_v2, %v3296_v1 }
 0x3d2   : > { %v3017_v10 = vpop.f32.mrb[152].mxu1  ;;  %v3415_v11 = vpack.c.bf16 %v3299_v6, %v3297_v4  ;;  %4887 = vmatpush1.bf16.msra.mxu0 %v8282_v63  ;;  %v8422_v4 = vld [vmem:[%s8623_s26 + $0x38] sm:$0xff] }
 0x3d3   : > { %v3018_v13 = vadd.f32 %v3017_v10, %v9228_v16  ;;  %v3019_v14 = vpop.f32.mrb[153].mxu1  ;;  %4888 = vmatprep.subr.bf16.mxu0 %v8287_v9  ;;  %7825 = vmatmul.mubr.msk.f32.gmra.mrb[2].mxu1 %vm377_vm1, %v8416_v15 }
 0x3d4   : > { %v3020_v17 = vadd.f32 %v3019_v14, %v9232_v51  ;;  %v3021_v18 = vpop.f32.mrb[154].mxu1  ;;  %3756 = vmatprep.mubr.bf16.mxu0 %v3415_v11  ;;  %4335 = vmatprep.mubr.f32.mxu1 %v8522_v0  ;;  %v8423_v14 = vld [vmem:[%s8623_s26 + $0x40] sm:$0xff] }
 0x3d5   : > { %v3022_v53 = vadd.f32 %v3021_v18, %v9228_v16  ;;  %v3023_v21 = vpop.f32.mrb[155].mxu1  ;;  %3757 = vmatmul.mubr.bf16.gmra.mrb[20].mxu0 %v3414_v8  ;;  %v3300_v23 = vmax.f32 %v3018_v13, 0.0 }
 0x3d6   : > { %v3024_v22 = vadd.f32 %v3023_v21, %v9232_v51  ;;  %4889 = vmatpush1.bf16.msra.mxu0 %v8285_v12  ;;  %v3301_v26 = vmax.f32 %v3020_v17, 0.0  ;;  %v8293_v21 = vld [vmem:[#allocation2 + $0x4c4] ss:$8 sps:$4 sm:$0xff]  }
 0x3d7   : > { %v3302_v24 = vmax.f32 %v3022_v53, 0.0  ;;  %7826 = vmatmul.mubr.msk.f32.gmra.mrb[4].mxu1 %vm377_vm1, %v8417_v25  ;;  %4890 = vmatprep.subr.bf16.mxu0 %v8290_v42  ;;  %v8291_v53 = vld [vmem:[#allocation2 + $0x4c0] ss:$8 sps:$4 sm:$0xff]  }
 0x3d8   : > { %v3303_v27 = vmax.f32 %v3024_v22, 0.0  ;;  %4341 = vmatprep.mubr.f32.mxu1 %v8522_v0 }
 0x3d9   : > { %v3416_v28 = vpack.c.bf16 %v3302_v24, %v3300_v23 }
 0x3da   : > { %v3027_v29 = vpop.f32.mrb[156].mxu1  ;;  %v3417_v30 = vpack.c.bf16 %v3303_v27, %v3301_v26  ;;  %4891 = vmatpush1.bf16.msra.mxu0 %v8288_v41  ;;  %v8424_v26 = vld [vmem:[%s8623_s26 + $0x48] sm:$0xff] }
 0x3db   : > { %v3028_v5 = vadd.f32 %v3027_v29, %v9228_v16  ;;  %v3029_v31 = vpop.f32.mrb[157].mxu1  ;;  %7827 = vmatmul.mubr.msk.f32.gmra.mrb[6].mxu1 %vm377_vm1, %v8418_v32  ;;  %4892 = vmatprep.subr.bf16.mxu0 %v8293_v21 }
 0x3dc   : > { %v3030_v7 = vadd.f32 %v3029_v31, %v9232_v51  ;;  %v3031_v33 = vpop.f32.mrb[158].mxu1  ;;  %3766 = vmatprep.mubr.bf16.mxu0 %v3417_v30  ;;  %4347 = vmatprep.mubr.f32.mxu1 %v8522_v0 }
 0x3dd   : > { %v3032_v19 = vadd.f32 %v3031_v33, %v9228_v16  ;;  %v3033_v34 = vpop.f32.mrb[159].mxu1  ;;  %3767 = vmatmul.mubr.bf16.gmra.mrb[24].mxu0 %v3416_v28  ;;  %v3304_v36 = vmax.f32 %v3028_v5, 0.0 }
 0x3de   : > { %v3034_v35 = vadd.f32 %v3033_v34, %v9232_v51  ;;  %v3305_v38 = vmax.f32 %v3030_v7, 0.0  ;;  %4893 = vmatpush1.bf16.msra.mxu0 %v8291_v53  ;;  %v8425_v7 = vld [vmem:[%s8623_s26 + $0x50] sm:$0xff] }
 0x3df   : > { %v3306_v37 = vmax.f32 %v3032_v19, 0.0  ;;  %7828 = vmatmul.mubr.msk.f32.gmra.mrb[8].mxu1 %vm377_vm1, %v8419_v20 }
 0x3e0   : > { %v3307_v39 = vmax.f32 %v3034_v35, 0.0  ;;  %4353 = vmatprep.mubr.f32.mxu1 %v8522_v0 }
 0x3e1   : > { %v3418_v40 = vpack.c.bf16 %v3306_v37, %v3304_v36 }
 0x3e2   : > { %v3037_v43 = vpop.f32.mrb[160].mxu1  ;;  %v3419_v44 = vpack.c.bf16 %v3307_v39, %v3305_v38  ;;  %v8426_v38 = vld [vmem:[%s8623_s26 + $0x58] sm:$0xff] }
 0x3e3   : > { %v3038_v45 = vadd.f32 %v3037_v43, %v9228_v16  ;;  %v3039_v48 = vpop.f32.mrb[161].mxu1  ;;  %7829 = vmatmul.mubr.msk.f32.gmra.mrb[10].mxu1 %vm377_vm1, %v8420_v49 }
 0x3e4   : > { %v3040_v50 = vadd.f32 %v3039_v48, %v9232_v51  ;;  %v3041_v52 = vpop.f32.mrb[162].mxu1  ;;  %3776 = vmatprep.mubr.bf16.mxu0 %v3419_v44  ;;  %4359 = vmatprep.mubr.f32.mxu1 %v8522_v0  ;;  %v8427_v48 = vld [vmem:[%s8623_s26 + $0x60] sm:$0xff] }
 0x3e5   : > { %v3042_v54 = vadd.f32 %v3041_v52, %v9228_v16  ;;  %v3043_v55 = vpop.f32.mrb[163].mxu1  ;;  %3777 = vmatmul.mubr.bf16.gmra.mrb[28].mxu0 %v3418_v40  ;;  %v3308_v57 = vmax.f32 %v3038_v45, 0.0 }
 0x3e6   : > { %v3044_v56 = vadd.f32 %v3043_v55, %v9232_v51  ;;  %v3309_v60 = vmax.f32 %v3040_v50, 0.0  ;;  %v8296_v55 = vld [vmem:[#allocation2 + $0x4d4] ss:$8 sps:$4 sm:$0xff]  }
 0x3e7   : > { %v3310_v58 = vmax.f32 %v3042_v54, 0.0  ;;  %7830 = vmatmul.mubr.msk.f32.gmra.mrb[12].mxu1 %vm377_vm1, %v8421_v59  ;;  %v8294_v54 = vld [vmem:[#allocation2 + $0x4d0] ss:$8 sps:$4 sm:$0xff]   ;;  %4894 = vmatprep.subr.bf16.mxu0 %v8296_v55 }
 0x3e8   : > { %v3311_v61 = vmax.f32 %v3044_v56, 0.0  ;;  %4365 = vmatprep.mubr.f32.mxu1 %v8522_v0  ;;  %4895 = vmatpush1.bf16.msra.mxu0 %v8294_v54 }
 0x3e9   : > { %v3420_v62 = vpack.c.bf16 %v3310_v58, %v3308_v57 }
 0x3ea   : > { %v3047_v63 = vpop.f32.mrb[164].mxu1  ;;  %v3421_v1 = vpack.c.bf16 %v3311_v61, %v3309_v60  ;;  %v8428_v60 = vld [vmem:[%s8623_s26 + $0x68] sm:$0xff] }
 0x3eb   : > { %v3048_v2 = vadd.f32 %v3047_v63, %v9228_v16  ;;  %v3049_v3 = vpop.f32.mrb[165].mxu1  ;;  %7831 = vmatmul.mubr.msk.f32.gmra.mrb[14].mxu1 %vm377_vm1, %v8422_v4 }
 0x3ec   : > { %v3050_v6 = vadd.f32 %v3049_v3, %v9232_v51  ;;  %v3051_v8 = vpop.f32.mrb[166].mxu1  ;;  %3786 = vmatprep.mubr.bf16.mxu0 %v3421_v1  ;;  %4371 = vmatprep.mubr.f32.mxu1 %v8522_v0 }
 0x3ed   : > { %v3052_v9 = vadd.f32 %v3051_v8, %v9228_v16  ;;  %v3053_v10 = vpop.f32.mrb[167].mxu1  ;;  %3787 = vmatmul.mubr.bf16.gmra.mrb[32].mxu0 %v3420_v62  ;;  %v3312_v12 = vmax.f32 %v3048_v2, 0.0 }
 0x3ee   : > { %v3054_v11 = vadd.f32 %v3053_v10, %v9232_v51  ;;  %v3313_v15 = vmax.f32 %v3050_v6, 0.0  ;;  %v8429_v6 = vld [vmem:[%s8623_s26 + $0x70] sm:$0xff] }
 0x3ef   : > { %v3314_v13 = vmax.f32 %v3052_v9, 0.0  ;;  %7832 = vmatmul.mubr.msk.f32.gmra.mrb[16].mxu1 %vm377_vm1, %v8423_v14 }
 0x3f0   : > { %v3315_v17 = vmax.f32 %v3054_v11, 0.0  ;;  %4377 = vmatprep.mubr.f32.mxu1 %v8522_v0 }
 0x3f1   : > { %v3422_v18 = vpack.c.bf16 %v3314_v13, %v3312_v12 }
 0x3f2   : > { %v3057_v22 = vpop.f32.mrb[168].mxu1  ;;  %v3423_v23 = vpack.c.bf16 %v3315_v17, %v3313_v15  ;;  %v8430_v15 = vld [vmem:[%s8623_s26 + $0x78] sm:$0xff] }
 0x3f3   : > { %v3058_v24 = vadd.f32 %v3057_v22, %v9228_v16  ;;  %v3059_v25 = vpop.f32.mrb[169].mxu1  ;;  %7833 = vmatmul.mubr.msk.f32.gmra.mrb[18].mxu1 %vm377_vm1, %v8424_v26 }
 0x3f4   : > { %v3060_v27 = vadd.f32 %v3059_v25, %v9232_v51  ;;  %v3061_v28 = vpop.f32.mrb[170].mxu1  ;;  %3796 = vmatprep.mubr.bf16.mxu0 %v3423_v23  ;;  %4383 = vmatprep.mubr.f32.mxu1 %v8522_v0  ;;  %v8431_v25 = vld [vmem:[%s8623_s26 + $0x80] sm:$0xff] }
 0x3f5   : > { %v3062_v29 = vadd.f32 %v3061_v28, %v9228_v16  ;;  %v3063_v30 = vpop.f32.mrb[171].mxu1  ;;  %3797 = vmatmul.mubr.bf16.gmra.mrb[36].mxu0 %v3422_v18  ;;  %v3316_v31 = vmax.f32 %v3058_v24, 0.0 }
 0x3f6   : > { %v3064_v5 = vadd.f32 %v3063_v30, %v9232_v51  ;;  %v3317_v33 = vmax.f32 %v3060_v27, 0.0  ;;  %v8300_v30 = vld [vmem:[#allocation2 + $0x500] ss:$8 sps:$4 sm:$0xff]  }
 0x3f7   : > { %v3318_v32 = vmax.f32 %v3062_v29, 0.0  ;;  %7834 = vmatmul.mubr.msk.f32.gmra.mrb[20].mxu1 %vm377_vm1, %v8425_v7  ;;  %v8299_v29 = vld [vmem:[#allocation2 + $0x4e4] ss:$8 sps:$4 sm:$0xff]  }
 0x3f8   : > { %v3319_v19 = vmax.f32 %v3064_v5, 0.0  ;;  %4389 = vmatprep.mubr.f32.mxu1 %v8522_v0  ;;  %v8302_v7 = vld [vmem:[#allocation2 + $0x504] ss:$8 sps:$4 sm:$0xff]   ;;  %4896 = vmatprep.subr.bf16.mxu0 %v8299_v29 }
 0x3f9   : > { %v3424_v34 = vpack.c.bf16 %v3318_v32, %v3316_v31  ;;  %v8297_v32 = vld [vmem:[#allocation2 + $0x4e0] ss:$8 sps:$4 sm:$0xff]   ;;  %5760 = vmatprep.subr.bf16.mxu1 %v8302_v7 }
 0x3fa   : > { %v3067_v35 = vpop.f32.mrb[172].mxu1  ;;  %v3425_v36 = vpack.c.bf16 %v3319_v19, %v3317_v33  ;;  %5761 = vmatpush1.bf16.msra.mxu1 %v8300_v30  ;;  %4897 = vmatpush1.bf16.msra.mxu0 %v8297_v32  ;;  %v8438_v30 = vld [vmem:[%s8623_s26 + $0xb8] sm:$0xff] }
 0x3fb   : > { %v3068_v37 = vadd.f32 %v3067_v35, %v9228_v16  ;;  %v3069_v20 = vpop.f32.mrb[173].mxu1  ;;  %7835 = vmatmul.mubr.msk.f32.gmra.mrb[22].mxu1 %vm377_vm1, %v8426_v38 }
 0x3fc   : > { %v3070_v39 = vadd.f32 %v3069_v20, %v9232_v51  ;;  %v3071_v40 = vpop.f32.mrb[174].mxu1  ;;  %3806 = vmatprep.mubr.bf16.mxu0 %v3425_v36  ;;  %4395 = vmatprep.mubr.f32.mxu1 %v8522_v0 }
 0x3fd   : > { %v3072_v41 = vadd.f32 %v3071_v40, %v9228_v16  ;;  %v3073_v42 = vpop.f32.mrb[175].mxu1  ;;  %3807 = vmatmul.mubr.bf16.gmra.mrb[40].mxu0 %v3424_v34  ;;  %v3320_v44 = vmax.f32 %v3068_v37, 0.0  ;;  %v8432_v34 = vld [vmem:[%s8623_s26 + $0x88] sm:$0xff] }
 0x3fe   : > { %v3074_v43 = vadd.f32 %v3073_v42, %v9232_v51  ;;  %v3321_v49 = vmax.f32 %v3070_v39, 0.0 }
 0x3ff   : > { %v3322_v45 = vmax.f32 %v3072_v41, 0.0  ;;  %7836 = vmatmul.mubr.msk.f32.gmra.mrb[24].mxu1 %vm377_vm1, %v8427_v48  ;;  %v8433_v41 = vld [vmem:[%s8623_s26 + $0x90] sm:$0xff] }
 0x400   : > { %v3323_v50 = vmax.f32 %v3074_v43, 0.0  ;;  %4401 = vmatprep.mubr.f32.mxu1 %v8522_v0 }
 0x401   : > { %v3426_v52 = vpack.c.bf16 %v3322_v45, %v3320_v44 }
 0x402   : > { %v3077_v56 = vpop.f32.mrb[176].mxu1  ;;  %v3427_v57 = vpack.c.bf16 %v3323_v50, %v3321_v49 }
 0x403   : > { %v3078_v58 = vadd.f32 %v3077_v56, %v9228_v16  ;;  %v3079_v59 = vpop.f32.mrb[177].mxu1  ;;  %7837 = vmatmul.mubr.msk.f32.gmra.mrb[26].mxu1 %vm377_vm1, %v8428_v60 }
 0x404   : > { %v3080_v61 = vadd.f32 %v3079_v59, %v9232_v51  ;;  %v3081_v62 = vpop.f32.mrb[178].mxu1  ;;  %3816 = vmatprep.mubr.bf16.mxu0 %v3427_v57  ;;  %4407 = vmatprep.mubr.f32.mxu1 %v8522_v0 }
 0x405   : > { %v3082_v63 = vadd.f32 %v3081_v62, %v9228_v16  ;;  %v3083_v1 = vpop.f32.mrb[179].mxu1  ;;  %3817 = vmatmul.mubr.bf16.gmra.mrb[44].mxu0 %v3426_v52  ;;  %v3324_v3 = vmax.f32 %v3078_v58, 0.0  ;;  %v8434_v52 = vld [vmem:[%s8623_s26 + $0x98] sm:$0xff] }
 0x406   : > { %v3084_v2 = vadd.f32 %v3083_v1, %v9232_v51  ;;  %v3325_v8 = vmax.f32 %v3080_v61, 0.0  ;;  %v8435_v61 = vld [vmem:[%s8623_s26 + $0xa0] sm:$0xff] }
 0x407   : > { %v3326_v4 = vmax.f32 %v3082_v63, 0.0  ;;  %7838 = vmatmul.mubr.msk.f32.gmra.mrb[28].mxu1 %vm377_vm1, %v8429_v6 }
 0x408   : > { %v3327_v9 = vmax.f32 %v3084_v2, 0.0  ;;  %4413 = vmatprep.mubr.f32.mxu1 %v8522_v0  ;;  %v8305_v2 = vld [vmem:[#allocation2 + $0x4f4] ss:$8 sps:$4 sm:$0xff]  }
 0x409   : > { %v3428_v10 = vpack.c.bf16 %v3326_v4, %v3324_v3  ;;  %v8306_v3 = vld [vmem:[#allocation2 + $0x510] ss:$8 sps:$4 sm:$0xff]   ;;  %4898 = vmatprep.subr.bf16.mxu0 %v8305_v2 }
 0x40a   : > { %v3087_v11 = vpop.f32.mrb[180].mxu1  ;;  %v3429_v12 = vpack.c.bf16 %v3327_v9, %v3325_v8  ;;  %v8303_v8 = vld [vmem:[#allocation2 + $0x4f0] ss:$8 sps:$4 sm:$0xff]   ;;  %v8308_v9 = vld [vmem:[#allocation2 + $0x514] ss:$8 sps:$4 sm:$0xff]  }
 0x40b   : > { %v3088_v13 = vadd.f32 %v3087_v11, %v9228_v16  ;;  %v3089_v14 = vpop.f32.mrb[181].mxu1  ;;  %7839 = vmatmul.mubr.msk.f32.gmra.mrb[30].mxu1 %vm377_vm1, %v8430_v15  ;;  %5762 = vmatprep.subr.bf16.mxu1 %v8308_v9 }
 0x40c   : > { %v3090_v17 = vadd.f32 %v3089_v14, %v9232_v51  ;;  %v3091_v18 = vpop.f32.mrb[182].mxu1  ;;  %3826 = vmatprep.mubr.bf16.mxu0 %v3429_v12  ;;  %4419 = vmatprep.mubr.f32.mxu1 %v8522_v0  ;;  %v8436_v12 = vld [vmem:[%s8623_s26 + $0xa8] sm:$0xff] }
 0x40d   : > { %v3092_v53 = vadd.f32 %v3091_v18, %v9228_v16  ;;  %v3093_v21 = vpop.f32.mrb[183].mxu1  ;;  %3827 = vmatmul.mubr.bf16.gmra.mrb[48].mxu0 %v3428_v10  ;;  %v3328_v23 = vmax.f32 %v3088_v13, 0.0  ;;  %5763 = vmatpush1.bf16.msra.mxu1 %v8306_v3 }
 0x40e   : > { %v3094_v22 = vadd.f32 %v3093_v21, %v9232_v51  ;;  %v3329_v26 = vmax.f32 %v3090_v17, 0.0  ;;  %4899 = vmatpush1.bf16.msra.mxu0 %v8303_v8 }
 0x40f   : > { %v3330_v24 = vmax.f32 %v3092_v53, 0.0  ;;  %7840 = vmatmul.mubr.msk.f32.gmra.mrb[32].mxu1 %vm377_vm1, %v8431_v25 }
 0x410   : > { %v3331_v27 = vmax.f32 %v3094_v22, 0.0  ;;  %4425 = vmatprep.mubr.f32.mxu1 %v8522_v0  ;;  %v8437_v22 = vld [vmem:[%s8623_s26 + $0xb0] sm:$0xff] }
 0x411   : > { %v3430_v28 = vpack.c.bf16 %v3330_v24, %v3328_v23 }
 0x412   : > { %v3097_v5 = vpop.f32.mrb[184].mxu1  ;;  %v3431_v31 = vpack.c.bf16 %v3331_v27, %v3329_v26 }
 0x413   : > { %v3098_v33 = vadd.f32 %v3097_v5, %v9228_v16  ;;  %v3099_v19 = vpop.f32.mrb[185].mxu1  ;;  %7841 = vmatmul.mubr.msk.f32.gmra.mrb[34].mxu1 %vm377_vm1, %v8432_v34 }
 0x414   : > { %v3100_v35 = vadd.f32 %v3099_v19, %v9232_v51  ;;  %v3101_v36 = vpop.f32.mrb[186].mxu1  ;;  %3836 = vmatprep.mubr.bf16.mxu0 %v3431_v31  ;;  %4431 = vmatprep.mubr.f32.mxu1 %v8522_v0 }
 0x415   : > { %v3102_v37 = vadd.f32 %v3101_v36, %v9228_v16  ;;  %v3103_v20 = vpop.f32.mrb[187].mxu1  ;;  %3837 = vmatmul.mubr.bf16.gmra.mrb[52].mxu0 %v3430_v28  ;;  %v3332_v39 = vmax.f32 %v3098_v33, 0.0  ;;  %v8311_v36 = vld [vmem:[#allocation2 + $0x524] ss:$8 sps:$4 sm:$0xff]  }
 0x416   : > { %v3104_v38 = vadd.f32 %v3103_v20, %v9232_v51  ;;  %v3333_v42 = vmax.f32 %v3100_v35, 0.0  ;;  %v8309_v35 = vld [vmem:[#allocation2 + $0x520] ss:$8 sps:$4 sm:$0xff]   ;;  %5764 = vmatprep.subr.bf16.mxu1 %v8311_v36  ;;  %v8446_v36 = vld [vmem:[%s8623_s26 + $0xf8] sm:$0xff] }
 0x417   : > { %v3334_v40 = vmax.f32 %v3102_v37, 0.0  ;;  %7842 = vmatmul.mubr.msk.f32.gmra.mrb[36].mxu1 %vm377_vm1, %v8433_v41  ;;  %v8439_v37 = vld [vmem:[%s8623_s26 + $0xc0] sm:$0xff] }
 0x418   : > { %v3335_v43 = vmax.f32 %v3104_v38, 0.0  ;;  %4437 = vmatprep.mubr.f32.mxu1 %v8522_v0  ;;  %5765 = vmatpush1.bf16.msra.mxu1 %v8309_v35 }
 0x419   : > { %v3432_v44 = vpack.c.bf16 %v3334_v40, %v3332_v39 }
 0x41a   : > { %v3107_v45 = vpop.f32.mrb[188].mxu1  ;;  %v3433_v48 = vpack.c.bf16 %v3335_v43, %v3333_v42 }
 0x41b   : > { %v3108_v49 = vadd.f32 %v3107_v45, %v9228_v16  ;;  %v3109_v50 = vpop.f32.mrb[189].mxu1  ;;  %7843 = vmatmul.mubr.msk.f32.gmra.mrb[38].mxu1 %vm377_vm1, %v8434_v52 }
 0x41c   : > { %v3110_v54 = vadd.f32 %v3109_v50, %v9232_v51  ;;  %v3111_v55 = vpop.f32.mrb[190].mxu1  ;;  %3846 = vmatprep.mubr.bf16.mxu0 %v3433_v48  ;;  %4443 = vmatprep.mubr.f32.mxu1 %v8522_v0 }
 0x41d   : > { %v3112_v56 = vadd.f32 %v3111_v55, %v9228_v16  ;;  %v3113_v57 = vpop.f32.mrb[191].mxu1  ;;  %3847 = vmatmul.mubr.bf16.gmra.mrb[56].mxu0 %v3432_v44  ;;  %v3336_v59 = vmax.f32 %v3108_v49, 0.0  ;;  %v8440_v44 = vld [vmem:[%s8623_s26 + $0xc8] sm:$0xff] }
 0x41e   : > { %v3114_v58 = vadd.f32 %v3113_v57, %v9232_v51  ;;  %v3337_v62 = vmax.f32 %v3110_v54, 0.0 }
 0x41f   : > { %v3338_v60 = vmax.f32 %v3112_v56, 0.0  ;;  %7844 = vmatmul.mubr.msk.f32.gmra.mrb[40].mxu1 %vm377_vm1, %v8435_v61  ;;  %v8441_v56 = vld [vmem:[%s8623_s26 + $0xd0] sm:$0xff] }
 0x420   : > { %v3339_v63 = vmax.f32 %v3114_v58, 0.0  ;;  %4449 = vmatprep.mubr.f32.mxu1 %v8522_v0 }
 0x421   : > { %v3434_v1 = vpack.c.bf16 %v3338_v60, %v3336_v59 }
 0x422   : > { %v3117_v4 = vpop.f32.mrb[192].mxu1  ;;  %v3435_v6 = vpack.c.bf16 %v3339_v63, %v3337_v62 }
 0x423   : > { %v3118_v10 = vadd.f32 %v3117_v4, %v9228_v16  ;;  %v3119_v11 = vpop.f32.mrb[193].mxu1  ;;  %7845 = vmatmul.mubr.msk.f32.gmra.mrb[42].mxu1 %vm377_vm1, %v8436_v12  ;;  %v8314_v12 = vld [vmem:[#allocation2 + $0x534] ss:$8 sps:$4 sm:$0xff]  }
 0x424   : > { %v3120_v13 = vadd.f32 %v3119_v11, %v9232_v51  ;;  %v3121_v14 = vpop.f32.mrb[194].mxu1  ;;  %3856 = vmatprep.mubr.bf16.mxu0 %v3435_v6  ;;  %4455 = vmatprep.mubr.f32.mxu1 %v8522_v0  ;;  %v8312_v11 = vld [vmem:[#allocation2 + $0x530] ss:$8 sps:$4 sm:$0xff]  }
 0x425   : > { %v3122_v15 = vadd.f32 %v3121_v14, %v9228_v16  ;;  %v3123_v17 = vpop.f32.mrb[195].mxu1  ;;  %3857 = vmatmul.mubr.bf16.gmra.mrb[60].mxu0 %v3434_v1  ;;  %v3340_v53 = vmax.f32 %v3118_v10, 0.0  ;;  %v8442_v1 = vld [vmem:[%s8623_s26 + $0xd8] sm:$0xff]  ;;  %5766 = vmatprep.subr.bf16.mxu1 %v8314_v12 }
 0x426   : > { %v3124_v18 = vadd.f32 %v3123_v17, %v9232_v51  ;;  %v3341_v23 = vmax.f32 %v3120_v13, 0.0  ;;  %v8443_v13 = vld [vmem:[%s8623_s26 + $0xe0] sm:$0xff]  ;;  %5767 = vmatpush1.bf16.msra.mxu1 %v8312_v11  ;;  %v8450_v12 = vld [vmem:[%s8623_s26 + $0x118] sm:$0xff] }
 0x427   : > { %v3342_v21 = vmax.f32 %v3122_v15, 0.0  ;;  %7846 = vmatmul.mubr.msk.f32.gmra.mrb[44].mxu1 %vm377_vm1, %v8437_v22 }
 0x428   : > { %v3343_v24 = vmax.f32 %v3124_v18, 0.0  ;;  %4461 = vmatprep.mubr.f32.mxu1 %v8522_v0 }
 0x429   : > { %v3436_v25 = vpack.c.bf16 %v3342_v21, %v3340_v53 }
 0x42a   : > { %v3127_v26 = vpop.f32.mrb[196].mxu1  ;;  %v3437_v27 = vpack.c.bf16 %v3343_v24, %v3341_v23  ;;  %v8444_v23 = vld [vmem:[%s8623_s26 + $0xe8] sm:$0xff] }
 0x42b   : > { %v3128_v28 = vadd.f32 %v3127_v26, %v9228_v16  ;;  %v3129_v29 = vpop.f32.mrb[197].mxu1  ;;  %7847 = vmatmul.mubr.msk.f32.gmra.mrb[46].mxu1 %vm377_vm1, %v8438_v30 }
 0x42c   : > { %v3130_v5 = vadd.f32 %v3129_v29, %v9232_v51  ;;  %v3131_v31 = vpop.f32.mrb[198].mxu1  ;;  %3866 = vmatprep.mubr.bf16.mxu0 %v3437_v27  ;;  %4467 = vmatprep.mubr.f32.mxu1 %v8522_v0 }
 0x42d   : > { %v3132_v32 = vadd.f32 %v3131_v31, %v9228_v16  ;;  %v3133_v7 = vpop.f32.mrb[199].mxu1  ;;  %3867 = vmatmul.mubr.bf16.gmra.mrb[64].mxu0 %v3436_v25  ;;  %v3344_v19 = vmax.f32 %v3128_v28, 0.0 }
 0x42e   : > { %v3134_v33 = vadd.f32 %v3133_v7, %v9232_v51  ;;  %v3345_v20 = vmax.f32 %v3130_v5, 0.0  ;;  %v8445_v5 = vld [vmem:[%s8623_s26 + $0xf0] sm:$0xff] }
 0x42f   : > { %v3346_v34 = vmax.f32 %v3132_v32, 0.0  ;;  %7848 = vmatmul.mubr.msk.f32.gmra.mrb[48].mxu1 %vm377_vm1, %v8439_v37 }
 0x430   : > { %v3347_v38 = vmax.f32 %v3134_v33, 0.0  ;;  %4473 = vmatprep.mubr.f32.mxu1 %v8522_v0 }
 0x431   : > { %v3438_v39 = vpack.c.bf16 %v3346_v34, %v3344_v19 }
 0x432   : > { %v3137_v40 = vpop.f32.mrb[200].mxu1  ;;  %v3439_v41 = vpack.c.bf16 %v3347_v38, %v3345_v20 }
 0x433   : > { %v3138_v42 = vadd.f32 %v3137_v40, %v9228_v16  ;;  %v3139_v43 = vpop.f32.mrb[201].mxu1  ;;  %7849 = vmatmul.mubr.msk.f32.gmra.mrb[50].mxu1 %vm377_vm1, %v8440_v44  ;;  %v8317_v44 = vld [vmem:[#allocation2 + $0x544] ss:$8 sps:$4 sm:$0xff]  }
 0x434   : > { %v3140_v45 = vadd.f32 %v3139_v43, %v9232_v51  ;;  %v3141_v48 = vpop.f32.mrb[202].mxu1  ;;  %3876 = vmatprep.mubr.bf16.mxu0 %v3439_v41  ;;  %4479 = vmatprep.mubr.f32.mxu1 %v8522_v0  ;;  %v8315_v43 = vld [vmem:[#allocation2 + $0x540] ss:$8 sps:$4 sm:$0xff]  }
 0x435   : > { %v3142_v49 = vadd.f32 %v3141_v48, %v9228_v16  ;;  %v3143_v50 = vpop.f32.mrb[203].mxu1  ;;  %3877 = vmatmul.mubr.bf16.gmra.mrb[68].mxu0 %v3438_v39  ;;  %v3348_v54 = vmax.f32 %v3138_v42, 0.0  ;;  %5768 = vmatprep.subr.bf16.mxu1 %v8317_v44  ;;  %v8454_v44 = vld [vmem:[%s8623_s26 + $0x138] sm:$0xff] }
 0x436   : > { %v3144_v52 = vadd.f32 %v3143_v50, %v9232_v51  ;;  %v3349_v57 = vmax.f32 %v3140_v45, 0.0  ;;  %v8447_v45 = vld [vmem:[%s8623_s26 + $0x100] sm:$0xff]  ;;  %5769 = vmatpush1.bf16.msra.mxu1 %v8315_v43 }
 0x437   : > { %v3350_v55 = vmax.f32 %v3142_v49, 0.0  ;;  %7850 = vmatmul.mubr.msk.f32.gmra.mrb[52].mxu1 %vm377_vm1, %v8441_v56 }
 0x438   : > { %v3351_v58 = vmax.f32 %v3144_v52, 0.0  ;;  %4485 = vmatprep.mubr.f32.mxu1 %v8522_v0 }
 0x439   : > { %v3440_v59 = vpack.c.bf16 %v3350_v55, %v3348_v54 }
 0x43a   : > { %v3147_v60 = vpop.f32.mrb[204].mxu1  ;;  %v3441_v61 = vpack.c.bf16 %v3351_v58, %v3349_v57  ;;  %v8448_v57 = vld [vmem:[%s8623_s26 + $0x108] sm:$0xff] }
 0x43b   : > { %v3148_v62 = vadd.f32 %v3147_v60, %v9228_v16  ;;  %v3149_v63 = vpop.f32.mrb[205].mxu1  ;;  %7851 = vmatmul.mubr.msk.f32.gmra.mrb[54].mxu1 %vm377_vm1, %v8442_v1 }
 0x43c   : > { %v3150_v2 = vadd.f32 %v3149_v63, %v9232_v51  ;;  %v3151_v3 = vpop.f32.mrb[206].mxu1  ;;  %3886 = vmatprep.mubr.bf16.mxu0 %v3441_v61  ;;  %4491 = vmatprep.mubr.f32.mxu1 %v8522_v0 }
 0x43d   : > { %v3152_v4 = vadd.f32 %v3151_v3, %v9228_v16  ;;  %v3153_v6 = vpop.f32.mrb[207].mxu1  ;;  %3887 = vmatmul.mubr.bf16.gmra.mrb[72].mxu0 %v3440_v59  ;;  %v3352_v9 = vmax.f32 %v3148_v62, 0.0 }
 0x43e   : > { %v3154_v8 = vadd.f32 %v3153_v6, %v9232_v51  ;;  %v3353_v14 = vmax.f32 %v3150_v2, 0.0  ;;  %v8449_v2 = vld [vmem:[%s8623_s26 + $0x110] sm:$0xff] }
 0x43f   : > { %v3354_v10 = vmax.f32 %v3152_v4, 0.0  ;;  %7852 = vmatmul.mubr.msk.f32.gmra.mrb[56].mxu1 %vm377_vm1, %v8443_v13 }
 0x440   : > { %v3355_v15 = vmax.f32 %v3154_v8, 0.0  ;;  %4497 = vmatprep.mubr.f32.mxu1 %v8522_v0 }
 0x441   : > { %v3442_v17 = vpack.c.bf16 %v3354_v10, %v3352_v9 }
 0x442   : > { %v3157_v18 = vpop.f32.mrb[208].mxu1  ;;  %v3443_v53 = vpack.c.bf16 %v3355_v15, %v3353_v14 }
 0x443   : > { %v3158_v21 = vadd.f32 %v3157_v18, %v9228_v16  ;;  %v3159_v22 = vpop.f32.mrb[209].mxu1  ;;  %7853 = vmatmul.mubr.msk.f32.gmra.mrb[58].mxu1 %vm377_vm1, %v8444_v23  ;;  %v8320_v23 = vld [vmem:[#allocation2 + $0x554] ss:$8 sps:$4 sm:$0xff]  }
 0x444   : > { %v3160_v24 = vadd.f32 %v3159_v22, %v9232_v51  ;;  %v3161_v25 = vpop.f32.mrb[210].mxu1  ;;  %3896 = vmatprep.mubr.bf16.mxu0 %v3443_v53  ;;  %4503 = vmatprep.mubr.f32.mxu1 %v8522_v0  ;;  %v8318_v22 = vld [vmem:[#allocation2 + $0x550] ss:$8 sps:$4 sm:$0xff]  }
 0x445   : > { %v3162_v26 = vadd.f32 %v3161_v25, %v9228_v16  ;;  %v3163_v27 = vpop.f32.mrb[211].mxu1  ;;  %3897 = vmatmul.mubr.bf16.gmra.mrb[76].mxu0 %v3442_v17  ;;  %v3356_v29 = vmax.f32 %v3158_v21, 0.0  ;;  %5770 = vmatprep.subr.bf16.mxu1 %v8320_v23 }
 0x446   : > { %v3164_v28 = vadd.f32 %v3163_v27, %v9232_v51  ;;  %v3357_v31 = vmax.f32 %v3160_v24, 0.0  ;;  %v8451_v24 = vld [vmem:[%s8623_s26 + $0x120] sm:$0xff]  ;;  %5771 = vmatpush1.bf16.msra.mxu1 %v8318_v22 }
 0x447   : > { %v3358_v30 = vmax.f32 %v3162_v26, 0.0  ;;  %7854 = vmatmul.mubr.msk.f32.gmra.mrb[60].mxu1 %vm377_vm1, %v8445_v5 }
 0x448   : > { %v3359_v32 = vmax.f32 %v3164_v28, 0.0  ;;  %4509 = vmatprep.mubr.f32.mxu1 %v8522_v0 }
 0x449   : > { %v3444_v7 = vpack.c.bf16 %v3358_v30, %v3356_v29 }
 0x44a   : > { %v3167_v33 = vpop.f32.mrb[212].mxu1  ;;  %v3445_v19 = vpack.c.bf16 %v3359_v32, %v3357_v31  ;;  %v8452_v31 = vld [vmem:[%s8623_s26 + $0x128] sm:$0xff] }
 0x44b   : > { %v3168_v34 = vadd.f32 %v3167_v33, %v9228_v16  ;;  %v3169_v35 = vpop.f32.mrb[213].mxu1  ;;  %7855 = vmatmul.mubr.msk.f32.gmra.mrb[62].mxu1 %vm377_vm1, %v8446_v36 }
 0x44c   : > { %v3170_v37 = vadd.f32 %v3169_v35, %v9232_v51  ;;  %v3171_v20 = vpop.f32.mrb[214].mxu1  ;;  %3906 = vmatprep.mubr.bf16.mxu0 %v3445_v19  ;;  %4515 = vmatprep.mubr.f32.mxu1 %v8522_v0 }
 0x44d   : > { %v3172_v38 = vadd.f32 %v3171_v20, %v9228_v16  ;;  %v3173_v39 = vpop.f32.mrb[215].mxu1  ;;  %3907 = vmatmul.mubr.bf16.gmra.mrb[80].mxu0 %v3444_v7  ;;  %v3360_v41 = vmax.f32 %v3168_v34, 0.0 }
 0x44e   : > { %v3174_v40 = vadd.f32 %v3173_v39, %v9232_v51  ;;  %v3361_v48 = vmax.f32 %v3170_v37, 0.0  ;;  %v8453_v37 = vld [vmem:[%s8623_s26 + $0x130] sm:$0xff] }
 0x44f   : > { %v3362_v42 = vmax.f32 %v3172_v38, 0.0  ;;  %7856 = vmatmul.mubr.msk.f32.gmra.mrb[64].mxu1 %vm377_vm1, %v8447_v45 }
 0x450   : > { %v3363_v49 = vmax.f32 %v3174_v40, 0.0  ;;  %4521 = vmatprep.mubr.f32.mxu1 %v8522_v0 }
 0x451   : > { %v3446_v50 = vpack.c.bf16 %v3362_v42, %v3360_v41 }
 0x452   : > { %v3177_v52 = vpop.f32.mrb[216].mxu1  ;;  %v3447_v54 = vpack.c.bf16 %v3363_v49, %v3361_v48 }
 0x453   : > { %v3178_v55 = vadd.f32 %v3177_v52, %v9228_v16  ;;  %v3179_v56 = vpop.f32.mrb[217].mxu1  ;;  %7857 = vmatmul.mubr.msk.f32.gmra.mrb[66].mxu1 %vm377_vm1, %v8448_v57  ;;  %v8323_v57 = vld [vmem:[#allocation2 + $0x564] ss:$8 sps:$4 sm:$0xff]  }
 0x454   : > { %v3180_v58 = vadd.f32 %v3179_v56, %v9232_v51  ;;  %v3181_v59 = vpop.f32.mrb[218].mxu1  ;;  %3916 = vmatprep.mubr.bf16.mxu0 %v3447_v54  ;;  %4527 = vmatprep.mubr.f32.mxu1 %v8522_v0  ;;  %v8321_v56 = vld [vmem:[#allocation2 + $0x560] ss:$8 sps:$4 sm:$0xff]  }
 0x455   : > { %v3182_v60 = vadd.f32 %v3181_v59, %v9228_v16  ;;  %v3183_v61 = vpop.f32.mrb[219].mxu1  ;;  %3917 = vmatmul.mubr.bf16.gmra.mrb[84].mxu0 %v3446_v50  ;;  %v3364_v63 = vmax.f32 %v3178_v55, 0.0  ;;  %5772 = vmatprep.subr.bf16.mxu1 %v8323_v57 }
 0x456   : > { %v3184_v62 = vadd.f32 %v3183_v61, %v9232_v51  ;;  %v3365_v3 = vmax.f32 %v3180_v58, 0.0  ;;  %v8455_v58 = vld [vmem:[%s8623_s26 + $0x140] sm:$0xff]  ;;  %5773 = vmatpush1.bf16.msra.mxu1 %v8321_v56 }
 0x457   : > { %v3366_v1 = vmax.f32 %v3182_v60, 0.0  ;;  %7858 = vmatmul.mubr.msk.f32.gmra.mrb[68].mxu1 %vm377_vm1, %v8449_v2 }
 0x458   : > { %v3367_v4 = vmax.f32 %v3184_v62, 0.0  ;;  %4533 = vmatprep.mubr.f32.mxu1 %v8522_v0 }
 0x459   : > { %v3448_v6 = vpack.c.bf16 %v3366_v1, %v3364_v63 }
 0x45a   : > { %v3187_v8 = vpop.f32.mrb[220].mxu1  ;;  %v3449_v9 = vpack.c.bf16 %v3367_v4, %v3365_v3  ;;  %v8456_v3 = vld [vmem:[%s8623_s26 + $0x148] sm:$0xff] }
 0x45b   : > { %v3188_v10 = vadd.f32 %v3187_v8, %v9228_v16  ;;  %v3189_v11 = vpop.f32.mrb[221].mxu1  ;;  %7859 = vmatmul.mubr.msk.f32.gmra.mrb[70].mxu1 %vm377_vm1, %v8450_v12 }
 0x45c   : > { %v3190_v13 = vadd.f32 %v3189_v11, %v9232_v51  ;;  %v3191_v14 = vpop.f32.mrb[222].mxu1  ;;  %3926 = vmatprep.mubr.bf16.mxu0 %v3449_v9  ;;  %4539 = vmatprep.mubr.f32.mxu1 %v8522_v0 }
 0x45d   : > { %v3192_v15 = vadd.f32 %v3191_v14, %v9228_v16  ;;  %v3193_v17 = vpop.f32.mrb[223].mxu1  ;;  %3927 = vmatmul.mubr.bf16.gmra.mrb[88].mxu0 %v3448_v6  ;;  %v3368_v53 = vmax.f32 %v3188_v10, 0.0 }
 0x45e   : > { %v3194_v18 = vadd.f32 %v3193_v17, %v9232_v51  ;;  %v3369_v25 = vmax.f32 %v3190_v13, 0.0  ;;  %v8457_v13 = vld [vmem:[%s8623_s26 + $0x150] sm:$0xff] }
 0x45f   : > { %v3370_v21 = vmax.f32 %v3192_v15, 0.0  ;;  %7860 = vmatmul.mubr.msk.f32.gmra.mrb[72].mxu1 %vm377_vm1, %v8451_v24  ;;  %v8458_v24 = vld [vmem:[%s8623_s26 + $0x158] sm:$0xff] }
 0x460   : > { %v3371_v26 = vmax.f32 %v3194_v18, 0.0  ;;  %4545 = vmatprep.mubr.f32.mxu1 %v8522_v0 }
 0x461   : > { %v3450_v27 = vpack.c.bf16 %v3370_v21, %v3368_v53  ;;  %v7789_v21 = vld [vmem:[%s11043_s4 + $0x8] sm:$0x3] }
 0x462   : > { %v3197_v28 = vpop.f32.mrb[224].mxu1  ;;  %v3451_v29 = vpack.c.bf16 %v3371_v26, %v3369_v25 }
 0x463   : > { %v3198_v30 = vadd.f32 %v3197_v28, %v9228_v16  ;;  %v3199_v5 = vpop.f32.mrb[225].mxu1  ;;  %7861 = vmatmul.mubr.msk.f32.gmra.mrb[74].mxu1 %vm377_vm1, %v8452_v31 }
 0x464   : > { %v3200_v32 = vadd.f32 %v3199_v5, %v9232_v51  ;;  %v3201_v7 = vpop.f32.mrb[226].mxu1  ;;  %3936 = vmatprep.mubr.bf16.mxu0 %v3451_v29  ;;  %4551 = vmatprep.mubr.f32.mxu1 %v8522_v0  ;;  %v9498_v29 = vrot.slane %v7789_v21, %v8790_v46  ;;  %v9502_v5 = vrot.slane %v7789_v21, %v8792_v47 }
 0x465   : > { %v3202_v33 = vadd.f32 %v3201_v7, %v9228_v16  ;;  %v3203_v19 = vpop.f32.mrb[227].mxu1  ;;  %3937 = vmatmul.mubr.bf16.gmra.mrb[92].mxu0 %v3450_v27  ;;  %v3372_v35 = vmax.f32 %v3198_v30, 0.0  ;;  %v8324_v7 = vld [vmem:[#allocation2 + $0x570] ss:$8 sps:$4 sm:$0xff]  }
 0x466   : > { %v3204_v34 = vadd.f32 %v3203_v19, %v9232_v51  ;;  %v3373_v20 = vmax.f32 %v3200_v32, 0.0  ;;  %v8459_v19 = vld [vmem:[%s8623_s26 + $0x160] sm:$0xff] }
 0x467   : > { %v3374_v36 = vmax.f32 %v3202_v33, 0.0  ;;  %7862 = vmatmul.mubr.msk.f32.gmra.mrb[76].mxu1 %vm377_vm1, %v8453_v37  ;;  %v8326_v33 = vld [vmem:[#allocation2 + $0x574] ss:$8 sps:$4 sm:$0xff]  }
 0x468   : > { %v3375_v38 = vmax.f32 %v3204_v34, 0.0  ;;  %4557 = vmatprep.mubr.f32.mxu1 %v8522_v0  ;;  %5774 = vmatprep.subr.bf16.mxu1 %v8326_v33 }
 0x469   : > { %v3452_v39 = vpack.c.bf16 %v3374_v36, %v3372_v35  ;;  %5775 = vmatpush1.bf16.msra.mxu1 %v8324_v7 }
 0x46a   : > { %v3207_v40 = vpop.f32.mrb[228].mxu1  ;;  %v3453_v41 = vpack.c.bf16 %v3375_v38, %v3373_v20 }
 0x46b   : > { %v3208_v42 = vadd.f32 %v3207_v40, %v9228_v16  ;;  %v3209_v43 = vpop.f32.mrb[229].mxu1  ;;  %7863 = vmatmul.mubr.msk.f32.gmra.mrb[78].mxu1 %vm377_vm1, %v8454_v44 }
 0x46c   : > { %v3210_v45 = vadd.f32 %v3209_v43, %v9232_v51  ;;  %v3211_v48 = vpop.f32.mrb[230].mxu1  ;;  %3946 = vmatprep.mubr.bf16.mxu0 %v3453_v41  ;;  %4563 = vmatprep.mubr.f32.mxu1 %v8522_v0 }
 0x46d   : > { %v3212_v49 = vadd.f32 %v3211_v48, %v9228_v16  ;;  %v3213_v50 = vpop.f32.mrb[231].mxu1  ;;  %3947 = vmatmul.mubr.bf16.gmra.mrb[96].mxu0 %v3452_v39  ;;  %v3376_v54 = vmax.f32 %v3208_v42, 0.0 }
 0x46e   : > { %v3214_v52 = vadd.f32 %v3213_v50, %v9232_v51  ;;  %v3377_v59 = vmax.f32 %v3210_v45, 0.0 }
 0x46f   : > { %v3378_v55 = vmax.f32 %v3212_v49, 0.0  ;;  %7864 = vmatmul.mubr.msk.f32.gmra.mrb[80].mxu1 %vm377_vm1, %v8455_v58  ;;  %v8460_v49 = vld [vmem:[%s8623_s26 + $0x168] sm:$0xff] }
 0x470   : > { %v3379_v60 = vmax.f32 %v3214_v52, 0.0  ;;  %4569 = vmatprep.mubr.f32.mxu1 %v8522_v0 }
 0x471   : > { %v3454_v61 = vpack.c.bf16 %v3378_v55, %v3376_v54 }
 0x472   : > { %v3217_v62 = vpop.f32.mrb[232].mxu1  ;;  %v3455_v63 = vpack.c.bf16 %v3379_v60, %v3377_v59 }
 0x473   : > { %v3218_v1 = vadd.f32 %v3217_v62, %v9228_v16  ;;  %v3219_v2 = vpop.f32.mrb[233].mxu1  ;;  %7865 = vmatmul.mubr.msk.f32.gmra.mrb[82].mxu1 %vm377_vm1, %v8456_v3 }
 0x474   : > { %v3220_v4 = vadd.f32 %v3219_v2, %v9232_v51  ;;  %v3221_v6 = vpop.f32.mrb[234].mxu1  ;;  %3956 = vmatprep.mubr.bf16.mxu0 %v3455_v63  ;;  %4575 = vmatprep.mubr.f32.mxu1 %v8522_v0  ;;  %v8461_v2 = vld [vmem:[%s8623_s26 + $0x170] sm:$0xff] }
 0x475   : > { %v3222_v8 = vadd.f32 %v3221_v6, %v9228_v16  ;;  %v3223_v9 = vpop.f32.mrb[235].mxu1  ;;  %3957 = vmatmul.mubr.bf16.gmra.mrb[100].mxu0 %v3454_v61  ;;  %v3380_v11 = vmax.f32 %v3218_v1, 0.0 }
 0x476   : > { %v3224_v10 = vadd.f32 %v3223_v9, %v9232_v51  ;;  %v3381_v14 = vmax.f32 %v3220_v4, 0.0 }
 0x477   : > { %v3382_v12 = vmax.f32 %v3222_v8, 0.0  ;;  %7866 = vmatmul.mubr.msk.f32.gmra.mrb[84].mxu1 %vm377_vm1, %v8457_v13 }
 0x478   : > { %v3383_v15 = vmax.f32 %v3224_v10, 0.0  ;;  %4581 = vmatprep.mubr.f32.mxu1 %v8522_v0 }
 0x479   : > { %v3456_v17 = vpack.c.bf16 %v3382_v12, %v3380_v11 }
 0x47a   : > { %v3227_v18 = vpop.f32.mrb[236].mxu1  ;;  %v3457_v53 = vpack.c.bf16 %v3383_v15, %v3381_v14 }
 0x47b   : > { %v3228_v22 = vadd.f32 %v3227_v18, %v9228_v16  ;;  %v3229_v23 = vpop.f32.mrb[237].mxu1  ;;  %7867 = vmatmul.mubr.msk.f32.gmra.mrb[86].mxu1 %vm377_vm1, %v8458_v24 }
 0x47c   : > { %v3230_v25 = vadd.f32 %v3229_v23, %v9232_v51  ;;  %v3231_v26 = vpop.f32.mrb[238].mxu1  ;;  %3966 = vmatprep.mubr.bf16.mxu0 %v3457_v53  ;;  %4587 = vmatprep.mubr.f32.mxu1 %v8522_v0 }
 0x47d   : > { %v3232_v27 = vadd.f32 %v3231_v26, %v9228_v16  ;;  %v3233_v28 = vpop.f32.mrb[239].mxu1  ;;  %3967 = vmatmul.mubr.bf16.gmra.mrb[104].mxu0 %v3456_v17  ;;  %v3384_v31 = vmax.f32 %v3228_v22, 0.0  ;;  %v8462_v22 = vld [vmem:[%s8623_s26 + $0x178] sm:$0xff] }
 0x47e   : > { %v3234_v30 = vadd.f32 %v3233_v28, %v9232_v51  ;;  %v3385_v34 = vmax.f32 %v3230_v25, 0.0 }
 0x47f   : > { %v3386_v32 = vmax.f32 %v3232_v27, 0.0  ;;  %7868 = vmatmul.mubr.msk.f32.gmra.mrb[88].mxu1 %vm377_vm1, %v8459_v19 }
 0x480   : > { %v3387_v35 = vmax.f32 %v3234_v30, 0.0  ;;  %v3708_v36 = vpop.f32.mrb[0].mxu0  ;;  %4593 = vmatprep.mubr.f32.mxu1 %v8522_v0 }
 0x481   : > { %v3458_v37 = vpack.c.bf16 %v3386_v32, %v3384_v31  ;;  %v3709_v20 = vadd.f32 %v3708_v36, %v9498_v29  ;;  %v3710_v38 = vpop.f32.mrb[1].mxu0  ;;  %v8329_v36 = vld [vmem:[#allocation2 + $0x584] ss:$8 sps:$4 sm:$0xff]  }
 0x482   : > { %v3711_v39 = vadd.f32 %v3710_v38, %v9502_v5  ;;  %v3237_v40 = vpop.f32.mrb[240].mxu1  ;;  %v3712_v41 = vpop.f32.mrb[2].mxu0  ;;  %v3459_v42 = vpack.c.bf16 %v3387_v35, %v3385_v34  ;;  %v8327_v35 = vld [vmem:[#allocation2 + $0x580] ss:$8 sps:$4 sm:$0xff]   ;;  %5776 = vmatprep.subr.bf16.mxu1 %v8329_v36 }
 0x483   : > { %v3238_v43 = vadd.f32 %v3237_v40, %v9228_v16  ;;  %v3713_v44 = vadd.f32 %v3712_v41, %v9498_v29  ;;  %v3239_v45 = vpop.f32.mrb[241].mxu1  ;;  %v3714_v48 = vpop.f32.mrb[3].mxu0  ;;  %7869 = vmatmul.mubr.msk.f32.gmra.mrb[90].mxu1 %vm377_vm1, %v8460_v49  ;;  %v4027_v55 = vmax.f32 %v3709_v20, 0.0 }
 0x484   : > { %v3240_v50 = vadd.f32 %v3239_v45, %v9232_v51  ;;  %v3715_v52 = vadd.f32 %v3714_v48, %v9502_v5  ;;  %v3241_v54 = vpop.f32.mrb[242].mxu1  ;;  %3976 = vmatprep.mubr.bf16.mxu0 %v3459_v42  ;;  %4599 = vmatprep.mubr.f32.mxu1 %v8522_v0  ;;  %v4028_v59 = vmax.f32 %v3711_v39, 0.0 }
 0x485   : > { %v4029_v56 = vmax.f32 %v3713_v44, 0.0  ;;  %v3242_v57 = vadd.f32 %v3241_v54, %v9228_v16  ;;  %v3243_v58 = vpop.f32.mrb[243].mxu1  ;;  %3977 = vmatmul.mubr.bf16.gmra.mrb[108].mxu0 %v3458_v37  ;;  %v3388_v62 = vmax.f32 %v3238_v43, 0.0  ;;  %v8463_v37 = vld [vmem:[%s8623_s26 + $0x180] sm:$0xff]  ;;  %5777 = vmatpush1.bf16.msra.mxu1 %v8327_v35 }
 0x486   : > { %v4030_v60 = vmax.f32 %v3715_v52, 0.0  ;;  %v3244_v61 = vadd.f32 %v3243_v58, %v9232_v51  ;;  %v3389_v3 = vmax.f32 %v3240_v50, 0.0 }
 0x487   : > { %v9518_v63 = vpack.c.bf16 %v4029_v56, %v4027_v55  ;;  %v3390_v1 = vmax.f32 %v3242_v57, 0.0  ;;  %7870 = vmatmul.mubr.msk.f32.gmra.mrb[92].mxu1 %vm377_vm1, %v8461_v2  ;;  %v8464_v56 = vld [vmem:[%s8623_s26 + $0x188] sm:$0xff] }
 0x488   : > { %v3391_v4 = vmax.f32 %v3244_v61, 0.0  ;;  %v3718_v6 = vpop.f32.mrb[4].mxu0  ;;  %v9522_v8 = vpack.c.bf16 %v4030_v60, %v4028_v59  ;;  %4605 = vmatprep.mubr.f32.mxu1 %v8522_v0 }
 0x489   : > { %v3460_v9 = vpack.c.bf16 %v3390_v1, %v3388_v62  ;;  %v3719_v10 = vadd.f32 %v3718_v6, %v9498_v29  ;;  %v3720_v11 = vpop.f32.mrb[5].mxu0 }
 0x48a   : > { %v3721_v12 = vadd.f32 %v3720_v11, %v9502_v5  ;;  %v3247_v13 = vpop.f32.mrb[244].mxu1  ;;  %v3722_v14 = vpop.f32.mrb[6].mxu0  ;;  %v3461_v15 = vpack.c.bf16 %v3391_v4, %v3389_v3  ;;  %v8465_v11 = vld [vmem:[%s8623_s26 + $0x190] sm:$0xff] }
 0x48b   : > { %v3248_v17 = vadd.f32 %v3247_v13, %v9228_v16  ;;  %v3723_v18 = vadd.f32 %v3722_v14, %v9498_v29  ;;  %v3249_v53 = vpop.f32.mrb[245].mxu1  ;;  %v3724_v21 = vpop.f32.mrb[7].mxu0  ;;  %7871 = vmatmul.mubr.msk.f32.gmra.mrb[94].mxu1 %vm377_vm1, %v8462_v22  ;;  %v4031_v26 = vmax.f32 %v3719_v10, 0.0 }
 0x48c   : > { %v3250_v23 = vadd.f32 %v3249_v53, %v9232_v51  ;;  %v3725_v24 = vadd.f32 %v3724_v21, %v9502_v5  ;;  %v3251_v25 = vpop.f32.mrb[246].mxu1  ;;  %3986 = vmatprep.mubr.bf16.mxu0 %v3461_v15  ;;  %4611 = vmatprep.mubr.f32.mxu1 %v8522_v0  ;;  %v4032_v31 = vmax.f32 %v3721_v12, 0.0 }
 0x48d   : > { %v4033_v27 = vmax.f32 %v3723_v18, 0.0  ;;  %v3252_v28 = vadd.f32 %v3251_v25, %v9228_v16  ;;  %v3253_v30 = vpop.f32.mrb[247].mxu1  ;;  %3987 = vmatmul.mubr.bf16.gmra.mrb[112].mxu0 %v3460_v9  ;;  %v3392_v33 = vmax.f32 %v3248_v17, 0.0 }
 0x48e   : > { %v4034_v32 = vmax.f32 %v3725_v24, 0.0  ;;  %v3254_v7 = vadd.f32 %v3253_v30, %v9232_v51  ;;  %v3393_v20 = vmax.f32 %v3250_v23, 0.0  ;;  %v8466_v30 = vld [vmem:[%s8623_s26 + $0x198] sm:$0xff] }
 0x48f   : > { %v9536_v19 = vpack.c.bf16 %v4033_v27, %v4031_v26  ;;  %v3394_v34 = vmax.f32 %v3252_v28, 0.0  ;;  %7872 = vmatmul.mubr.msk.f32.gmra.mrb[96].mxu1 %vm377_vm1, %v8463_v37 }
 0x490   : > { %v3395_v38 = vmax.f32 %v3254_v7, 0.0  ;;  %v3728_v39 = vpop.f32.mrb[8].mxu0  ;;  %v9540_v40 = vpack.c.bf16 %v4034_v32, %v4032_v31  ;;  %4617 = vmatprep.mubr.f32.mxu1 %v8522_v0 }
 0x491   : > { %v3462_v41 = vpack.c.bf16 %v3394_v34, %v3392_v33  ;;  %v3729_v42 = vadd.f32 %v3728_v39, %v9498_v29  ;;  %v3730_v43 = vpop.f32.mrb[9].mxu0 }
 0x492   : > { %v3731_v44 = vadd.f32 %v3730_v43, %v9502_v5  ;;  %v3257_v45 = vpop.f32.mrb[248].mxu1  ;;  %v3732_v48 = vpop.f32.mrb[10].mxu0  ;;  %v3463_v49 = vpack.c.bf16 %v3395_v38, %v3393_v20  ;;  %v8330_v43 = vld [vmem:[#allocation2 + $0x590] ss:$8 sps:$4 sm:$0xff]  }
 0x493   : > { %v3258_v50 = vadd.f32 %v3257_v45, %v9228_v16  ;;  %v3733_v52 = vadd.f32 %v3732_v48, %v9498_v29  ;;  %v3259_v54 = vpop.f32.mrb[249].mxu1  ;;  %v3734_v55 = vpop.f32.mrb[11].mxu0  ;;  %7873 = vmatmul.mubr.msk.f32.gmra.mrb[98].mxu1 %vm377_vm1, %v8464_v56  ;;  %v4035_v60 = vmax.f32 %v3729_v42, 0.0  ;;  %v8467_v45 = vld [vmem:[%s8623_s26 + $0x1a0] sm:$0xff] }
 0x494   : > { %v3260_v57 = vadd.f32 %v3259_v54, %v9232_v51  ;;  %v3735_v58 = vadd.f32 %v3734_v55, %v9502_v5  ;;  %v3261_v59 = vpop.f32.mrb[250].mxu1  ;;  %3996 = vmatprep.mubr.bf16.mxu0 %v3463_v49  ;;  %4623 = vmatprep.mubr.f32.mxu1 %v8522_v0  ;;  %v4036_v2 = vmax.f32 %v3731_v44, 0.0  ;;  %v8332_v44 = vld [vmem:[#allocation2 + $0x594] ss:$8 sps:$4 sm:$0xff]  }
 0x495   : > { %v4037_v61 = vmax.f32 %v3733_v52, 0.0  ;;  %v3262_v62 = vadd.f32 %v3261_v59, %v9228_v16  ;;  %v3263_v1 = vpop.f32.mrb[251].mxu1  ;;  %3997 = vmatmul.mubr.bf16.gmra.mrb[116].mxu0 %v3462_v41  ;;  %v3396_v6 = vmax.f32 %v3258_v50, 0.0  ;;  %5778 = vmatprep.subr.bf16.mxu1 %v8332_v44  ;;  %v8473_v44 = vld [vmem:[%s8623_s26 + $0x1d0] sm:$0xff] }
 0x496   : > { %v4038_v3 = vmax.f32 %v3735_v58, 0.0  ;;  %v3264_v4 = vadd.f32 %v3263_v1, %v9232_v51  ;;  %v3397_v12 = vmax.f32 %v3260_v57, 0.0  ;;  %5779 = vmatpush1.bf16.msra.mxu1 %v8330_v43 }
 0x497   : > { %v9554_v9 = vpack.c.bf16 %v4037_v61, %v4035_v60  ;;  %v3398_v10 = vmax.f32 %v3262_v62, 0.0  ;;  %7874 = vmatmul.mubr.msk.f32.gmra.mrb[100].mxu1 %vm377_vm1, %v8465_v11  ;;  %v8468_v60 = vld [vmem:[%s8623_s26 + $0x1a8] sm:$0xff] }
 0x498   : > { %v3399_v13 = vmax.f32 %v3264_v4, 0.0  ;;  %v3738_v14 = vpop.f32.mrb[12].mxu0  ;;  %v9558_v15 = vpack.c.bf16 %v4038_v3, %v4036_v2  ;;  %4629 = vmatprep.mubr.f32.mxu1 %v8522_v0 }
 0x499   : > { %v3464_v17 = vpack.c.bf16 %v3398_v10, %v3396_v6  ;;  %v3739_v18 = vadd.f32 %v3738_v14, %v9498_v29  ;;  %v3740_v53 = vpop.f32.mrb[13].mxu0  ;;  %v8469_v6 = vld [vmem:[%s8623_s26 + $0x1b0] sm:$0xff] }
 0x49a   : > { %v3741_v21 = vadd.f32 %v3740_v53, %v9502_v5  ;;  %v3267_v22 = vpop.f32.mrb[252].mxu1  ;;  %v3742_v23 = vpop.f32.mrb[14].mxu0  ;;  %v3465_v24 = vpack.c.bf16 %v3399_v13, %v3397_v12  ;;  %v8470_v53 = vld [vmem:[%s8623_s26 + $0x1b8] sm:$0xff] }
 0x49b   : > { %v3268_v25 = vadd.f32 %v3267_v22, %v9228_v16  ;;  %v3743_v26 = vadd.f32 %v3742_v23, %v9498_v29  ;;  %v3269_v27 = vpop.f32.mrb[253].mxu1  ;;  %v3744_v28 = vpop.f32.mrb[15].mxu0  ;;  %7875 = vmatmul.mubr.msk.f32.gmra.mrb[102].mxu1 %vm377_vm1, %v8466_v30  ;;  %v4039_v33 = vmax.f32 %v3739_v18, 0.0  ;;  %v8471_v30 = vld [vmem:[%s8623_s26 + $0x1c0] sm:$0xff] }
 0x49c   : > { %v3270_v31 = vadd.f32 %v3269_v27, %v9232_v51  ;;  %v3745_v32 = vadd.f32 %v3744_v28, %v9502_v5  ;;  %v3271_v7 = vpop.f32.mrb[254].mxu1  ;;  %4006 = vmatprep.mubr.bf16.mxu0 %v3465_v24  ;;  %4635 = vmatprep.mubr.f32.mxu1 %v8522_v0  ;;  %v4040_v37 = vmax.f32 %v3741_v21, 0.0  ;;  %v8333_v27 = vld [vmem:[#allocation2 + $0x5a0] ss:$8 sps:$4 sm:$0xff]   ;;  %v8335_v28 = vld [vmem:[#allocation2 + $0x5a4] ss:$8 sps:$4 sm:$0xff]  }
 0x49d   : > { %v4041_v34 = vmax.f32 %v3743_v26, 0.0  ;;  %v3272_v35 = vadd.f32 %v3271_v7, %v9228_v16  ;;  %v3273_v36 = vpop.f32.mrb[255].mxu1  ;;  %4007 = vmatmul.mubr.bf16.gmra.mrb[120].mxu0 %v3464_v17  ;;  %v3400_v39 = vmax.f32 %v3268_v25, 0.0  ;;  %5780 = vmatprep.subr.bf16.mxu1 %v8335_v28 }
 0x49e   : > { %v4042_v20 = vmax.f32 %v3745_v32, 0.0  ;;  %v3274_v38 = vadd.f32 %v3273_v36, %v9232_v51  ;;  %v3401_v48 = vmax.f32 %v3270_v31, 0.0  ;;  %5781 = vmatpush1.bf16.msra.mxu1 %v8333_v27  ;;  %v8472_v36 = vld [vmem:[%s8623_s26 + $0x1c8] sm:$0xff] }
 0x49f   : > { %v9572_v41 = vpack.c.bf16 %v4041_v34, %v4039_v33  ;;  %v3402_v42 = vmax.f32 %v3272_v35, 0.0  ;;  %7876 = vmatmul.mubr.msk.f32.gmra.mrb[104].mxu1 %vm377_vm1, %v8467_v45 }
 0x4a0   : > { %v3403_v49 = vmax.f32 %v3274_v38, 0.0  ;;  %v3748_v50 = vpop.f32.mrb[16].mxu0  ;;  %v9576_v16 = vpack.c.bf16 %v4042_v20, %v4040_v37  ;;  %4641 = vmatprep.mubr.f32.mxu1 %v8522_v0 }
 0x4a1   : > { %v3466_v52 = vpack.c.bf16 %v3402_v42, %v3400_v39  ;;  %v3749_v51 = vadd.f32 %v3748_v50, %v9498_v29  ;;  %v3750_v54 = vpop.f32.mrb[17].mxu0 }
 0x4a2   : > { %v3751_v55 = vadd.f32 %v3750_v54, %v9502_v5  ;;  %v3752_v56 = vpop.f32.mrb[18].mxu0  ;;  %v3467_v57 = vpack.c.bf16 %v3403_v49, %v3401_v48  ;;  %v8474_v54 = vld [vmem:[%s8623_s26 + $0x1d8] sm:$0xff] }
 0x4a3   : > { %v3753_v58 = vadd.f32 %v3752_v56, %v9498_v29  ;;  %v3754_v59 = vpop.f32.mrb[19].mxu0  ;;  %7877 = vmatmul.mubr.msk.f32.gmra.mrb[106].mxu1 %vm377_vm1, %v8468_v60  ;;  %v4043_v62 = vmax.f32 %v3749_v51, 0.0 }
 0x4a4   : > { %v3755_v61 = vadd.f32 %v3754_v59, %v9502_v5  ;;  %4016 = vmatprep.mubr.bf16.mxu0 %v3467_v57  ;;  %4647 = vmatprep.mubr.f32.mxu1 %v8522_v0  ;;  %v4044_v2 = vmax.f32 %v3751_v55, 0.0 }
 0x4a5   : > { %v4045_v1 = vmax.f32 %v3753_v58, 0.0  ;;  %4017 = vmatmul.mubr.bf16.gmra.mrb[124].mxu0 %v3466_v52 }
 0x4a6   : > { %v4046_v3 = vmax.f32 %v3755_v61, 0.0  ;;  %4900 = vmatprep.mubr.bf16.mxu0 %v9522_v8  ;;  %v8336_v61 = vld [vmem:[#allocation2 + $0x5b0] ss:$8 sps:$4 sm:$0xff]  }
 0x4a7   : > { %v9587_v4 = vpack.c.bf16 %v4045_v1, %v4043_v62  ;;  %7878 = vmatmul.mubr.msk.f32.gmra.mrb[108].mxu1 %vm377_vm1, %v8469_v6  ;;  %v8338_v62 = vld [vmem:[#allocation2 + $0x5b4] ss:$8 sps:$4 sm:$0xff]   ;;  %v8475_v1 = vld [vmem:[%s8623_s26 + $0x1e0] sm:$0xff] }
 0x4a8   : > { %v3758_v10 = vpop.f32.mrb[20].mxu0  ;;  %v9591_v11 = vpack.c.bf16 %v4046_v3, %v4044_v2  ;;  %4653 = vmatprep.mubr.f32.mxu1 %v8522_v0  ;;  %5782 = vmatprep.subr.bf16.mxu1 %v8338_v62 }
 0x4a9   : > { %v3759_v12 = vadd.f32 %v3758_v10, %v9498_v29  ;;  %v3760_v13 = vpop.f32.mrb[21].mxu0  ;;  %5783 = vmatpush1.bf16.msra.mxu1 %v8336_v61 }
 0x4aa   : > { %v3761_v14 = vadd.f32 %v3760_v13, %v9502_v5  ;;  %v3762_v17 = vpop.f32.mrb[22].mxu0 }
 0x4ab   : > { %v3763_v18 = vadd.f32 %v3762_v17, %v9498_v29  ;;  %v3764_v8 = vpop.f32.mrb[23].mxu0  ;;  %7879 = vmatmul.mubr.msk.f32.gmra.mrb[110].mxu1 %vm377_vm1, %v8470_v53  ;;  %v4047_v22 = vmax.f32 %v3759_v12, 0.0 }
 0x4ac   : > { %v3765_v21 = vadd.f32 %v3764_v8, %v9502_v5  ;;  %4659 = vmatprep.mubr.f32.mxu1 %v8522_v0  ;;  %v4048_v24 = vmax.f32 %v3761_v14, 0.0  ;;  %v8476_v14 = vld [vmem:[%s8623_s26 + $0x1e8] sm:$0xff] }
 0x4ad   : > { %v4049_v23 = vmax.f32 %v3763_v18, 0.0  ;;  %4901 = vmatmul.mubr.bf16.vlgmr.msra.gmra.mrb[128].mxu0 %v9518_v63 }
 0x4ae   : > { %v4050_v25 = vmax.f32 %v3765_v21, 0.0  ;;  %4910 = vmatprep.mubr.bf16.mxu0 %v9540_v40 }
 0x4af   : > { %v9603_v26 = vpack.c.bf16 %v4049_v23, %v4047_v22  ;;  %7880 = vmatmul.mubr.msk.f32.gmra.mrb[112].mxu1 %vm377_vm1, %v8471_v30  ;;  %v8477_v23 = vld [vmem:[%s8623_s26 + $0x1f0] sm:$0xff] }
 0x4b0   : > { %v3768_v31 = vpop.f32.mrb[24].mxu0  ;;  %v9607_v32 = vpack.c.bf16 %v4050_v25, %v4048_v24  ;;  %4665 = vmatprep.mubr.f32.mxu1 %v8522_v0 }
 0x4b1   : > { %v3769_v7 = vadd.f32 %v3768_v31, %v9498_v29  ;;  %v3770_v63 = vpop.f32.mrb[25].mxu0 }
 0x4b2   : > { %v3771_v33 = vadd.f32 %v3770_v63, %v9502_v5  ;;  %v3772_v40 = vpop.f32.mrb[26].mxu0 }
 0x4b3   : > { %v3773_v34 = vadd.f32 %v3772_v40, %v9498_v29  ;;  %v3774_v35 = vpop.f32.mrb[27].mxu0  ;;  %7881 = vmatmul.mubr.msk.f32.gmra.mrb[114].mxu1 %vm377_vm1, %v8472_v36  ;;  %v4051_v20 = vmax.f32 %v3769_v7, 0.0  ;;  %v8339_v36 = vld [vmem:[#allocation2 + $0x5c0] ss:$8 sps:$4 sm:$0xff]  }
 0x4b4   : > { %v3775_v37 = vadd.f32 %v3774_v35, %v9502_v5  ;;  %4671 = vmatprep.mubr.f32.mxu1 %v8522_v0  ;;  %v4052_v39 = vmax.f32 %v3771_v33, 0.0 }
 0x4b5   : > { %v4053_v38 = vmax.f32 %v3773_v34, 0.0  ;;  %4911 = vmatmul.mubr.bf16.gmra.mrb[132].mxu0 %v9536_v19 }
 0x4b6   : > { %v4054_v42 = vmax.f32 %v3775_v37, 0.0  ;;  %4920 = vmatprep.mubr.bf16.mxu0 %v9558_v15  ;;  %v8341_v37 = vld [vmem:[#allocation2 + $0x5c4] ss:$8 sps:$4 sm:$0xff]  }
 0x4b7   : > { %v9619_v43 = vpack.c.bf16 %v4053_v38, %v4051_v20  ;;  %7882 = vmatmul.mubr.msk.f32.gmra.mrb[116].mxu1 %vm377_vm1, %v8473_v44  ;;  %5784 = vmatprep.subr.bf16.mxu1 %v8341_v37 }
 0x4b8   : > { %v3778_v45 = vpop.f32.mrb[28].mxu0  ;;  %v9623_v48 = vpack.c.bf16 %v4054_v42, %v4052_v39  ;;  %4677 = vmatprep.mubr.f32.mxu1 %v8522_v0  ;;  %5785 = vmatpush1.bf16.msra.mxu1 %v8339_v36 }
 0x4b9   : > { %v3779_v49 = vadd.f32 %v3778_v45, %v9498_v29  ;;  %v3780_v50 = vpop.f32.mrb[29].mxu0 }
 0x4ba   : > { %v3781_v19 = vadd.f32 %v3780_v50, %v9502_v5  ;;  %v3782_v52 = vpop.f32.mrb[30].mxu0 }
 0x4bb   : > { %v3783_v51 = vadd.f32 %v3782_v52, %v9498_v29  ;;  %v3784_v15 = vpop.f32.mrb[31].mxu0  ;;  %7883 = vmatmul.mubr.msk.f32.gmra.mrb[118].mxu1 %vm377_vm1, %v8474_v54  ;;  %v4055_v56 = vmax.f32 %v3779_v49, 0.0 }
 0x4bc   : > { %v3785_v55 = vadd.f32 %v3784_v15, %v9502_v5  ;;  %4683 = vmatprep.mubr.f32.mxu1 %v8522_v0  ;;  %v4056_v58 = vmax.f32 %v3781_v19, 0.0 }
 0x4bd   : > { %v4057_v57 = vmax.f32 %v3783_v51, 0.0  ;;  %4921 = vmatmul.mubr.bf16.gmra.mrb[136].mxu0 %v9554_v9 }
 0x4be   : > { %v4058_v59 = vmax.f32 %v3785_v55, 0.0  ;;  %4930 = vmatprep.mubr.bf16.mxu0 %v9576_v16 }
 0x4bf   : > { %v9635_v60 = vpack.c.bf16 %v4057_v57, %v4055_v56  ;;  %7884 = vmatmul.mubr.msk.f32.gmra.mrb[120].mxu1 %vm377_vm1, %v8475_v1 }
 0x4c0   : > { %v3788_v2 = vpop.f32.mrb[32].mxu0  ;;  %v9639_v3 = vpack.c.bf16 %v4058_v59, %v4056_v58  ;;  %4689 = vmatprep.mubr.f32.mxu1 %v8522_v0 }
 0x4c1   : > { %v3789_v6 = vadd.f32 %v3788_v2, %v9498_v29  ;;  %v3790_v9 = vpop.f32.mrb[33].mxu0 }
 0x4c2   : > { %v3791_v10 = vadd.f32 %v3790_v9, %v9502_v5  ;;  %v3792_v16 = vpop.f32.mrb[34].mxu0 }
 0x4c3   : > { %v3793_v12 = vadd.f32 %v3792_v16, %v9498_v29  ;;  %v3794_v13 = vpop.f32.mrb[35].mxu0  ;;  %7885 = vmatmul.mubr.msk.f32.gmra.mrb[122].mxu1 %vm377_vm1, %v8476_v14  ;;  %v4059_v18 = vmax.f32 %v3789_v6, 0.0  ;;  %v8344_v16 = vld [vmem:[#allocation2 + $0x5d4] ss:$8 sps:$4 sm:$0xff]  }
 0x4c4   : > { %v3795_v17 = vadd.f32 %v3794_v13, %v9502_v5  ;;  %4695 = vmatprep.mubr.f32.mxu1 %v8522_v0  ;;  %v4060_v53 = vmax.f32 %v3791_v10, 0.0  ;;  %v8342_v10 = vld [vmem:[#allocation2 + $0x5d0] ss:$8 sps:$4 sm:$0xff]   ;;  %5786 = vmatprep.subr.bf16.mxu1 %v8344_v16 }
 0x4c5   : > { %v4061_v8 = vmax.f32 %v3793_v12, 0.0  ;;  %4931 = vmatmul.mubr.bf16.gmra.mrb[140].mxu0 %v9572_v41  ;;  %v9688_v12 = vpop.f32.mrb[0].mxu1  ;;  %5787 = vmatpush1.bf16.msra.mxu1 %v8342_v10 }
 0x4c6   : > { %v4062_v21 = vmax.f32 %v3795_v17, 0.0  ;;  %4940 = vmatprep.mubr.bf16.mxu0 %v9591_v11  ;;  %v8478_v11 = vld [vmem:[%s8623_s26 + $0x1f8] sm:$0xff]  ;;  %v9692_v17 = vpop.f32.mrb[1].mxu1 }
 0x4c7   : > { %v9651_v22 = vpack.c.bf16 %v4061_v8, %v4059_v18  ;;  %7886 = vmatmul.mubr.msk.f32.gmra.mrb[124].mxu1 %vm377_vm1, %v8477_v23  ;;  %v9697_v23 = vpop.f32.mrb[2].mxu1 }
 0x4c8   : > { %v3798_v24 = vpop.f32.mrb[36].mxu0  ;;  %v9655_v25 = vpack.c.bf16 %v4062_v21, %v4060_v53  ;;  %4701 = vmatprep.mubr.f32.mxu1 %v8522_v0 }
 0x4c9   : > { %v3799_v27 = vadd.f32 %v3798_v24, %v9498_v29  ;;  %v3800_v28 = vpop.f32.mrb[37].mxu0 }
 0x4ca   : > { %v3801_v41 = vadd.f32 %v3800_v28, %v9502_v5  ;;  %v3802_v30 = vpop.f32.mrb[38].mxu0 }
 0x4cb   : > { %v3803_v31 = vadd.f32 %v3802_v30, %v9498_v29  ;;  %v3804_v7 = vpop.f32.mrb[39].mxu0  ;;  %7887 = vmatmul.mubr.msk.f32.gmra.mrb[126].mxu1 %vm377_vm1, %v8478_v11  ;;  %v4063_v33 = vmax.f32 %v3799_v27, 0.0  ;;  %v9700_v27 = vpop.f32.mrb[3].mxu1 }
 0x4cc   : > { %v3805_v63 = vadd.f32 %v3804_v7, %v9502_v5  ;;  %v4064_v34 = vmax.f32 %v3801_v41, 0.0  ;;  %v9706_v11 = vpop.f32.mrb[4].mxu1 }
 0x4cd   : > { %v4065_v40 = vmax.f32 %v3803_v31, 0.0  ;;  %4941 = vmatmul.mubr.bf16.gmra.mrb[144].mxu0 %v9587_v4 }
 0x4ce   : > { %v4066_v0 = vmax.f32 %v3805_v63, 0.0  ;;  %4950 = vmatprep.mubr.bf16.mxu0 %v9607_v32 }
 0x4cf   : > { %v9666_v35 = vpack.c.bf16 %v4065_v40, %v4063_v33  ;;  %v9710_v40 = vpop.f32.mrb[5].mxu1 }
 0x4d0   : > { %v3808_v20 = vpop.f32.mrb[40].mxu0  ;;  %v9668_v38 = vpack.c.bf16 %v4066_v0, %v4064_v34 }
 0x4d1   : > { %v3809_v39 = vadd.f32 %v3808_v20, %v9498_v29  ;;  %v3810_v42 = vpop.f32.mrb[41].mxu0 }
 0x4d2   : > { %v3811_v44 = vadd.f32 %v3810_v42, %v9502_v5  ;;  %v3812_v45 = vpop.f32.mrb[42].mxu0 }
 0x4d3   : > { %v3813_v4 = vadd.f32 %v3812_v45, %v9498_v29  ;;  %v3814_v49 = vpop.f32.mrb[43].mxu0  ;;  %v4067_v50 = vmax.f32 %v3809_v39, 0.0  ;;  %v9715_v39 = vpop.f32.mrb[6].mxu1 }
 0x4d4   : > { %v3815_v32 = vadd.f32 %v3814_v49, %v9502_v5  ;;  %v4068_v52 = vmax.f32 %v3811_v44, 0.0  ;;  %v9718_v42 = vpop.f32.mrb[7].mxu1 }
 0x4d5   : > { %v4069_v19 = vmax.f32 %v3813_v4, 0.0  ;;  %4951 = vmatmul.mubr.bf16.gmra.mrb[148].mxu0 %v9603_v26 }
 0x4d6   : > { %v4070_v51 = vmax.f32 %v3815_v32, 0.0  ;;  %4960 = vmatprep.mubr.bf16.mxu0 %v9623_v48 }
 0x4d7   : > { %v9676_v15 = vpack.c.bf16 %v4069_v19, %v4067_v50  ;;  %v8345_v50 = vld [vmem:[#allocation2 + $0x600] ss:$8 sps:$4 sm:$0xff]   ;;  %v8347_v19 = vld [vmem:[#allocation2 + $0x604] ss:$8 sps:$4 sm:$0xff]  }
 0x4d8   : > { %v3818_v54 = vpop.f32.mrb[44].mxu0  ;;  %v9678_v55 = vpack.c.bf16 %v4070_v51, %v4068_v52  ;;  %v8348_v52 = vld [vmem:[#allocation2 + $0x5e0] ss:$8 sps:$4 sm:$0xff]   ;;  %6511 = vmatprep.subr.bf16.mxu0 %v8347_v19 }
 0x4d9   : > { %v3819_v56 = vadd.f32 %v3818_v54, %v9498_v29  ;;  %v3820_v57 = vpop.f32.mrb[45].mxu0  ;;  %6512 = vmatpush1.bf16.msra.mxu0 %v8345_v50 }
 0x4da   : > { %v3821_v58 = vadd.f32 %v3820_v57, %v9502_v5  ;;  %v3822_v59 = vpop.f32.mrb[46].mxu0  ;;  %v9726_v57 = vpop.f32.mrb[8].mxu1 }
 0x4db   : > { %v3823_v61 = vadd.f32 %v3822_v59, %v9498_v29  ;;  %v3824_v62 = vpop.f32.mrb[47].mxu0  ;;  %v4071_v1 = vmax.f32 %v3819_v56, 0.0  ;;  %v8350_v56 = vld [vmem:[#allocation2 + $0x5e4] ss:$8 sps:$4 sm:$0xff]  }
 0x4dc   : > { %v3825_v26 = vadd.f32 %v3824_v62, %v9502_v5  ;;  %v4072_v48 = vmax.f32 %v3821_v58, 0.0  ;;  %5788 = vmatprep.subr.bf16.mxu1 %v8350_v56 }
 0x4dd   : > { %v4073_v2 = vmax.f32 %v3823_v61, 0.0  ;;  %4961 = vmatmul.mubr.bf16.gmra.mrb[152].mxu0 %v9619_v43  ;;  %5789 = vmatpush1.bf16.msra.mxu1 %v8348_v52 }
 0x4de   : > { %v4074_v6 = vmax.f32 %v3825_v26, 0.0  ;;  %4970 = vmatprep.mubr.bf16.mxu0 %v9639_v3 }
 0x4df   : > { %v9686_v9 = vpack.c.bf16 %v4073_v2, %v4071_v1 }
 0x4e0   : > { %v3828_v13 = vpop.f32.mrb[48].mxu0  ;;  %v9690_v14 = vpack.c.bf16 %v4074_v6, %v4072_v48 }
 0x4e1   : > { %v3829_v18 = vadd.f32 %v3828_v13, %v9498_v29  ;;  %v3830_v8 = vpop.f32.mrb[49].mxu0 }
 0x4e2   : > { %v3831_v43 = vadd.f32 %v3830_v8, %v9502_v5  ;;  %v3832_v53 = vpop.f32.mrb[50].mxu0 }
 0x4e3   : > { %v3833_v3 = vadd.f32 %v3832_v53, %v9498_v29  ;;  %v3834_v21 = vpop.f32.mrb[51].mxu0  ;;  %v4075_v28 = vmax.f32 %v3829_v18, 0.0 }
 0x4e4   : > { %v3835_v24 = vadd.f32 %v3834_v21, %v9502_v5  ;;  %v4076_v30 = vmax.f32 %v3831_v43, 0.0 }
 0x4e5   : > { %v4077_v41 = vmax.f32 %v3833_v3, 0.0  ;;  %4971 = vmatmul.mubr.bf16.gmra.mrb[156].mxu0 %v9635_v60 }
 0x4e6   : > { %v4078_v31 = vmax.f32 %v3835_v24, 0.0  ;;  %4980 = vmatprep.mubr.bf16.mxu0 %v9655_v25 }
 0x4e7   : > { %v9704_v7 = vpack.c.bf16 %v4077_v41, %v4075_v28 }
 0x4e8   : > { %v3838_v63 = vpop.f32.mrb[52].mxu0  ;;  %v9708_v33 = vpack.c.bf16 %v4078_v31, %v4076_v30 }
 0x4e9   : > { %v3839_v34 = vadd.f32 %v3838_v63, %v9498_v29  ;;  %v3840_v0 = vpop.f32.mrb[53].mxu0 }
 0x4ea   : > { %v3841_v36 = vadd.f32 %v3840_v0, %v9502_v5  ;;  %v3842_v37 = vpop.f32.mrb[54].mxu0 }
 0x4eb   : > { %v3843_v60 = vadd.f32 %v3842_v37, %v9498_v29  ;;  %v3844_v20 = vpop.f32.mrb[55].mxu0  ;;  %v4079_v44 = vmax.f32 %v3839_v34, 0.0 }
 0x4ec   : > { %v3845_v25 = vadd.f32 %v3844_v20, %v9502_v5  ;;  %v4080_v4 = vmax.f32 %v3841_v36, 0.0  ;;  %v8351_v20 = vld [vmem:[#allocation2 + $0x610] ss:$8 sps:$4 sm:$0xff]  }
 0x4ed   : > { %v4081_v45 = vmax.f32 %v3843_v60, 0.0  ;;  %4981 = vmatmul.mubr.bf16.gmra.mrb[160].mxu0 %v9651_v22  ;;  %v9729_v22 = vpop.f32.mrb[9].mxu1 }
 0x4ee   : > { %v4082_v49 = vmax.f32 %v3845_v25, 0.0  ;;  %4990 = vmatprep.mubr.bf16.mxu0 %v9668_v38  ;;  %v9733_v1 = vpop.f32.mrb[10].mxu1  ;;  %v8353_v25 = vld [vmem:[#allocation2 + $0x614] ss:$8 sps:$4 sm:$0xff]  }
 0x4ef   : > { %v9722_v32 = vpack.c.bf16 %v4081_v45, %v4079_v44  ;;  %v9736_v48 = vpop.f32.mrb[11].mxu1  ;;  %v8354_v44 = vld [vmem:[#allocation2 + $0x5f0] ss:$8 sps:$4 sm:$0xff]   ;;  %6513 = vmatprep.subr.bf16.mxu0 %v8353_v25 }
 0x4f0   : > { %v3848_v51 = vpop.f32.mrb[56].mxu0  ;;  %v9724_v54 = vpack.c.bf16 %v4082_v49, %v4080_v4  ;;  %v9742_v8 = vpop.f32.mrb[12].mxu1  ;;  %v8356_v49 = vld [vmem:[#allocation2 + $0x5f4] ss:$8 sps:$4 sm:$0xff]   ;;  %6514 = vmatpush1.bf16.msra.mxu0 %v8351_v20 }
 0x4f1   : > { %v3849_v58 = vadd.f32 %v3848_v51, %v9498_v29  ;;  %v3850_v59 = vpop.f32.mrb[57].mxu0  ;;  %v9746_v3 = vpop.f32.mrb[13].mxu1  ;;  %5790 = vmatprep.subr.bf16.mxu1 %v8356_v49 }
 0x4f2   : > { %v3851_v61 = vadd.f32 %v3850_v59, %v9502_v5  ;;  %v3852_v38 = vpop.f32.mrb[58].mxu0  ;;  %v9751_v31 = vpop.f32.mrb[14].mxu1  ;;  %5791 = vmatpush1.bf16.msra.mxu1 %v8354_v44 }
 0x4f3   : > { %v3853_v62 = vadd.f32 %v3852_v38, %v9498_v29  ;;  %v3854_v26 = vpop.f32.mrb[59].mxu0  ;;  %v4083_v6 = vmax.f32 %v3849_v58, 0.0  ;;  %v9754_v63 = vpop.f32.mrb[15].mxu1 }
 0x4f4   : > { %v3855_v2 = vadd.f32 %v3854_v26, %v9502_v5  ;;  %v4084_v16 = vmax.f32 %v3851_v61, 0.0  ;;  %v9762_v50 = vpop.f32.mrb[16].mxu1 }
 0x4f5   : > { %v4085_v10 = vmax.f32 %v3853_v62, 0.0  ;;  %4991 = vmatmul.mubr.bf16.gmra.mrb[164].mxu0 %v9666_v35 }
 0x4f6   : > { %v4086_v13 = vmax.f32 %v3855_v2, 0.0  ;;  %5000 = vmatprep.mubr.bf16.mxu0 %v9678_v55 }
 0x4f7   : > { %v9740_v18 = vpack.c.bf16 %v4085_v10, %v4083_v6 }
 0x4f8   : > { %v3858_v43 = vpop.f32.mrb[60].mxu0  ;;  %v9744_v53 = vpack.c.bf16 %v4086_v13, %v4084_v16 }
 0x4f9   : > { %v3859_v21 = vadd.f32 %v3858_v43, %v9498_v29  ;;  %v3860_v24 = vpop.f32.mrb[61].mxu0 }
 0x4fa   : > { %v3861_v28 = vadd.f32 %v3860_v24, %v9502_v5  ;;  %v3862_v41 = vpop.f32.mrb[62].mxu0 }
 0x4fb   : > { %v3863_v35 = vadd.f32 %v3862_v41, %v9498_v29  ;;  %v3864_v30 = vpop.f32.mrb[63].mxu0  ;;  %v4087_v34 = vmax.f32 %v3859_v21, 0.0 }
 0x4fc   : > { %v3865_v55 = vadd.f32 %v3864_v30, %v9502_v5  ;;  %v4088_v36 = vmax.f32 %v3861_v28, 0.0 }
 0x4fd   : > { %v4089_v0 = vmax.f32 %v3863_v35, 0.0  ;;  %5001 = vmatmul.mubr.bf16.gmra.mrb[168].mxu0 %v9676_v15  ;;  %v9765_v15 = vpop.f32.mrb[17].mxu1 }
 0x4fe   : > { %v4090_v37 = vmax.f32 %v3865_v55, 0.0  ;;  %5010 = vmatprep.mubr.bf16.mxu0 %v9690_v14  ;;  %v9769_v59 = vpop.f32.mrb[18].mxu1 }
 0x4ff   : > { %v9758_v60 = vpack.c.bf16 %v4089_v0, %v4087_v34  ;;  %v9772_v38 = vpop.f32.mrb[19].mxu1 }
 0x500   : > { %v3868_v45 = vpop.f32.mrb[64].mxu0  ;;  %v9760_v4 = vpack.c.bf16 %v4090_v37, %v4088_v36  ;;  %v9778_v16 = vpop.f32.mrb[20].mxu1 }
 0x501   : > { %v3869_v19 = vadd.f32 %v3868_v45, %v9498_v29  ;;  %v3870_v52 = vpop.f32.mrb[65].mxu0  ;;  %v9782_v21 = vpop.f32.mrb[21].mxu1 }
 0x502   : > { %v3871_v51 = vadd.f32 %v3870_v52, %v9502_v5  ;;  %v3872_v14 = vpop.f32.mrb[66].mxu0  ;;  %v9787_v55 = vpop.f32.mrb[22].mxu1 }
 0x503   : > { %v3873_v56 = vadd.f32 %v3872_v14, %v9498_v29  ;;  %v3874_v58 = vpop.f32.mrb[67].mxu0  ;;  %v4091_v62 = vmax.f32 %v3869_v19, 0.0  ;;  %v9790_v34 = vpop.f32.mrb[23].mxu1  ;;  %v8357_v14 = vld [vmem:[#allocation2 + $0x620] ss:$8 sps:$4 sm:$0xff]  }
 0x504   : > { %v3875_v61 = vadd.f32 %v3874_v58, %v9502_v5  ;;  %v4092_v2 = vmax.f32 %v3871_v51, 0.0  ;;  %v9796_v44 = vpop.f32.mrb[24].mxu1 }
 0x505   : > { %v4093_v26 = vmax.f32 %v3873_v56, 0.0  ;;  %5011 = vmatmul.mubr.bf16.gmra.mrb[172].mxu0 %v9686_v9  ;;  %v9800_v19 = vpop.f32.mrb[25].mxu1  ;;  %v8359_v56 = vld [vmem:[#allocation2 + $0x624] ss:$8 sps:$4 sm:$0xff]  }
 0x506   : > { %v4094_v6 = vmax.f32 %v3875_v61, 0.0  ;;  %5020 = vmatprep.mubr.bf16.mxu0 %v9708_v33  ;;  %6515 = vmatprep.subr.bf16.mxu0 %v8359_v56 }
 0x507   : > { %v9776_v10 = vpack.c.bf16 %v4093_v26, %v4091_v62  ;;  %v9805_v62 = vpop.f32.mrb[26].mxu1  ;;  %6516 = vmatpush1.bf16.msra.mxu0 %v8357_v14 }
 0x508   : > { %v3878_v13 = vpop.f32.mrb[68].mxu0  ;;  %v9780_v43 = vpack.c.bf16 %v4094_v6, %v4092_v2  ;;  %v9808_v2 = vpop.f32.mrb[27].mxu1 }
 0x509   : > { %v3879_v24 = vadd.f32 %v3878_v13, %v9498_v29  ;;  %v3880_v28 = vpop.f32.mrb[69].mxu0 }
 0x50a   : > { %v3881_v41 = vadd.f32 %v3880_v28, %v9502_v5  ;;  %v3882_v35 = vpop.f32.mrb[70].mxu0 }
 0x50b   : > { %v3883_v9 = vadd.f32 %v3882_v35, %v9498_v29  ;;  %v3884_v30 = vpop.f32.mrb[71].mxu0  ;;  %v4095_v0 = vmax.f32 %v3879_v24, 0.0  ;;  %v9814_v35 = vpop.f32.mrb[28].mxu1 }
 0x50c   : > { %v3885_v33 = vadd.f32 %v3884_v30, %v9502_v5  ;;  %v4096_v37 = vmax.f32 %v3881_v41, 0.0 }
 0x50d   : > { %v4097_v36 = vmax.f32 %v3883_v9, 0.0  ;;  %5021 = vmatmul.mubr.bf16.gmra.mrb[176].mxu0 %v9704_v7 }
 0x50e   : > { %v4098_v20 = vmax.f32 %v3885_v33, 0.0  ;;  %5030 = vmatprep.mubr.bf16.mxu0 %v9724_v54  ;;  %v9818_v33 = vpop.f32.mrb[29].mxu1 }
 0x50f   : > { %v9794_v25 = vpack.c.bf16 %v4097_v36, %v4095_v0 }
 0x510   : > { %v3888_v45 = vpop.f32.mrb[72].mxu0  ;;  %v9798_v49 = vpack.c.bf16 %v4098_v20, %v4096_v37 }
 0x511   : > { %v3889_v52 = vadd.f32 %v3888_v45, %v9498_v29  ;;  %v3890_v51 = vpop.f32.mrb[73].mxu0 }
 0x512   : > { %v3891_v7 = vadd.f32 %v3890_v51, %v9502_v5  ;;  %v3892_v58 = vpop.f32.mrb[74].mxu0 }
 0x513   : > { %v3893_v61 = vadd.f32 %v3892_v58, %v9498_v29  ;;  %v3894_v54 = vpop.f32.mrb[75].mxu0  ;;  %v4099_v6 = vmax.f32 %v3889_v52, 0.0  ;;  %v9823_v52 = vpop.f32.mrb[30].mxu1 }
 0x514   : > { %v3895_v26 = vadd.f32 %v3894_v54, %v9502_v5  ;;  %v4100_v24 = vmax.f32 %v3891_v7, 0.0  ;;  %v9826_v51 = vpop.f32.mrb[31].mxu1 }
 0x515   : > { %v4101_v13 = vmax.f32 %v3893_v61, 0.0  ;;  %5031 = vmatmul.mubr.bf16.gmra.mrb[180].mxu0 %v9722_v32  ;;  %v9832_v54 = vpop.f32.mrb[32].mxu1 }
 0x516   : > { %v4102_v28 = vmax.f32 %v3895_v26, 0.0  ;;  %5040 = vmatprep.mubr.bf16.mxu0 %v9744_v53 }
 0x517   : > { %v9812_v41 = vpack.c.bf16 %v4101_v13, %v4099_v6  ;;  %v9836_v13 = vpop.f32.mrb[33].mxu1 }
 0x518   : > { %v3898_v9 = vpop.f32.mrb[76].mxu0  ;;  %v9816_v30 = vpack.c.bf16 %v4102_v28, %v4100_v24 }
 0x519   : > { %v3899_v0 = vadd.f32 %v3898_v9, %v9498_v29  ;;  %v3900_v36 = vpop.f32.mrb[77].mxu0  ;;  %v8360_v9 = vld [vmem:[#allocation2 + $0x630] ss:$8 sps:$4 sm:$0xff]  }
 0x51a   : > { %v3901_v37 = vadd.f32 %v3900_v36, %v9502_v5  ;;  %v3902_v20 = vpop.f32.mrb[78].mxu0 }
 0x51b   : > { %v3903_v32 = vadd.f32 %v3902_v20, %v9498_v29  ;;  %v3904_v45 = vpop.f32.mrb[79].mxu0  ;;  %v4103_v14 = vmax.f32 %v3899_v0, 0.0  ;;  %v8362_v0 = vld [vmem:[#allocation2 + $0x634] ss:$8 sps:$4 sm:$0xff]   ;;  %v9841_v20 = vpop.f32.mrb[34].mxu1 }
 0x51c   : > { %v3905_v53 = vadd.f32 %v3904_v45, %v9502_v5  ;;  %v4104_v7 = vmax.f32 %v3901_v37, 0.0  ;;  %6517 = vmatprep.subr.bf16.mxu0 %v8362_v0  ;;  %v9844_v45 = vpop.f32.mrb[35].mxu1 }
 0x51d   : > { %v4105_v56 = vmax.f32 %v3903_v32, 0.0  ;;  %5041 = vmatmul.mubr.bf16.gmra.mrb[184].mxu0 %v9740_v18  ;;  %11066 = vst [vmem:[#allocation7_spill] sm:$0xff] %v9844_v45 }
 0x51e   : > { %v4106_v58 = vmax.f32 %v3905_v53, 0.0  ;;  %5050 = vmatprep.mubr.bf16.mxu0 %v9760_v4  ;;  %6518 = vmatpush1.bf16.msra.mxu0 %v8360_v9 }
 0x51f   : > { %v9830_v61 = vpack.c.bf16 %v4105_v56, %v4103_v14 }
 0x520   : > { %v3908_v26 = vpop.f32.mrb[80].mxu0  ;;  %v9834_v6 = vpack.c.bf16 %v4106_v58, %v4104_v7 }
 0x521   : > { %v3909_v24 = vadd.f32 %v3908_v26, %v9498_v29  ;;  %v3910_v28 = vpop.f32.mrb[81].mxu0  ;;  %v9850_v26 = vpop.f32.mrb[36].mxu1 }
 0x522   : > { %v3911_v18 = vadd.f32 %v3910_v28, %v9502_v5  ;;  %v3912_v36 = vpop.f32.mrb[82].mxu0  ;;  %11067 = vst [vmem:[#allocation8_spill] sm:$0xff] %v9850_v26 }
 0x523   : > { %v3913_v37 = vadd.f32 %v3912_v36, %v9498_v29  ;;  %v3914_v4 = vpop.f32.mrb[83].mxu0  ;;  %v4107_v53 = vmax.f32 %v3909_v24, 0.0  ;;  %v9854_v36 = vpop.f32.mrb[37].mxu1 }
 0x524   : > { %v3915_v32 = vadd.f32 %v3914_v4, %v9502_v5  ;;  %v4108_v56 = vmax.f32 %v3911_v18, 0.0  ;;  %11068 = vst [vmem:[#allocation9_spill] sm:$0xff] %v9854_v36 }
 0x525   : > { %v4109_v14 = vmax.f32 %v3913_v37, 0.0  ;;  %5051 = vmatmul.mubr.bf16.gmra.mrb[188].mxu0 %v9758_v60 }
 0x526   : > { %v4110_v7 = vmax.f32 %v3915_v32, 0.0  ;;  %5060 = vmatprep.mubr.bf16.mxu0 %v9780_v43  ;;  %v9859_v32 = vpop.f32.mrb[38].mxu1 }
 0x527   : > { %v9848_v58 = vpack.c.bf16 %v4109_v14, %v4107_v53  ;;  %11069 = vst [vmem:[#allocation10_spill] sm:$0xff] %v9859_v32  ;;  %v9862_v53 = vpop.f32.mrb[39].mxu1 }
 0x528   : > { %v3918_v28 = vpop.f32.mrb[84].mxu0  ;;  %v9852_v0 = vpack.c.bf16 %v4110_v7, %v4108_v56  ;;  %11070 = vst [vmem:[#allocation11_spill] sm:$0xff] %v9862_v53 }
 0x529   : > { %v3919_v9 = vadd.f32 %v3918_v28, %v9498_v29  ;;  %v3920_v4 = vpop.f32.mrb[85].mxu0 }
 0x52a   : > { %v3921_v24 = vadd.f32 %v3920_v4, %v9502_v5  ;;  %v3922_v37 = vpop.f32.mrb[86].mxu0  ;;  %v9868_v4 = vpop.f32.mrb[40].mxu1 }
 0x52b   : > { %v3923_v60 = vadd.f32 %v3922_v37, %v9498_v29  ;;  %v3924_v18 = vpop.f32.mrb[87].mxu0  ;;  %v4111_v14 = vmax.f32 %v3919_v9, 0.0  ;;  %11071 = vst [vmem:[#allocation12_spill] sm:$0xff] %v9868_v4  ;;  %v9872_v32 = vpop.f32.mrb[41].mxu1  ;;  %v8363_v9 = vld [vmem:[#allocation2 + $0x640] ss:$8 sps:$4 sm:$0xff]  }
 0x52c   : > { %v3925_v43 = vadd.f32 %v3924_v18, %v9502_v5  ;;  %v4112_v7 = vmax.f32 %v3921_v24, 0.0  ;;  %11072 = vst [vmem:[#allocation13_spill] sm:$0xff] %v9872_v32 }
 0x52d   : > { %v4113_v56 = vmax.f32 %v3923_v60, 0.0  ;;  %5061 = vmatmul.mubr.bf16.gmra.mrb[192].mxu0 %v9776_v10  ;;  %v8365_v60 = vld [vmem:[#allocation2 + $0x644] ss:$8 sps:$4 sm:$0xff]  }
 0x52e   : > { %v4114_v36 = vmax.f32 %v3925_v43, 0.0  ;;  %5070 = vmatprep.mubr.bf16.mxu0 %v9798_v49  ;;  %6519 = vmatprep.subr.bf16.mxu0 %v8365_v60 }
 0x52f   : > { %v9866_v28 = vpack.c.bf16 %v4113_v56, %v4111_v14  ;;  %v9877_v14 = vpop.f32.mrb[42].mxu1  ;;  %6520 = vmatpush1.bf16.msra.mxu0 %v8363_v9 }
 0x530   : > { %v3928_v37 = vpop.f32.mrb[88].mxu0  ;;  %v9870_v26 = vpack.c.bf16 %v4114_v36, %v4112_v7  ;;  %11073 = vst [vmem:[#allocation14_spill] sm:$0xff] %v9877_v14  ;;  %v9880_v36 = vpop.f32.mrb[43].mxu1 }
 0x531   : > { %v3929_v18 = vadd.f32 %v3928_v37, %v9498_v29  ;;  %v3930_v53 = vpop.f32.mrb[89].mxu0  ;;  %11074 = vst [vmem:[#allocation15_spill] sm:$0xff] %v9880_v36 }
 0x532   : > { %v3931_v10 = vadd.f32 %v3930_v53, %v9502_v5  ;;  %v3932_v24 = vpop.f32.mrb[90].mxu0 }
 0x533   : > { %v3933_v43 = vadd.f32 %v3932_v24, %v9498_v29  ;;  %v3934_v49 = vpop.f32.mrb[91].mxu0  ;;  %v4115_v7 = vmax.f32 %v3929_v18, 0.0  ;;  %v9886_v24 = vpop.f32.mrb[44].mxu1 }
 0x534   : > { %v3935_v56 = vadd.f32 %v3934_v49, %v9502_v5  ;;  %v4116_v37 = vmax.f32 %v3931_v10, 0.0  ;;  %11075 = vst [vmem:[#allocation16_spill] sm:$0xff] %v9886_v24  ;;  %v9890_v14 = vpop.f32.mrb[45].mxu1 }
 0x535   : > { %v4117_v32 = vmax.f32 %v3933_v43, 0.0  ;;  %5071 = vmatmul.mubr.bf16.gmra.mrb[196].mxu0 %v9794_v25  ;;  %11076 = vst [vmem:[#allocation17_spill] sm:$0xff] %v9890_v14 }
 0x536   : > { %v4118_v4 = vmax.f32 %v3935_v56, 0.0  ;;  %5080 = vmatprep.mubr.bf16.mxu0 %v9816_v30  ;;  %v9895_v56 = vpop.f32.mrb[46].mxu1 }
 0x537   : > { %v9884_v53 = vpack.c.bf16 %v4117_v32, %v4115_v7  ;;  %11077 = vst [vmem:[#allocation18_spill] sm:$0xff] %v9895_v56  ;;  %v9898_v32 = vpop.f32.mrb[47].mxu1 }
 0x538   : > { %v3938_v60 = vpop.f32.mrb[92].mxu0  ;;  %v9888_v45 = vpack.c.bf16 %v4118_v4, %v4116_v37  ;;  %11078 = vst [vmem:[#allocation19_spill] sm:$0xff] %v9898_v32 }
 0x539   : > { %v3939_v9 = vadd.f32 %v3938_v60, %v9498_v29  ;;  %v3940_v49 = vpop.f32.mrb[93].mxu0 }
 0x53a   : > { %v3941_v18 = vadd.f32 %v3940_v49, %v9502_v5  ;;  %v3942_v43 = vpop.f32.mrb[94].mxu0  ;;  %v9904_v49 = vpop.f32.mrb[48].mxu1 }
 0x53b   : > { %v3943_v25 = vadd.f32 %v3942_v43, %v9498_v29  ;;  %v3944_v10 = vpop.f32.mrb[95].mxu0  ;;  %v4119_v7 = vmax.f32 %v3939_v9, 0.0  ;;  %11079 = vst [vmem:[#allocation20_spill] sm:$0xff] %v9904_v49  ;;  %v9908_v56 = vpop.f32.mrb[49].mxu1  ;;  %v8366_v9 = vld [vmem:[#allocation2 + $0x650] ss:$8 sps:$4 sm:$0xff]  }
 0x53c   : > { %v3945_v30 = vadd.f32 %v3944_v10, %v9502_v5  ;;  %v4120_v37 = vmax.f32 %v3941_v18, 0.0  ;;  %11080 = vst [vmem:[#allocation21_spill] sm:$0xff] %v9908_v56 }
 0x53d   : > { %v4121_v4 = vmax.f32 %v3943_v25, 0.0  ;;  %5081 = vmatmul.mubr.bf16.gmra.mrb[200].mxu0 %v9812_v41  ;;  %v8368_v25 = vld [vmem:[#allocation2 + $0x654] ss:$8 sps:$4 sm:$0xff]  }
 0x53e   : > { %v4122_v14 = vmax.f32 %v3945_v30, 0.0  ;;  %5090 = vmatprep.mubr.bf16.mxu0 %v9834_v6  ;;  %6521 = vmatprep.subr.bf16.mxu0 %v8368_v25 }
 0x53f   : > { %v9902_v60 = vpack.c.bf16 %v4121_v4, %v4119_v7  ;;  %v9913_v7 = vpop.f32.mrb[50].mxu1  ;;  %6522 = vmatpush1.bf16.msra.mxu0 %v8366_v9 }
 0x540   : > { %v3948_v43 = vpop.f32.mrb[96].mxu0  ;;  %v9906_v24 = vpack.c.bf16 %v4122_v14, %v4120_v37  ;;  %11081 = vst [vmem:[#allocation22_spill] sm:$0xff] %v9913_v7  ;;  %v9916_v14 = vpop.f32.mrb[51].mxu1 }
 0x541   : > { %v3949_v10 = vadd.f32 %v3948_v43, %v9498_v29  ;;  %v3950_v32 = vpop.f32.mrb[97].mxu0  ;;  %11082 = vst [vmem:[#allocation23_spill] sm:$0xff] %v9916_v14 }
 0x542   : > { %v3951_v41 = vadd.f32 %v3950_v32, %v9502_v5  ;;  %v3952_v18 = vpop.f32.mrb[98].mxu0 }
 0x543   : > { %v3953_v30 = vadd.f32 %v3952_v18, %v9498_v29  ;;  %v3954_v6 = vpop.f32.mrb[99].mxu0  ;;  %v4123_v37 = vmax.f32 %v3949_v10, 0.0  ;;  %v9922_v18 = vpop.f32.mrb[52].mxu1 }
 0x544   : > { %v3955_v4 = vadd.f32 %v3954_v6, %v9502_v5  ;;  %v4124_v43 = vmax.f32 %v3951_v41, 0.0  ;;  %11083 = vst [vmem:[#allocation24_spill] sm:$0xff] %v9922_v18  ;;  %v9926_v7 = vpop.f32.mrb[53].mxu1 }
 0x545   : > { %v4125_v56 = vmax.f32 %v3953_v30, 0.0  ;;  %5091 = vmatmul.mubr.bf16.gmra.mrb[204].mxu0 %v9830_v61  ;;  %11084 = vst [vmem:[#allocation25_spill] sm:$0xff] %v9926_v7 }
 0x546   : > { %v4126_v49 = vmax.f32 %v3955_v4, 0.0  ;;  %5100 = vmatprep.mubr.bf16.mxu0 %v9852_v0  ;;  %v9931_v4 = vpop.f32.mrb[54].mxu1 }
 0x547   : > { %v9920_v32 = vpack.c.bf16 %v4125_v56, %v4123_v37  ;;  %11085 = vst [vmem:[#allocation26_spill] sm:$0xff] %v9931_v4  ;;  %v9934_v56 = vpop.f32.mrb[55].mxu1 }
 0x548   : > { %v3958_v25 = vpop.f32.mrb[100].mxu0  ;;  %v9924_v36 = vpack.c.bf16 %v4126_v49, %v4124_v43  ;;  %11086 = vst [vmem:[#allocation27_spill] sm:$0xff] %v9934_v56 }
 0x549   : > { %v3959_v9 = vadd.f32 %v3958_v25, %v9498_v29  ;;  %v3960_v6 = vpop.f32.mrb[101].mxu0 }
 0x54a   : > { %v3961_v10 = vadd.f32 %v3960_v6, %v9502_v5  ;;  %v3962_v30 = vpop.f32.mrb[102].mxu0  ;;  %v9940_v6 = vpop.f32.mrb[56].mxu1 }
 0x54b   : > { %v3963_v61 = vadd.f32 %v3962_v30, %v9498_v29  ;;  %v3964_v41 = vpop.f32.mrb[103].mxu0  ;;  %v4127_v37 = vmax.f32 %v3959_v9, 0.0  ;;  %11087 = vst [vmem:[#allocation28_spill] sm:$0xff] %v9940_v6  ;;  %v9944_v4 = vpop.f32.mrb[57].mxu1  ;;  %v8369_v9 = vld [vmem:[#allocation2 + $0x660] ss:$8 sps:$4 sm:$0xff]  }
 0x54c   : > { %v3965_v0 = vadd.f32 %v3964_v41, %v9502_v5  ;;  %v4128_v43 = vmax.f32 %v3961_v10, 0.0  ;;  %11088 = vst [vmem:[#allocation29_spill] sm:$0xff] %v9944_v4 }
 0x54d   : > { %v4129_v49 = vmax.f32 %v3963_v61, 0.0  ;;  %5101 = vmatmul.mubr.bf16.gmra.mrb[208].mxu0 %v9848_v58  ;;  %v8371_v61 = vld [vmem:[#allocation2 + $0x664] ss:$8 sps:$4 sm:$0xff]  }
 0x54e   : > { %v4130_v7 = vmax.f32 %v3965_v0, 0.0  ;;  %5110 = vmatprep.mubr.bf16.mxu0 %v9870_v26  ;;  %6523 = vmatprep.subr.bf16.mxu0 %v8371_v61 }
 0x54f   : > { %v9938_v25 = vpack.c.bf16 %v4129_v49, %v4127_v37  ;;  %v9949_v37 = vpop.f32.mrb[58].mxu1  ;;  %6524 = vmatpush1.bf16.msra.mxu0 %v8369_v9 }
 0x550   : > { %v3968_v30 = vpop.f32.mrb[104].mxu0  ;;  %v9942_v18 = vpack.c.bf16 %v4130_v7, %v4128_v43  ;;  %11089 = vst [vmem:[#allocation30_spill] sm:$0xff] %v9949_v37  ;;  %v9952_v7 = vpop.f32.mrb[59].mxu1 }
 0x551   : > { %v3969_v41 = vadd.f32 %v3968_v30, %v9498_v29  ;;  %v3970_v56 = vpop.f32.mrb[105].mxu0  ;;  %11090 = vst [vmem:[#allocation31_spill] sm:$0xff] %v9952_v7 }
 0x552   : > { %v3971_v58 = vadd.f32 %v3970_v56, %v9502_v5  ;;  %v3972_v10 = vpop.f32.mrb[106].mxu0 }
 0x553   : > { %v3973_v0 = vadd.f32 %v3972_v10, %v9498_v29  ;;  %v3974_v26 = vpop.f32.mrb[107].mxu0  ;;  %v4131_v43 = vmax.f32 %v3969_v41, 0.0  ;;  %v9958_v10 = vpop.f32.mrb[60].mxu1 }
 0x554   : > { %v3975_v49 = vadd.f32 %v3974_v26, %v9502_v5  ;;  %v4132_v30 = vmax.f32 %v3971_v58, 0.0  ;;  %11091 = vst [vmem:[#allocation32_spill] sm:$0xff] %v9958_v10  ;;  %v9962_v37 = vpop.f32.mrb[61].mxu1 }
 0x555   : > { %v4133_v4 = vmax.f32 %v3973_v0, 0.0  ;;  %5111 = vmatmul.mubr.bf16.gmra.mrb[212].mxu0 %v9866_v28  ;;  %11092 = vst [vmem:[#allocation33_spill] sm:$0xff] %v9962_v37 }
 0x556   : > { %v4134_v6 = vmax.f32 %v3975_v49, 0.0  ;;  %5120 = vmatprep.mubr.bf16.mxu0 %v9888_v45  ;;  %v9967_v49 = vpop.f32.mrb[62].mxu1 }
 0x557   : > { %v9956_v56 = vpack.c.bf16 %v4133_v4, %v4131_v43  ;;  %11093 = vst [vmem:[#allocation34_spill] sm:$0xff] %v9967_v49  ;;  %v9970_v4 = vpop.f32.mrb[63].mxu1 }
 0x558   : > { %v3978_v61 = vpop.f32.mrb[108].mxu0  ;;  %v9960_v14 = vpack.c.bf16 %v4134_v6, %v4132_v30  ;;  %11094 = vst [vmem:[#allocation35_spill] sm:$0xff] %v9970_v4 }
 0x559   : > { %v3979_v9 = vadd.f32 %v3978_v61, %v9498_v29  ;;  %v3980_v26 = vpop.f32.mrb[109].mxu0 }
 0x55a   : > { %v3981_v41 = vadd.f32 %v3980_v26, %v9502_v5  ;;  %v3982_v0 = vpop.f32.mrb[110].mxu0  ;;  %v9976_v26 = vpop.f32.mrb[64].mxu1 }
 0x55b   : > { %v3983_v28 = vadd.f32 %v3982_v0, %v9498_v29  ;;  %v3984_v58 = vpop.f32.mrb[111].mxu0  ;;  %v4135_v43 = vmax.f32 %v3979_v9, 0.0  ;;  %11095 = vst [vmem:[#allocation36_spill] sm:$0xff] %v9976_v26  ;;  %v9980_v49 = vpop.f32.mrb[65].mxu1  ;;  %v8372_v9 = vld [vmem:[#allocation2 + $0x670] ss:$8 sps:$4 sm:$0xff]  }
 0x55c   : > { %v3985_v45 = vadd.f32 %v3984_v58, %v9502_v5  ;;  %v4136_v30 = vmax.f32 %v3981_v41, 0.0  ;;  %11096 = vst [vmem:[#allocation37_spill] sm:$0xff] %v9980_v49 }
 0x55d   : > { %v4137_v6 = vmax.f32 %v3983_v28, 0.0  ;;  %5121 = vmatmul.mubr.bf16.gmra.mrb[216].mxu0 %v9884_v53  ;;  %v8374_v28 = vld [vmem:[#allocation2 + $0x674] ss:$8 sps:$4 sm:$0xff]  }
 0x55e   : > { %v4138_v37 = vmax.f32 %v3985_v45, 0.0  ;;  %5130 = vmatprep.mubr.bf16.mxu0 %v9906_v24  ;;  %6525 = vmatprep.subr.bf16.mxu0 %v8374_v28 }
 0x55f   : > { %v9974_v61 = vpack.c.bf16 %v4137_v6, %v4135_v43  ;;  %v9985_v43 = vpop.f32.mrb[66].mxu1  ;;  %6526 = vmatpush1.bf16.msra.mxu0 %v8372_v9 }
 0x560   : > { %v3988_v0 = vpop.f32.mrb[112].mxu0  ;;  %v9978_v10 = vpack.c.bf16 %v4138_v37, %v4136_v30  ;;  %11097 = vst [vmem:[#allocation38_spill] sm:$0xff] %v9985_v43  ;;  %v9988_v37 = vpop.f32.mrb[67].mxu1 }
 0x561   : > { %v3989_v58 = vadd.f32 %v3988_v0, %v9498_v29  ;;  %v3990_v4 = vpop.f32.mrb[113].mxu0  ;;  %11098 = vst [vmem:[#allocation39_spill] sm:$0xff] %v9988_v37 }
 0x562   : > { %v3991_v53 = vadd.f32 %v3990_v4, %v9502_v5  ;;  %v3992_v41 = vpop.f32.mrb[114].mxu0 }
 0x563   : > { %v3993_v45 = vadd.f32 %v3992_v41, %v9498_v29  ;;  %v3994_v24 = vpop.f32.mrb[115].mxu0  ;;  %v4139_v30 = vmax.f32 %v3989_v58, 0.0  ;;  %v9994_v41 = vpop.f32.mrb[68].mxu1 }
 0x564   : > { %v3995_v6 = vadd.f32 %v3994_v24, %v9502_v5  ;;  %v4140_v0 = vmax.f32 %v3991_v53, 0.0  ;;  %11099 = vst [vmem:[#allocation40_spill] sm:$0xff] %v9994_v41  ;;  %v9998_v43 = vpop.f32.mrb[69].mxu1 }
 0x565   : > { %v4141_v49 = vmax.f32 %v3993_v45, 0.0  ;;  %5131 = vmatmul.mubr.bf16.gmra.mrb[220].mxu0 %v9902_v60  ;;  %11100 = vst [vmem:[#allocation41_spill] sm:$0xff] %v9998_v43 }
 0x566   : > { %v4142_v26 = vmax.f32 %v3995_v6, 0.0  ;;  %5140 = vmatprep.mubr.bf16.mxu0 %v9924_v36  ;;  %v10003_v6 = vpop.f32.mrb[70].mxu1 }
 0x567   : > { %v9992_v4 = vpack.c.bf16 %v4141_v49, %v4139_v30  ;;  %11101 = vst [vmem:[#allocation42_spill] sm:$0xff] %v10003_v6  ;;  %v10006_v49 = vpop.f32.mrb[71].mxu1 }
 0x568   : > { %v3998_v28 = vpop.f32.mrb[116].mxu0  ;;  %v9996_v7 = vpack.c.bf16 %v4142_v26, %v4140_v0  ;;  %11102 = vst [vmem:[#allocation43_spill] sm:$0xff] %v10006_v49 }
 0x569   : > { %v3999_v9 = vadd.f32 %v3998_v28, %v9498_v29  ;;  %v4000_v24 = vpop.f32.mrb[117].mxu0 }
 0x56a   : > { %v4001_v58 = vadd.f32 %v4000_v24, %v9502_v5  ;;  %v4002_v45 = vpop.f32.mrb[118].mxu0  ;;  %v10012_v24 = vpop.f32.mrb[72].mxu1 }
 0x56b   : > { %v4003_v60 = vadd.f32 %v4002_v45, %v9498_v29  ;;  %v4004_v53 = vpop.f32.mrb[119].mxu0  ;;  %v4143_v30 = vmax.f32 %v3999_v9, 0.0  ;;  %11103 = vst [vmem:[#allocation44_spill] sm:$0xff] %v10012_v24  ;;  %v10016_v6 = vpop.f32.mrb[73].mxu1  ;;  %v8375_v9 = vld [vmem:[#allocation2 + $0x680] ss:$8 sps:$4 sm:$0xff]  }
 0x56c   : > { %v4005_v36 = vadd.f32 %v4004_v53, %v9502_v5  ;;  %v4144_v0 = vmax.f32 %v4001_v58, 0.0  ;;  %11104 = vst [vmem:[#allocation45_spill] sm:$0xff] %v10016_v6 }
 0x56d   : > { %v4145_v26 = vmax.f32 %v4003_v60, 0.0  ;;  %5141 = vmatmul.mubr.bf16.gmra.mrb[224].mxu0 %v9920_v32  ;;  %v8377_v60 = vld [vmem:[#allocation2 + $0x684] ss:$8 sps:$4 sm:$0xff]  }
 0x56e   : > { %v4146_v43 = vmax.f32 %v4005_v36, 0.0  ;;  %5150 = vmatprep.mubr.bf16.mxu0 %v9942_v18  ;;  %6527 = vmatprep.subr.bf16.mxu0 %v8377_v60 }
 0x56f   : > { %v10010_v28 = vpack.c.bf16 %v4145_v26, %v4143_v30  ;;  %v10021_v30 = vpop.f32.mrb[74].mxu1  ;;  %6528 = vmatpush1.bf16.msra.mxu0 %v8375_v9 }
 0x570   : > { %v4008_v45 = vpop.f32.mrb[120].mxu0  ;;  %v10014_v41 = vpack.c.bf16 %v4146_v43, %v4144_v0  ;;  %11105 = vst [vmem:[#allocation46_spill] sm:$0xff] %v10021_v30  ;;  %v10024_v43 = vpop.f32.mrb[75].mxu1 }
 0x571   : > { %v4009_v53 = vadd.f32 %v4008_v45, %v9498_v29  ;;  %v4010_v49 = vpop.f32.mrb[121].mxu0 }
 0x572   : > { %v4011_v32 = vadd.f32 %v4010_v49, %v9502_v5  ;;  %v4012_v58 = vpop.f32.mrb[122].mxu0 }
 0x573   : > { %v4013_v36 = vadd.f32 %v4012_v58, %v9498_v29  ;;  %v4014_v18 = vpop.f32.mrb[123].mxu0  ;;  %v4147_v0 = vmax.f32 %v4009_v53, 0.0  ;;  %v10030_v58 = vpop.f32.mrb[76].mxu1 }
 0x574   : > { %v4015_v26 = vadd.f32 %v4014_v18, %v9502_v5  ;;  %v4148_v45 = vmax.f32 %v4011_v32, 0.0  ;;  %v10034_v30 = vpop.f32.mrb[77].mxu1 }
 0x575   : > { %v4149_v6 = vmax.f32 %v4013_v36, 0.0  ;;  %5151 = vmatmul.mubr.bf16.gmra.mrb[228].mxu0 %v9938_v25 }
 0x576   : > { %v4150_v24 = vmax.f32 %v4015_v26, 0.0  ;;  %5160 = vmatprep.mubr.bf16.mxu0 %v9960_v14  ;;  %v10039_v26 = vpop.f32.mrb[78].mxu1 }
 0x577   : > { %v10028_v49 = vpack.c.bf16 %v4149_v6, %v4147_v0  ;;  %11106 = vst [vmem:[#allocation47_spill] sm:$0xff] %v10039_v26  ;;  %v7920_v6 = vld [vmem:[%s11043_s4 + $0xa] sm:$0x3] }
 0x578   : > { %v4018_v60 = vpop.f32.mrb[124].mxu0  ;;  %v10032_v37 = vpack.c.bf16 %v4150_v24, %v4148_v45  ;;  %v10045_v24 = vpop.f32.mrb[79].mxu1  ;;  %v10057_v26 = vrot.slane %v7920_v6, %v8792_v47 }
 0x579   : > { %v4019_v9 = vadd.f32 %v4018_v60, %v9498_v29  ;;  %v4020_v18 = vpop.f32.mrb[125].mxu0  ;;  %11107 = vst [vmem:[#allocation48_spill] sm:$0xff] %v10045_v24 }
 0x57a   : > { %v4021_v53 = vadd.f32 %v4020_v18, %v9502_v5  ;;  %v4022_v36 = vpop.f32.mrb[126].mxu0 }
 0x57b   : > { %v4023_v25 = vadd.f32 %v4022_v36, %v9498_v29  ;;  %v4024_v32 = vpop.f32.mrb[127].mxu0  ;;  %v4151_v0 = vmax.f32 %v4019_v9, 0.0  ;;  %v10052_v36 = vrot.slane %v7920_v6, %v8790_v46 }
 0x57c   : > { %v4025_v14 = vadd.f32 %v4024_v32, %v9502_v5  ;;  %v4152_v60 = vmax.f32 %v4021_v53, 0.0  ;;  %v10054_v5 = vpop.f32.mrb[80].mxu1 }
 0x57d   : > { %v4153_v45 = vmax.f32 %v4023_v25, 0.0  ;;  %5161 = vmatmul.mubr.bf16.gmra.mrb[232].mxu0 %v9956_v56  ;;  %11108 = vst [vmem:[#allocation49_spill] sm:$0xff] %v10054_v5  ;;  %v10061_v9 = vpop.f32.mrb[81].mxu1  ;;  %v8378_v25 = vld [vmem:[#allocation2 + $0x690] ss:$8 sps:$4 sm:$0xff]  }
 0x57e   : > { %v4154_v18 = vmax.f32 %v4025_v14, 0.0  ;;  %5170 = vmatprep.mubr.bf16.mxu0 %v9978_v10  ;;  %v8380_v10 = vld [vmem:[#allocation2 + $0x694] ss:$8 sps:$4 sm:$0xff]   ;;  %v10067_v6 = vpop.f32.mrb[82].mxu1 }
 0x57f   : > { %v10049_v29 = vpack.c.bf16 %v4153_v45, %v4151_v0  ;;  %6529 = vmatprep.subr.bf16.mxu0 %v8380_v10 }
 0x580   : > { %v4902_v32 = vpop.f32.mrb[128].mxu0  ;;  %v10059_v24 = vpack.c.bf16 %v4154_v18, %v4152_v60  ;;  %6530 = vmatpush1.bf16.msra.mxu0 %v8378_v25 }
 0x581   : > { %v4903_v56 = vadd.f32 %v4902_v32, %v9688_v12  ;;  %v4904_v53 = vpop.f32.mrb[129].mxu0  ;;  %v10071_v12 = vpop.f32.mrb[83].mxu1 }
 0x582   : > { %v4905_v14 = vadd.f32 %v4904_v53, %v9692_v17  ;;  %v4906_v0 = vpop.f32.mrb[130].mxu0  ;;  %11109 = vst [vmem:[#allocation50_spill] sm:$0xff] %v10071_v12  ;;  %v10077_v53 = vpop.f32.mrb[84].mxu1 }
 0x583   : > { %v5234_v45 = vadd.f32 %v10052_v36, %v4903_v56  ;;  %v4907_v46 = vadd.f32 %v4906_v0, %v9697_v23  ;;  %v4908_v5 = vpop.f32.mrb[131].mxu0  ;;  %v10079_v47 = vpop.f32.mrb[85].mxu1 }
 0x584   : > { %v5235_v60 = vadd.f32 %v10057_v26, %v4905_v14  ;;  %v4909_v18 = vadd.f32 %v4908_v5, %v9700_v27 }
 0x585   : > { %v5236_v32 = vadd.f32 %v10052_v36, %v4907_v46  ;;  %5171 = vmatmul.mubr.bf16.gmra.mrb[236].mxu0 %v9974_v61  ;;  %v5362_v23 = vmax.f32 %v5234_v45, 0.0 }
 0x586   : > { %v5237_v17 = vadd.f32 %v10057_v26, %v4909_v18  ;;  %5180 = vmatprep.mubr.bf16.mxu0 %v9996_v7  ;;  %v5363_v0 = vmax.f32 %v5235_v60, 0.0 }
 0x587   : > { %v5364_v56 = vmax.f32 %v5236_v32, 0.0  ;;  %v10085_v32 = vpop.f32.mrb[86].mxu1 }
 0x588   : > { %v4912_v10 = vpop.f32.mrb[132].mxu0  ;;  %v5365_v14 = vmax.f32 %v5237_v17, 0.0 }
 0x589   : > { %v5490_v27 = vpack.c.bf16 %v5364_v56, %v5362_v23  ;;  %v4913_v5 = vadd.f32 %v4912_v10, %v9706_v11  ;;  %v4914_v25 = vpop.f32.mrb[133].mxu0  ;;  %v10089_v23 = vpop.f32.mrb[87].mxu1 }
 0x58a   : > { %v4915_v46 = vadd.f32 %v4914_v25, %v9710_v40  ;;  %v4916_v61 = vpop.f32.mrb[134].mxu0  ;;  %v5491_v12 = vpack.c.bf16 %v5365_v14, %v5363_v0  ;;  %v10095_v10 = vpop.f32.mrb[88].mxu1 }
 0x58b   : > { %v5238_v18 = vadd.f32 %v10052_v36, %v4913_v5  ;;  %v4917_v7 = vadd.f32 %v4916_v61, %v9715_v39  ;;  %v4918_v45 = vpop.f32.mrb[135].mxu0  ;;  %v8381_v61 = vld [vmem:[#allocation2 + $0x6a0] ss:$8 sps:$4 sm:$0xff]  }
 0x58c   : > { %v5239_v60 = vadd.f32 %v10057_v26, %v4915_v46  ;;  %v4919_v17 = vadd.f32 %v4918_v45, %v9718_v42  ;;  %5792 = vmatprep.mubr.bf16.mxu1 %v5491_v12  ;;  %v10097_v42 = vpop.f32.mrb[89].mxu1 }
 0x58d   : > { %v5240_v11 = vadd.f32 %v10052_v36, %v4917_v7  ;;  %5181 = vmatmul.mubr.bf16.gmra.mrb[240].mxu0 %v9992_v4  ;;  %5793 = vmatmul.mubr.bf16.vlgmr.msra.gmra.mrb[128].mxu1 %v5490_v27  ;;  %v5366_v39 = vmax.f32 %v5238_v18, 0.0  ;;  %v8383_v4 = vld [vmem:[#allocation2 + $0x6a4] ss:$8 sps:$4 sm:$0xff]  }
 0x58e   : > { %v5241_v40 = vadd.f32 %v10057_v26, %v4919_v17  ;;  %5190 = vmatprep.mubr.bf16.mxu0 %v10014_v41  ;;  %v5367_v14 = vmax.f32 %v5239_v60, 0.0  ;;  %6531 = vmatprep.subr.bf16.mxu0 %v8383_v4  ;;  %v10103_v60 = vpop.f32.mrb[90].mxu1 }
 0x58f   : > { %v5368_v56 = vmax.f32 %v5240_v11, 0.0  ;;  %6532 = vmatpush1.bf16.msra.mxu0 %v8381_v61 }
 0x590   : > { %v4922_v0 = vpop.f32.mrb[136].mxu0  ;;  %v5369_v5 = vmax.f32 %v5241_v40, 0.0 }
 0x591   : > { %v5492_v12 = vpack.c.bf16 %v5368_v56, %v5366_v39  ;;  %v4923_v25 = vadd.f32 %v4922_v0, %v9726_v57  ;;  %v4924_v46 = vpop.f32.mrb[137].mxu0  ;;  %v10107_v57 = vpop.f32.mrb[91].mxu1 }
 0x592   : > { %v4925_v27 = vadd.f32 %v4924_v46, %v9729_v22  ;;  %v4926_v7 = vpop.f32.mrb[138].mxu0  ;;  %v5493_v45 = vpack.c.bf16 %v5369_v5, %v5367_v14  ;;  %v10113_v0 = vpop.f32.mrb[92].mxu1 }
 0x593   : > { %v5242_v41 = vadd.f32 %v10052_v36, %v4923_v25  ;;  %v4927_v18 = vadd.f32 %v4926_v7, %v9733_v1  ;;  %v4928_v17 = vpop.f32.mrb[139].mxu0  ;;  %v10115_v25 = vpop.f32.mrb[93].mxu1 }
 0x594   : > { %v5243_v11 = vadd.f32 %v10057_v26, %v4925_v27  ;;  %v4929_v40 = vadd.f32 %v4928_v17, %v9736_v48  ;;  %5802 = vmatprep.mubr.bf16.mxu1 %v5493_v45 }
 0x595   : > { %v5244_v22 = vadd.f32 %v10052_v36, %v4927_v18  ;;  %5191 = vmatmul.mubr.bf16.gmra.mrb[244].mxu0 %v10010_v28  ;;  %5803 = vmatmul.mubr.bf16.gmra.mrb[132].mxu1 %v5492_v12  ;;  %v5370_v1 = vmax.f32 %v5242_v41, 0.0  ;;  %v10121_v41 = vpop.f32.mrb[94].mxu1 }
 0x596   : > { %v5245_v39 = vadd.f32 %v10057_v26, %v4929_v40  ;;  %5200 = vmatprep.mubr.bf16.mxu0 %v10032_v37  ;;  %v5371_v5 = vmax.f32 %v5243_v11, 0.0  ;;  %v10125_v11 = vpop.f32.mrb[95].mxu1 }
 0x597   : > { %v5372_v56 = vmax.f32 %v5244_v22, 0.0  ;;  %v10131_v22 = vpop.f32.mrb[96].mxu1 }
 0x598   : > { %v4932_v14 = vpop.f32.mrb[140].mxu0  ;;  %v5373_v48 = vmax.f32 %v5245_v39, 0.0 }
 0x599   : > { %v5494_v46 = vpack.c.bf16 %v5372_v56, %v5370_v1  ;;  %v4933_v61 = vadd.f32 %v4932_v14, %v9742_v8  ;;  %v4934_v4 = vpop.f32.mrb[141].mxu0 }
 0x59a   : > { %v4935_v28 = vadd.f32 %v4934_v4, %v9746_v3  ;;  %v4936_v12 = vpop.f32.mrb[142].mxu0  ;;  %v5495_v27 = vpack.c.bf16 %v5373_v48, %v5371_v5 }
 0x59b   : > { %v5246_v7 = vadd.f32 %v10052_v36, %v4933_v61  ;;  %v4937_v37 = vadd.f32 %v4936_v12, %v9751_v31  ;;  %v4938_v45 = vpop.f32.mrb[143].mxu0  ;;  %v8384_v61 = vld [vmem:[#allocation2 + $0x6b0] ss:$8 sps:$4 sm:$0xff]  }
 0x59c   : > { %v5247_v18 = vadd.f32 %v10057_v26, %v4935_v28  ;;  %v4939_v17 = vadd.f32 %v4938_v45, %v9754_v63  ;;  %5812 = vmatprep.mubr.bf16.mxu1 %v5495_v27  ;;  %v10133_v63 = vpop.f32.mrb[97].mxu1 }
 0x59d   : > { %v5248_v8 = vadd.f32 %v10052_v36, %v4937_v37  ;;  %5201 = vmatmul.mubr.bf16.gmra.mrb[248].mxu0 %v10028_v49  ;;  %5813 = vmatmul.mubr.bf16.gmra.mrb[136].mxu1 %v5494_v46  ;;  %v5374_v31 = vmax.f32 %v5246_v7, 0.0  ;;  %v8386_v49 = vld [vmem:[#allocation2 + $0x6b4] ss:$8 sps:$4 sm:$0xff]   ;;  %v10139_v7 = vpop.f32.mrb[98].mxu1 }
 0x59e   : > { %v5249_v3 = vadd.f32 %v10057_v26, %v4939_v17  ;;  %5210 = vmatprep.mubr.bf16.mxu0 %v10059_v24  ;;  %v5375_v39 = vmax.f32 %v5247_v18, 0.0  ;;  %6533 = vmatprep.subr.bf16.mxu0 %v8386_v49 }
 0x59f   : > { %v5376_v40 = vmax.f32 %v5248_v8, 0.0  ;;  %6534 = vmatpush1.bf16.msra.mxu0 %v8384_v61 }
 0x5a0   : > { %v5377_v1 = vmax.f32 %v5249_v3, 0.0  ;;  %v4942_v56 = vpop.f32.mrb[144].mxu0 }
 0x5a1   : > { %v5496_v14 = vpack.c.bf16 %v5376_v40, %v5374_v31  ;;  %v4943_v5 = vadd.f32 %v4942_v56, %v9762_v50  ;;  %v4944_v48 = vpop.f32.mrb[145].mxu0  ;;  %v10143_v50 = vpop.f32.mrb[99].mxu1 }
 0x5a2   : > { %v4945_v46 = vadd.f32 %v4944_v48, %v9765_v15  ;;  %v4946_v4 = vpop.f32.mrb[146].mxu0  ;;  %v5497_v28 = vpack.c.bf16 %v5377_v1, %v5375_v39  ;;  %v10148_v8 = vpop.f32.mrb[100].mxu1 }
 0x5a3   : > { %v5250_v24 = vadd.f32 %v10052_v36, %v4943_v5  ;;  %v4947_v12 = vadd.f32 %v4946_v4, %v9769_v59  ;;  %v4948_v27 = vpop.f32.mrb[147].mxu0  ;;  %v10150_v39 = vpop.f32.mrb[101].mxu1 }
 0x5a4   : > { %v5251_v37 = vadd.f32 %v10057_v26, %v4945_v46  ;;  %v4949_v45 = vadd.f32 %v4948_v27, %v9772_v38  ;;  %5822 = vmatprep.mubr.bf16.mxu1 %v5497_v28  ;;  %v10156_v46 = vpop.f32.mrb[102].mxu1 }
 0x5a5   : > { %v5252_v15 = vadd.f32 %v10052_v36, %v4947_v12  ;;  %5211 = vmatmul.mubr.bf16.gmra.mrb[252].mxu0 %v10049_v29  ;;  %5823 = vmatmul.mubr.bf16.gmra.mrb[140].mxu1 %v5496_v14  ;;  %v5378_v59 = vmax.f32 %v5250_v24, 0.0  ;;  %v10160_v24 = vpop.f32.mrb[103].mxu1 }
 0x5a6   : > { %v5253_v18 = vadd.f32 %v10057_v26, %v4949_v45  ;;  %v5379_v3 = vmax.f32 %v5251_v37, 0.0  ;;  %v10164_v37 = vpop.f32.mrb[104].mxu1 }
 0x5a7   : > { %v5380_v17 = vmax.f32 %v5252_v15, 0.0 }
 0x5a8   : > { %v5381_v31 = vmax.f32 %v5253_v18, 0.0  ;;  %v4952_v40 = vpop.f32.mrb[148].mxu0  ;;  %v10166_v18 = vpop.f32.mrb[105].mxu1 }
 0x5a9   : > { %v5498_v38 = vpack.c.bf16 %v5380_v17, %v5378_v59  ;;  %v4953_v1 = vadd.f32 %v4952_v40, %v9778_v16  ;;  %v4954_v56 = vpop.f32.mrb[149].mxu0 }
 0x5aa   : > { %v4955_v5 = vadd.f32 %v4954_v56, %v9782_v21  ;;  %v4956_v48 = vpop.f32.mrb[150].mxu0  ;;  %v5499_v29 = vpack.c.bf16 %v5381_v31, %v5379_v3  ;;  %v8387_v3 = vld [vmem:[#allocation2 + $0x6c0] ss:$8 sps:$4 sm:$0xff]   ;;  %v8389_v31 = vld [vmem:[#allocation2 + $0x6c4] ss:$8 sps:$4 sm:$0xff]  }
 0x5ab   : > { %v5254_v14 = vadd.f32 %v10052_v36, %v4953_v1  ;;  %v4957_v61 = vadd.f32 %v4956_v48, %v9787_v55  ;;  %v4958_v49 = vpop.f32.mrb[151].mxu0  ;;  %6535 = vmatprep.subr.bf16.mxu0 %v8389_v31 }
 0x5ac   : > { %v5255_v4 = vadd.f32 %v10057_v26, %v4955_v5  ;;  %v4959_v28 = vadd.f32 %v4958_v49, %v9790_v34  ;;  %5832 = vmatprep.mubr.bf16.mxu1 %v5499_v29  ;;  %v10172_v29 = vpop.f32.mrb[106].mxu1  ;;  %6536 = vmatpush1.bf16.msra.mxu0 %v8387_v3 }
 0x5ad   : > { %v5256_v16 = vadd.f32 %v10052_v36, %v4957_v61  ;;  %5833 = vmatmul.mubr.bf16.gmra.mrb[144].mxu1 %v5498_v38  ;;  %v5382_v12 = vmax.f32 %v5254_v14, 0.0 }
 0x5ae   : > { %v5257_v21 = vadd.f32 %v10057_v26, %v4959_v28  ;;  %v5383_v55 = vmax.f32 %v5255_v4, 0.0 }
 0x5af   : > { %v5384_v27 = vmax.f32 %v5256_v16, 0.0 }
 0x5b0   : > { %v5385_v45 = vmax.f32 %v5257_v21, 0.0  ;;  %v4962_v15 = vpop.f32.mrb[152].mxu0 }
 0x5b1   : > { %v5500_v59 = vpack.c.bf16 %v5384_v27, %v5382_v12  ;;  %v4963_v34 = vadd.f32 %v4962_v15, %v9796_v44  ;;  %v4964_v17 = vpop.f32.mrb[153].mxu0  ;;  %v10176_v44 = vpop.f32.mrb[107].mxu1 }
 0x5b2   : > { %v4965_v40 = vadd.f32 %v4964_v17, %v9800_v19  ;;  %v4966_v38 = vpop.f32.mrb[154].mxu0  ;;  %v5501_v1 = vpack.c.bf16 %v5385_v45, %v5383_v55 }
 0x5b3   : > { %v5258_v56 = vadd.f32 %v10052_v36, %v4963_v34  ;;  %v4967_v5 = vadd.f32 %v4966_v38, %v9805_v62  ;;  %v4968_v48 = vpop.f32.mrb[155].mxu0  ;;  %v10180_v62 = vpop.f32.mrb[108].mxu1 }
 0x5b4   : > { %v5259_v14 = vadd.f32 %v10057_v26, %v4965_v40  ;;  %v4969_v61 = vadd.f32 %v4968_v48, %v9808_v2  ;;  %5842 = vmatprep.mubr.bf16.mxu1 %v5501_v1  ;;  %v10182_v27 = vpop.f32.mrb[109].mxu1 }
 0x5b5   : > { %v5260_v19 = vadd.f32 %v10052_v36, %v4967_v5  ;;  %5843 = vmatmul.mubr.bf16.gmra.mrb[148].mxu1 %v5500_v59  ;;  %v5386_v4 = vmax.f32 %v5258_v56, 0.0  ;;  %v10188_v40 = vpop.f32.mrb[110].mxu1 }
 0x5b6   : > { %v5261_v49 = vadd.f32 %v10057_v26, %v4969_v61  ;;  %v5387_v16 = vmax.f32 %v5259_v14, 0.0  ;;  %v10192_v56 = vpop.f32.mrb[111].mxu1 }
 0x5b7   : > { %v5388_v28 = vmax.f32 %v5260_v19, 0.0  ;;  %v10196_v14 = vpop.f32.mrb[112].mxu1 }
 0x5b8   : > { %v5389_v21 = vmax.f32 %v5261_v49, 0.0  ;;  %v4972_v12 = vpop.f32.mrb[156].mxu0  ;;  %v10198_v49 = vpop.f32.mrb[113].mxu1 }
 0x5b9   : > { %v5502_v55 = vpack.c.bf16 %v5388_v28, %v5386_v4  ;;  %v4973_v2 = vadd.f32 %v4972_v12, %v9814_v35  ;;  %v4974_v45 = vpop.f32.mrb[157].mxu0 }
 0x5ba   : > { %v4975_v15 = vadd.f32 %v4974_v45, %v9818_v33  ;;  %v4976_v34 = vpop.f32.mrb[158].mxu0  ;;  %v5503_v17 = vpack.c.bf16 %v5389_v21, %v5387_v16  ;;  %v8390_v16 = vld [vmem:[#allocation2 + $0x6d0] ss:$8 sps:$4 sm:$0xff]   ;;  %v8392_v21 = vld [vmem:[#allocation2 + $0x6d4] ss:$8 sps:$4 sm:$0xff]  }
 0x5bb   : > { %v5262_v59 = vadd.f32 %v10052_v36, %v4973_v2  ;;  %v4977_v3 = vadd.f32 %v4976_v34, %v9823_v52  ;;  %v4978_v31 = vpop.f32.mrb[159].mxu0  ;;  %6537 = vmatprep.subr.bf16.mxu0 %v8392_v21 }
 0x5bc   : > { %v5263_v38 = vadd.f32 %v10057_v26, %v4975_v15  ;;  %v4979_v1 = vadd.f32 %v4978_v31, %v9826_v51  ;;  %5852 = vmatprep.mubr.bf16.mxu1 %v5503_v17  ;;  %v10204_v17 = vpop.f32.mrb[114].mxu1  ;;  %6538 = vmatpush1.bf16.msra.mxu0 %v8390_v16  ;;  %v11113_v16 = vld [vmem:[#allocation9_spill] sm:$0xff] }
 0x5bd   : > { %v5264_v35 = vadd.f32 %v10052_v36, %v4977_v3  ;;  %5853 = vmatmul.mubr.bf16.gmra.mrb[152].mxu1 %v5502_v55  ;;  %v5390_v5 = vmax.f32 %v5262_v59, 0.0  ;;  %v11110_v3 = vld [vmem:[#allocation7_spill] sm:$0xff] }
 0x5be   : > { %v5265_v33 = vadd.f32 %v10057_v26, %v4979_v1  ;;  %v5391_v52 = vmax.f32 %v5263_v38, 0.0 }
 0x5bf   : > { %v5392_v48 = vmax.f32 %v5264_v35, 0.0 }
 0x5c0   : > { %v5393_v61 = vmax.f32 %v5265_v33, 0.0  ;;  %v4982_v19 = vpop.f32.mrb[160].mxu0 }
 0x5c1   : > { %v5504_v4 = vpack.c.bf16 %v5392_v48, %v5390_v5  ;;  %v4983_v51 = vadd.f32 %v4982_v19, %v9832_v54  ;;  %v4984_v28 = vpop.f32.mrb[161].mxu0  ;;  %v10208_v54 = vpop.f32.mrb[115].mxu1  ;;  %v11112_v19 = vld [vmem:[#allocation8_spill] sm:$0xff] }
 0x5c2   : > { %v4985_v12 = vadd.f32 %v4984_v28, %v9836_v13  ;;  %v4986_v55 = vpop.f32.mrb[162].mxu0  ;;  %v5505_v2 = vpack.c.bf16 %v5393_v61, %v5391_v52 }
 0x5c3   : > { %v5266_v45 = vadd.f32 %v10052_v36, %v4983_v51  ;;  %v4987_v15 = vadd.f32 %v4986_v55, %v9841_v20  ;;  %v4988_v34 = vpop.f32.mrb[163].mxu0  ;;  %v10212_v20 = vpop.f32.mrb[116].mxu1 }
 0x5c4   : > { %v5267_v59 = vadd.f32 %v10057_v26, %v4985_v12  ;;  %v4989_v31 = vadd.f32 %v4988_v34, %v11110_v3  ;;  %5862 = vmatprep.mubr.bf16.mxu1 %v5505_v2  ;;  %v10214_v52 = vpop.f32.mrb[117].mxu1  ;;  %v11114_v2 = vld [vmem:[#allocation10_spill] sm:$0xff]  ;;  %v11116_v3 = vld [vmem:[#allocation11_spill] sm:$0xff] }
 0x5c5   : > { %v5268_v13 = vadd.f32 %v10052_v36, %v4987_v15  ;;  %5863 = vmatmul.mubr.bf16.gmra.mrb[156].mxu1 %v5504_v4  ;;  %v5394_v1 = vmax.f32 %v5266_v45, 0.0  ;;  %11111 = vst [vmem:[#allocation7_spill] sm:$0xff] %v10214_v52  ;;  %v10220_v34 = vpop.f32.mrb[118].mxu1 }
 0x5c6   : > { %v5269_v38 = vadd.f32 %v10057_v26, %v4989_v31  ;;  %v5395_v33 = vmax.f32 %v5267_v59, 0.0  ;;  %11115 = vst [vmem:[#allocation8_spill] sm:$0xff] %v10220_v34 }
 0x5c7   : > { %v5396_v35 = vmax.f32 %v5268_v13, 0.0  ;;  %v10224_v13 = vpop.f32.mrb[119].mxu1 }
 0x5c8   : > { %v5397_v5 = vmax.f32 %v5269_v38, 0.0  ;;  %v4992_v48 = vpop.f32.mrb[164].mxu0  ;;  %11117 = vst [vmem:[#allocation9_spill] sm:$0xff] %v10224_v13 }
 0x5c9   : > { %v5506_v61 = vpack.c.bf16 %v5396_v35, %v5394_v1  ;;  %v4993_v51 = vadd.f32 %v4992_v48, %v11112_v19  ;;  %v4994_v28 = vpop.f32.mrb[165].mxu0 }
 0x5ca   : > { %v4995_v21 = vadd.f32 %v4994_v28, %v11113_v16  ;;  %v4996_v12 = vpop.f32.mrb[166].mxu0  ;;  %v5507_v55 = vpack.c.bf16 %v5397_v5, %v5395_v33  ;;  %v10228_v5 = vpop.f32.mrb[120].mxu1 }
 0x5cb   : > { %v5270_v4 = vadd.f32 %v10052_v36, %v4993_v51  ;;  %v4997_v45 = vadd.f32 %v4996_v12, %v11114_v2  ;;  %v4998_v15 = vpop.f32.mrb[167].mxu0  ;;  %11118 = vst [vmem:[#allocation10_spill] sm:$0xff] %v10228_v5  ;;  %v10230_v28 = vpop.f32.mrb[121].mxu1  ;;  %v8393_v2 = vld [vmem:[#allocation2 + $0x6e0] ss:$8 sps:$4 sm:$0xff]  }
 0x5cc   : > { %v5271_v59 = vadd.f32 %v10057_v26, %v4995_v21  ;;  %v4999_v31 = vadd.f32 %v4998_v15, %v11116_v3  ;;  %5872 = vmatprep.mubr.bf16.mxu1 %v5507_v55  ;;  %11119 = vst [vmem:[#allocation11_spill] sm:$0xff] %v10230_v28  ;;  %v11120_v21 = vld [vmem:[#allocation12_spill] sm:$0xff]  ;;  %v8395_v15 = vld [vmem:[#allocation2 + $0x6e4] ss:$8 sps:$4 sm:$0xff]  }
 0x5cd   : > { %v5272_v38 = vadd.f32 %v10052_v36, %v4997_v45  ;;  %5873 = vmatmul.mubr.bf16.gmra.mrb[160].mxu1 %v5506_v61  ;;  %v5398_v35 = vmax.f32 %v5270_v4, 0.0  ;;  %v11121_v3 = vld [vmem:[#allocation13_spill] sm:$0xff]  ;;  %6539 = vmatprep.subr.bf16.mxu0 %v8395_v15 }
 0x5ce   : > { %v5273_v1 = vadd.f32 %v10057_v26, %v4999_v31  ;;  %v5399_v48 = vmax.f32 %v5271_v59, 0.0  ;;  %v11122_v31 = vld [vmem:[#allocation14_spill] sm:$0xff]  ;;  %v10236_v59 = vpop.f32.mrb[122].mxu1  ;;  %6540 = vmatpush1.bf16.msra.mxu0 %v8393_v2 }
 0x5cf   : > { %v5400_v33 = vmax.f32 %v5272_v38, 0.0  ;;  %11123 = vst [vmem:[#allocation12_spill] sm:$0xff] %v10236_v59 }
 0x5d0   : > { %v5401_v19 = vmax.f32 %v5273_v1, 0.0  ;;  %v5002_v51 = vpop.f32.mrb[168].mxu0 }
 0x5d1   : > { %v5508_v16 = vpack.c.bf16 %v5400_v33, %v5398_v35  ;;  %v5003_v12 = vadd.f32 %v5002_v51, %v11120_v21  ;;  %v5004_v55 = vpop.f32.mrb[169].mxu0  ;;  %v11124_v35 = vld [vmem:[#allocation15_spill] sm:$0xff]  ;;  %v10240_v51 = vpop.f32.mrb[123].mxu1 }
 0x5d2   : > { %v5005_v45 = vadd.f32 %v5004_v55, %v11121_v3  ;;  %v5006_v61 = vpop.f32.mrb[170].mxu0  ;;  %v5509_v13 = vpack.c.bf16 %v5401_v19, %v5399_v48  ;;  %11125 = vst [vmem:[#allocation13_spill] sm:$0xff] %v10240_v51  ;;  %v10244_v55 = vpop.f32.mrb[124].mxu1 }
 0x5d3   : > { %v5274_v4 = vadd.f32 %v10052_v36, %v5003_v12  ;;  %v5007_v38 = vadd.f32 %v5006_v61, %v11122_v31  ;;  %v5008_v5 = vpop.f32.mrb[171].mxu0  ;;  %11126 = vst [vmem:[#allocation14_spill] sm:$0xff] %v10244_v55  ;;  %v10246_v31 = vpop.f32.mrb[125].mxu1 }
 0x5d4   : > { %v5275_v1 = vadd.f32 %v10057_v26, %v5005_v45  ;;  %v5009_v33 = vadd.f32 %v5008_v5, %v11124_v35  ;;  %5882 = vmatprep.mubr.bf16.mxu1 %v5509_v13  ;;  %11127 = vst [vmem:[#allocation15_spill] sm:$0xff] %v10246_v31  ;;  %v11128_v5 = vld [vmem:[#allocation16_spill] sm:$0xff]  ;;  %v11129_v35 = vld [vmem:[#allocation17_spill] sm:$0xff]  ;;  %v10252_v28 = vpop.f32.mrb[126].mxu1 }
 0x5d5   : > { %v5276_v21 = vadd.f32 %v10052_v36, %v5007_v38  ;;  %5883 = vmatmul.mubr.bf16.gmra.mrb[164].mxu1 %v5508_v16  ;;  %v5402_v19 = vmax.f32 %v5274_v4, 0.0  ;;  %11131 = vst [vmem:[#allocation16_spill] sm:$0xff] %v10252_v28  ;;  %v8398_v31 = vld [vmem:[#allocation2 + $0x6f4] ss:$8 sps:$4 sm:$0xff]  }
 0x5d6   : > { %v5277_v48 = vadd.f32 %v10057_v26, %v5009_v33  ;;  %v5403_v15 = vmax.f32 %v5275_v1, 0.0  ;;  %v11130_v33 = vld [vmem:[#allocation18_spill] sm:$0xff]  ;;  %6541 = vmatprep.subr.bf16.mxu0 %v8398_v31 }
 0x5d7   : > { %v5404_v12 = vmax.f32 %v5276_v21, 0.0 }
 0x5d8   : > { %v5405_v3 = vmax.f32 %v5277_v48, 0.0  ;;  %v5012_v61 = vpop.f32.mrb[172].mxu0  ;;  %v11132_v48 = vld [vmem:[#allocation19_spill] sm:$0xff] }
 0x5d9   : > { %v5510_v45 = vpack.c.bf16 %v5404_v12, %v5402_v19  ;;  %v5013_v13 = vadd.f32 %v5012_v61, %v11128_v5  ;;  %v5014_v2 = vpop.f32.mrb[173].mxu0  ;;  %v10256_v19 = vpop.f32.mrb[127].mxu1 }
 0x5da   : > { %v5015_v51 = vadd.f32 %v5014_v2, %v11129_v35  ;;  %v5016_v59 = vpop.f32.mrb[174].mxu0  ;;  %v5511_v38 = vpack.c.bf16 %v5405_v3, %v5403_v15  ;;  %11133 = vst [vmem:[#allocation17_spill] sm:$0xff] %v10256_v19  ;;  %v11134_v35 = vld [vmem:[#allocation20_spill] sm:$0xff] }
 0x5db   : > { %v5278_v16 = vadd.f32 %v10052_v36, %v5013_v13  ;;  %v5017_v4 = vadd.f32 %v5016_v59, %v11130_v33  ;;  %v5018_v21 = vpop.f32.mrb[175].mxu0 }
 0x5dc   : > { %v5279_v1 = vadd.f32 %v10057_v26, %v5015_v51  ;;  %v5019_v55 = vadd.f32 %v5018_v21, %v11132_v48  ;;  %5892 = vmatprep.mubr.bf16.mxu1 %v5511_v38  ;;  %v8396_v51 = vld [vmem:[#allocation2 + $0x6f0] ss:$8 sps:$4 sm:$0xff]   ;;  %v11135_v21 = vld [vmem:[#allocation21_spill] sm:$0xff] }
 0x5dd   : > { %v5280_v12 = vadd.f32 %v10052_v36, %v5017_v4  ;;  %5893 = vmatmul.mubr.bf16.gmra.mrb[168].mxu1 %v5510_v45  ;;  %v5406_v15 = vmax.f32 %v5278_v16, 0.0  ;;  %v11136_v45 = vld [vmem:[#allocation22_spill] sm:$0xff]  ;;  %6542 = vmatpush1.bf16.msra.mxu0 %v8396_v51  ;;  %v11140_v51 = vld [vmem:[#allocation25_spill] sm:$0xff] }
 0x5de   : > { %v5281_v61 = vadd.f32 %v10057_v26, %v5019_v55  ;;  %v5407_v5 = vmax.f32 %v5279_v1, 0.0  ;;  %v11137_v1 = vld [vmem:[#allocation23_spill] sm:$0xff] }
 0x5df   : > { %v5408_v3 = vmax.f32 %v5280_v12, 0.0 }
 0x5e0   : > { %v5409_v13 = vmax.f32 %v5281_v61, 0.0  ;;  %v5022_v59 = vpop.f32.mrb[176].mxu0 }
 0x5e1   : > { %v5512_v2 = vpack.c.bf16 %v5408_v3, %v5406_v15  ;;  %v5023_v33 = vadd.f32 %v5022_v59, %v11134_v35  ;;  %v5024_v28 = vpop.f32.mrb[177].mxu0  ;;  %v10272_v3 = vld [vmem:[%s11044_s5] sm:$0xff]  }
 0x5e2   : > { %v5025_v38 = vadd.f32 %v5024_v28, %v11135_v21  ;;  %v5026_v48 = vpop.f32.mrb[178].mxu0  ;;  %v5513_v19 = vpack.c.bf16 %v5409_v13, %v5407_v5  ;;  %v11054_v28 = vmov 0   ;;  %11138 = vst [vmem:[#allocation18_spill] sm:$0xff] %v10272_v3 }
 0x5e3   : > { %v5282_v4 = vadd.f32 %v10052_v36, %v5023_v33  ;;  %v5027_v34 = vadd.f32 %v5026_v48, %v11136_v45  ;;  %v5028_v55 = vpop.f32.mrb[179].mxu0  ;;  %8006 = vmatprep.subr.bf16.mxu1 %v11054_v28  ;;  %7191 = vmatprep.subr.bf16.mxu0 %v11054_v28 }
 0x5e4   : > { %v5283_v16 = vadd.f32 %v10057_v26, %v5025_v38  ;;  %v5029_v12 = vadd.f32 %v5028_v55, %v11137_v1  ;;  %5902 = vmatprep.mubr.bf16.mxu1 %v5513_v19  ;;  %8022 = vmatpush1.bf16.msra.mxu1 %v10272_v3  ;;  %v11141_v55 = vld [vmem:[#allocation26_spill] sm:$0xff] }
 0x5e5   : > { %v5284_v61 = vadd.f32 %v10052_v36, %v5027_v34  ;;  %5903 = vmatmul.mubr.bf16.gmra.mrb[172].mxu1 %v5512_v2  ;;  %v5410_v31 = vmax.f32 %v5282_v4, 0.0  ;;  %v11139_v2 = vld [vmem:[#allocation24_spill] sm:$0xff]  ;;  %8007 = vmatprep.subr.bf16.mxu1 %v11054_v28 }
 0x5e6   : > { %v5285_v15 = vadd.f32 %v10057_v26, %v5029_v12  ;;  %v5411_v13 = vmax.f32 %v5283_v16, 0.0  ;;  %v11142_v12 = vld [vmem:[#allocation27_spill] sm:$0xff] }
 0x5e7   : > { %v5412_v5 = vmax.f32 %v5284_v61, 0.0 }
 0x5e8   : > { %v5413_v19 = vmax.f32 %v5285_v15, 0.0  ;;  %v5032_v59 = vpop.f32.mrb[180].mxu0 }
 0x5e9   : > { %v5514_v34 = vpack.c.bf16 %v5412_v5, %v5410_v31  ;;  %v5033_v35 = vadd.f32 %v5032_v59, %v11139_v2  ;;  %v5034_v33 = vpop.f32.mrb[181].mxu0 }
 0x5ea   : > { %v5035_v21 = vadd.f32 %v5034_v33, %v11140_v51  ;;  %v5036_v38 = vpop.f32.mrb[182].mxu0  ;;  %v5515_v48 = vpack.c.bf16 %v5413_v19, %v5411_v13 }
 0x5eb   : > { %v5286_v45 = vadd.f32 %v10052_v36, %v5033_v35  ;;  %v5037_v4 = vadd.f32 %v5036_v38, %v11141_v55  ;;  %v5038_v1 = vpop.f32.mrb[183].mxu0  ;;  %v11143_v35 = vld [vmem:[#allocation28_spill] sm:$0xff]  ;;  %v11144_v55 = vld [vmem:[#allocation29_spill] sm:$0xff] }
 0x5ec   : > { %v5287_v16 = vadd.f32 %v10057_v26, %v5035_v21  ;;  %v5039_v61 = vadd.f32 %v5038_v1, %v11142_v12  ;;  %5912 = vmatprep.mubr.bf16.mxu1 %v5515_v48  ;;  %v11145_v1 = vld [vmem:[#allocation30_spill] sm:$0xff] }
 0x5ed   : > { %v5288_v15 = vadd.f32 %v10052_v36, %v5037_v4  ;;  %5913 = vmatmul.mubr.bf16.gmra.mrb[176].mxu1 %v5514_v34  ;;  %v5414_v5 = vmax.f32 %v5286_v45, 0.0  ;;  %v11146_v45 = vld [vmem:[#allocation31_spill] sm:$0xff] }
 0x5ee   : > { %v5289_v31 = vadd.f32 %v10057_v26, %v5039_v61  ;;  %v5415_v2 = vmax.f32 %v5287_v16, 0.0 }
 0x5ef   : > { %v5416_v59 = vmax.f32 %v5288_v15, 0.0 }
 0x5f0   : > { %v5417_v33 = vmax.f32 %v5289_v31, 0.0  ;;  %v5042_v13 = vpop.f32.mrb[184].mxu0  ;;  %v10296_v31 = vld [vmem:[%s11044_s5 + $0x8] sm:$0xff]  }
 0x5f1   : > { %v5516_v19 = vpack.c.bf16 %v5416_v59, %v5414_v5  ;;  %v5043_v51 = vadd.f32 %v5042_v13, %v11143_v35  ;;  %v5044_v38 = vpop.f32.mrb[185].mxu0  ;;  %11147 = vst [vmem:[#allocation19_spill] sm:$0xff] %v10296_v31  ;;  %8023 = vmatpush1.bf16.msra.mxu1 %v10296_v31  ;;  %v11148_v35 = vld [vmem:[#allocation32_spill] sm:$0xff] }
 0x5f2   : > { %v5045_v28 = vadd.f32 %v5044_v38, %v11144_v55  ;;  %v5046_v21 = vpop.f32.mrb[186].mxu0  ;;  %v5517_v3 = vpack.c.bf16 %v5417_v33, %v5415_v2  ;;  %v11149_v38 = vmov 0  }
 0x5f3   : > { %v5290_v48 = vadd.f32 %v10052_v36, %v5043_v51  ;;  %v5047_v4 = vadd.f32 %v5046_v21, %v11145_v1  ;;  %v5048_v34 = vpop.f32.mrb[187].mxu0  ;;  %8008 = vmatprep.subr.bf16.mxu1 %v11149_v38 }
 0x5f4   : > { %v5291_v12 = vadd.f32 %v10057_v26, %v5045_v28  ;;  %v5049_v61 = vadd.f32 %v5048_v34, %v11146_v45  ;;  %5922 = vmatprep.mubr.bf16.mxu1 %v5517_v3  ;;  %v11151_v34 = vld [vmem:[#allocation34_spill] sm:$0xff] }
 0x5f5   : > { %v5292_v16 = vadd.f32 %v10052_v36, %v5047_v4  ;;  %5923 = vmatmul.mubr.bf16.gmra.mrb[180].mxu1 %v5516_v19  ;;  %v5418_v5 = vmax.f32 %v5290_v48, 0.0  ;;  %v11150_v19 = vld [vmem:[#allocation33_spill] sm:$0xff] }
 0x5f6   : > { %v5293_v15 = vadd.f32 %v10057_v26, %v5049_v61  ;;  %v5419_v2 = vmax.f32 %v5291_v12, 0.0  ;;  %v11152_v61 = vld [vmem:[#allocation35_spill] sm:$0xff] }
 0x5f7   : > { %v5420_v59 = vmax.f32 %v5292_v16, 0.0 }
 0x5f8   : > { %v5421_v33 = vmax.f32 %v5293_v15, 0.0  ;;  %v5052_v13 = vpop.f32.mrb[188].mxu0 }
 0x5f9   : > { %v5518_v28 = vpack.c.bf16 %v5420_v59, %v5418_v5  ;;  %v5053_v3 = vadd.f32 %v5052_v13, %v11148_v35  ;;  %v5054_v51 = vpop.f32.mrb[189].mxu0 }
 0x5fa   : > { %v5055_v55 = vadd.f32 %v5054_v51, %v11150_v19  ;;  %v5056_v21 = vpop.f32.mrb[190].mxu0  ;;  %v5519_v1 = vpack.c.bf16 %v5421_v33, %v5419_v2 }
 0x5fb   : > { %v5294_v4 = vadd.f32 %v10052_v36, %v5053_v3  ;;  %v5057_v48 = vadd.f32 %v5056_v21, %v11151_v34  ;;  %v5058_v45 = vpop.f32.mrb[191].mxu0  ;;  %v11153_v3 = vld [vmem:[#allocation36_spill] sm:$0xff]  ;;  %v11154_v34 = vld [vmem:[#allocation37_spill] sm:$0xff] }
 0x5fc   : > { %v5295_v12 = vadd.f32 %v10057_v26, %v5055_v55  ;;  %v5059_v16 = vadd.f32 %v5058_v45, %v11152_v61  ;;  %5932 = vmatprep.mubr.bf16.mxu1 %v5519_v1  ;;  %v11155_v45 = vld [vmem:[#allocation38_spill] sm:$0xff] }
 0x5fd   : > { %v5296_v15 = vadd.f32 %v10052_v36, %v5057_v48  ;;  %5933 = vmatmul.mubr.bf16.gmra.mrb[184].mxu1 %v5518_v28  ;;  %v5422_v59 = vmax.f32 %v5294_v4, 0.0  ;;  %v11156_v4 = vld [vmem:[#allocation39_spill] sm:$0xff] }
 0x5fe   : > { %v5297_v5 = vadd.f32 %v10057_v26, %v5059_v16  ;;  %v5423_v35 = vmax.f32 %v5295_v12, 0.0  ;;  %v10317_v12 = vld [vmem:[%s11044_s5 + $0x10] sm:$0xff]  }
 0x5ff   : > { %v5424_v13 = vmax.f32 %v5296_v15, 0.0  ;;  %11157 = vst [vmem:[#allocation20_spill] sm:$0xff] %v10317_v12  ;;  %8024 = vmatpush1.bf16.msra.mxu1 %v10317_v12 }
 0x600   : > { %v5425_v51 = vmax.f32 %v5297_v5, 0.0  ;;  %v5062_v2 = vpop.f32.mrb[192].mxu0  ;;  %8009 = vmatprep.subr.bf16.mxu1 %v11149_v38 }
 0x601   : > { %v5520_v33 = vpack.c.bf16 %v5424_v13, %v5422_v59  ;;  %v5063_v19 = vadd.f32 %v5062_v2, %v11153_v3  ;;  %v5064_v21 = vpop.f32.mrb[193].mxu0  ;;  %v11158_v2 = vld [vmem:[#allocation40_spill] sm:$0xff] }
 0x602   : > { %v5065_v31 = vadd.f32 %v5064_v21, %v11154_v34  ;;  %v5066_v55 = vpop.f32.mrb[194].mxu0  ;;  %v5521_v52 = vpack.c.bf16 %v5425_v51, %v5423_v35  ;;  %v11159_v21 = vld [vmem:[#allocation41_spill] sm:$0xff] }
 0x603   : > { %v5298_v1 = vadd.f32 %v10052_v36, %v5063_v19  ;;  %v5067_v48 = vadd.f32 %v5066_v55, %v11155_v45  ;;  %v5068_v28 = vpop.f32.mrb[195].mxu0 }
 0x604   : > { %v5299_v61 = vadd.f32 %v10057_v26, %v5065_v31  ;;  %v5069_v16 = vadd.f32 %v5068_v28, %v11156_v4  ;;  %5942 = vmatprep.mubr.bf16.mxu1 %v5521_v52 }
 0x605   : > { %v5300_v15 = vadd.f32 %v10052_v36, %v5067_v48  ;;  %5943 = vmatmul.mubr.bf16.gmra.mrb[188].mxu1 %v5520_v33  ;;  %v5426_v59 = vmax.f32 %v5298_v1, 0.0  ;;  %v11160_v48 = vld [vmem:[#allocation42_spill] sm:$0xff] }
 0x606   : > { %v5301_v5 = vadd.f32 %v10057_v26, %v5069_v16  ;;  %v5427_v31 = vmax.f32 %v5299_v61, 0.0  ;;  %v11161_v16 = vld [vmem:[#allocation43_spill] sm:$0xff] }
 0x607   : > { %v5428_v13 = vmax.f32 %v5300_v15, 0.0 }
 0x608   : > { %v5429_v35 = vmax.f32 %v5301_v5, 0.0  ;;  %v5072_v51 = vpop.f32.mrb[196].mxu0 }
 0x609   : > { %v5522_v52 = vpack.c.bf16 %v5428_v13, %v5426_v59  ;;  %v5073_v3 = vadd.f32 %v5072_v51, %v11158_v2  ;;  %v5074_v19 = vpop.f32.mrb[197].mxu0 }
 0x60a   : > { %v5075_v34 = vadd.f32 %v5074_v19, %v11159_v21  ;;  %v5076_v55 = vpop.f32.mrb[198].mxu0  ;;  %v5523_v45 = vpack.c.bf16 %v5429_v35, %v5427_v31 }
 0x60b   : > { %v5302_v33 = vadd.f32 %v10052_v36, %v5073_v3  ;;  %v5077_v28 = vadd.f32 %v5076_v55, %v11160_v48  ;;  %v5078_v4 = vpop.f32.mrb[199].mxu0  ;;  %v11162_v3 = vld [vmem:[#allocation44_spill] sm:$0xff]  ;;  %v11163_v55 = vld [vmem:[#allocation45_spill] sm:$0xff] }
 0x60c   : > { %v5303_v1 = vadd.f32 %v10057_v26, %v5075_v34  ;;  %v5079_v15 = vadd.f32 %v5078_v4, %v11161_v16  ;;  %5952 = vmatprep.mubr.bf16.mxu1 %v5523_v45  ;;  %v11164_v4 = vld [vmem:[#allocation46_spill] sm:$0xff] }
 0x60d   : > { %v5304_v61 = vadd.f32 %v10052_v36, %v5077_v28  ;;  %5953 = vmatmul.mubr.bf16.gmra.mrb[192].mxu1 %v5522_v52  ;;  %v5430_v59 = vmax.f32 %v5302_v33, 0.0 }
 0x60e   : > { %v5305_v5 = vadd.f32 %v10057_v26, %v5079_v15  ;;  %v5431_v51 = vmax.f32 %v5303_v1, 0.0  ;;  %v10340_v1 = vld [vmem:[%s11044_s5 + $0x18] sm:$0xff]  }
 0x60f   : > { %v5432_v13 = vmax.f32 %v5304_v61, 0.0  ;;  %8025 = vmatpush1.bf16.msra.mxu1 %v10340_v1 }
 0x610   : > { %v5433_v2 = vmax.f32 %v5305_v5, 0.0  ;;  %v5082_v31 = vpop.f32.mrb[200].mxu0  ;;  %8010 = vmatprep.subr.bf16.mxu1 %v11149_v38 }
 0x611   : > { %v5524_v35 = vpack.c.bf16 %v5432_v13, %v5430_v59  ;;  %v5083_v19 = vadd.f32 %v5082_v31, %v11162_v3  ;;  %v5084_v21 = vpop.f32.mrb[201].mxu0 }
 0x612   : > { %v5085_v48 = vadd.f32 %v5084_v21, %v11163_v55  ;;  %v5086_v34 = vpop.f32.mrb[202].mxu0  ;;  %v5525_v12 = vpack.c.bf16 %v5433_v2, %v5431_v51  ;;  %v11165_v55 = vld [vmem:[#allocation47_spill] sm:$0xff] }
 0x613   : > { %v5306_v45 = vadd.f32 %v10052_v36, %v5083_v19  ;;  %v5087_v28 = vadd.f32 %v5086_v34, %v11164_v4  ;;  %v5088_v52 = vpop.f32.mrb[203].mxu0  ;;  %v11166_v4 = vld [vmem:[#allocation48_spill] sm:$0xff] }
 0x614   : > { %v5307_v16 = vadd.f32 %v10057_v26, %v5085_v48  ;;  %v5089_v33 = vadd.f32 %v5088_v52, %v10024_v43  ;;  %5962 = vmatprep.mubr.bf16.mxu1 %v5525_v12 }
 0x615   : > { %v5308_v15 = vadd.f32 %v10052_v36, %v5087_v28  ;;  %5963 = vmatmul.mubr.bf16.gmra.mrb[196].mxu1 %v5524_v35  ;;  %v5434_v5 = vmax.f32 %v5306_v45, 0.0 }
 0x616   : > { %v5309_v61 = vadd.f32 %v10057_v26, %v5089_v33  ;;  %v5435_v13 = vmax.f32 %v5307_v16, 0.0 }
 0x617   : > { %v5436_v59 = vmax.f32 %v5308_v15, 0.0 }
 0x618   : > { %v5437_v51 = vmax.f32 %v5309_v61, 0.0  ;;  %v5092_v43 = vpop.f32.mrb[204].mxu0 }
 0x619   : > { %v5526_v12 = vpack.c.bf16 %v5436_v59, %v5434_v5  ;;  %v5093_v2 = vadd.f32 %v5092_v43, %v10030_v58  ;;  %v5094_v31 = vpop.f32.mrb[205].mxu0  ;;  %v11167_v59 = vld [vmem:[#allocation49_spill] sm:$0xff] }
 0x61a   : > { %v5095_v3 = vadd.f32 %v5094_v31, %v10034_v30  ;;  %v5096_v19 = vpop.f32.mrb[206].mxu0  ;;  %v5527_v21 = vpack.c.bf16 %v5437_v51, %v5435_v13 }
 0x61b   : > { %v5310_v35 = vadd.f32 %v10052_v36, %v5093_v2  ;;  %v5097_v48 = vadd.f32 %v5096_v19, %v11165_v55  ;;  %v5098_v34 = vpop.f32.mrb[207].mxu0 }
 0x61c   : > { %v5311_v45 = vadd.f32 %v10057_v26, %v5095_v3  ;;  %v5099_v28 = vadd.f32 %v5098_v34, %v11166_v4  ;;  %5972 = vmatprep.mubr.bf16.mxu1 %v5527_v21 }
 0x61d   : > { %v5312_v52 = vadd.f32 %v10052_v36, %v5097_v48  ;;  %5973 = vmatmul.mubr.bf16.gmra.mrb[200].mxu1 %v5526_v12  ;;  %v5438_v16 = vmax.f32 %v5310_v35, 0.0  ;;  %v11168_v35 = vld [vmem:[#allocation50_spill] sm:$0xff]  ;;  %v10363_v48 = vld [vmem:[%s11044_s5 + $0x20] sm:$0xff]  }
 0x61e   : > { %v5313_v58 = vadd.f32 %v10057_v26, %v5099_v28  ;;  %v5439_v30 = vmax.f32 %v5311_v45, 0.0  ;;  %8026 = vmatpush1.bf16.msra.mxu1 %v10363_v48 }
 0x61f   : > { %v5440_v33 = vmax.f32 %v5312_v52, 0.0  ;;  %8011 = vmatprep.subr.bf16.mxu1 %v11149_v38 }
 0x620   : > { %v5441_v15 = vmax.f32 %v5313_v58, 0.0  ;;  %v5102_v61 = vpop.f32.mrb[208].mxu0 }
 0x621   : > { %v5528_v5 = vpack.c.bf16 %v5440_v33, %v5438_v16  ;;  %v5103_v13 = vadd.f32 %v5102_v61, %v11167_v59  ;;  %v5104_v51 = vpop.f32.mrb[209].mxu0 }
 0x622   : > { %v5105_v43 = vadd.f32 %v5104_v51, %v10061_v9  ;;  %v5106_v2 = vpop.f32.mrb[210].mxu0  ;;  %v5529_v31 = vpack.c.bf16 %v5441_v15, %v5439_v30 }
 0x623   : > { %v5314_v3 = vadd.f32 %v10052_v36, %v5103_v13  ;;  %v5107_v19 = vadd.f32 %v5106_v2, %v10067_v6  ;;  %v5108_v12 = vpop.f32.mrb[211].mxu0 }
 0x624   : > { %v5315_v21 = vadd.f32 %v10057_v26, %v5105_v43  ;;  %v5109_v55 = vadd.f32 %v5108_v12, %v11168_v35  ;;  %5982 = vmatprep.mubr.bf16.mxu1 %v5529_v31 }
 0x625   : > { %v5316_v34 = vadd.f32 %v10052_v36, %v5107_v19  ;;  %5983 = vmatmul.mubr.bf16.gmra.mrb[204].mxu1 %v5528_v5  ;;  %v5442_v45 = vmax.f32 %v5314_v3, 0.0 }
 0x626   : > { %v5317_v9 = vadd.f32 %v10057_v26, %v5109_v55  ;;  %v5443_v4 = vmax.f32 %v5315_v21, 0.0 }
 0x627   : > { %v5444_v6 = vmax.f32 %v5316_v34, 0.0 }
 0x628   : > { %v5445_v28 = vmax.f32 %v5317_v9, 0.0  ;;  %v5112_v52 = vpop.f32.mrb[212].mxu0 }
 0x629   : > { %v5530_v58 = vpack.c.bf16 %v5444_v6, %v5442_v45  ;;  %v5113_v16 = vadd.f32 %v5112_v52, %v10077_v53  ;;  %v5114_v33 = vpop.f32.mrb[213].mxu0  ;;  %v10386_v52 = vld [vmem:[%s11044_s5 + $0x28] sm:$0xff]  }
 0x62a   : > { %v5115_v30 = vadd.f32 %v5114_v33, %v10079_v47  ;;  %v5116_v15 = vpop.f32.mrb[214].mxu0  ;;  %v5531_v61 = vpack.c.bf16 %v5445_v28, %v5443_v4  ;;  %8027 = vmatpush1.bf16.msra.mxu1 %v10386_v52 }
 0x62b   : > { %v5318_v5 = vadd.f32 %v10052_v36, %v5113_v16  ;;  %v5117_v59 = vadd.f32 %v5116_v15, %v10085_v32  ;;  %v5118_v13 = vpop.f32.mrb[215].mxu0  ;;  %8012 = vmatprep.subr.bf16.mxu1 %v11149_v38 }
 0x62c   : > { %v5319_v51 = vadd.f32 %v10057_v26, %v5115_v30  ;;  %v5119_v43 = vadd.f32 %v5118_v13, %v10089_v23  ;;  %5992 = vmatprep.mubr.bf16.mxu1 %v5531_v61 }
 0x62d   : > { %v5320_v2 = vadd.f32 %v10052_v36, %v5117_v59  ;;  %5993 = vmatmul.mubr.bf16.gmra.mrb[208].mxu1 %v5530_v58  ;;  %v5446_v31 = vmax.f32 %v5318_v5, 0.0 }
 0x62e   : > { %v5321_v53 = vadd.f32 %v10057_v26, %v5119_v43  ;;  %v5447_v47 = vmax.f32 %v5319_v51, 0.0 }
 0x62f   : > { %v5448_v3 = vmax.f32 %v5320_v2, 0.0 }
 0x630   : > { %v5449_v19 = vmax.f32 %v5321_v53, 0.0  ;;  %v5122_v12 = vpop.f32.mrb[216].mxu0 }
 0x631   : > { %v5532_v21 = vpack.c.bf16 %v5448_v3, %v5446_v31  ;;  %v5123_v35 = vadd.f32 %v5122_v12, %v10095_v10  ;;  %v5124_v32 = vpop.f32.mrb[217].mxu0 }
 0x632   : > { %v5125_v55 = vadd.f32 %v5124_v32, %v10097_v42  ;;  %v5126_v34 = vpop.f32.mrb[218].mxu0  ;;  %v5533_v9 = vpack.c.bf16 %v5449_v19, %v5447_v47 }
 0x633   : > { %v5322_v23 = vadd.f32 %v10052_v36, %v5123_v35  ;;  %v5127_v45 = vadd.f32 %v5126_v34, %v10103_v60  ;;  %v5128_v6 = vpop.f32.mrb[219].mxu0 }
 0x634   : > { %v5323_v4 = vadd.f32 %v10057_v26, %v5125_v55  ;;  %v5129_v28 = vadd.f32 %v5128_v6, %v10107_v57  ;;  %6002 = vmatprep.mubr.bf16.mxu1 %v5533_v9 }
 0x635   : > { %v5324_v10 = vadd.f32 %v10052_v36, %v5127_v45  ;;  %6003 = vmatmul.mubr.bf16.gmra.mrb[212].mxu1 %v5532_v21  ;;  %v5450_v58 = vmax.f32 %v5322_v23, 0.0 }
 0x636   : > { %v5325_v42 = vadd.f32 %v10057_v26, %v5129_v28  ;;  %v5451_v16 = vmax.f32 %v5323_v4, 0.0  ;;  %v10409_v28 = vld [vmem:[%s11044_s5 + $0x30] sm:$0xff]  }
 0x637   : > { %v5452_v60 = vmax.f32 %v5324_v10, 0.0  ;;  %8028 = vmatpush1.bf16.msra.mxu1 %v10409_v28 }
 0x638   : > { %v5453_v33 = vmax.f32 %v5325_v42, 0.0  ;;  %v5132_v57 = vpop.f32.mrb[220].mxu0  ;;  %8013 = vmatprep.subr.bf16.mxu1 %v11149_v38 }
 0x639   : > { %v5534_v30 = vpack.c.bf16 %v5452_v60, %v5450_v58  ;;  %v5133_v15 = vadd.f32 %v5132_v57, %v10113_v0  ;;  %v5134_v61 = vpop.f32.mrb[221].mxu0 }
 0x63a   : > { %v5135_v5 = vadd.f32 %v5134_v61, %v10115_v25  ;;  %v5136_v59 = vpop.f32.mrb[222].mxu0  ;;  %v5535_v13 = vpack.c.bf16 %v5453_v33, %v5451_v16 }
 0x63b   : > { %v5326_v51 = vadd.f32 %v10052_v36, %v5133_v15  ;;  %v5137_v43 = vadd.f32 %v5136_v59, %v10121_v41  ;;  %v5138_v2 = vpop.f32.mrb[223].mxu0 }
 0x63c   : > { %v5327_v53 = vadd.f32 %v10057_v26, %v5135_v5  ;;  %v5139_v31 = vadd.f32 %v5138_v2, %v10125_v11  ;;  %6012 = vmatprep.mubr.bf16.mxu1 %v5535_v13 }
 0x63d   : > { %v5328_v3 = vadd.f32 %v10052_v36, %v5137_v43  ;;  %6013 = vmatmul.mubr.bf16.gmra.mrb[216].mxu1 %v5534_v30  ;;  %v5454_v47 = vmax.f32 %v5326_v51, 0.0 }
 0x63e   : > { %v5329_v0 = vadd.f32 %v10057_v26, %v5139_v31  ;;  %v5455_v25 = vmax.f32 %v5327_v53, 0.0 }
 0x63f   : > { %v5456_v19 = vmax.f32 %v5328_v3, 0.0 }
 0x640   : > { %v5457_v12 = vmax.f32 %v5329_v0, 0.0  ;;  %v5142_v21 = vpop.f32.mrb[224].mxu0 }
 0x641   : > { %v5536_v35 = vpack.c.bf16 %v5456_v19, %v5454_v47  ;;  %v5143_v32 = vadd.f32 %v5142_v21, %v10131_v22  ;;  %v5144_v41 = vpop.f32.mrb[225].mxu0 }
 0x642   : > { %v5145_v55 = vadd.f32 %v5144_v41, %v10133_v63  ;;  %v5146_v34 = vpop.f32.mrb[226].mxu0  ;;  %v5537_v9 = vpack.c.bf16 %v5457_v12, %v5455_v25 }
 0x643   : > { %v5330_v11 = vadd.f32 %v10052_v36, %v5143_v32  ;;  %v5147_v23 = vadd.f32 %v5146_v34, %v10139_v7  ;;  %v5148_v45 = vpop.f32.mrb[227].mxu0 }
 0x644   : > { %v5331_v6 = vadd.f32 %v10057_v26, %v5145_v55  ;;  %v5149_v4 = vadd.f32 %v5148_v45, %v10143_v50  ;;  %6022 = vmatprep.mubr.bf16.mxu1 %v5537_v9  ;;  %v10432_v55 = vld [vmem:[%s11044_s5 + $0x38] sm:$0xff]  }
 0x645   : > { %v5332_v22 = vadd.f32 %v10052_v36, %v5147_v23  ;;  %6023 = vmatmul.mubr.bf16.gmra.mrb[220].mxu1 %v5536_v35  ;;  %v5458_v10 = vmax.f32 %v5330_v11, 0.0 }
 0x646   : > { %v5333_v63 = vadd.f32 %v10057_v26, %v5149_v4  ;;  %v5459_v42 = vmax.f32 %v5331_v6, 0.0  ;;  %8029 = vmatpush1.bf16.msra.mxu1 %v10432_v55 }
 0x647   : > { %v5460_v7 = vmax.f32 %v5332_v22, 0.0  ;;  %8014 = vmatprep.subr.bf16.mxu1 %v11149_v38 }
 0x648   : > { %v5461_v58 = vmax.f32 %v5333_v63, 0.0  ;;  %v5152_v50 = vpop.f32.mrb[228].mxu0 }
 0x649   : > { %v5538_v60 = vpack.c.bf16 %v5460_v7, %v5458_v10  ;;  %v5153_v16 = vadd.f32 %v5152_v50, %v10148_v8  ;;  %v5154_v33 = vpop.f32.mrb[229].mxu0  ;;  %v7921_v10 = vld [vmem:[%s11043_s4 + $0xc] sm:$0x3] }
 0x64a   : > { %v5155_v57 = vadd.f32 %v5154_v33, %v10150_v39  ;;  %v5156_v30 = vpop.f32.mrb[230].mxu0  ;;  %v5539_v15 = vpack.c.bf16 %v5461_v58, %v5459_v42 }
 0x64b   : > { %v5334_v61 = vadd.f32 %v10052_v36, %v5153_v16  ;;  %v5157_v5 = vadd.f32 %v5156_v30, %v10156_v46  ;;  %v5158_v59 = vpop.f32.mrb[231].mxu0 }
 0x64c   : > { %v5335_v13 = vadd.f32 %v10057_v26, %v5155_v57  ;;  %v5159_v51 = vadd.f32 %v5158_v59, %v10160_v24  ;;  %6032 = vmatprep.mubr.bf16.mxu1 %v5539_v15  ;;  %v11170_v57 = vld [vmem:[#allocation6_spill] sm:$0xff] }
 0x64d   : > { %v5336_v43 = vadd.f32 %v10052_v36, %v5157_v5  ;;  %6033 = vmatmul.mubr.bf16.gmra.mrb[224].mxu1 %v5538_v60  ;;  %v5462_v2 = vmax.f32 %v5334_v61, 0.0  ;;  %v10453_v30 = vrot.slane %v7921_v10, %v11170_v57 }
 0x64e   : > { %v5337_v8 = vadd.f32 %v10057_v26, %v5159_v51  ;;  %v5463_v39 = vmax.f32 %v5335_v13, 0.0 }
 0x64f   : > { %v5464_v53 = vmax.f32 %v5336_v43, 0.0 }
 0x650   : > { %v5465_v31 = vmax.f32 %v5337_v8, 0.0  ;;  %v5162_v3 = vpop.f32.mrb[232].mxu0 }
 0x651   : > { %v5540_v0 = vpack.c.bf16 %v5464_v53, %v5462_v2  ;;  %v5163_v47 = vadd.f32 %v5162_v3, %v10164_v37  ;;  %v5164_v46 = vpop.f32.mrb[233].mxu0 }
 0x652   : > { %v5165_v19 = vadd.f32 %v5164_v46, %v10166_v18  ;;  %v5166_v25 = vpop.f32.mrb[234].mxu0  ;;  %v5541_v12 = vpack.c.bf16 %v5465_v31, %v5463_v39 }
 0x653   : > { %v5338_v24 = vadd.f32 %v10052_v36, %v5163_v47  ;;  %v5167_v21 = vadd.f32 %v5166_v25, %v10172_v29  ;;  %v5168_v35 = vpop.f32.mrb[235].mxu0 }
 0x654   : > { %v5339_v32 = vadd.f32 %v10057_v26, %v5165_v19  ;;  %v5169_v41 = vadd.f32 %v5168_v35, %v10176_v44  ;;  %6042 = vmatprep.mubr.bf16.mxu1 %v5541_v12 }
 0x655   : > { %v5340_v37 = vadd.f32 %v10052_v36, %v5167_v21  ;;  %6043 = vmatmul.mubr.bf16.gmra.mrb[228].mxu1 %v5540_v0  ;;  %v5466_v34 = vmax.f32 %v5338_v24, 0.0 }
 0x656   : > { %v5341_v18 = vadd.f32 %v10057_v26, %v5169_v41  ;;  %v5467_v9 = vmax.f32 %v5339_v32, 0.0 }
 0x657   : > { %v5468_v29 = vmax.f32 %v5340_v37, 0.0 }
 0x658   : > { %v5469_v11 = vmax.f32 %v5341_v18, 0.0  ;;  %v5172_v44 = vpop.f32.mrb[236].mxu0 }
 0x659   : > { %v5542_v23 = vpack.c.bf16 %v5468_v29, %v5466_v34  ;;  %v5173_v45 = vadd.f32 %v5172_v44, %v10180_v62  ;;  %v5174_v6 = vpop.f32.mrb[237].mxu0 }
 0x65a   : > { %v5175_v4 = vadd.f32 %v5174_v6, %v10182_v27  ;;  %v5176_v22 = vpop.f32.mrb[238].mxu0  ;;  %v5543_v63 = vpack.c.bf16 %v5469_v11, %v5467_v9  ;;  %v11169_v27 = vld [vmem:[#allocation5_spill] sm:$0xff] }
 0x65b   : > { %v5342_v7 = vadd.f32 %v10052_v36, %v5173_v45  ;;  %v5177_v42 = vadd.f32 %v5176_v22, %v10188_v40  ;;  %v5178_v58 = vpop.f32.mrb[239].mxu0  ;;  %v10449_v16 = vrot.slane %v7921_v10, %v11169_v27 }
 0x65c   : > { %v5343_v50 = vadd.f32 %v10057_v26, %v5175_v4  ;;  %v5179_v60 = vadd.f32 %v5178_v58, %v10192_v56  ;;  %6052 = vmatprep.mubr.bf16.mxu1 %v5543_v63 }
 0x65d   : > { %v5344_v62 = vadd.f32 %v10052_v36, %v5177_v42  ;;  %6053 = vmatmul.mubr.bf16.gmra.mrb[232].mxu1 %v5542_v23  ;;  %v5470_v15 = vmax.f32 %v5342_v7, 0.0  ;;  %v11171_v7 = vld [vmem:[#allocation7_spill] sm:$0xff] }
 0x65e   : > { %v5345_v33 = vadd.f32 %v10057_v26, %v5179_v60  ;;  %v5471_v40 = vmax.f32 %v5343_v50, 0.0 }
 0x65f   : > { %v5472_v61 = vmax.f32 %v5344_v62, 0.0 }
 0x660   : > { %v5473_v5 = vmax.f32 %v5345_v33, 0.0  ;;  %v5182_v59 = vpop.f32.mrb[240].mxu0  ;;  %v5794_v13 = vpop.f32.mrb[128].mxu1 }
 0x661   : > { %v5544_v51 = vpack.c.bf16 %v5472_v61, %v5470_v15  ;;  %v5183_v56 = vadd.f32 %v5182_v59, %v10196_v14  ;;  %v5795_v43 = vadd.f32 %v5794_v13, %v10449_v16  ;;  %v5184_v8 = vpop.f32.mrb[241].mxu0  ;;  %v5796_v2 = vpop.f32.mrb[129].mxu1  ;;  %v11172_v15 = vld [vmem:[#allocation8_spill] sm:$0xff]  ;;  %v11173_v13 = vld [vmem:[#allocation9_spill] sm:$0xff] }
 0x662   : > { %v5185_v53 = vadd.f32 %v5184_v8, %v10198_v49  ;;  %v5797_v39 = vadd.f32 %v5796_v2, %v10453_v30  ;;  %v5186_v31 = vpop.f32.mrb[242].mxu0  ;;  %v5798_v3 = vpop.f32.mrb[130].mxu1  ;;  %v5545_v0 = vpack.c.bf16 %v5473_v5, %v5471_v40  ;;  %v10468_v49 = vld [vmem:[%s11044_s5 + $0x40] sm:$0xff]  }
 0x663   : > { %v5346_v47 = vadd.f32 %v10052_v36, %v5183_v56  ;;  %v5187_v46 = vadd.f32 %v5186_v31, %v10204_v17  ;;  %v5799_v19 = vadd.f32 %v5798_v3, %v10449_v16  ;;  %v5188_v25 = vpop.f32.mrb[243].mxu0  ;;  %v5800_v12 = vpop.f32.mrb[131].mxu1  ;;  %v6113_v35 = vmax.f32 %v5795_v43, 0.0  ;;  %8030 = vmatpush1.bf16.msra.mxu1 %v10468_v49  ;;  %v11174_v43 = vld [vmem:[#allocation18_spill] sm:$0xff] }
 0x664   : > { %v5347_v14 = vadd.f32 %v10057_v26, %v5185_v53  ;;  %v5189_v24 = vadd.f32 %v5188_v25, %v10208_v54  ;;  %v5801_v21 = vadd.f32 %v5800_v12, %v10453_v30  ;;  %6062 = vmatprep.mubr.bf16.mxu1 %v5545_v0  ;;  %v6114_v41 = vmax.f32 %v5797_v39, 0.0  ;;  %8015 = vmatprep.subr.bf16.mxu1 %v11149_v38 }
 0x665   : > { %v5348_v32 = vadd.f32 %v10052_v36, %v5187_v46  ;;  %v6115_v17 = vmax.f32 %v5799_v19, 0.0  ;;  %6063 = vmatmul.mubr.bf16.gmra.mrb[236].mxu1 %v5544_v51  ;;  %v5474_v54 = vmax.f32 %v5346_v47, 0.0 }
 0x666   : > { %v5349_v37 = vadd.f32 %v10057_v26, %v5189_v24  ;;  %v6116_v18 = vmax.f32 %v5801_v21, 0.0  ;;  %v5475_v9 = vmax.f32 %v5347_v14, 0.0  ;;  %v11175_v21 = vld [vmem:[#allocation19_spill] sm:$0xff] }
 0x667   : > { %v5476_v34 = vmax.f32 %v5348_v32, 0.0  ;;  %v6241_v29 = vpack.c.bf16 %v6115_v17, %v6113_v35  ;;  %v11176_v32 = vld [vmem:[#allocation10_spill] sm:$0xff] }
 0x668   : > { %v5477_v11 = vmax.f32 %v5349_v37, 0.0  ;;  %v6242_v44 = vpack.c.bf16 %v6116_v18, %v6114_v41  ;;  %v5192_v23 = vpop.f32.mrb[244].mxu0  ;;  %v5804_v45 = vpop.f32.mrb[132].mxu1 }
 0x669   : > { %v5546_v6 = vpack.c.bf16 %v5476_v34, %v5474_v54  ;;  %v5193_v4 = vadd.f32 %v5192_v23, %v10212_v20  ;;  %v5805_v22 = vadd.f32 %v5804_v45, %v10449_v16  ;;  %v5194_v63 = vpop.f32.mrb[245].mxu0  ;;  %v5806_v10 = vpop.f32.mrb[133].mxu1  ;;  %v11177_v54 = vld [vmem:[#allocation11_spill] sm:$0xff]  ;;  %v11178_v45 = vld [vmem:[#allocation12_spill] sm:$0xff] }
 0x66a   : > { %v5195_v42 = vadd.f32 %v5194_v63, %v11171_v7  ;;  %v5807_v58 = vadd.f32 %v5806_v10, %v10453_v30  ;;  %v5196_v50 = vpop.f32.mrb[246].mxu0  ;;  %v5808_v60 = vpop.f32.mrb[134].mxu1  ;;  %6543 = vmatprep.mubr.bf16.mxu0 %v6242_v44  ;;  %v5547_v62 = vpack.c.bf16 %v5477_v11, %v5475_v9  ;;  %v11179_v7 = vld [vmem:[#allocation13_spill] sm:$0xff] }
 0x66b   : > { %v5350_v33 = vadd.f32 %v10052_v36, %v5193_v4  ;;  %v5197_v61 = vadd.f32 %v5196_v50, %v11172_v15  ;;  %v5809_v40 = vadd.f32 %v5808_v60, %v10449_v16  ;;  %v5198_v5 = vpop.f32.mrb[247].mxu0  ;;  %v5810_v20 = vpop.f32.mrb[135].mxu1  ;;  %6544 = vmatmul.mubr.bf16.vlgmr.msra.gmra.mrb[0].mxu0 %v6241_v29  ;;  %v6117_v8 = vmax.f32 %v5805_v22, 0.0  ;;  %v10503_v50 = vld [vmem:[%s11044_s5 + $0x48] sm:$0xff]   ;;  %v11180_v60 = vld [vmem:[#allocation20_spill] sm:$0xff] }
 0x66c   : > { %v5351_v59 = vadd.f32 %v10057_v26, %v5195_v42  ;;  %v5199_v51 = vadd.f32 %v5198_v5, %v11173_v13  ;;  %v5811_v56 = vadd.f32 %v5810_v20, %v10453_v30  ;;  %6072 = vmatprep.mubr.bf16.mxu1 %v5547_v62  ;;  %7192 = vmatpush1.bf16.msra.mxu0 %v11174_v43  ;;  %v6118_v39 = vmax.f32 %v5807_v58, 0.0 }
 0x66d   : > { %v5352_v2 = vadd.f32 %v10052_v36, %v5197_v61  ;;  %v6119_v53 = vmax.f32 %v5809_v40, 0.0  ;;  %6073 = vmatmul.mubr.bf16.gmra.mrb[240].mxu1 %v5546_v6  ;;  %7193 = vmatprep.subr.bf16.mxu0 %v11149_v38  ;;  %v5478_v0 = vmax.f32 %v5350_v33, 0.0 }
 0x66e   : > { %v5353_v31 = vadd.f32 %v10057_v26, %v5199_v51  ;;  %v6120_v3 = vmax.f32 %v5811_v56, 0.0  ;;  %v5479_v19 = vmax.f32 %v5351_v59, 0.0  ;;  %8031 = vmatpush1.bf16.msra.mxu1 %v10503_v50 }
 0x66f   : > { %v5480_v47 = vmax.f32 %v5352_v2, 0.0  ;;  %v6243_v46 = vpack.c.bf16 %v6119_v53, %v6117_v8  ;;  %8016 = vmatprep.subr.bf16.mxu1 %v11149_v38 }
 0x670   : > { %v5481_v25 = vmax.f32 %v5353_v31, 0.0  ;;  %v6244_v12 = vpack.c.bf16 %v6120_v3, %v6118_v39  ;;  %v5202_v14 = vpop.f32.mrb[248].mxu0  ;;  %v5814_v24 = vpop.f32.mrb[136].mxu1  ;;  %7194 = vmatpush1.bf16.msra.mxu0 %v11175_v21  ;;  %v11181_v39 = vld [vmem:[#allocation14_spill] sm:$0xff] }
 0x671   : > { %v5548_v35 = vpack.c.bf16 %v5480_v47, %v5478_v0  ;;  %v5203_v17 = vadd.f32 %v5202_v14, %v11176_v32  ;;  %v5815_v41 = vadd.f32 %v5814_v24, %v10449_v16  ;;  %v5204_v37 = vpop.f32.mrb[249].mxu0  ;;  %v5816_v18 = vpop.f32.mrb[137].mxu1  ;;  %7195 = vmatprep.subr.bf16.mxu0 %v11149_v38 }
 0x672   : > { %v5205_v34 = vadd.f32 %v5204_v37, %v11177_v54  ;;  %v5817_v29 = vadd.f32 %v5816_v18, %v10453_v30  ;;  %v5206_v9 = vpop.f32.mrb[250].mxu0  ;;  %v5818_v11 = vpop.f32.mrb[138].mxu1  ;;  %6553 = vmatprep.mubr.bf16.mxu0 %v6244_v12  ;;  %v5549_v44 = vpack.c.bf16 %v5481_v25, %v5479_v19  ;;  %v11184_v18 = vld [vmem:[#allocation17_spill] sm:$0xff] }
 0x673   : > { %v5354_v23 = vadd.f32 %v10052_v36, %v5203_v17  ;;  %v5207_v6 = vadd.f32 %v5206_v9, %v11178_v45  ;;  %v5819_v4 = vadd.f32 %v5818_v11, %v10449_v16  ;;  %v5208_v22 = vpop.f32.mrb[251].mxu0  ;;  %v5820_v63 = vpop.f32.mrb[139].mxu1  ;;  %6554 = vmatmul.mubr.bf16.gmra.mrb[4].mxu0 %v6243_v46  ;;  %v6121_v62 = vmax.f32 %v5815_v41, 0.0  ;;  %v11182_v46 = vld [vmem:[#allocation15_spill] sm:$0xff] }
 0x674   : > { %v5355_v10 = vadd.f32 %v10057_v26, %v5205_v34  ;;  %v5209_v42 = vadd.f32 %v5208_v22, %v11179_v7  ;;  %v5821_v58 = vadd.f32 %v5820_v63, %v10453_v30  ;;  %6082 = vmatprep.mubr.bf16.mxu1 %v5549_v44  ;;  %7196 = vmatpush1.bf16.msra.mxu0 %v11180_v60  ;;  %v6122_v61 = vmax.f32 %v5817_v29, 0.0 }
 0x675   : > { %v5356_v33 = vadd.f32 %v10052_v36, %v5207_v6  ;;  %v6123_v15 = vmax.f32 %v5819_v4, 0.0  ;;  %6083 = vmatmul.mubr.bf16.gmra.mrb[244].mxu1 %v5548_v35  ;;  %7197 = vmatprep.subr.bf16.mxu0 %v11149_v38  ;;  %v5482_v20 = vmax.f32 %v5354_v23, 0.0 }
 0x676   : > { %v5357_v40 = vadd.f32 %v10057_v26, %v5209_v42  ;;  %v6124_v5 = vmax.f32 %v5821_v58, 0.0  ;;  %v5483_v51 = vmax.f32 %v5355_v10, 0.0 }
 0x677   : > { %v5484_v59 = vmax.f32 %v5356_v33, 0.0  ;;  %v6245_v13 = vpack.c.bf16 %v6123_v15, %v6121_v62 }
 0x678   : > { %v5485_v56 = vmax.f32 %v5357_v40, 0.0  ;;  %v6246_v43 = vpack.c.bf16 %v6124_v5, %v6122_v61  ;;  %v5212_v8 = vpop.f32.mrb[252].mxu0  ;;  %v5824_v2 = vpop.f32.mrb[140].mxu1  ;;  %7198 = vmatpush1.bf16.msra.mxu0 %v10340_v1  ;;  %v11183_v1 = vld [vmem:[#allocation16_spill] sm:$0xff] }
 0x679   : > { %v5550_v53 = vpack.c.bf16 %v5484_v59, %v5482_v20  ;;  %v5213_v31 = vadd.f32 %v5212_v8, %v11181_v39  ;;  %v5825_v3 = vadd.f32 %v5824_v2, %v10449_v16  ;;  %v5214_v0 = vpop.f32.mrb[253].mxu0  ;;  %v5826_v47 = vpop.f32.mrb[141].mxu1  ;;  %7199 = vmatprep.subr.bf16.mxu0 %v11149_v38 }
 0x67a   : > { %v5215_v19 = vadd.f32 %v5214_v0, %v11182_v46  ;;  %v5827_v25 = vadd.f32 %v5826_v47, %v10453_v30  ;;  %v5216_v12 = vpop.f32.mrb[254].mxu0  ;;  %v5828_v14 = vpop.f32.mrb[142].mxu1  ;;  %6563 = vmatprep.mubr.bf16.mxu0 %v6246_v43  ;;  %v5551_v24 = vpack.c.bf16 %v5485_v56, %v5483_v51 }
 0x67b   : > { %v5358_v21 = vadd.f32 %v10052_v36, %v5213_v31  ;;  %v5217_v35 = vadd.f32 %v5216_v12, %v11183_v1  ;;  %v5829_v32 = vadd.f32 %v5828_v14, %v10449_v16  ;;  %v5218_v17 = vpop.f32.mrb[255].mxu0  ;;  %v5830_v41 = vpop.f32.mrb[143].mxu1  ;;  %6564 = vmatmul.mubr.bf16.gmra.mrb[8].mxu0 %v6245_v13  ;;  %v6125_v29 = vmax.f32 %v5825_v3, 0.0 }
 0x67c   : > { %v5359_v37 = vadd.f32 %v10057_v26, %v5215_v19  ;;  %v5219_v54 = vadd.f32 %v5218_v17, %v11184_v18  ;;  %v5831_v34 = vadd.f32 %v5830_v41, %v10453_v30  ;;  %6092 = vmatprep.mubr.bf16.mxu1 %v5551_v24  ;;  %7200 = vmatpush1.bf16.msra.mxu0 %v10363_v48  ;;  %v6126_v44 = vmax.f32 %v5827_v25, 0.0 }
 0x67d   : > { %v5360_v9 = vadd.f32 %v10052_v36, %v5217_v35  ;;  %v6127_v11 = vmax.f32 %v5829_v32, 0.0  ;;  %6093 = vmatmul.mubr.bf16.gmra.mrb[248].mxu1 %v5550_v53  ;;  %7201 = vmatprep.subr.bf16.mxu0 %v11149_v38  ;;  %v5486_v6 = vmax.f32 %v5358_v21, 0.0  ;;  %v8410_v32 = vld [vmem:[%s11044_s5 + $0x58] sm:$0xff]  }
 0x67e   : > { %v5361_v23 = vadd.f32 %v10057_v26, %v5219_v54  ;;  %v6128_v45 = vmax.f32 %v5831_v34, 0.0  ;;  %v5487_v63 = vmax.f32 %v5359_v37, 0.0 }
 0x67f   : > { %v5488_v4 = vmax.f32 %v5360_v9, 0.0  ;;  %v6247_v22 = vpack.c.bf16 %v6127_v11, %v6125_v29 }
 0x680   : > { %v5489_v10 = vmax.f32 %v5361_v23, 0.0  ;;  %v6248_v7 = vpack.c.bf16 %v6128_v45, %v6126_v44  ;;  %v5834_v42 = vpop.f32.mrb[144].mxu1  ;;  %7202 = vmatpush1.bf16.msra.mxu0 %v10386_v52  ;;  %v8409_v52 = vld [vmem:[%s11044_s5 + $0x50] sm:$0xff]  }
 0x681   : > { %v5552_v48 = vpack.c.bf16 %v5488_v4, %v5486_v6  ;;  %v5835_v36 = vadd.f32 %v5834_v42, %v10449_v16  ;;  %v5836_v58 = vpop.f32.mrb[145].mxu1  ;;  %7203 = vmatprep.subr.bf16.mxu0 %v11149_v38  ;;  %8032 = vmatpush1.bf16.msra.mxu1 %v8409_v52 }
 0x682   : > { %v5837_v60 = vadd.f32 %v5836_v58, %v10453_v30  ;;  %v5838_v62 = vpop.f32.mrb[146].mxu1  ;;  %6573 = vmatprep.mubr.bf16.mxu0 %v6248_v7  ;;  %v5553_v26 = vpack.c.bf16 %v5489_v10, %v5487_v63  ;;  %8017 = vmatprep.subr.bf16.mxu1 %v11149_v38 }
 0x683   : > { %v5839_v33 = vadd.f32 %v5838_v62, %v10449_v16  ;;  %v5840_v15 = vpop.f32.mrb[147].mxu1  ;;  %6574 = vmatmul.mubr.bf16.gmra.mrb[12].mxu0 %v6247_v22  ;;  %v6129_v40 = vmax.f32 %v5835_v36, 0.0 }
 0x684   : > { %v5841_v61 = vadd.f32 %v5840_v15, %v10453_v30  ;;  %6102 = vmatprep.mubr.bf16.mxu1 %v5553_v26  ;;  %7204 = vmatpush1.bf16.msra.mxu0 %v10409_v28  ;;  %v6130_v20 = vmax.f32 %v5837_v60, 0.0 }
 0x685   : > { %v6131_v5 = vmax.f32 %v5839_v33, 0.0  ;;  %6103 = vmatmul.mubr.bf16.gmra.mrb[252].mxu1 %v5552_v48  ;;  %7205 = vmatprep.subr.bf16.mxu0 %v11149_v38 }
 0x686   : > { %v6132_v59 = vmax.f32 %v5841_v61, 0.0  ;;  %8033 = vmatpush1.bf16.msra.mxu1 %v8410_v32  ;;  %v8411_v61 = vld [vmem:[%s11044_s5 + $0x60] sm:$0xff]  }
 0x687   : > { %v6249_v13 = vpack.c.bf16 %v6131_v5, %v6129_v40  ;;  %8018 = vmatprep.subr.bf16.mxu1 %v11149_v38 }
 0x688   : > { %v6250_v51 = vpack.c.bf16 %v6132_v59, %v6130_v20  ;;  %v5844_v56 = vpop.f32.mrb[148].mxu1  ;;  %7206 = vmatpush1.bf16.msra.mxu0 %v10432_v55 }
 0x689   : > { %v5845_v43 = vadd.f32 %v5844_v56, %v10449_v16  ;;  %v5846_v8 = vpop.f32.mrb[149].mxu1  ;;  %7207 = vmatprep.subr.bf16.mxu0 %v11149_v38 }
 0x68a   : > { %v5847_v28 = vadd.f32 %v5846_v8, %v10453_v30  ;;  %v5848_v2 = vpop.f32.mrb[150].mxu1  ;;  %6583 = vmatprep.mubr.bf16.mxu0 %v6250_v51  ;;  %8034 = vmatpush1.bf16.msra.mxu1 %v8411_v61 }
 0x68b   : > { %v5849_v53 = vadd.f32 %v5848_v2, %v10449_v16  ;;  %v5850_v39 = vpop.f32.mrb[151].mxu1  ;;  %6584 = vmatmul.mubr.bf16.gmra.mrb[16].mxu0 %v6249_v13  ;;  %v6133_v3 = vmax.f32 %v5845_v43, 0.0  ;;  %8019 = vmatprep.subr.bf16.mxu1 %v11149_v38 }
 0x68c   : > { %v5851_v31 = vadd.f32 %v5850_v39, %v10453_v30  ;;  %7208 = vmatpush1.bf16.msra.mxu0 %v10468_v49  ;;  %v6134_v55 = vmax.f32 %v5847_v28, 0.0 }
 0x68d   : > { %v6135_v0 = vmax.f32 %v5849_v53, 0.0  ;;  %7209 = vmatprep.subr.bf16.mxu0 %v11149_v38 }
 0x68e   : > { %v6136_v47 = vmax.f32 %v5851_v31, 0.0 }
 0x68f   : > { %v6251_v46 = vpack.c.bf16 %v6135_v0, %v6133_v3 }
 0x690   : > { %v6252_v19 = vpack.c.bf16 %v6136_v47, %v6134_v55  ;;  %v5854_v25 = vpop.f32.mrb[152].mxu1  ;;  %7210 = vmatpush1.bf16.msra.mxu0 %v10503_v50 }
 0x691   : > { %v5855_v12 = vadd.f32 %v5854_v25, %v10449_v16  ;;  %v5856_v14 = vpop.f32.mrb[153].mxu1  ;;  %7211 = vmatprep.subr.bf16.mxu0 %v11149_v38 }
 0x692   : > { %v5857_v24 = vadd.f32 %v5856_v14, %v10453_v30  ;;  %v5858_v21 = vpop.f32.mrb[154].mxu1  ;;  %6593 = vmatprep.mubr.bf16.mxu0 %v6252_v19 }
 0x693   : > { %v5859_v49 = vadd.f32 %v5858_v21, %v10449_v16  ;;  %v5860_v1 = vpop.f32.mrb[155].mxu1  ;;  %6594 = vmatmul.mubr.bf16.gmra.mrb[20].mxu0 %v6251_v46  ;;  %v6137_v50 = vmax.f32 %v5855_v12, 0.0 }
 0x694   : > { %v5861_v35 = vadd.f32 %v5860_v1, %v10453_v30  ;;  %7212 = vmatpush1.bf16.msra.mxu0 %v8409_v52  ;;  %v6138_v41 = vmax.f32 %v5857_v24, 0.0 }
 0x695   : > { %v6139_v17 = vmax.f32 %v5859_v49, 0.0  ;;  %7213 = vmatprep.subr.bf16.mxu0 %v11149_v38 }
 0x696   : > { %v6140_v37 = vmax.f32 %v5861_v35, 0.0  ;;  %v8412_v35 = vld [vmem:[%s11044_s5 + $0x68] sm:$0xff]  }
 0x697   : > { %v6253_v18 = vpack.c.bf16 %v6139_v17, %v6137_v50  ;;  %8035 = vmatpush1.bf16.msra.mxu1 %v8412_v35 }
 0x698   : > { %v6254_v54 = vpack.c.bf16 %v6140_v37, %v6138_v41  ;;  %v5864_v34 = vpop.f32.mrb[156].mxu1  ;;  %7214 = vmatpush1.bf16.msra.mxu0 %v8410_v32  ;;  %8020 = vmatprep.subr.bf16.mxu1 %v11149_v38 }
 0x699   : > { %v5865_v29 = vadd.f32 %v5864_v34, %v10449_v16  ;;  %v5866_v9 = vpop.f32.mrb[157].mxu1  ;;  %7215 = vmatprep.subr.bf16.mxu0 %v11149_v38 }
 0x69a   : > { %v5867_v11 = vadd.f32 %v5866_v9, %v10453_v30  ;;  %v5868_v44 = vpop.f32.mrb[158].mxu1  ;;  %6603 = vmatprep.mubr.bf16.mxu0 %v6254_v54 }
 0x69b   : > { %v5869_v23 = vadd.f32 %v5868_v44, %v10449_v16  ;;  %v5870_v45 = vpop.f32.mrb[159].mxu1  ;;  %6604 = vmatmul.mubr.bf16.gmra.mrb[24].mxu0 %v6253_v18  ;;  %v6141_v4 = vmax.f32 %v5865_v29, 0.0 }
 0x69c   : > { %v5871_v6 = vadd.f32 %v5870_v45, %v10453_v30  ;;  %v6142_v63 = vmax.f32 %v5867_v11, 0.0  ;;  %7216 = vmatpush1.bf16.msra.mxu0 %v8411_v61 }
 0x69d   : > { %v6143_v22 = vmax.f32 %v5869_v23, 0.0  ;;  %7217 = vmatprep.subr.bf16.mxu0 %v11149_v38 }
 0x69e   : > { %v6144_v10 = vmax.f32 %v5871_v6, 0.0 }
 0x69f   : > { %v6255_v7 = vpack.c.bf16 %v6143_v22, %v6141_v4 }
 0x6a0   : > { %v6256_v42 = vpack.c.bf16 %v6144_v10, %v6142_v63  ;;  %v5874_v48 = vpop.f32.mrb[160].mxu1  ;;  %7218 = vmatpush1.bf16.msra.mxu0 %v8412_v35 }
 0x6a1   : > { %v5875_v36 = vadd.f32 %v5874_v48, %v10449_v16  ;;  %v5876_v58 = vpop.f32.mrb[161].mxu1  ;;  %7219 = vmatprep.subr.bf16.mxu0 %v11149_v38 }
 0x6a2   : > { %v5877_v60 = vadd.f32 %v5876_v58, %v10453_v30  ;;  %v5878_v62 = vpop.f32.mrb[162].mxu1  ;;  %6613 = vmatprep.mubr.bf16.mxu0 %v6256_v42 }
 0x6a3   : > { %v5879_v26 = vadd.f32 %v5878_v62, %v10449_v16  ;;  %v5880_v33 = vpop.f32.mrb[163].mxu1  ;;  %6614 = vmatmul.mubr.bf16.gmra.mrb[28].mxu0 %v6255_v7  ;;  %v6145_v52 = vmax.f32 %v5875_v36, 0.0 }
 0x6a4   : > { %v5881_v15 = vadd.f32 %v5880_v33, %v10453_v30  ;;  %v6146_v5 = vmax.f32 %v5877_v60, 0.0 }
 0x6a5   : > { %v6147_v40 = vmax.f32 %v5879_v26, 0.0 }
 0x6a6   : > { %v6148_v20 = vmax.f32 %v5881_v15, 0.0 }
 0x6a7   : > { %v6257_v59 = vpack.c.bf16 %v6147_v40, %v6145_v52 }
 0x6a8   : > { %v6258_v13 = vpack.c.bf16 %v6148_v20, %v6146_v5  ;;  %v5884_v51 = vpop.f32.mrb[164].mxu1  ;;  %v8413_v5 = vld [vmem:[%s11044_s5 + $0x70] sm:$0xff]  }
 0x6a9   : > { %v5885_v56 = vadd.f32 %v5884_v51, %v10449_v16  ;;  %v5886_v43 = vpop.f32.mrb[165].mxu1  ;;  %8036 = vmatpush1.bf16.msra.mxu1 %v8413_v5  ;;  %7220 = vmatpush1.bf16.msra.mxu0 %v8413_v5 }
 0x6aa   : > { %v5887_v8 = vadd.f32 %v5886_v43, %v10453_v30  ;;  %v5888_v28 = vpop.f32.mrb[166].mxu1  ;;  %6623 = vmatprep.mubr.bf16.mxu0 %v6258_v13  ;;  %8021 = vmatprep.subr.bf16.mxu1 %v11149_v38 }
 0x6ab   : > { %v5889_v2 = vadd.f32 %v5888_v28, %v10449_v16  ;;  %v5890_v53 = vpop.f32.mrb[167].mxu1  ;;  %6624 = vmatmul.mubr.bf16.gmra.mrb[32].mxu0 %v6257_v59  ;;  %v6149_v31 = vmax.f32 %v5885_v56, 0.0  ;;  %7221 = vmatprep.subr.bf16.mxu0 %v11149_v38 }
 0x6ac   : > { %v5891_v39 = vadd.f32 %v5890_v53, %v10453_v30  ;;  %v6150_v0 = vmax.f32 %v5887_v8, 0.0 }
 0x6ad   : > { %v6151_v3 = vmax.f32 %v5889_v2, 0.0 }
 0x6ae   : > { %v6152_v55 = vmax.f32 %v5891_v39, 0.0 }
 0x6af   : > { %v6259_v47 = vpack.c.bf16 %v6151_v3, %v6149_v31 }
 0x6b0   : > { %v6260_v46 = vpack.c.bf16 %v6152_v55, %v6150_v0  ;;  %v5894_v19 = vpop.f32.mrb[168].mxu1 }
 0x6b1   : > { %v5895_v25 = vadd.f32 %v5894_v19, %v10449_v16  ;;  %v5896_v12 = vpop.f32.mrb[169].mxu1 }
 0x6b2   : > { %v5897_v14 = vadd.f32 %v5896_v12, %v10453_v30  ;;  %v5898_v24 = vpop.f32.mrb[170].mxu1  ;;  %6633 = vmatprep.mubr.bf16.mxu0 %v6260_v46 }
 0x6b3   : > { %v5899_v21 = vadd.f32 %v5898_v24, %v10449_v16  ;;  %v5900_v49 = vpop.f32.mrb[171].mxu1  ;;  %6634 = vmatmul.mubr.bf16.gmra.mrb[36].mxu0 %v6259_v47  ;;  %v6153_v32 = vmax.f32 %v5895_v25, 0.0 }
 0x6b4   : > { %v5901_v1 = vadd.f32 %v5900_v49, %v10453_v30  ;;  %v6154_v17 = vmax.f32 %v5897_v14, 0.0 }
 0x6b5   : > { %v6155_v50 = vmax.f32 %v5899_v21, 0.0 }
 0x6b6   : > { %v6156_v41 = vmax.f32 %v5901_v1, 0.0 }
 0x6b7   : > { %v6261_v37 = vpack.c.bf16 %v6155_v50, %v6153_v32  ;;  %v8414_v50 = vld [vmem:[%s11044_s5 + $0x78] sm:$0xff]  }
 0x6b8   : > { %v6262_v18 = vpack.c.bf16 %v6156_v41, %v6154_v17  ;;  %v5904_v54 = vpop.f32.mrb[172].mxu1  ;;  %8037 = vmatpush1.bf16.msra.mxu1 %v8414_v50  ;;  %7222 = vmatpush1.bf16.msra.mxu0 %v8414_v50 }
 0x6b9   : > { %v5905_v34 = vadd.f32 %v5904_v54, %v10449_v16  ;;  %v5906_v29 = vpop.f32.mrb[173].mxu1 }
 0x6ba   : > { %v5907_v9 = vadd.f32 %v5906_v29, %v10453_v30  ;;  %v5908_v11 = vpop.f32.mrb[174].mxu1  ;;  %6643 = vmatprep.mubr.bf16.mxu0 %v6262_v18 }
 0x6bb   : > { %v5909_v44 = vadd.f32 %v5908_v11, %v10449_v16  ;;  %v5910_v23 = vpop.f32.mrb[175].mxu1  ;;  %6644 = vmatmul.mubr.bf16.gmra.mrb[40].mxu0 %v6261_v37  ;;  %v6157_v6 = vmax.f32 %v5905_v34, 0.0 }
 0x6bc   : > { %v5911_v45 = vadd.f32 %v5910_v23, %v10453_v30  ;;  %v6158_v22 = vmax.f32 %v5907_v9, 0.0 }
 0x6bd   : > { %v6159_v4 = vmax.f32 %v5909_v44, 0.0 }
 0x6be   : > { %v6160_v63 = vmax.f32 %v5911_v45, 0.0 }
 0x6bf   : > { %v6263_v10 = vpack.c.bf16 %v6159_v4, %v6157_v6 }
 0x6c0   : > { %v6264_v7 = vpack.c.bf16 %v6160_v63, %v6158_v22  ;;  %v5914_v42 = vpop.f32.mrb[176].mxu1 }
 0x6c1   : > { %v5915_v48 = vadd.f32 %v5914_v42, %v10449_v16  ;;  %v5916_v36 = vpop.f32.mrb[177].mxu1 }
 0x6c2   : > { %v5917_v58 = vadd.f32 %v5916_v36, %v10453_v30  ;;  %v5918_v60 = vpop.f32.mrb[178].mxu1  ;;  %6653 = vmatprep.mubr.bf16.mxu0 %v6264_v7 }
 0x6c3   : > { %v5919_v62 = vadd.f32 %v5918_v60, %v10449_v16  ;;  %v5920_v26 = vpop.f32.mrb[179].mxu1  ;;  %6654 = vmatmul.mubr.bf16.gmra.mrb[44].mxu0 %v6263_v10  ;;  %v6161_v15 = vmax.f32 %v5915_v48, 0.0 }
 0x6c4   : > { %v5921_v33 = vadd.f32 %v5920_v26, %v10453_v30  ;;  %v6162_v52 = vmax.f32 %v5917_v58, 0.0 }
 0x6c5   : > { %v6163_v61 = vmax.f32 %v5919_v62, 0.0 }
 0x6c6   : > { %v6164_v40 = vmax.f32 %v5921_v33, 0.0 }
 0x6c7   : > { %v6265_v20 = vpack.c.bf16 %v6163_v61, %v6161_v15 }
 0x6c8   : > { %v6266_v59 = vpack.c.bf16 %v6164_v40, %v6162_v52  ;;  %v5924_v13 = vpop.f32.mrb[180].mxu1 }
 0x6c9   : > { %v5925_v51 = vadd.f32 %v5924_v13, %v10449_v16  ;;  %v5926_v56 = vpop.f32.mrb[181].mxu1 }
 0x6ca   : > { %v5927_v43 = vadd.f32 %v5926_v56, %v10453_v30  ;;  %v5928_v8 = vpop.f32.mrb[182].mxu1  ;;  %6663 = vmatprep.mubr.bf16.mxu0 %v6266_v59 }
 0x6cb   : > { %v5929_v28 = vadd.f32 %v5928_v8, %v10449_v16  ;;  %v5930_v2 = vpop.f32.mrb[183].mxu1  ;;  %6664 = vmatmul.mubr.bf16.gmra.mrb[48].mxu0 %v6265_v20  ;;  %v6165_v39 = vmax.f32 %v5925_v51, 0.0 }
 0x6cc   : > { %v5931_v53 = vadd.f32 %v5930_v2, %v10453_v30  ;;  %v6166_v3 = vmax.f32 %v5927_v43, 0.0 }
 0x6cd   : > { %v6167_v31 = vmax.f32 %v5929_v28, 0.0 }
 0x6ce   : > { %v6168_v0 = vmax.f32 %v5931_v53, 0.0 }
 0x6cf   : > { %v6267_v55 = vpack.c.bf16 %v6167_v31, %v6165_v39 }
 0x6d0   : > { %v6268_v47 = vpack.c.bf16 %v6168_v0, %v6166_v3  ;;  %v5934_v46 = vpop.f32.mrb[184].mxu1 }
 0x6d1   : > { %v5935_v19 = vadd.f32 %v5934_v46, %v10449_v16  ;;  %v5936_v38 = vpop.f32.mrb[185].mxu1 }
 0x6d2   : > { %v5937_v25 = vadd.f32 %v5936_v38, %v10453_v30  ;;  %v5938_v12 = vpop.f32.mrb[186].mxu1  ;;  %6673 = vmatprep.mubr.bf16.mxu0 %v6268_v47 }
 0x6d3   : > { %v5939_v14 = vadd.f32 %v5938_v12, %v10449_v16  ;;  %v5940_v24 = vpop.f32.mrb[187].mxu1  ;;  %6674 = vmatmul.mubr.bf16.gmra.mrb[52].mxu0 %v6267_v55  ;;  %v6169_v49 = vmax.f32 %v5935_v19, 0.0 }
 0x6d4   : > { %v5941_v21 = vadd.f32 %v5940_v24, %v10453_v30  ;;  %v6170_v35 = vmax.f32 %v5937_v25, 0.0 }
 0x6d5   : > { %v6171_v1 = vmax.f32 %v5939_v14, 0.0 }
 0x6d6   : > { %v6172_v32 = vmax.f32 %v5941_v21, 0.0 }
 0x6d7   : > { %v6269_v17 = vpack.c.bf16 %v6171_v1, %v6169_v49 }
 0x6d8   : > { %v6270_v41 = vpack.c.bf16 %v6172_v32, %v6170_v35  ;;  %v5944_v37 = vpop.f32.mrb[188].mxu1 }
 0x6d9   : > { %v5945_v18 = vadd.f32 %v5944_v37, %v10449_v16  ;;  %v5946_v54 = vpop.f32.mrb[189].mxu1 }
 0x6da   : > { %v5947_v34 = vadd.f32 %v5946_v54, %v10453_v30  ;;  %v5948_v29 = vpop.f32.mrb[190].mxu1  ;;  %6683 = vmatprep.mubr.bf16.mxu0 %v6270_v41 }
 0x6db   : > { %v5949_v9 = vadd.f32 %v5948_v29, %v10449_v16  ;;  %v5950_v11 = vpop.f32.mrb[191].mxu1  ;;  %6684 = vmatmul.mubr.bf16.gmra.mrb[56].mxu0 %v6269_v17  ;;  %v6173_v23 = vmax.f32 %v5945_v18, 0.0 }
 0x6dc   : > { %v5951_v44 = vadd.f32 %v5950_v11, %v10453_v30  ;;  %v6174_v6 = vmax.f32 %v5947_v34, 0.0 }
 0x6dd   : > { %v6175_v45 = vmax.f32 %v5949_v9, 0.0 }
 0x6de   : > { %v6176_v4 = vmax.f32 %v5951_v44, 0.0 }
 0x6df   : > { %v6271_v22 = vpack.c.bf16 %v6175_v45, %v6173_v23 }
 0x6e0   : > { %v6272_v63 = vpack.c.bf16 %v6176_v4, %v6174_v6  ;;  %v5954_v10 = vpop.f32.mrb[192].mxu1 }
 0x6e1   : > { %v5955_v7 = vadd.f32 %v5954_v10, %v10449_v16  ;;  %v5956_v42 = vpop.f32.mrb[193].mxu1 }
 0x6e2   : > { %v5957_v48 = vadd.f32 %v5956_v42, %v10453_v30  ;;  %v5958_v36 = vpop.f32.mrb[194].mxu1  ;;  %6693 = vmatprep.mubr.bf16.mxu0 %v6272_v63 }
 0x6e3   : > { %v5959_v58 = vadd.f32 %v5958_v36, %v10449_v16  ;;  %v5960_v60 = vpop.f32.mrb[195].mxu1  ;;  %6694 = vmatmul.mubr.bf16.gmra.mrb[60].mxu0 %v6271_v22  ;;  %v6177_v26 = vmax.f32 %v5955_v7, 0.0 }
 0x6e4   : > { %v5961_v62 = vadd.f32 %v5960_v60, %v10453_v30  ;;  %v6178_v15 = vmax.f32 %v5957_v48, 0.0 }
 0x6e5   : > { %v6179_v33 = vmax.f32 %v5959_v58, 0.0 }
 0x6e6   : > { %v6180_v61 = vmax.f32 %v5961_v62, 0.0 }
 0x6e7   : > { %v6273_v52 = vpack.c.bf16 %v6179_v33, %v6177_v26 }
 0x6e8   : > { %v6274_v40 = vpack.c.bf16 %v6180_v61, %v6178_v15  ;;  %v5964_v5 = vpop.f32.mrb[196].mxu1 }
 0x6e9   : > { %v5965_v20 = vadd.f32 %v5964_v5, %v10449_v16  ;;  %v5966_v59 = vpop.f32.mrb[197].mxu1 }
 0x6ea   : > { %v5967_v13 = vadd.f32 %v5966_v59, %v10453_v30  ;;  %v5968_v51 = vpop.f32.mrb[198].mxu1  ;;  %6703 = vmatprep.mubr.bf16.mxu0 %v6274_v40 }
 0x6eb   : > { %v5969_v56 = vadd.f32 %v5968_v51, %v10449_v16  ;;  %v5970_v43 = vpop.f32.mrb[199].mxu1  ;;  %6704 = vmatmul.mubr.bf16.gmra.mrb[64].mxu0 %v6273_v52  ;;  %v6181_v28 = vmax.f32 %v5965_v20, 0.0 }
 0x6ec   : > { %v5971_v8 = vadd.f32 %v5970_v43, %v10453_v30  ;;  %v6182_v53 = vmax.f32 %v5967_v13, 0.0 }
 0x6ed   : > { %v6183_v2 = vmax.f32 %v5969_v56, 0.0 }
 0x6ee   : > { %v6184_v39 = vmax.f32 %v5971_v8, 0.0 }
 0x6ef   : > { %v6275_v31 = vpack.c.bf16 %v6183_v2, %v6181_v28 }
 0x6f0   : > { %v6276_v3 = vpack.c.bf16 %v6184_v39, %v6182_v53  ;;  %v5974_v0 = vpop.f32.mrb[200].mxu1 }
 0x6f1   : > { %v5975_v55 = vadd.f32 %v5974_v0, %v10449_v16  ;;  %v5976_v47 = vpop.f32.mrb[201].mxu1 }
 0x6f2   : > { %v5977_v46 = vadd.f32 %v5976_v47, %v10453_v30  ;;  %v5978_v19 = vpop.f32.mrb[202].mxu1  ;;  %6713 = vmatprep.mubr.bf16.mxu0 %v6276_v3 }
 0x6f3   : > { %v5979_v38 = vadd.f32 %v5978_v19, %v10449_v16  ;;  %v5980_v25 = vpop.f32.mrb[203].mxu1  ;;  %6714 = vmatmul.mubr.bf16.gmra.mrb[68].mxu0 %v6275_v31  ;;  %v6185_v14 = vmax.f32 %v5975_v55, 0.0 }
 0x6f4   : > { %v5981_v12 = vadd.f32 %v5980_v25, %v10453_v30  ;;  %v6186_v21 = vmax.f32 %v5977_v46, 0.0 }
 0x6f5   : > { %v6187_v24 = vmax.f32 %v5979_v38, 0.0 }
 0x6f6   : > { %v6188_v49 = vmax.f32 %v5981_v12, 0.0 }
 0x6f7   : > { %v6277_v1 = vpack.c.bf16 %v6187_v24, %v6185_v14 }
 0x6f8   : > { %v6278_v35 = vpack.c.bf16 %v6188_v49, %v6186_v21  ;;  %v5984_v32 = vpop.f32.mrb[204].mxu1 }
 0x6f9   : > { %v5985_v50 = vadd.f32 %v5984_v32, %v10449_v16  ;;  %v5986_v17 = vpop.f32.mrb[205].mxu1 }
 0x6fa   : > { %v5987_v41 = vadd.f32 %v5986_v17, %v10453_v30  ;;  %v5988_v37 = vpop.f32.mrb[206].mxu1  ;;  %6723 = vmatprep.mubr.bf16.mxu0 %v6278_v35 }
 0x6fb   : > { %v5989_v18 = vadd.f32 %v5988_v37, %v10449_v16  ;;  %v5990_v54 = vpop.f32.mrb[207].mxu1  ;;  %6724 = vmatmul.mubr.bf16.gmra.mrb[72].mxu0 %v6277_v1  ;;  %v6189_v29 = vmax.f32 %v5985_v50, 0.0 }
 0x6fc   : > { %v5991_v34 = vadd.f32 %v5990_v54, %v10453_v30  ;;  %v6190_v11 = vmax.f32 %v5987_v41, 0.0 }
 0x6fd   : > { %v6191_v9 = vmax.f32 %v5989_v18, 0.0 }
 0x6fe   : > { %v6192_v44 = vmax.f32 %v5991_v34, 0.0 }
 0x6ff   : > { %v6279_v23 = vpack.c.bf16 %v6191_v9, %v6189_v29 }
 0x700   : > { %v6280_v45 = vpack.c.bf16 %v6192_v44, %v6190_v11  ;;  %v5994_v6 = vpop.f32.mrb[208].mxu1 }
 0x701   : > { %v5995_v4 = vadd.f32 %v5994_v6, %v10449_v16  ;;  %v5996_v22 = vpop.f32.mrb[209].mxu1 }
 0x702   : > { %v5997_v63 = vadd.f32 %v5996_v22, %v10453_v30  ;;  %v5998_v10 = vpop.f32.mrb[210].mxu1  ;;  %6733 = vmatprep.mubr.bf16.mxu0 %v6280_v45 }
 0x703   : > { %v5999_v7 = vadd.f32 %v5998_v10, %v10449_v16  ;;  %v6000_v42 = vpop.f32.mrb[211].mxu1  ;;  %6734 = vmatmul.mubr.bf16.gmra.mrb[76].mxu0 %v6279_v23  ;;  %v6193_v36 = vmax.f32 %v5995_v4, 0.0 }
 0x704   : > { %v6001_v48 = vadd.f32 %v6000_v42, %v10453_v30  ;;  %v6194_v60 = vmax.f32 %v5997_v63, 0.0 }
 0x705   : > { %v6195_v58 = vmax.f32 %v5999_v7, 0.0 }
 0x706   : > { %v6196_v62 = vmax.f32 %v6001_v48, 0.0 }
 0x707   : > { %v6281_v26 = vpack.c.bf16 %v6195_v58, %v6193_v36 }
 0x708   : > { %v6282_v33 = vpack.c.bf16 %v6196_v62, %v6194_v60  ;;  %v6004_v15 = vpop.f32.mrb[212].mxu1 }
 0x709   : > { %v6005_v61 = vadd.f32 %v6004_v15, %v10449_v16  ;;  %v6006_v52 = vpop.f32.mrb[213].mxu1 }
 0x70a   : > { %v6007_v40 = vadd.f32 %v6006_v52, %v10453_v30  ;;  %v6008_v5 = vpop.f32.mrb[214].mxu1  ;;  %6743 = vmatprep.mubr.bf16.mxu0 %v6282_v33 }
 0x70b   : > { %v6009_v20 = vadd.f32 %v6008_v5, %v10449_v16  ;;  %v6010_v59 = vpop.f32.mrb[215].mxu1  ;;  %6744 = vmatmul.mubr.bf16.gmra.mrb[80].mxu0 %v6281_v26  ;;  %v6197_v51 = vmax.f32 %v6005_v61, 0.0 }
 0x70c   : > { %v6011_v13 = vadd.f32 %v6010_v59, %v10453_v30  ;;  %v6198_v43 = vmax.f32 %v6007_v40, 0.0 }
 0x70d   : > { %v6199_v56 = vmax.f32 %v6009_v20, 0.0 }
 0x70e   : > { %v6200_v8 = vmax.f32 %v6011_v13, 0.0 }
 0x70f   : > { %v6283_v28 = vpack.c.bf16 %v6199_v56, %v6197_v51 }
 0x710   : > { %v6284_v2 = vpack.c.bf16 %v6200_v8, %v6198_v43  ;;  %v6014_v53 = vpop.f32.mrb[216].mxu1 }
 0x711   : > { %v6015_v39 = vadd.f32 %v6014_v53, %v10449_v16  ;;  %v6016_v31 = vpop.f32.mrb[217].mxu1 }
 0x712   : > { %v6017_v3 = vadd.f32 %v6016_v31, %v10453_v30  ;;  %v6018_v0 = vpop.f32.mrb[218].mxu1  ;;  %6753 = vmatprep.mubr.bf16.mxu0 %v6284_v2 }
 0x713   : > { %v6019_v55 = vadd.f32 %v6018_v0, %v10449_v16  ;;  %v6020_v47 = vpop.f32.mrb[219].mxu1  ;;  %6754 = vmatmul.mubr.bf16.gmra.mrb[84].mxu0 %v6283_v28  ;;  %v6201_v19 = vmax.f32 %v6015_v39, 0.0 }
 0x714   : > { %v6021_v46 = vadd.f32 %v6020_v47, %v10453_v30  ;;  %v6202_v25 = vmax.f32 %v6017_v3, 0.0 }
 0x715   : > { %v6203_v38 = vmax.f32 %v6019_v55, 0.0 }
 0x716   : > { %v6204_v12 = vmax.f32 %v6021_v46, 0.0 }
 0x717   : > { %v6285_v14 = vpack.c.bf16 %v6203_v38, %v6201_v19 }
 0x718   : > { %v6286_v24 = vpack.c.bf16 %v6204_v12, %v6202_v25  ;;  %v6024_v21 = vpop.f32.mrb[220].mxu1  ;;  %v7954_v12 = vld [vmem:[%s11043_s4 + $0xe] sm:$0x3] }
 0x719   : > { %v6025_v49 = vadd.f32 %v6024_v21, %v10449_v16  ;;  %v6026_v1 = vpop.f32.mrb[221].mxu1 }
 0x71a   : > { %v6027_v35 = vadd.f32 %v6026_v1, %v10453_v30  ;;  %v6028_v32 = vpop.f32.mrb[222].mxu1  ;;  %6763 = vmatprep.mubr.bf16.mxu0 %v6286_v24 }
 0x71b   : > { %v6029_v50 = vadd.f32 %v6028_v32, %v10449_v16  ;;  %v6030_v17 = vpop.f32.mrb[223].mxu1  ;;  %6764 = vmatmul.mubr.bf16.gmra.mrb[88].mxu0 %v6285_v14  ;;  %v6205_v37 = vmax.f32 %v6025_v49, 0.0  ;;  %v10664_v32 = vrot.slane %v7954_v12, %v11169_v27 }
 0x71c   : > { %v6031_v41 = vadd.f32 %v6030_v17, %v10453_v30  ;;  %v6206_v54 = vmax.f32 %v6027_v35, 0.0  ;;  %v10668_v17 = vrot.slane %v7954_v12, %v11170_v57 }
 0x71d   : > { %v6207_v18 = vmax.f32 %v6029_v50, 0.0 }
 0x71e   : > { %v6208_v34 = vmax.f32 %v6031_v41, 0.0 }
 0x71f   : > { %v6287_v29 = vpack.c.bf16 %v6207_v18, %v6205_v37 }
 0x720   : > { %v6288_v9 = vpack.c.bf16 %v6208_v34, %v6206_v54  ;;  %v6034_v11 = vpop.f32.mrb[224].mxu1 }
 0x721   : > { %v6035_v44 = vadd.f32 %v6034_v11, %v10449_v16  ;;  %v6036_v23 = vpop.f32.mrb[225].mxu1 }
 0x722   : > { %v6037_v45 = vadd.f32 %v6036_v23, %v10453_v30  ;;  %v6038_v6 = vpop.f32.mrb[226].mxu1  ;;  %6773 = vmatprep.mubr.bf16.mxu0 %v6288_v9 }
 0x723   : > { %v6039_v4 = vadd.f32 %v6038_v6, %v10449_v16  ;;  %v6040_v22 = vpop.f32.mrb[227].mxu1  ;;  %6774 = vmatmul.mubr.bf16.gmra.mrb[92].mxu0 %v6287_v29  ;;  %v6209_v10 = vmax.f32 %v6035_v44, 0.0 }
 0x724   : > { %v6041_v63 = vadd.f32 %v6040_v22, %v10453_v30  ;;  %v6210_v42 = vmax.f32 %v6037_v45, 0.0 }
 0x725   : > { %v6211_v7 = vmax.f32 %v6039_v4, 0.0 }
 0x726   : > { %v6212_v48 = vmax.f32 %v6041_v63, 0.0 }
 0x727   : > { %v6289_v36 = vpack.c.bf16 %v6211_v7, %v6209_v10 }
 0x728   : > { %v6290_v58 = vpack.c.bf16 %v6212_v48, %v6210_v42  ;;  %v6044_v60 = vpop.f32.mrb[228].mxu1 }
 0x729   : > { %v6045_v62 = vadd.f32 %v6044_v60, %v10449_v16  ;;  %v6046_v26 = vpop.f32.mrb[229].mxu1 }
 0x72a   : > { %v6047_v33 = vadd.f32 %v6046_v26, %v10453_v30  ;;  %v6048_v15 = vpop.f32.mrb[230].mxu1  ;;  %6783 = vmatprep.mubr.bf16.mxu0 %v6290_v58 }
 0x72b   : > { %v6049_v61 = vadd.f32 %v6048_v15, %v10449_v16  ;;  %v6050_v52 = vpop.f32.mrb[231].mxu1  ;;  %6784 = vmatmul.mubr.bf16.gmra.mrb[96].mxu0 %v6289_v36  ;;  %v6213_v5 = vmax.f32 %v6045_v62, 0.0 }
 0x72c   : > { %v6051_v40 = vadd.f32 %v6050_v52, %v10453_v30  ;;  %v6214_v59 = vmax.f32 %v6047_v33, 0.0 }
 0x72d   : > { %v6215_v20 = vmax.f32 %v6049_v61, 0.0 }
 0x72e   : > { %v6216_v13 = vmax.f32 %v6051_v40, 0.0 }
 0x72f   : > { %v6291_v51 = vpack.c.bf16 %v6215_v20, %v6213_v5 }
 0x730   : > { %v6292_v56 = vpack.c.bf16 %v6216_v13, %v6214_v59  ;;  %v6054_v43 = vpop.f32.mrb[232].mxu1 }
 0x731   : > { %v6055_v8 = vadd.f32 %v6054_v43, %v10449_v16  ;;  %v6056_v28 = vpop.f32.mrb[233].mxu1 }
 0x732   : > { %v6057_v2 = vadd.f32 %v6056_v28, %v10453_v30  ;;  %v6058_v53 = vpop.f32.mrb[234].mxu1  ;;  %6793 = vmatprep.mubr.bf16.mxu0 %v6292_v56 }
 0x733   : > { %v6059_v39 = vadd.f32 %v6058_v53, %v10449_v16  ;;  %v6060_v31 = vpop.f32.mrb[235].mxu1  ;;  %6794 = vmatmul.mubr.bf16.gmra.mrb[100].mxu0 %v6291_v51  ;;  %v6217_v0 = vmax.f32 %v6055_v8, 0.0 }
 0x734   : > { %v6061_v3 = vadd.f32 %v6060_v31, %v10453_v30  ;;  %v6218_v47 = vmax.f32 %v6057_v2, 0.0 }
 0x735   : > { %v6219_v55 = vmax.f32 %v6059_v39, 0.0 }
 0x736   : > { %v6220_v46 = vmax.f32 %v6061_v3, 0.0 }
 0x737   : > { %v6293_v19 = vpack.c.bf16 %v6219_v55, %v6217_v0 }
 0x738   : > { %v6294_v38 = vpack.c.bf16 %v6220_v46, %v6218_v47  ;;  %v6064_v25 = vpop.f32.mrb[236].mxu1 }
 0x739   : > { %v6065_v14 = vadd.f32 %v6064_v25, %v10449_v16  ;;  %v6066_v24 = vpop.f32.mrb[237].mxu1 }
 0x73a   : > { %v6067_v21 = vadd.f32 %v6066_v24, %v10453_v30  ;;  %v6068_v49 = vpop.f32.mrb[238].mxu1  ;;  %6803 = vmatprep.mubr.bf16.mxu0 %v6294_v38 }
 0x73b   : > { %v6069_v1 = vadd.f32 %v6068_v49, %v10449_v16  ;;  %v6070_v35 = vpop.f32.mrb[239].mxu1  ;;  %6804 = vmatmul.mubr.bf16.gmra.mrb[104].mxu0 %v6293_v19  ;;  %v6221_v41 = vmax.f32 %v6065_v14, 0.0 }
 0x73c   : > { %v6071_v50 = vadd.f32 %v6070_v35, %v10453_v30  ;;  %v6222_v18 = vmax.f32 %v6067_v21, 0.0 }
 0x73d   : > { %v6223_v37 = vmax.f32 %v6069_v1, 0.0 }
 0x73e   : > { %v6224_v54 = vmax.f32 %v6071_v50, 0.0  ;;  %v6545_v34 = vpop.f32.mrb[0].mxu0 }
 0x73f   : > { %v6295_v29 = vpack.c.bf16 %v6223_v37, %v6221_v41  ;;  %v6546_v9 = vadd.f32 %v6545_v34, %v10664_v32  ;;  %v6547_v11 = vpop.f32.mrb[1].mxu0 }
 0x740   : > { %v6296_v44 = vpack.c.bf16 %v6224_v54, %v6222_v18  ;;  %v6548_v23 = vadd.f32 %v6547_v11, %v10668_v17  ;;  %v6074_v45 = vpop.f32.mrb[240].mxu1  ;;  %v6549_v27 = vpop.f32.mrb[2].mxu0 }
 0x741   : > { %v6075_v6 = vadd.f32 %v6074_v45, %v10449_v16  ;;  %v6550_v4 = vadd.f32 %v6549_v27, %v10664_v32  ;;  %v6076_v57 = vpop.f32.mrb[241].mxu1  ;;  %v6551_v22 = vpop.f32.mrb[3].mxu0  ;;  %v6864_v42 = vmax.f32 %v6546_v9, 0.0 }
 0x742   : > { %v6077_v63 = vadd.f32 %v6076_v57, %v10453_v30  ;;  %v6552_v10 = vadd.f32 %v6551_v22, %v10668_v17  ;;  %v6078_v7 = vpop.f32.mrb[242].mxu1  ;;  %6813 = vmatprep.mubr.bf16.mxu0 %v6296_v44  ;;  %v6865_v60 = vmax.f32 %v6548_v23, 0.0 }
 0x743   : > { %v6866_v48 = vmax.f32 %v6550_v4, 0.0  ;;  %v6079_v36 = vadd.f32 %v6078_v7, %v10449_v16  ;;  %v6080_v58 = vpop.f32.mrb[243].mxu1  ;;  %6814 = vmatmul.mubr.bf16.gmra.mrb[108].mxu0 %v6295_v29  ;;  %v6225_v33 = vmax.f32 %v6075_v6, 0.0 }
 0x744   : > { %v6867_v62 = vmax.f32 %v6552_v10, 0.0  ;;  %v6081_v26 = vadd.f32 %v6080_v58, %v10453_v30  ;;  %v6226_v52 = vmax.f32 %v6077_v63, 0.0 }
 0x745   : > { %v10678_v15 = vpack.c.bf16 %v6866_v48, %v6864_v42  ;;  %v6227_v61 = vmax.f32 %v6079_v36, 0.0 }
 0x746   : > { %v10680_v40 = vpack.c.bf16 %v6867_v62, %v6865_v60  ;;  %v6228_v5 = vmax.f32 %v6081_v26, 0.0  ;;  %v6555_v20 = vpop.f32.mrb[4].mxu0 }
 0x747   : > { %v6297_v59 = vpack.c.bf16 %v6227_v61, %v6225_v33  ;;  %v6556_v13 = vadd.f32 %v6555_v20, %v10664_v32  ;;  %v6557_v51 = vpop.f32.mrb[5].mxu0 }
 0x748   : > { %v6298_v56 = vpack.c.bf16 %v6228_v5, %v6226_v52  ;;  %v6558_v43 = vadd.f32 %v6557_v51, %v10668_v17  ;;  %v6084_v8 = vpop.f32.mrb[244].mxu1  ;;  %v6559_v28 = vpop.f32.mrb[6].mxu0 }
 0x749   : > { %v6085_v2 = vadd.f32 %v6084_v8, %v10449_v16  ;;  %v6560_v53 = vadd.f32 %v6559_v28, %v10664_v32  ;;  %v6086_v39 = vpop.f32.mrb[245].mxu1  ;;  %v6561_v31 = vpop.f32.mrb[7].mxu0  ;;  %v6868_v47 = vmax.f32 %v6556_v13, 0.0 }
 0x74a   : > { %v6087_v3 = vadd.f32 %v6086_v39, %v10453_v30  ;;  %v6562_v0 = vadd.f32 %v6561_v31, %v10668_v17  ;;  %v6088_v55 = vpop.f32.mrb[246].mxu1  ;;  %6823 = vmatprep.mubr.bf16.mxu0 %v6298_v56  ;;  %v6869_v25 = vmax.f32 %v6558_v43, 0.0 }
 0x74b   : > { %v6870_v46 = vmax.f32 %v6560_v53, 0.0  ;;  %v6089_v19 = vadd.f32 %v6088_v55, %v10449_v16  ;;  %v6090_v38 = vpop.f32.mrb[247].mxu1  ;;  %6824 = vmatmul.mubr.bf16.gmra.mrb[112].mxu0 %v6297_v59  ;;  %v6229_v24 = vmax.f32 %v6085_v2, 0.0 }
 0x74c   : > { %v6871_v12 = vmax.f32 %v6562_v0, 0.0  ;;  %v6091_v14 = vadd.f32 %v6090_v38, %v10453_v30  ;;  %v6230_v1 = vmax.f32 %v6087_v3, 0.0 }
 0x74d   : > { %v10690_v21 = vpack.c.bf16 %v6870_v46, %v6868_v47  ;;  %v6231_v49 = vmax.f32 %v6089_v19, 0.0 }
 0x74e   : > { %v10692_v35 = vpack.c.bf16 %v6871_v12, %v6869_v25  ;;  %v6232_v50 = vmax.f32 %v6091_v14, 0.0  ;;  %v6565_v41 = vpop.f32.mrb[8].mxu0 }
 0x74f   : > { %v6299_v37 = vpack.c.bf16 %v6231_v49, %v6229_v24  ;;  %v6566_v18 = vadd.f32 %v6565_v41, %v10664_v32  ;;  %v6567_v54 = vpop.f32.mrb[9].mxu0 }
 0x750   : > { %v6300_v34 = vpack.c.bf16 %v6232_v50, %v6230_v1  ;;  %v6568_v29 = vadd.f32 %v6567_v54, %v10668_v17  ;;  %v6094_v9 = vpop.f32.mrb[248].mxu1  ;;  %v6569_v11 = vpop.f32.mrb[10].mxu0 }
 0x751   : > { %v6095_v44 = vadd.f32 %v6094_v9, %v10449_v16  ;;  %v6570_v23 = vadd.f32 %v6569_v11, %v10664_v32  ;;  %v6096_v45 = vpop.f32.mrb[249].mxu1  ;;  %v6571_v27 = vpop.f32.mrb[11].mxu0  ;;  %v6872_v22 = vmax.f32 %v6566_v18, 0.0 }
 0x752   : > { %v6097_v6 = vadd.f32 %v6096_v45, %v10453_v30  ;;  %v6572_v4 = vadd.f32 %v6571_v27, %v10668_v17  ;;  %v6098_v57 = vpop.f32.mrb[250].mxu1  ;;  %6833 = vmatprep.mubr.bf16.mxu0 %v6300_v34  ;;  %v6873_v42 = vmax.f32 %v6568_v29, 0.0 }
 0x753   : > { %v6874_v63 = vmax.f32 %v6570_v23, 0.0  ;;  %v6099_v10 = vadd.f32 %v6098_v57, %v10449_v16  ;;  %v6100_v7 = vpop.f32.mrb[251].mxu1  ;;  %6834 = vmatmul.mubr.bf16.gmra.mrb[116].mxu0 %v6299_v37  ;;  %v6233_v58 = vmax.f32 %v6095_v44, 0.0 }
 0x754   : > { %v6875_v48 = vmax.f32 %v6572_v4, 0.0  ;;  %v6101_v36 = vadd.f32 %v6100_v7, %v10453_v30  ;;  %v6234_v26 = vmax.f32 %v6097_v6, 0.0 }
 0x755   : > { %v10702_v60 = vpack.c.bf16 %v6874_v63, %v6872_v22  ;;  %v6235_v62 = vmax.f32 %v6099_v10, 0.0 }
 0x756   : > { %v10704_v33 = vpack.c.bf16 %v6875_v48, %v6873_v42  ;;  %v6236_v61 = vmax.f32 %v6101_v36, 0.0  ;;  %v6575_v52 = vpop.f32.mrb[12].mxu0 }
 0x757   : > { %v6301_v5 = vpack.c.bf16 %v6235_v62, %v6233_v58  ;;  %v6576_v20 = vadd.f32 %v6575_v52, %v10664_v32  ;;  %v6577_v59 = vpop.f32.mrb[13].mxu0 }
 0x758   : > { %v6302_v13 = vpack.c.bf16 %v6236_v61, %v6234_v26  ;;  %v6578_v51 = vadd.f32 %v6577_v59, %v10668_v17  ;;  %v6104_v56 = vpop.f32.mrb[252].mxu1  ;;  %v6579_v43 = vpop.f32.mrb[14].mxu0 }
 0x759   : > { %v6105_v8 = vadd.f32 %v6104_v56, %v10449_v16  ;;  %v6580_v28 = vadd.f32 %v6579_v43, %v10664_v32  ;;  %v6106_v2 = vpop.f32.mrb[253].mxu1  ;;  %v6581_v53 = vpop.f32.mrb[15].mxu0  ;;  %v6876_v0 = vmax.f32 %v6576_v20, 0.0 }
 0x75a   : > { %v6107_v39 = vadd.f32 %v6106_v2, %v10453_v30  ;;  %v6582_v31 = vadd.f32 %v6581_v53, %v10668_v17  ;;  %v6108_v3 = vpop.f32.mrb[254].mxu1  ;;  %6843 = vmatprep.mubr.bf16.mxu0 %v6302_v13  ;;  %v6877_v19 = vmax.f32 %v6578_v51, 0.0 }
 0x75b   : > { %v6878_v55 = vmax.f32 %v6580_v28, 0.0  ;;  %v6109_v47 = vadd.f32 %v6108_v3, %v10449_v16  ;;  %v6110_v46 = vpop.f32.mrb[255].mxu1  ;;  %6844 = vmatmul.mubr.bf16.gmra.mrb[120].mxu0 %v6301_v5  ;;  %v6237_v12 = vmax.f32 %v6105_v8, 0.0 }
 0x75c   : > { %v6879_v38 = vmax.f32 %v6582_v31, 0.0  ;;  %v6111_v25 = vadd.f32 %v6110_v46, %v10453_v30  ;;  %v6238_v49 = vmax.f32 %v6107_v39, 0.0 }
 0x75d   : > { %v6998_v14 = vpack.c.bf16 %v6878_v55, %v6876_v0  ;;  %v6239_v24 = vmax.f32 %v6109_v47, 0.0 }
 0x75e   : > { %v6999_v1 = vpack.c.bf16 %v6879_v38, %v6877_v19  ;;  %v6240_v50 = vmax.f32 %v6111_v25, 0.0  ;;  %v6585_v41 = vpop.f32.mrb[16].mxu0 }
 0x75f   : > { %v6303_v37 = vpack.c.bf16 %v6239_v24, %v6237_v12  ;;  %v6586_v18 = vadd.f32 %v6585_v41, %v10664_v32  ;;  %v6587_v54 = vpop.f32.mrb[17].mxu0 }
 0x760   : > { %v6304_v34 = vpack.c.bf16 %v6240_v50, %v6238_v49  ;;  %v6588_v16 = vadd.f32 %v6587_v54, %v10668_v17  ;;  %v6589_v29 = vpop.f32.mrb[18].mxu0  ;;  %7247 = vmatprep.mubr.bf16.mxu1 %v6999_v1 }
 0x761   : > { %v6590_v9 = vadd.f32 %v6589_v29, %v10664_v32  ;;  %v6591_v11 = vpop.f32.mrb[19].mxu0  ;;  %7248 = vmatmul.mubr.bf16.vlgmr.msra.gmra.mrb[0].mxu1 %v6998_v14  ;;  %v6880_v44 = vmax.f32 %v6586_v18, 0.0 }
 0x762   : > { %v6592_v30 = vadd.f32 %v6591_v11, %v10668_v17  ;;  %6853 = vmatprep.mubr.bf16.mxu0 %v6304_v34  ;;  %v6881_v45 = vmax.f32 %v6588_v16, 0.0 }
 0x763   : > { %v6882_v23 = vmax.f32 %v6590_v9, 0.0  ;;  %6854 = vmatmul.mubr.bf16.gmra.mrb[124].mxu0 %v6303_v37 }
 0x764   : > { %v6883_v27 = vmax.f32 %v6592_v30, 0.0  ;;  %7223 = vmatprep.mubr.bf16.mxu0 %v10680_v40 }
 0x765   : > { %v7000_v6 = vpack.c.bf16 %v6882_v23, %v6880_v44 }
 0x766   : > { %v7001_v4 = vpack.c.bf16 %v6883_v27, %v6881_v45  ;;  %v6595_v57 = vpop.f32.mrb[20].mxu0 }
 0x767   : > { %v6596_v22 = vadd.f32 %v6595_v57, %v10664_v32  ;;  %v6597_v63 = vpop.f32.mrb[21].mxu0 }
 0x768   : > { %v6598_v10 = vadd.f32 %v6597_v63, %v10668_v17  ;;  %v6599_v7 = vpop.f32.mrb[22].mxu0  ;;  %7255 = vmatprep.mubr.bf16.mxu1 %v7001_v4 }
 0x769   : > { %v6600_v42 = vadd.f32 %v6599_v7, %v10664_v32  ;;  %v6601_v48 = vpop.f32.mrb[23].mxu0  ;;  %7256 = vmatmul.mubr.bf16.gmra.mrb[4].mxu1 %v7000_v6  ;;  %v6884_v58 = vmax.f32 %v6596_v22, 0.0 }
 0x76a   : > { %v6602_v36 = vadd.f32 %v6601_v48, %v10668_v17  ;;  %v6885_v40 = vmax.f32 %v6598_v10, 0.0 }
 0x76b   : > { %v6886_v62 = vmax.f32 %v6600_v42, 0.0  ;;  %7224 = vmatmul.mubr.bf16.vlgmr.msra.gmra.mrb[128].mxu0 %v10678_v15 }
 0x76c   : > { %v6887_v26 = vmax.f32 %v6602_v36, 0.0  ;;  %7231 = vmatprep.mubr.bf16.mxu0 %v10692_v35 }
 0x76d   : > { %v7002_v61 = vpack.c.bf16 %v6886_v62, %v6884_v58 }
 0x76e   : > { %v7003_v52 = vpack.c.bf16 %v6887_v26, %v6885_v40  ;;  %v6605_v5 = vpop.f32.mrb[24].mxu0 }
 0x76f   : > { %v6606_v20 = vadd.f32 %v6605_v5, %v10664_v32  ;;  %v6607_v59 = vpop.f32.mrb[25].mxu0 }
 0x770   : > { %v6608_v13 = vadd.f32 %v6607_v59, %v10668_v17  ;;  %v6609_v51 = vpop.f32.mrb[26].mxu0  ;;  %7263 = vmatprep.mubr.bf16.mxu1 %v7003_v52 }
 0x771   : > { %v6610_v56 = vadd.f32 %v6609_v51, %v10664_v32  ;;  %v6611_v43 = vpop.f32.mrb[27].mxu0  ;;  %7264 = vmatmul.mubr.bf16.gmra.mrb[8].mxu1 %v7002_v61  ;;  %v6888_v8 = vmax.f32 %v6606_v20, 0.0 }
 0x772   : > { %v6612_v15 = vadd.f32 %v6611_v43, %v10668_v17  ;;  %v6889_v35 = vmax.f32 %v6608_v13, 0.0 }
 0x773   : > { %v6890_v28 = vmax.f32 %v6610_v56, 0.0  ;;  %7232 = vmatmul.mubr.bf16.gmra.mrb[132].mxu0 %v10690_v21 }
 0x774   : > { %v6891_v2 = vmax.f32 %v6612_v15, 0.0  ;;  %7239 = vmatprep.mubr.bf16.mxu0 %v10704_v33 }
 0x775   : > { %v7004_v53 = vpack.c.bf16 %v6890_v28, %v6888_v8 }
 0x776   : > { %v7005_v39 = vpack.c.bf16 %v6891_v2, %v6889_v35  ;;  %v6615_v31 = vpop.f32.mrb[28].mxu0 }
 0x777   : > { %v6616_v3 = vadd.f32 %v6615_v31, %v10664_v32  ;;  %v6617_v0 = vpop.f32.mrb[29].mxu0 }
 0x778   : > { %v6618_v55 = vadd.f32 %v6617_v0, %v10668_v17  ;;  %v6619_v47 = vpop.f32.mrb[30].mxu0  ;;  %7271 = vmatprep.mubr.bf16.mxu1 %v7005_v39 }
 0x779   : > { %v6620_v46 = vadd.f32 %v6619_v47, %v10664_v32  ;;  %v6621_v19 = vpop.f32.mrb[31].mxu0  ;;  %7272 = vmatmul.mubr.bf16.gmra.mrb[12].mxu1 %v7004_v53  ;;  %v6892_v38 = vmax.f32 %v6616_v3, 0.0 }
 0x77a   : > { %v6622_v21 = vadd.f32 %v6621_v19, %v10668_v17  ;;  %v6893_v33 = vmax.f32 %v6618_v55, 0.0 }
 0x77b   : > { %v6894_v25 = vmax.f32 %v6620_v46, 0.0  ;;  %7240 = vmatmul.mubr.bf16.gmra.mrb[136].mxu0 %v10702_v60 }
 0x77c   : > { %v6895_v12 = vmax.f32 %v6622_v21, 0.0 }
 0x77d   : > { %v7006_v14 = vpack.c.bf16 %v6894_v25, %v6892_v38 }
 0x77e   : > { %v7007_v24 = vpack.c.bf16 %v6895_v12, %v6893_v33  ;;  %v6625_v49 = vpop.f32.mrb[32].mxu0 }
 0x77f   : > { %v6626_v1 = vadd.f32 %v6625_v49, %v10664_v32  ;;  %v6627_v50 = vpop.f32.mrb[33].mxu0 }
 0x780   : > { %v6628_v41 = vadd.f32 %v6627_v50, %v10668_v17  ;;  %v6629_v37 = vpop.f32.mrb[34].mxu0  ;;  %7279 = vmatprep.mubr.bf16.mxu1 %v7007_v24 }
 0x781   : > { %v6630_v18 = vadd.f32 %v6629_v37, %v10664_v32  ;;  %v6631_v54 = vpop.f32.mrb[35].mxu0  ;;  %7280 = vmatmul.mubr.bf16.gmra.mrb[16].mxu1 %v7006_v14  ;;  %v6896_v16 = vmax.f32 %v6626_v1, 0.0 }
 0x782   : > { %v6632_v34 = vadd.f32 %v6631_v54, %v10668_v17  ;;  %v6897_v29 = vmax.f32 %v6628_v41, 0.0 }
 0x783   : > { %v6898_v60 = vmax.f32 %v6630_v18, 0.0 }
 0x784   : > { %v6899_v9 = vmax.f32 %v6632_v34, 0.0 }
 0x785   : > { %v7008_v11 = vpack.c.bf16 %v6898_v60, %v6896_v16 }
 0x786   : > { %v7009_v30 = vpack.c.bf16 %v6899_v9, %v6897_v29  ;;  %v6635_v44 = vpop.f32.mrb[36].mxu0 }
 0x787   : > { %v6636_v23 = vadd.f32 %v6635_v44, %v10664_v32  ;;  %v6637_v45 = vpop.f32.mrb[37].mxu0 }
 0x788   : > { %v6638_v27 = vadd.f32 %v6637_v45, %v10668_v17  ;;  %v6639_v6 = vpop.f32.mrb[38].mxu0  ;;  %7287 = vmatprep.mubr.bf16.mxu1 %v7009_v30 }
 0x789   : > { %v6640_v4 = vadd.f32 %v6639_v6, %v10664_v32  ;;  %v6641_v57 = vpop.f32.mrb[39].mxu0  ;;  %7288 = vmatmul.mubr.bf16.gmra.mrb[20].mxu1 %v7008_v11  ;;  %v6900_v63 = vmax.f32 %v6636_v23, 0.0 }
 0x78a   : > { %v6642_v22 = vadd.f32 %v6641_v57, %v10668_v17  ;;  %v6901_v7 = vmax.f32 %v6638_v27, 0.0 }
 0x78b   : > { %v6902_v10 = vmax.f32 %v6640_v4, 0.0 }
 0x78c   : > { %v6903_v42 = vmax.f32 %v6642_v22, 0.0 }
 0x78d   : > { %v7010_v48 = vpack.c.bf16 %v6902_v10, %v6900_v63 }
 0x78e   : > { %v7011_v36 = vpack.c.bf16 %v6903_v42, %v6901_v7  ;;  %v6645_v58 = vpop.f32.mrb[40].mxu0 }
 0x78f   : > { %v6646_v62 = vadd.f32 %v6645_v58, %v10664_v32  ;;  %v6647_v40 = vpop.f32.mrb[41].mxu0 }
 0x790   : > { %v6648_v26 = vadd.f32 %v6647_v40, %v10668_v17  ;;  %v6649_v61 = vpop.f32.mrb[42].mxu0  ;;  %7295 = vmatprep.mubr.bf16.mxu1 %v7011_v36 }
 0x791   : > { %v6650_v52 = vadd.f32 %v6649_v61, %v10664_v32  ;;  %v6651_v5 = vpop.f32.mrb[43].mxu0  ;;  %7296 = vmatmul.mubr.bf16.gmra.mrb[24].mxu1 %v7010_v48  ;;  %v6904_v59 = vmax.f32 %v6646_v62, 0.0 }
 0x792   : > { %v6652_v20 = vadd.f32 %v6651_v5, %v10668_v17  ;;  %v6905_v51 = vmax.f32 %v6648_v26, 0.0 }
 0x793   : > { %v6906_v13 = vmax.f32 %v6650_v52, 0.0 }
 0x794   : > { %v6907_v56 = vmax.f32 %v6652_v20, 0.0 }
 0x795   : > { %v7012_v43 = vpack.c.bf16 %v6906_v13, %v6904_v59 }
 0x796   : > { %v7013_v15 = vpack.c.bf16 %v6907_v56, %v6905_v51  ;;  %v6655_v8 = vpop.f32.mrb[44].mxu0 }
 0x797   : > { %v6656_v28 = vadd.f32 %v6655_v8, %v10664_v32  ;;  %v6657_v35 = vpop.f32.mrb[45].mxu0 }
 0x798   : > { %v6658_v2 = vadd.f32 %v6657_v35, %v10668_v17  ;;  %v6659_v53 = vpop.f32.mrb[46].mxu0  ;;  %7303 = vmatprep.mubr.bf16.mxu1 %v7013_v15 }
 0x799   : > { %v6660_v39 = vadd.f32 %v6659_v53, %v10664_v32  ;;  %v6661_v31 = vpop.f32.mrb[47].mxu0  ;;  %7304 = vmatmul.mubr.bf16.gmra.mrb[28].mxu1 %v7012_v43  ;;  %v6908_v0 = vmax.f32 %v6656_v28, 0.0 }
 0x79a   : > { %v6662_v3 = vadd.f32 %v6661_v31, %v10668_v17  ;;  %v6909_v47 = vmax.f32 %v6658_v2, 0.0 }
 0x79b   : > { %v6910_v55 = vmax.f32 %v6660_v39, 0.0 }
 0x79c   : > { %v6911_v46 = vmax.f32 %v6662_v3, 0.0 }
 0x79d   : > { %v7014_v19 = vpack.c.bf16 %v6910_v55, %v6908_v0 }
 0x79e   : > { %v7015_v21 = vpack.c.bf16 %v6911_v46, %v6909_v47  ;;  %v6665_v38 = vpop.f32.mrb[48].mxu0 }
 0x79f   : > { %v6666_v25 = vadd.f32 %v6665_v38, %v10664_v32  ;;  %v6667_v33 = vpop.f32.mrb[49].mxu0 }
 0x7a0   : > { %v6668_v12 = vadd.f32 %v6667_v33, %v10668_v17  ;;  %v6669_v14 = vpop.f32.mrb[50].mxu0  ;;  %7311 = vmatprep.mubr.bf16.mxu1 %v7015_v21 }
 0x7a1   : > { %v6670_v24 = vadd.f32 %v6669_v14, %v10664_v32  ;;  %v6671_v49 = vpop.f32.mrb[51].mxu0  ;;  %7312 = vmatmul.mubr.bf16.gmra.mrb[32].mxu1 %v7014_v19  ;;  %v6912_v50 = vmax.f32 %v6666_v25, 0.0 }
 0x7a2   : > { %v6672_v1 = vadd.f32 %v6671_v49, %v10668_v17  ;;  %v6913_v37 = vmax.f32 %v6668_v12, 0.0 }
 0x7a3   : > { %v6914_v41 = vmax.f32 %v6670_v24, 0.0 }
 0x7a4   : > { %v6915_v18 = vmax.f32 %v6672_v1, 0.0 }
 0x7a5   : > { %v7016_v54 = vpack.c.bf16 %v6914_v41, %v6912_v50 }
 0x7a6   : > { %v7017_v34 = vpack.c.bf16 %v6915_v18, %v6913_v37  ;;  %v6675_v16 = vpop.f32.mrb[52].mxu0 }
 0x7a7   : > { %v6676_v60 = vadd.f32 %v6675_v16, %v10664_v32  ;;  %v6677_v29 = vpop.f32.mrb[53].mxu0 }
 0x7a8   : > { %v6678_v9 = vadd.f32 %v6677_v29, %v10668_v17  ;;  %v6679_v11 = vpop.f32.mrb[54].mxu0  ;;  %7319 = vmatprep.mubr.bf16.mxu1 %v7017_v34 }
 0x7a9   : > { %v6680_v30 = vadd.f32 %v6679_v11, %v10664_v32  ;;  %v6681_v44 = vpop.f32.mrb[55].mxu0  ;;  %7320 = vmatmul.mubr.bf16.gmra.mrb[36].mxu1 %v7016_v54  ;;  %v6916_v45 = vmax.f32 %v6676_v60, 0.0 }
 0x7aa   : > { %v6682_v23 = vadd.f32 %v6681_v44, %v10668_v17  ;;  %v6917_v6 = vmax.f32 %v6678_v9, 0.0 }
 0x7ab   : > { %v6918_v27 = vmax.f32 %v6680_v30, 0.0 }
 0x7ac   : > { %v6919_v4 = vmax.f32 %v6682_v23, 0.0 }
 0x7ad   : > { %v7018_v57 = vpack.c.bf16 %v6918_v27, %v6916_v45 }
 0x7ae   : > { %v7019_v22 = vpack.c.bf16 %v6919_v4, %v6917_v6  ;;  %v6685_v63 = vpop.f32.mrb[56].mxu0 }
 0x7af   : > { %v6686_v10 = vadd.f32 %v6685_v63, %v10664_v32  ;;  %v6687_v7 = vpop.f32.mrb[57].mxu0 }
 0x7b0   : > { %v6688_v42 = vadd.f32 %v6687_v7, %v10668_v17  ;;  %v6689_v48 = vpop.f32.mrb[58].mxu0  ;;  %7327 = vmatprep.mubr.bf16.mxu1 %v7019_v22 }
 0x7b1   : > { %v6690_v36 = vadd.f32 %v6689_v48, %v10664_v32  ;;  %v6691_v58 = vpop.f32.mrb[59].mxu0  ;;  %7328 = vmatmul.mubr.bf16.gmra.mrb[40].mxu1 %v7018_v57  ;;  %v6920_v40 = vmax.f32 %v6686_v10, 0.0 }
 0x7b2   : > { %v6692_v62 = vadd.f32 %v6691_v58, %v10668_v17  ;;  %v6921_v61 = vmax.f32 %v6688_v42, 0.0 }
 0x7b3   : > { %v6922_v26 = vmax.f32 %v6690_v36, 0.0 }
 0x7b4   : > { %v6923_v52 = vmax.f32 %v6692_v62, 0.0 }
 0x7b5   : > { %v7020_v5 = vpack.c.bf16 %v6922_v26, %v6920_v40 }
 0x7b6   : > { %v7021_v20 = vpack.c.bf16 %v6923_v52, %v6921_v61  ;;  %v6695_v59 = vpop.f32.mrb[60].mxu0 }
 0x7b7   : > { %v6696_v13 = vadd.f32 %v6695_v59, %v10664_v32  ;;  %v6697_v51 = vpop.f32.mrb[61].mxu0 }
 0x7b8   : > { %v6698_v56 = vadd.f32 %v6697_v51, %v10668_v17  ;;  %v6699_v43 = vpop.f32.mrb[62].mxu0  ;;  %7335 = vmatprep.mubr.bf16.mxu1 %v7021_v20 }
 0x7b9   : > { %v6700_v15 = vadd.f32 %v6699_v43, %v10664_v32  ;;  %v6701_v8 = vpop.f32.mrb[63].mxu0  ;;  %7336 = vmatmul.mubr.bf16.gmra.mrb[44].mxu1 %v7020_v5  ;;  %v6924_v35 = vmax.f32 %v6696_v13, 0.0 }
 0x7ba   : > { %v6702_v28 = vadd.f32 %v6701_v8, %v10668_v17  ;;  %v6925_v53 = vmax.f32 %v6698_v56, 0.0 }
 0x7bb   : > { %v6926_v2 = vmax.f32 %v6700_v15, 0.0 }
 0x7bc   : > { %v6927_v39 = vmax.f32 %v6702_v28, 0.0 }
 0x7bd   : > { %v7022_v31 = vpack.c.bf16 %v6926_v2, %v6924_v35 }
 0x7be   : > { %v7023_v3 = vpack.c.bf16 %v6927_v39, %v6925_v53  ;;  %v6705_v0 = vpop.f32.mrb[64].mxu0 }
 0x7bf   : > { %v6706_v55 = vadd.f32 %v6705_v0, %v10664_v32  ;;  %v6707_v47 = vpop.f32.mrb[65].mxu0 }
 0x7c0   : > { %v6708_v46 = vadd.f32 %v6707_v47, %v10668_v17  ;;  %v6709_v19 = vpop.f32.mrb[66].mxu0  ;;  %7343 = vmatprep.mubr.bf16.mxu1 %v7023_v3 }
 0x7c1   : > { %v6710_v21 = vadd.f32 %v6709_v19, %v10664_v32  ;;  %v6711_v38 = vpop.f32.mrb[67].mxu0  ;;  %7344 = vmatmul.mubr.bf16.gmra.mrb[48].mxu1 %v7022_v31  ;;  %v6928_v33 = vmax.f32 %v6706_v55, 0.0 }
 0x7c2   : > { %v6712_v25 = vadd.f32 %v6711_v38, %v10668_v17  ;;  %v6929_v14 = vmax.f32 %v6708_v46, 0.0 }
 0x7c3   : > { %v6930_v12 = vmax.f32 %v6710_v21, 0.0 }
 0x7c4   : > { %v6931_v24 = vmax.f32 %v6712_v25, 0.0 }
 0x7c5   : > { %v7024_v49 = vpack.c.bf16 %v6930_v12, %v6928_v33 }
 0x7c6   : > { %v7025_v1 = vpack.c.bf16 %v6931_v24, %v6929_v14  ;;  %v6715_v50 = vpop.f32.mrb[68].mxu0 }
 0x7c7   : > { %v6716_v41 = vadd.f32 %v6715_v50, %v10664_v32  ;;  %v6717_v37 = vpop.f32.mrb[69].mxu0 }
 0x7c8   : > { %v6718_v18 = vadd.f32 %v6717_v37, %v10668_v17  ;;  %v6719_v54 = vpop.f32.mrb[70].mxu0  ;;  %7351 = vmatprep.mubr.bf16.mxu1 %v7025_v1 }
 0x7c9   : > { %v6720_v34 = vadd.f32 %v6719_v54, %v10664_v32  ;;  %v6721_v16 = vpop.f32.mrb[71].mxu0  ;;  %7352 = vmatmul.mubr.bf16.gmra.mrb[52].mxu1 %v7024_v49  ;;  %v6932_v29 = vmax.f32 %v6716_v41, 0.0 }
 0x7ca   : > { %v6722_v60 = vadd.f32 %v6721_v16, %v10668_v17  ;;  %v6933_v11 = vmax.f32 %v6718_v18, 0.0 }
 0x7cb   : > { %v6934_v9 = vmax.f32 %v6720_v34, 0.0 }
 0x7cc   : > { %v6935_v30 = vmax.f32 %v6722_v60, 0.0 }
 0x7cd   : > { %v7026_v44 = vpack.c.bf16 %v6934_v9, %v6932_v29 }
 0x7ce   : > { %v7027_v23 = vpack.c.bf16 %v6935_v30, %v6933_v11  ;;  %v6725_v45 = vpop.f32.mrb[72].mxu0 }
 0x7cf   : > { %v6726_v27 = vadd.f32 %v6725_v45, %v10664_v32  ;;  %v6727_v6 = vpop.f32.mrb[73].mxu0 }
 0x7d0   : > { %v6728_v4 = vadd.f32 %v6727_v6, %v10668_v17  ;;  %v6729_v57 = vpop.f32.mrb[74].mxu0  ;;  %7359 = vmatprep.mubr.bf16.mxu1 %v7027_v23 }
 0x7d1   : > { %v6730_v22 = vadd.f32 %v6729_v57, %v10664_v32  ;;  %v6731_v63 = vpop.f32.mrb[75].mxu0  ;;  %7360 = vmatmul.mubr.bf16.gmra.mrb[56].mxu1 %v7026_v44  ;;  %v6936_v7 = vmax.f32 %v6726_v27, 0.0 }
 0x7d2   : > { %v6732_v10 = vadd.f32 %v6731_v63, %v10668_v17  ;;  %v6937_v48 = vmax.f32 %v6728_v4, 0.0 }
 0x7d3   : > { %v6938_v42 = vmax.f32 %v6730_v22, 0.0 }
 0x7d4   : > { %v6939_v36 = vmax.f32 %v6732_v10, 0.0 }
 0x7d5   : > { %v7028_v58 = vpack.c.bf16 %v6938_v42, %v6936_v7 }
 0x7d6   : > { %v7029_v62 = vpack.c.bf16 %v6939_v36, %v6937_v48  ;;  %v6735_v40 = vpop.f32.mrb[76].mxu0 }
 0x7d7   : > { %v6736_v26 = vadd.f32 %v6735_v40, %v10664_v32  ;;  %v6737_v61 = vpop.f32.mrb[77].mxu0 }
 0x7d8   : > { %v6738_v52 = vadd.f32 %v6737_v61, %v10668_v17  ;;  %v6739_v5 = vpop.f32.mrb[78].mxu0  ;;  %7367 = vmatprep.mubr.bf16.mxu1 %v7029_v62 }
 0x7d9   : > { %v6740_v20 = vadd.f32 %v6739_v5, %v10664_v32  ;;  %v6741_v59 = vpop.f32.mrb[79].mxu0  ;;  %7368 = vmatmul.mubr.bf16.gmra.mrb[60].mxu1 %v7028_v58  ;;  %v6940_v51 = vmax.f32 %v6736_v26, 0.0 }
 0x7da   : > { %v6742_v13 = vadd.f32 %v6741_v59, %v10668_v17  ;;  %v6941_v43 = vmax.f32 %v6738_v52, 0.0 }
 0x7db   : > { %v6942_v56 = vmax.f32 %v6740_v20, 0.0 }
 0x7dc   : > { %v6943_v15 = vmax.f32 %v6742_v13, 0.0 }
 0x7dd   : > { %v7030_v8 = vpack.c.bf16 %v6942_v56, %v6940_v51 }
 0x7de   : > { %v7031_v28 = vpack.c.bf16 %v6943_v15, %v6941_v43  ;;  %v6745_v35 = vpop.f32.mrb[80].mxu0 }
 0x7df   : > { %v6746_v2 = vadd.f32 %v6745_v35, %v10664_v32  ;;  %v6747_v53 = vpop.f32.mrb[81].mxu0 }
 0x7e0   : > { %v6748_v39 = vadd.f32 %v6747_v53, %v10668_v17  ;;  %v6749_v31 = vpop.f32.mrb[82].mxu0  ;;  %7375 = vmatprep.mubr.bf16.mxu1 %v7031_v28 }
 0x7e1   : > { %v6750_v3 = vadd.f32 %v6749_v31, %v10664_v32  ;;  %v6751_v0 = vpop.f32.mrb[83].mxu0  ;;  %7376 = vmatmul.mubr.bf16.gmra.mrb[64].mxu1 %v7030_v8  ;;  %v6944_v47 = vmax.f32 %v6746_v2, 0.0 }
 0x7e2   : > { %v6752_v55 = vadd.f32 %v6751_v0, %v10668_v17  ;;  %v6945_v19 = vmax.f32 %v6748_v39, 0.0 }
 0x7e3   : > { %v6946_v46 = vmax.f32 %v6750_v3, 0.0 }
 0x7e4   : > { %v6947_v21 = vmax.f32 %v6752_v55, 0.0 }
 0x7e5   : > { %v7032_v38 = vpack.c.bf16 %v6946_v46, %v6944_v47 }
 0x7e6   : > { %v7033_v25 = vpack.c.bf16 %v6947_v21, %v6945_v19  ;;  %v6755_v33 = vpop.f32.mrb[84].mxu0 }
 0x7e7   : > { %v6756_v12 = vadd.f32 %v6755_v33, %v10664_v32  ;;  %v6757_v14 = vpop.f32.mrb[85].mxu0 }
 0x7e8   : > { %v6758_v24 = vadd.f32 %v6757_v14, %v10668_v17  ;;  %v6759_v49 = vpop.f32.mrb[86].mxu0  ;;  %7383 = vmatprep.mubr.bf16.mxu1 %v7033_v25 }
 0x7e9   : > { %v6760_v1 = vadd.f32 %v6759_v49, %v10664_v32  ;;  %v6761_v50 = vpop.f32.mrb[87].mxu0  ;;  %7384 = vmatmul.mubr.bf16.gmra.mrb[68].mxu1 %v7032_v38  ;;  %v6948_v37 = vmax.f32 %v6756_v12, 0.0 }
 0x7ea   : > { %v6762_v41 = vadd.f32 %v6761_v50, %v10668_v17  ;;  %v6949_v54 = vmax.f32 %v6758_v24, 0.0 }
 0x7eb   : > { %v6950_v18 = vmax.f32 %v6760_v1, 0.0 }
 0x7ec   : > { %v6951_v34 = vmax.f32 %v6762_v41, 0.0 }
 0x7ed   : > { %v7034_v16 = vpack.c.bf16 %v6950_v18, %v6948_v37 }
 0x7ee   : > { %v7035_v60 = vpack.c.bf16 %v6951_v34, %v6949_v54  ;;  %v6765_v29 = vpop.f32.mrb[88].mxu0 }
 0x7ef   : > { %v6766_v9 = vadd.f32 %v6765_v29, %v10664_v32  ;;  %v6767_v11 = vpop.f32.mrb[89].mxu0 }
 0x7f0   : > { %v6768_v30 = vadd.f32 %v6767_v11, %v10668_v17  ;;  %v6769_v44 = vpop.f32.mrb[90].mxu0  ;;  %7391 = vmatprep.mubr.bf16.mxu1 %v7035_v60 }
 0x7f1   : > { %v6770_v23 = vadd.f32 %v6769_v44, %v10664_v32  ;;  %v6771_v45 = vpop.f32.mrb[91].mxu0  ;;  %7392 = vmatmul.mubr.bf16.gmra.mrb[72].mxu1 %v7034_v16  ;;  %v6952_v6 = vmax.f32 %v6766_v9, 0.0 }
 0x7f2   : > { %v6772_v27 = vadd.f32 %v6771_v45, %v10668_v17  ;;  %v6953_v57 = vmax.f32 %v6768_v30, 0.0 }
 0x7f3   : > { %v6954_v4 = vmax.f32 %v6770_v23, 0.0 }
 0x7f4   : > { %v6955_v22 = vmax.f32 %v6772_v27, 0.0 }
 0x7f5   : > { %v7036_v63 = vpack.c.bf16 %v6954_v4, %v6952_v6 }
 0x7f6   : > { %v7037_v10 = vpack.c.bf16 %v6955_v22, %v6953_v57  ;;  %v6775_v7 = vpop.f32.mrb[92].mxu0 }
 0x7f7   : > { %v6776_v42 = vadd.f32 %v6775_v7, %v10664_v32  ;;  %v6777_v48 = vpop.f32.mrb[93].mxu0 }
 0x7f8   : > { %v6778_v36 = vadd.f32 %v6777_v48, %v10668_v17  ;;  %v6779_v58 = vpop.f32.mrb[94].mxu0  ;;  %7399 = vmatprep.mubr.bf16.mxu1 %v7037_v10 }
 0x7f9   : > { %v6780_v62 = vadd.f32 %v6779_v58, %v10664_v32  ;;  %v6781_v40 = vpop.f32.mrb[95].mxu0  ;;  %7400 = vmatmul.mubr.bf16.gmra.mrb[76].mxu1 %v7036_v63  ;;  %v6956_v61 = vmax.f32 %v6776_v42, 0.0 }
 0x7fa   : > { %v6782_v26 = vadd.f32 %v6781_v40, %v10668_v17  ;;  %v6957_v5 = vmax.f32 %v6778_v36, 0.0 }
 0x7fb   : > { %v6958_v52 = vmax.f32 %v6780_v62, 0.0 }
 0x7fc   : > { %v6959_v20 = vmax.f32 %v6782_v26, 0.0 }
 0x7fd   : > { %v7038_v59 = vpack.c.bf16 %v6958_v52, %v6956_v61 }
 0x7fe   : > { %v7039_v13 = vpack.c.bf16 %v6959_v20, %v6957_v5  ;;  %v6785_v51 = vpop.f32.mrb[96].mxu0 }
 0x7ff   : > { %v6786_v56 = vadd.f32 %v6785_v51, %v10664_v32  ;;  %v6787_v43 = vpop.f32.mrb[97].mxu0 }
 0x800   : > { %v6788_v15 = vadd.f32 %v6787_v43, %v10668_v17  ;;  %v6789_v8 = vpop.f32.mrb[98].mxu0  ;;  %7407 = vmatprep.mubr.bf16.mxu1 %v7039_v13 }
 0x801   : > { %v6790_v28 = vadd.f32 %v6789_v8, %v10664_v32  ;;  %v6791_v35 = vpop.f32.mrb[99].mxu0  ;;  %7408 = vmatmul.mubr.bf16.gmra.mrb[80].mxu1 %v7038_v59  ;;  %v6960_v53 = vmax.f32 %v6786_v56, 0.0 }
 0x802   : > { %v6792_v2 = vadd.f32 %v6791_v35, %v10668_v17  ;;  %v6961_v31 = vmax.f32 %v6788_v15, 0.0 }
 0x803   : > { %v6962_v39 = vmax.f32 %v6790_v28, 0.0 }
 0x804   : > { %v6963_v3 = vmax.f32 %v6792_v2, 0.0 }
 0x805   : > { %v7040_v0 = vpack.c.bf16 %v6962_v39, %v6960_v53 }
 0x806   : > { %v7041_v55 = vpack.c.bf16 %v6963_v3, %v6961_v31  ;;  %v6795_v47 = vpop.f32.mrb[100].mxu0 }
 0x807   : > { %v6796_v46 = vadd.f32 %v6795_v47, %v10664_v32  ;;  %v6797_v19 = vpop.f32.mrb[101].mxu0 }
 0x808   : > { %v6798_v21 = vadd.f32 %v6797_v19, %v10668_v17  ;;  %v6799_v38 = vpop.f32.mrb[102].mxu0  ;;  %7415 = vmatprep.mubr.bf16.mxu1 %v7041_v55 }
 0x809   : > { %v6800_v25 = vadd.f32 %v6799_v38, %v10664_v32  ;;  %v6801_v33 = vpop.f32.mrb[103].mxu0  ;;  %7416 = vmatmul.mubr.bf16.gmra.mrb[84].mxu1 %v7040_v0  ;;  %v6964_v14 = vmax.f32 %v6796_v46, 0.0 }
 0x80a   : > { %v6802_v12 = vadd.f32 %v6801_v33, %v10668_v17  ;;  %v6965_v49 = vmax.f32 %v6798_v21, 0.0 }
 0x80b   : > { %v6966_v24 = vmax.f32 %v6800_v25, 0.0 }
 0x80c   : > { %v6967_v1 = vmax.f32 %v6802_v12, 0.0 }
 0x80d   : > { %v7042_v50 = vpack.c.bf16 %v6966_v24, %v6964_v14 }
 0x80e   : > { %v7043_v41 = vpack.c.bf16 %v6967_v1, %v6965_v49  ;;  %v6805_v37 = vpop.f32.mrb[104].mxu0 }
 0x80f   : > { %v6806_v18 = vadd.f32 %v6805_v37, %v10664_v32  ;;  %v6807_v54 = vpop.f32.mrb[105].mxu0 }
 0x810   : > { %v6808_v34 = vadd.f32 %v6807_v54, %v10668_v17  ;;  %v6809_v16 = vpop.f32.mrb[106].mxu0  ;;  %7423 = vmatprep.mubr.bf16.mxu1 %v7043_v41  ;;  %v10831_v54 = vld [vmem:[%s11045_s6] ss:$0 sm:$0xff] }
 0x811   : > { %v6810_v60 = vadd.f32 %v6809_v16, %v10664_v32  ;;  %v6811_v29 = vpop.f32.mrb[107].mxu0  ;;  %7424 = vmatmul.mubr.bf16.gmra.mrb[88].mxu1 %v7042_v50  ;;  %v6968_v11 = vmax.f32 %v6806_v18, 0.0 }
 0x812   : > { %v6812_v9 = vadd.f32 %v6811_v29, %v10668_v17  ;;  %v6969_v44 = vmax.f32 %v6808_v34, 0.0 }
 0x813   : > { %v6970_v30 = vmax.f32 %v6810_v60, 0.0 }
 0x814   : > { %v6971_v23 = vmax.f32 %v6812_v9, 0.0 }
 0x815   : > { %v7044_v45 = vpack.c.bf16 %v6970_v30, %v6968_v11 }
 0x816   : > { %v7045_v27 = vpack.c.bf16 %v6971_v23, %v6969_v44  ;;  %v6815_v6 = vpop.f32.mrb[108].mxu0 }
 0x817   : > { %v6816_v4 = vadd.f32 %v6815_v6, %v10664_v32  ;;  %v6817_v57 = vpop.f32.mrb[109].mxu0 }
 0x818   : > { %v6818_v22 = vadd.f32 %v6817_v57, %v10668_v17  ;;  %v6819_v63 = vpop.f32.mrb[110].mxu0  ;;  %7431 = vmatprep.mubr.bf16.mxu1 %v7045_v27 }
 0x819   : > { %v6820_v10 = vadd.f32 %v6819_v63, %v10664_v32  ;;  %v6821_v7 = vpop.f32.mrb[111].mxu0  ;;  %7432 = vmatmul.mubr.bf16.gmra.mrb[92].mxu1 %v7044_v45  ;;  %v6972_v48 = vmax.f32 %v6816_v4, 0.0 }
 0x81a   : > { %v6822_v42 = vadd.f32 %v6821_v7, %v10668_v17  ;;  %v6973_v58 = vmax.f32 %v6818_v22, 0.0 }
 0x81b   : > { %v6974_v36 = vmax.f32 %v6820_v10, 0.0 }
 0x81c   : > { %v6975_v62 = vmax.f32 %v6822_v42, 0.0 }
 0x81d   : > { %v7046_v40 = vpack.c.bf16 %v6974_v36, %v6972_v48 }
 0x81e   : > { %v7047_v26 = vpack.c.bf16 %v6975_v62, %v6973_v58  ;;  %v6825_v61 = vpop.f32.mrb[112].mxu0 }
 0x81f   : > { %v6826_v52 = vadd.f32 %v6825_v61, %v10664_v32  ;;  %v6827_v5 = vpop.f32.mrb[113].mxu0 }
 0x820   : > { %v6828_v20 = vadd.f32 %v6827_v5, %v10668_v17  ;;  %v6829_v59 = vpop.f32.mrb[114].mxu0  ;;  %7439 = vmatprep.mubr.bf16.mxu1 %v7047_v26 }
 0x821   : > { %v6830_v13 = vadd.f32 %v6829_v59, %v10664_v32  ;;  %v6831_v51 = vpop.f32.mrb[115].mxu0  ;;  %7440 = vmatmul.mubr.bf16.gmra.mrb[96].mxu1 %v7046_v40  ;;  %v6976_v43 = vmax.f32 %v6826_v52, 0.0 }
 0x822   : > { %v6832_v56 = vadd.f32 %v6831_v51, %v10668_v17  ;;  %v6977_v8 = vmax.f32 %v6828_v20, 0.0 }
 0x823   : > { %v6978_v15 = vmax.f32 %v6830_v13, 0.0 }
 0x824   : > { %v6979_v28 = vmax.f32 %v6832_v56, 0.0 }
 0x825   : > { %v7048_v35 = vpack.c.bf16 %v6978_v15, %v6976_v43 }
 0x826   : > { %v7049_v2 = vpack.c.bf16 %v6979_v28, %v6977_v8  ;;  %v6835_v53 = vpop.f32.mrb[116].mxu0 }
 0x827   : > { %v6836_v39 = vadd.f32 %v6835_v53, %v10664_v32  ;;  %v6837_v31 = vpop.f32.mrb[117].mxu0 }
 0x828   : > { %v6838_v3 = vadd.f32 %v6837_v31, %v10668_v17  ;;  %v6839_v0 = vpop.f32.mrb[118].mxu0  ;;  %7447 = vmatprep.mubr.bf16.mxu1 %v7049_v2 }
 0x829   : > { %v6840_v55 = vadd.f32 %v6839_v0, %v10664_v32  ;;  %v6841_v47 = vpop.f32.mrb[119].mxu0  ;;  %7448 = vmatmul.mubr.bf16.gmra.mrb[100].mxu1 %v7048_v35  ;;  %v6980_v19 = vmax.f32 %v6836_v39, 0.0 }
 0x82a   : > { %v6842_v46 = vadd.f32 %v6841_v47, %v10668_v17  ;;  %v6981_v38 = vmax.f32 %v6838_v3, 0.0 }
 0x82b   : > { %v6982_v21 = vmax.f32 %v6840_v55, 0.0 }
 0x82c   : > { %v6983_v25 = vmax.f32 %v6842_v46, 0.0 }
 0x82d   : > { %v7050_v33 = vpack.c.bf16 %v6982_v21, %v6980_v19 }
 0x82e   : > { %v7051_v12 = vpack.c.bf16 %v6983_v25, %v6981_v38  ;;  %v6845_v14 = vpop.f32.mrb[120].mxu0 }
 0x82f   : > { %v6846_v24 = vadd.f32 %v6845_v14, %v10664_v32  ;;  %v6847_v49 = vpop.f32.mrb[121].mxu0 }
 0x830   : > { %v6848_v1 = vadd.f32 %v6847_v49, %v10668_v17  ;;  %v6849_v50 = vpop.f32.mrb[122].mxu0  ;;  %7455 = vmatprep.mubr.bf16.mxu1 %v7051_v12 }
 0x831   : > { %v6850_v41 = vadd.f32 %v6849_v50, %v10664_v32  ;;  %v6851_v37 = vpop.f32.mrb[123].mxu0  ;;  %7456 = vmatmul.mubr.bf16.gmra.mrb[104].mxu1 %v7050_v33  ;;  %v6984_v34 = vmax.f32 %v6846_v24, 0.0 }
 0x832   : > { %v6852_v18 = vadd.f32 %v6851_v37, %v10668_v17  ;;  %v6985_v60 = vmax.f32 %v6848_v1, 0.0 }
 0x833   : > { %v6986_v16 = vmax.f32 %v6850_v41, 0.0 }
 0x834   : > { %v6987_v29 = vmax.f32 %v6852_v18, 0.0  ;;  %v7249_v9 = vpop.f32.mrb[0].mxu1 }
 0x835   : > { %v7052_v11 = vpack.c.bf16 %v6986_v16, %v6984_v34  ;;  %v7250_v30 = vadd.f32 %v10831_v54, %v7249_v9  ;;  %v7251_v44 = vpop.f32.mrb[1].mxu1 }
 0x836   : > { %v7053_v23 = vpack.c.bf16 %v6987_v29, %v6985_v60  ;;  %v6855_v45 = vpop.f32.mrb[124].mxu0  ;;  %v7252_v27 = vpop.f32.mrb[2].mxu1 }
 0x837   : > { %7487 = vst.msk [vmem:[%s10838_s19 + $0x30] sm:$0xff] %vm7480_vm2, %v7250_v30  ;;  %v6856_v6 = vadd.f32 %v6855_v45, %v10664_v32  ;;  %v7253_v4 = vadd.f32 %v10831_v54, %v7252_v27  ;;  %v6857_v57 = vpop.f32.mrb[125].mxu0  ;;  %v7254_v22 = vpop.f32.mrb[3].mxu1 }
 0x838   : > { %v6858_v63 = vadd.f32 %v6857_v57, %v10668_v17  ;;  %v6859_v10 = vpop.f32.mrb[126].mxu0  ;;  %7463 = vmatprep.mubr.bf16.mxu1 %v7053_v23 }
 0x839   : > { %7488 = vst.msk [vmem:[%s10838_s19 + $0x38] sm:$0xff] %vm7480_vm2, %v7253_v4  ;;  %v6860_v7 = vadd.f32 %v6859_v10, %v10664_v32  ;;  %v6861_v42 = vpop.f32.mrb[127].mxu0  ;;  %7464 = vmatmul.mubr.bf16.gmra.mrb[108].mxu1 %v7052_v11  ;;  %v6988_v36 = vmax.f32 %v6856_v6, 0.0 }
 0x83a   : > { %v6862_v48 = vadd.f32 %v6861_v42, %v10668_v17  ;;  %v6989_v62 = vmax.f32 %v6858_v63, 0.0 }
 0x83b   : > { %v6990_v58 = vmax.f32 %v6860_v7, 0.0 }
 0x83c   : > { %v6991_v40 = vmax.f32 %v6862_v48, 0.0  ;;  %v7257_v26 = vpop.f32.mrb[4].mxu1 }
 0x83d   : > { %v7054_v61 = vpack.c.bf16 %v6990_v58, %v6988_v36  ;;  %v7258_v52 = vadd.f32 %v10831_v54, %v7257_v26  ;;  %v7259_v5 = vpop.f32.mrb[5].mxu1 }
 0x83e   : > { %v7055_v20 = vpack.c.bf16 %v6991_v40, %v6989_v62  ;;  %v7225_v59 = vpop.f32.mrb[128].mxu0  ;;  %v7260_v13 = vpop.f32.mrb[6].mxu1 }
 0x83f   : > { %7489 = vst.msk [vmem:[%s10838_s19 + $0x40] sm:$0xff] %vm7480_vm2, %v7258_v52  ;;  %v7226_v32 = vadd.f32 %v10831_v54, %v7225_v59  ;;  %v7261_v17 = vadd.f32 %v10831_v54, %v7260_v13  ;;  %v7227_v51 = vpop.f32.mrb[129].mxu0  ;;  %v7262_v56 = vpop.f32.mrb[7].mxu1 }
 0x840   : > { %v7228_v43 = vpop.f32.mrb[130].mxu0  ;;  %7471 = vmatprep.mubr.bf16.mxu1 %v7055_v20 }
 0x841   : > { %7481 = vst.msk [vmem:[%s10838_s19] sm:$0xff] %vm7480_vm2, %v7226_v32  ;;  %7490 = vst.msk [vmem:[%s10838_s19 + $0x48] sm:$0xff] %vm7480_vm2, %v7261_v17  ;;  %v7229_v15 = vadd.f32 %v10831_v54, %v7228_v43  ;;  %v7230_v8 = vpop.f32.mrb[131].mxu0  ;;  %7472 = vmatmul.mubr.bf16.gmra.mrb[112].mxu1 %v7054_v61 }
 0x843   : > { %7482 = vst.msk [vmem:[%s10838_s19 + $0x8] sm:$0xff] %vm7480_vm2, %v7229_v15 }
 0x844   : > { %v7265_v28 = vpop.f32.mrb[8].mxu1 }
 0x845   : > { %v7266_v35 = vadd.f32 %v10831_v54, %v7265_v28  ;;  %v7267_v2 = vpop.f32.mrb[9].mxu1 }
 0x846   : > { %v7233_v53 = vpop.f32.mrb[132].mxu0  ;;  %v7268_v39 = vpop.f32.mrb[10].mxu1 }
 0x847   : > { %7491 = vst.msk [vmem:[%s10838_s19 + $0x50] sm:$0xff] %vm7480_vm2, %v7266_v35  ;;  %v7234_v31 = vadd.f32 %v10831_v54, %v7233_v53  ;;  %v7269_v3 = vadd.f32 %v10831_v54, %v7268_v39  ;;  %v7235_v0 = vpop.f32.mrb[133].mxu0  ;;  %v7270_v55 = vpop.f32.mrb[11].mxu1 }
 0x848   : > { %v7236_v47 = vpop.f32.mrb[134].mxu0 }
 0x849   : > { %7483 = vst.msk [vmem:[%s10838_s19 + $0x10] sm:$0xff] %vm7480_vm2, %v7234_v31  ;;  %7492 = vst.msk [vmem:[%s10838_s19 + $0x58] sm:$0xff] %vm7480_vm2, %v7269_v3  ;;  %v7237_v46 = vadd.f32 %v10831_v54, %v7236_v47  ;;  %v7238_v19 = vpop.f32.mrb[135].mxu0 }
 0x84b   : > { %7484 = vst.msk [vmem:[%s10838_s19 + $0x18] sm:$0xff] %vm7480_vm2, %v7237_v46 }
 0x84c   : > { %v7273_v21 = vpop.f32.mrb[12].mxu1 }
 0x84d   : > { %v7274_v38 = vadd.f32 %v10831_v54, %v7273_v21  ;;  %v7275_v25 = vpop.f32.mrb[13].mxu1 }
 0x84e   : > { %v7241_v33 = vpop.f32.mrb[136].mxu0  ;;  %v7276_v12 = vpop.f32.mrb[14].mxu1 }
 0x84f   : > { %7493 = vst.msk [vmem:[%s10838_s19 + $0x60] sm:$0xff] %vm7480_vm2, %v7274_v38  ;;  %v7242_v14 = vadd.f32 %v10831_v54, %v7241_v33  ;;  %v7277_v24 = vadd.f32 %v10831_v54, %v7276_v12  ;;  %v7243_v49 = vpop.f32.mrb[137].mxu0  ;;  %v7278_v1 = vpop.f32.mrb[15].mxu1 }
 0x850   : > { %v7244_v50 = vpop.f32.mrb[138].mxu0 }
 0x851   : > { %7485 = vst.msk [vmem:[%s10838_s19 + $0x20] sm:$0xff] %vm7480_vm2, %v7242_v14  ;;  %7494 = vst.msk [vmem:[%s10838_s19 + $0x68] sm:$0xff] %vm7480_vm2, %v7277_v24  ;;  %v7245_v41 = vadd.f32 %v10831_v54, %v7244_v50  ;;  %v7246_v37 = vpop.f32.mrb[139].mxu0 }
 0x853   : > { %7486 = vst.msk [vmem:[%s10838_s19 + $0x28] sm:$0xff] %vm7480_vm2, %v7245_v41 }
 0x854   : > { %v7281_v18 = vpop.f32.mrb[16].mxu1 }
 0x855   : > { %v7282_v34 = vadd.f32 %v10831_v54, %v7281_v18  ;;  %v7283_v16 = vpop.f32.mrb[17].mxu1 }
 0x856   : > { %v7284_v60 = vpop.f32.mrb[18].mxu1 }
 0x857   : > { %7495 = vst.msk [vmem:[%s10838_s19 + $0x70] sm:$0xff] %vm7480_vm2, %v7282_v34  ;;  %v7285_v29 = vadd.f32 %v10831_v54, %v7284_v60  ;;  %v7286_v9 = vpop.f32.mrb[19].mxu1 }
 0x859   : > { %7496 = vst.msk [vmem:[%s10838_s19 + $0x78] sm:$0xff] %vm7480_vm2, %v7285_v29 }
 0x85c   : > { %v7289_v11 = vpop.f32.mrb[20].mxu1 }
 0x85d   : > { %v7290_v30 = vadd.f32 %v10831_v54, %v7289_v11  ;;  %v7291_v44 = vpop.f32.mrb[21].mxu1 }
 0x85e   : > { %v7292_v23 = vpop.f32.mrb[22].mxu1 }
 0x85f   : > { %7497 = vst.msk [vmem:[%s10838_s19 + $0x80] sm:$0xff] %vm7480_vm2, %v7290_v30  ;;  %v7293_v45 = vadd.f32 %v10831_v54, %v7292_v23  ;;  %v7294_v27 = vpop.f32.mrb[23].mxu1 }
 0x861   : > { %7498 = vst.msk [vmem:[%s10838_s19 + $0x88] sm:$0xff] %vm7480_vm2, %v7293_v45 }
 0x864   : > { %v7297_v6 = vpop.f32.mrb[24].mxu1 }
 0x865   : > { %v7298_v4 = vadd.f32 %v10831_v54, %v7297_v6  ;;  %v7299_v57 = vpop.f32.mrb[25].mxu1 }
 0x866   : > { %v7300_v22 = vpop.f32.mrb[26].mxu1 }
 0x867   : > { %7499 = vst.msk [vmem:[%s10838_s19 + $0x90] sm:$0xff] %vm7480_vm2, %v7298_v4  ;;  %v7301_v63 = vadd.f32 %v10831_v54, %v7300_v22  ;;  %v7302_v10 = vpop.f32.mrb[27].mxu1 }
 0x869   : > { %7500 = vst.msk [vmem:[%s10838_s19 + $0x98] sm:$0xff] %vm7480_vm2, %v7301_v63 }
 0x86c   : > { %v7305_v7 = vpop.f32.mrb[28].mxu1 }
 0x86d   : > { %v7306_v42 = vadd.f32 %v10831_v54, %v7305_v7  ;;  %v7307_v48 = vpop.f32.mrb[29].mxu1 }
 0x86e   : > { %v7308_v36 = vpop.f32.mrb[30].mxu1 }
 0x86f   : > { %7501 = vst.msk [vmem:[%s10838_s19 + $0xa0] sm:$0xff] %vm7480_vm2, %v7306_v42  ;;  %v7309_v58 = vadd.f32 %v10831_v54, %v7308_v36  ;;  %v7310_v62 = vpop.f32.mrb[31].mxu1 }
 0x871   : > { %7502 = vst.msk [vmem:[%s10838_s19 + $0xa8] sm:$0xff] %vm7480_vm2, %v7309_v58 }
 0x874   : > { %v7313_v40 = vpop.f32.mrb[32].mxu1 }
 0x875   : > { %v7314_v26 = vadd.f32 %v10831_v54, %v7313_v40  ;;  %v7315_v61 = vpop.f32.mrb[33].mxu1 }
 0x876   : > { %v7316_v52 = vpop.f32.mrb[34].mxu1 }
 0x877   : > { %7503 = vst.msk [vmem:[%s10838_s19 + $0xb0] sm:$0xff] %vm7480_vm2, %v7314_v26  ;;  %v7317_v5 = vadd.f32 %v10831_v54, %v7316_v52  ;;  %v7318_v20 = vpop.f32.mrb[35].mxu1 }
 0x879   : > { %7504 = vst.msk [vmem:[%s10838_s19 + $0xb8] sm:$0xff] %vm7480_vm2, %v7317_v5 }
 0x87c   : > { %v7321_v59 = vpop.f32.mrb[36].mxu1 }
 0x87d   : > { %v7322_v13 = vadd.f32 %v10831_v54, %v7321_v59  ;;  %v7323_v32 = vpop.f32.mrb[37].mxu1 }
 0x87e   : > { %v7324_v17 = vpop.f32.mrb[38].mxu1 }
 0x87f   : > { %7505 = vst.msk [vmem:[%s10838_s19 + $0xc0] sm:$0xff] %vm7480_vm2, %v7322_v13  ;;  %v7325_v51 = vadd.f32 %v10831_v54, %v7324_v17  ;;  %v7326_v56 = vpop.f32.mrb[39].mxu1 }
 0x881   : > { %7506 = vst.msk [vmem:[%s10838_s19 + $0xc8] sm:$0xff] %vm7480_vm2, %v7325_v51 }
 0x884   : > { %v7329_v43 = vpop.f32.mrb[40].mxu1 }
 0x885   : > { %v7330_v15 = vadd.f32 %v10831_v54, %v7329_v43  ;;  %v7331_v8 = vpop.f32.mrb[41].mxu1 }
 0x886   : > { %v7332_v28 = vpop.f32.mrb[42].mxu1 }
 0x887   : > { %7507 = vst.msk [vmem:[%s10838_s19 + $0xd0] sm:$0xff] %vm7480_vm2, %v7330_v15  ;;  %v7333_v35 = vadd.f32 %v10831_v54, %v7332_v28  ;;  %v7334_v2 = vpop.f32.mrb[43].mxu1 }
 0x889   : > { %7508 = vst.msk [vmem:[%s10838_s19 + $0xd8] sm:$0xff] %vm7480_vm2, %v7333_v35 }
 0x88c   : > { %v7337_v53 = vpop.f32.mrb[44].mxu1 }
 0x88d   : > { %v7338_v39 = vadd.f32 %v10831_v54, %v7337_v53  ;;  %v7339_v31 = vpop.f32.mrb[45].mxu1 }
 0x88e   : > { %v7340_v3 = vpop.f32.mrb[46].mxu1 }
 0x88f   : > { %7509 = vst.msk [vmem:[%s10838_s19 + $0xe0] sm:$0xff] %vm7480_vm2, %v7338_v39  ;;  %v7341_v0 = vadd.f32 %v10831_v54, %v7340_v3  ;;  %v7342_v55 = vpop.f32.mrb[47].mxu1 }
 0x891   : > { %7510 = vst.msk [vmem:[%s10838_s19 + $0xe8] sm:$0xff] %vm7480_vm2, %v7341_v0 }
 0x894   : > { %v7345_v47 = vpop.f32.mrb[48].mxu1 }
 0x895   : > { %v7346_v46 = vadd.f32 %v10831_v54, %v7345_v47  ;;  %v7347_v19 = vpop.f32.mrb[49].mxu1 }
 0x896   : > { %v7348_v21 = vpop.f32.mrb[50].mxu1 }
 0x897   : > { %7511 = vst.msk [vmem:[%s10838_s19 + $0xf0] sm:$0xff] %vm7480_vm2, %v7346_v46  ;;  %v7349_v38 = vadd.f32 %v10831_v54, %v7348_v21  ;;  %v7350_v25 = vpop.f32.mrb[51].mxu1 }
 0x899   : > { %7512 = vst.msk [vmem:[%s10838_s19 + $0xf8] sm:$0xff] %vm7480_vm2, %v7349_v38 }
 0x89c   : > { %v7353_v33 = vpop.f32.mrb[52].mxu1 }
 0x89d   : > { %v7354_v12 = vadd.f32 %v10831_v54, %v7353_v33  ;;  %v7355_v14 = vpop.f32.mrb[53].mxu1 }
 0x89e   : > { %v7356_v24 = vpop.f32.mrb[54].mxu1 }
 0x89f   : > { %7513 = vst.msk [vmem:[%s10838_s19 + $0x100] sm:$0xff] %vm7480_vm2, %v7354_v12  ;;  %v7357_v49 = vadd.f32 %v10831_v54, %v7356_v24  ;;  %v7358_v1 = vpop.f32.mrb[55].mxu1 }
 0x8a1   : > { %7514 = vst.msk [vmem:[%s10838_s19 + $0x108] sm:$0xff] %vm7480_vm2, %v7357_v49 }
 0x8a4   : > { %v7361_v50 = vpop.f32.mrb[56].mxu1 }
 0x8a5   : > { %v7362_v41 = vadd.f32 %v10831_v54, %v7361_v50  ;;  %v7363_v37 = vpop.f32.mrb[57].mxu1 }
 0x8a6   : > { %v7364_v18 = vpop.f32.mrb[58].mxu1 }
 0x8a7   : > { %7515 = vst.msk [vmem:[%s10838_s19 + $0x110] sm:$0xff] %vm7480_vm2, %v7362_v41  ;;  %v7365_v34 = vadd.f32 %v10831_v54, %v7364_v18  ;;  %v7366_v16 = vpop.f32.mrb[59].mxu1 }
 0x8a9   : > { %7516 = vst.msk [vmem:[%s10838_s19 + $0x118] sm:$0xff] %vm7480_vm2, %v7365_v34 }
 0x8ac   : > { %v7369_v60 = vpop.f32.mrb[60].mxu1 }
 0x8ad   : > { %v7370_v29 = vadd.f32 %v10831_v54, %v7369_v60  ;;  %v7371_v9 = vpop.f32.mrb[61].mxu1 }
 0x8ae   : > { %v7372_v11 = vpop.f32.mrb[62].mxu1 }
 0x8af   : > { %7517 = vst.msk [vmem:[%s10838_s19 + $0x120] sm:$0xff] %vm7480_vm2, %v7370_v29  ;;  %v7373_v30 = vadd.f32 %v10831_v54, %v7372_v11  ;;  %v7374_v44 = vpop.f32.mrb[63].mxu1 }
 0x8b1   : > { %7518 = vst.msk [vmem:[%s10838_s19 + $0x128] sm:$0xff] %vm7480_vm2, %v7373_v30 }
 0x8b4   : > { %v7377_v23 = vpop.f32.mrb[64].mxu1 }
 0x8b5   : > { %v7378_v45 = vadd.f32 %v10831_v54, %v7377_v23  ;;  %v7379_v27 = vpop.f32.mrb[65].mxu1 }
 0x8b6   : > { %v7380_v6 = vpop.f32.mrb[66].mxu1 }
 0x8b7   : > { %7519 = vst.msk [vmem:[%s10838_s19 + $0x130] sm:$0xff] %vm7480_vm2, %v7378_v45  ;;  %v7381_v4 = vadd.f32 %v10831_v54, %v7380_v6  ;;  %v7382_v57 = vpop.f32.mrb[67].mxu1 }
 0x8b9   : > { %7520 = vst.msk [vmem:[%s10838_s19 + $0x138] sm:$0xff] %vm7480_vm2, %v7381_v4 }
 0x8bc   : > { %v7385_v22 = vpop.f32.mrb[68].mxu1 }
 0x8bd   : > { %v7386_v63 = vadd.f32 %v10831_v54, %v7385_v22  ;;  %v7387_v10 = vpop.f32.mrb[69].mxu1 }
 0x8be   : > { %v7388_v7 = vpop.f32.mrb[70].mxu1 }
 0x8bf   : > { %7521 = vst.msk [vmem:[%s10838_s19 + $0x140] sm:$0xff] %vm7480_vm2, %v7386_v63  ;;  %v7389_v42 = vadd.f32 %v10831_v54, %v7388_v7  ;;  %v7390_v48 = vpop.f32.mrb[71].mxu1 }
 0x8c1   : > { %7522 = vst.msk [vmem:[%s10838_s19 + $0x148] sm:$0xff] %vm7480_vm2, %v7389_v42 }
 0x8c4   : > { %v7393_v36 = vpop.f32.mrb[72].mxu1 }
 0x8c5   : > { %v7394_v58 = vadd.f32 %v10831_v54, %v7393_v36  ;;  %v7395_v62 = vpop.f32.mrb[73].mxu1 }
 0x8c6   : > { %v7396_v40 = vpop.f32.mrb[74].mxu1 }
 0x8c7   : > { %7523 = vst.msk [vmem:[%s10838_s19 + $0x150] sm:$0xff] %vm7480_vm2, %v7394_v58  ;;  %v7397_v26 = vadd.f32 %v10831_v54, %v7396_v40  ;;  %v7398_v61 = vpop.f32.mrb[75].mxu1 }
 0x8c9   : > { %7524 = vst.msk [vmem:[%s10838_s19 + $0x158] sm:$0xff] %vm7480_vm2, %v7397_v26 }
 0x8cc   : > { %v7401_v52 = vpop.f32.mrb[76].mxu1 }
 0x8cd   : > { %v7402_v5 = vadd.f32 %v10831_v54, %v7401_v52  ;;  %v7403_v20 = vpop.f32.mrb[77].mxu1 }
 0x8ce   : > { %v7404_v59 = vpop.f32.mrb[78].mxu1 }
 0x8cf   : > { %7525 = vst.msk [vmem:[%s10838_s19 + $0x160] sm:$0xff] %vm7480_vm2, %v7402_v5  ;;  %v7405_v13 = vadd.f32 %v10831_v54, %v7404_v59  ;;  %v7406_v32 = vpop.f32.mrb[79].mxu1 }
 0x8d1   : > { %7526 = vst.msk [vmem:[%s10838_s19 + $0x168] sm:$0xff] %vm7480_vm2, %v7405_v13 }
 0x8d4   : > { %v7409_v17 = vpop.f32.mrb[80].mxu1 }
 0x8d5   : > { %v7410_v51 = vadd.f32 %v10831_v54, %v7409_v17  ;;  %v7411_v56 = vpop.f32.mrb[81].mxu1 }
 0x8d6   : > { %v7412_v43 = vpop.f32.mrb[82].mxu1 }
 0x8d7   : > { %7527 = vst.msk [vmem:[%s10838_s19 + $0x170] sm:$0xff] %vm7480_vm2, %v7410_v51  ;;  %v7413_v15 = vadd.f32 %v10831_v54, %v7412_v43  ;;  %v7414_v8 = vpop.f32.mrb[83].mxu1 }
 0x8d9   : > { %7528 = vst.msk [vmem:[%s10838_s19 + $0x178] sm:$0xff] %vm7480_vm2, %v7413_v15 }
 0x8dc   : > { %v7417_v28 = vpop.f32.mrb[84].mxu1 }
 0x8dd   : > { %v7418_v35 = vadd.f32 %v10831_v54, %v7417_v28  ;;  %v7419_v2 = vpop.f32.mrb[85].mxu1 }
 0x8de   : > { %v7420_v53 = vpop.f32.mrb[86].mxu1 }
 0x8df   : > { %7529 = vst.msk [vmem:[%s10838_s19 + $0x180] sm:$0xff] %vm7480_vm2, %v7418_v35  ;;  %v7421_v39 = vadd.f32 %v10831_v54, %v7420_v53  ;;  %v7422_v31 = vpop.f32.mrb[87].mxu1 }
 0x8e1   : > { %7530 = vst.msk [vmem:[%s10838_s19 + $0x188] sm:$0xff] %vm7480_vm2, %v7421_v39 }
 0x8e4   : > { %v7425_v3 = vpop.f32.mrb[88].mxu1 }
 0x8e5   : > { %v7426_v0 = vadd.f32 %v10831_v54, %v7425_v3  ;;  %v7427_v55 = vpop.f32.mrb[89].mxu1 }
 0x8e6   : > { %v7428_v47 = vpop.f32.mrb[90].mxu1 }
 0x8e7   : > { %7531 = vst.msk [vmem:[%s10838_s19 + $0x190] sm:$0xff] %vm7480_vm2, %v7426_v0  ;;  %v7429_v46 = vadd.f32 %v10831_v54, %v7428_v47  ;;  %v7430_v19 = vpop.f32.mrb[91].mxu1 }
 0x8e9   : > { %7532 = vst.msk [vmem:[%s10838_s19 + $0x198] sm:$0xff] %vm7480_vm2, %v7429_v46 }
 0x8ec   : > { %v7433_v21 = vpop.f32.mrb[92].mxu1 }
 0x8ed   : > { %v7434_v38 = vadd.f32 %v10831_v54, %v7433_v21  ;;  %v7435_v25 = vpop.f32.mrb[93].mxu1 }
 0x8ee   : > { %v7436_v33 = vpop.f32.mrb[94].mxu1 }
 0x8ef   : > { %7533 = vst.msk [vmem:[%s10838_s19 + $0x1a0] sm:$0xff] %vm7480_vm2, %v7434_v38  ;;  %v7437_v12 = vadd.f32 %v10831_v54, %v7436_v33  ;;  %v7438_v14 = vpop.f32.mrb[95].mxu1 }
 0x8f1   : > { %7534 = vst.msk [vmem:[%s10838_s19 + $0x1a8] sm:$0xff] %vm7480_vm2, %v7437_v12 }
 0x8f4   : > { %v7441_v24 = vpop.f32.mrb[96].mxu1 }
 0x8f5   : > { %v7442_v49 = vadd.f32 %v10831_v54, %v7441_v24  ;;  %v7443_v1 = vpop.f32.mrb[97].mxu1 }
 0x8f6   : > { %v7444_v50 = vpop.f32.mrb[98].mxu1 }
 0x8f7   : > { %7535 = vst.msk [vmem:[%s10838_s19 + $0x1b0] sm:$0xff] %vm7480_vm2, %v7442_v49  ;;  %v7445_v41 = vadd.f32 %v10831_v54, %v7444_v50  ;;  %v7446_v37 = vpop.f32.mrb[99].mxu1 }
 0x8f9   : > { %7536 = vst.msk [vmem:[%s10838_s19 + $0x1b8] sm:$0xff] %vm7480_vm2, %v7445_v41 }
 0x8fc   : > { %v7449_v18 = vpop.f32.mrb[100].mxu1 }
 0x8fd   : > { %v7450_v34 = vadd.f32 %v10831_v54, %v7449_v18  ;;  %v7451_v16 = vpop.f32.mrb[101].mxu1 }
 0x8fe   : > { %v7452_v60 = vpop.f32.mrb[102].mxu1 }
 0x8ff   : > { %7537 = vst.msk [vmem:[%s10838_s19 + $0x1c0] sm:$0xff] %vm7480_vm2, %v7450_v34  ;;  %v7453_v29 = vadd.f32 %v10831_v54, %v7452_v60  ;;  %v7454_v9 = vpop.f32.mrb[103].mxu1 }
 0x901   : > { %7538 = vst.msk [vmem:[%s10838_s19 + $0x1c8] sm:$0xff] %vm7480_vm2, %v7453_v29 }
 0x904   : > { %v7457_v11 = vpop.f32.mrb[104].mxu1 }
 0x905   : > { %v7458_v30 = vadd.f32 %v10831_v54, %v7457_v11  ;;  %v7459_v44 = vpop.f32.mrb[105].mxu1 }
 0x906   : > { %v7460_v23 = vpop.f32.mrb[106].mxu1 }
 0x907   : > { %7539 = vst.msk [vmem:[%s10838_s19 + $0x1d0] sm:$0xff] %vm7480_vm2, %v7458_v30  ;;  %v7461_v45 = vadd.f32 %v10831_v54, %v7460_v23  ;;  %v7462_v27 = vpop.f32.mrb[107].mxu1 }
 0x909   : > { %7540 = vst.msk [vmem:[%s10838_s19 + $0x1d8] sm:$0xff] %vm7480_vm2, %v7461_v45 }
 0x90c   : > { %v7465_v6 = vpop.f32.mrb[108].mxu1 }
 0x90d   : > { %v7466_v4 = vadd.f32 %v10831_v54, %v7465_v6  ;;  %v7467_v57 = vpop.f32.mrb[109].mxu1 }
 0x90e   : > { %v7468_v22 = vpop.f32.mrb[110].mxu1 }
 0x90f   : > { %7541 = vst.msk [vmem:[%s10838_s19 + $0x1e0] sm:$0xff] %vm7480_vm2, %v7466_v4  ;;  %v7469_v63 = vadd.f32 %v10831_v54, %v7468_v22  ;;  %v7470_v10 = vpop.f32.mrb[111].mxu1 }
 0x911   : > { %7542 = vst.msk [vmem:[%s10838_s19 + $0x1e8] sm:$0xff] %vm7480_vm2, %v7469_v63 }
 0x914   : > { %v7473_v7 = vpop.f32.mrb[112].mxu1 }
 0x915   : > { %v7474_v42 = vadd.f32 %v10831_v54, %v7473_v7  ;;  %v7475_v48 = vpop.f32.mrb[113].mxu1 }
 0x916   : > { %v7476_v36 = vpop.f32.mrb[114].mxu1 }
 0x917   : > { %7543 = vst.msk [vmem:[%s10838_s19 + $0x1f0] sm:$0xff] %vm7480_vm2, %v7474_v42  ;;  %v7477_v58 = vadd.f32 %v10831_v54, %v7476_v36  ;;  %v7478_v62 = vpop.f32.mrb[115].mxu1 }
 0x919   : > { %7544 = vst.msk [vmem:[%s10838_s19 + $0x1f8] sm:$0xff] %vm7480_vm2, %v7477_v58 }
 0x91a PF: > { %s18_s24 = sadd.s32 1, %s8517_s24  }
 0x91b   : > { %p15_p3 = scmp.ge.s32.totalorder %s18_s24, 4  }
 0x91d   :  { %17 = sbr.rel (!%p15_p3) target bundleno = 1 (0x1), region = 96 }
 0x924   :  { %7567 = vsyncpa [#allocation3], 1 }
 0x925   :  { %7569 = vsyncpa [#allocation3 + $0x1], 1 }

</bundles_post_ra>
